<compile_context>
chip_gen: v7x
topology: tpu7x:2x2x1
jax: 0.10.0
libtpu: 0.0.40
codegen_flags: <defaults>
</compile_context>

<pallas_src>
import jax
import jax.numpy as jnp
from jax.experimental import pallas as pl
from jax.experimental.pallas import tpu as pltpu

NEG_SLOPE = 0.01   # nn.LeakyReLU default
BN_EPS = 1e-5      # nn.BatchNorm2d default


# ---------------------------------------------------------------------------
# Tile-size heuristic: >= 4 grid steps for large M, <= 512 rows, VMEM-aware.
# ---------------------------------------------------------------------------
def _pick_tm(M, K, Cout):
    if M <= 256:
        return M                      # single block; these cases are overhead-bound
    # double-buffered bf16 tap block + f32 output block, per row of the tile
    row_bytes = 2 * (2 * K + 4 * Cout)
    vmem_rows = max(8, (24 * 1024 * 1024) // row_bytes)   # ~24 MiB budget (v7x-safe)
    tm = min(512, vmem_rows, max(256, M // 4))
    return max(8, (tm // 8) * 8)


# ---------------------------------------------------------------------------
# Fused Pallas kernel: one MXU matmul (folded dw+pw) + scale/shift (+LeakyReLU)
# ---------------------------------------------------------------------------
def _fused_matmul_affine_act(taps, w_eff, scale, shift, apply_act):
    """taps: (P, M, K) bf16, w_eff: (P, K, Cout) bf16, scale/shift: (1, Cout) f32.
    Returns act((taps @ w_eff) * scale + shift) as (P, M, Cout) f32."""
    P, M, K = taps.shape
    Cout = w_eff.shape[-1]
    tm = _pick_tm(M, K, Cout)
    grid_m = pl.cdiv(M, tm)
    Mp = grid_m * tm
    if Mp != M:                       # pad rows so tm always divides (robustness)
        taps = jnp.pad(taps, ((0, 0), (0, Mp - M), (0, 0)))

    def kernel(x_ref, w_ref, sc_ref, sh_ref, o_ref):
        y = jnp.dot(x_ref[...], w_ref[...], preferred_element_type=jnp.float32)
        y = y * sc_ref[...] + sh_ref[...]
        if apply_act:
            y = jnp.where(y >= 0.0, y, NEG_SLOPE * y)     # LeakyReLU
        o_ref[...] = y

    out = pl.pallas_call(
        kernel,
        out_shape=jax.ShapeDtypeStruct((P, Mp, Cout), jnp.float32),
        grid=(P, grid_m),
        in_specs=[
            pl.BlockSpec((None, tm, K), lambda p, i: (p, i, 0)),
            pl.BlockSpec((None, K, Cout), lambda p, i: (p, 0, 0)),
            pl.BlockSpec((1, Cout), lambda p, i: (0, 0)),
            pl.BlockSpec((1, Cout), lambda p, i: (0, 0)),
        ],
        out_specs=pl.BlockSpec((None, tm, Cout), lambda p, i: (p, i, 0)),
        compiler_params=pltpu.CompilerParams(
            dimension_semantics=("parallel", "parallel"),
            vmem_limit_bytes=32 * 1024 * 1024),
    )(taps, w_eff, scale, shift)
    return out[:, :M, :] if Mp != M else out


# ---------------------------------------------------------------------------
# Transposed-conv phase (sub-pixel) decomposition plan (static, shape-free).
# For output position o = s*o' + r, the contributing taps are (kk, off) with
# out[o] += x[o' + off] * w[kk].
# ---------------------------------------------------------------------------
def _convT_phase_taps(k, s, p):
    plans = []
    for r in range(s):
        plans.append([(kk, (r + p - kk) // s)
                      for kk in range(k) if (kk - r - p) % s == 0])
    return plans


# ---------------------------------------------------------------------------
# JAX glue: tap gathering for the fused kernels
# ---------------------------------------------------------------------------
def _down_block(x, prm, cfg):
    """Downsample: depthwise Conv2d + 1x1 Conv2d + BN + LeakyReLU, fused."""
    kH, kW, sh, sw, ph, pw = cfg
    N, H, W, C = x.shape
    xp = jnp.pad(x, ((0, 0), (ph, ph), (pw, pw), (0, 0)))
    Ho = (H + 2 * ph - kH) // sh + 1
    Wo = (W + 2 * pw - kW) // sw + 1
    cols = []
    for kh in range(kH):
        for kw in range(kW):
            sl = xp[:, kh:kh + sh * (Ho - 1) + 1:sh, kw:kw + sw * (Wo - 1) + 1:sw, :]
            cols.append(sl.reshape(N * Ho * Wo, C))
    taps = jnp.concatenate(cols, axis=-1).astype(jnp.bfloat16)[None]   # (1, M, T*C)
    out = _fused_matmul_affine_act(taps, prm["w_eff"], prm["scale"], prm["shift"], True)
    return out[0].reshape(N, Ho, Wo, -1)


def _up_block(x, prm, cfg, apply_act):
    """Upsample / convTranspose_bn_LRelu: depthwise ConvTranspose2d + 1x1
    ConvTranspose2d (+ BN + LeakyReLU), fused, phase-decomposed."""
    kH, kW, sh, sw, ph, pw = cfg
    N, H, W, C = x.shape
    hplans = _convT_phase_taps(kH, sh, ph)
    wplans = _convT_phase_taps(kW, sw, pw)
    assert len({len(t) for t in hplans}) == 1 and len({len(t) for t in wplans}) == 1
    Ho = (H - 1) * sh - 2 * ph + kH
    Wo = (W - 1) * sw - 2 * pw + kW
    Hq, Wq = Ho // sh, Wo // sw
    assert Hq * sh == Ho and Wq * sw == Wo
    h_offs = [o for taps in hplans for _, o in taps]
    w_offs = [o for taps in wplans for _, o in taps]
    h_lo = max(0, -min(h_offs))
    h_hi = max(0, Hq - 1 + max(h_offs) - (H - 1))
    w_lo = max(0, -min(w_offs))
    w_hi = max(0, Wq - 1 + max(w_offs) - (W - 1))
    xp = jnp.pad(x, ((0, 0), (h_lo, h_hi), (w_lo, w_hi), (0, 0)))
    slabs = []
    for r in range(sh):
        for q in range(sw):
            cols = []
            for kh, oh in hplans[r]:
                for kw, ow in wplans[q]:
                    sl = xp[:, oh + h_lo:oh + h_lo + Hq, ow + w_lo:ow + w_lo + Wq, :]
                    cols.append(sl.reshape(N * Hq * Wq, C))
            slabs.append(jnp.concatenate(cols, axis=-1))
    taps = jnp.stack(slabs, 0).astype(jnp.bfloat16)                     # (P, M, Tph*C)
    out = _fused_matmul_affine_act(taps, prm["w_eff"], prm["scale"], prm["shift"],
                                   apply_act)
    Cout = out.shape[-1]
    out = out.reshape(sh, sw, N, Hq, Wq, Cout)
    out = jnp.transpose(out, (2, 3, 0, 4, 1, 5)).reshape(N, Ho, Wo, Cout)
    return out


# ---------------------------------------------------------------------------
# Deterministic parameter init + folding (shapes follow the torch module)
# ---------------------------------------------------------------------------
def _init_down(key, Cin, Cout, cfg):
    kH, kW = cfg[0], cfg[1]
    k = jax.random.split(key, 6)
    w_dw = 0.1 * jax.random.normal(k[0], (Cin, 1, kH, kW), jnp.float32)   # dw Conv2d
    b_dw = 0.05 * jax.random.normal(k[1], (Cin,), jnp.float32)
    w_pw = 0.1 * jax.random.normal(k[2], (Cout, Cin), jnp.float32)        # (Cout,Cin,1,1)
    b_pw = 0.05 * jax.random.normal(k[3], (Cout,), jnp.float32)
    gamma = 1.0 + 0.1 * jax.random.normal(k[4], (Cout,), jnp.float32)
    beta = 0.05 * jax.random.normal(k[5], (Cout,), jnp.float32)
    mean = jnp.zeros((Cout,), jnp.float32)
    var = jnp.ones((Cout,), jnp.float32)
    # fold depthwise into pointwise: W_eff[(kh*kW+kw)*Cin + c, o] = w_dw[c,kh,kw]*w_pw[o,c]
    dw_flat = w_dw[:, 0].reshape(Cin, kH * kW)                            # [c, t]
    w_eff = jnp.einsum('ct,oc->tco', dw_flat, w_pw).reshape(1, kH * kW * Cin, Cout)
    b_eff = jnp.dot(w_pw, b_dw) + b_pw
    scale = gamma / jnp.sqrt(var + BN_EPS)
    shift = (b_eff - mean) * scale + beta
    return dict(w_eff=w_eff.astype(jnp.bfloat16),
                scale=scale.reshape(1, Cout).astype(jnp.float32),
                shift=shift.reshape(1, Cout).astype(jnp.float32))


def _init_up(key, Cin, Cout, cfg, use_bn):
    kH, kW, sh, sw, ph, pw = cfg
    k = jax.random.split(key, 6)
    w_dw = 0.1 * jax.random.normal(k[0], (Cin, 1, kH, kW), jnp.float32)   # dw ConvT
    b_dw = 0.05 * jax.random.normal(k[1], (Cin,), jnp.float32)
    w_pw = 0.1 * jax.random.normal(k[2], (Cin, Cout), jnp.float32)        # (Cin,Cout,1,1)
    b_pw = 0.05 * jax.random.normal(k[3], (Cout,), jnp.float32)
    hplans = _convT_phase_taps(kH, sh, ph)
    wplans = _convT_phase_taps(kW, sw, pw)
    w_eff_ph = []
    for r in range(sh):                        # same phase/tap order as _up_block
        for q in range(sw):
            rows = []
            for kh, _ in hplans[r]:
                for kw, _ in wplans[q]:
                    rows.append(w_dw[:, 0, kh, kw][:, None] * w_pw)       # (Cin, Cout)
            w_eff_ph.append(jnp.concatenate(rows, axis=0))                # (Tph*Cin, Cout)
    w_eff = jnp.stack(w_eff_ph, 0)                                        # (P, Tph*Cin, Cout)
    b_eff = jnp.dot(b_dw, w_pw) + b_pw
    if use_bn:
        gamma = 1.0 + 0.1 * jax.random.normal(k[4], (Cout,), jnp.float32)
        beta = 0.05 * jax.random.normal(k[5], (Cout,), jnp.float32)
        mean = jnp.zeros((Cout,), jnp.float32)
        var = jnp.ones((Cout,), jnp.float32)
        scale = gamma / jnp.sqrt(var + BN_EPS)
        shift = (b_eff - mean) * scale + beta
    else:                                      # last=True: no BN / no LeakyReLU
        scale = jnp.ones((Cout,), jnp.float32)
        shift = b_eff
    return dict(w_eff=w_eff.astype(jnp.bfloat16),
                scale=scale.reshape(1, Cout).astype(jnp.float32),
                shift=shift.reshape(1, Cout).astype(jnp.float32))


# (kH, kW, sh, sw, ph, pw)
_CFG_D1 = (4, 4, 2, 4, 1, 0)
_CFG_STD = (4, 4, 2, 2, 1, 1)
_CFG_U6 = (4, 4, 2, 4, 1, 0)

_DOWN_BLOCKS = [
    ("d1", 3, 16, _CFG_D1),
    ("d2", 16, 32, _CFG_STD),
    ("d3", 32, 64, _CFG_STD),
    ("d4", 64, 128, _CFG_STD),
    ("d5", 128, 256, _CFG_STD),
    ("d6", 256, 512, _CFG_STD),
]
_UP_BLOCKS = [
    ("u1", 512, 256, _CFG_STD, True),
    ("u2", 512, 128, _CFG_STD, True),
    ("u3", 256, 64, _CFG_STD, True),
    ("u4", 128, 32, _CFG_STD, True),
    ("u5", 64, 16, _CFG_STD, True),
    ("u6", 32, 20, _CFG_U6, False),    # last=True -> no BN / no LeakyReLU
]


def init_unet_params(key):
    params = {}
    keys = jax.random.split(key, len(_DOWN_BLOCKS) + len(_UP_BLOCKS))
    idx = 0
    for name, cin, cout, cfg in _DOWN_BLOCKS:
        params[name] = _init_down(keys[idx], cin, cout, cfg)
        idx += 1
    for name, cin, cout, cfg, use_bn in _UP_BLOCKS:
        params[name] = _init_up(keys[idx], cin, cout, cfg, use_bn)
        idx += 1
    return params


# ---------------------------------------------------------------------------
# Unet forward (NCHW in / NCHW out, matching the torch module)
# ---------------------------------------------------------------------------
def unet_forward(x_nchw, params):
    x = jnp.transpose(x_nchw, (0, 2, 3, 1))                      # -> NHWC

    down1 = _down_block(x, params["d1"], _CFG_D1)
    down2 = _down_block(down1, params["d2"], _CFG_STD)           # drop1: eval identity
    down3 = _down_block(down2, params["d3"], _CFG_STD)
    down4 = _down_block(down3, params["d4"], _CFG_STD)           # drop1: identity
    down5 = _down_block(down4, params["d5"], _CFG_STD)
    down6 = _down_block(down5, params["d6"], _CFG_STD)           # drop1: identity

    up1 = _up_block(down6, params["u1"], _CFG_STD, True)
    up2 = _up_block(jnp.concatenate([down5, up1], -1), params["u2"], _CFG_STD, True)
    up3 = _up_block(jnp.concatenate([down4, up2], -1), params["u3"], _CFG_STD, True)
    up4 = _up_block(jnp.concatenate([down3, up3], -1), params["u4"], _CFG_STD, True)
    up5 = _up_block(jnp.concatenate([down2, up4], -1), params["u5"], _CFG_STD, True)
    up6 = _up_block(jnp.concatenate([down1, up5], -1), params["u6"], _CFG_U6, False)

    return jnp.transpose(up6, (0, 3, 1, 2))                      # -> NCHW


if __name__ == "__main__":
    key = jax.random.PRNGKey(0)
    key, xkey = jax.random.split(key)
    # Smallest spatial size the 6-level Unet supports: H=64, W=128 (W shrinks 4x in d1).
    x = jax.random.normal(xkey, (1, 3, 64, 128), jnp.float32)
    params = init_unet_params(key)

    fwd = jax.jit(lambda inp: unet_forward(inp, params))
    out = fwd(x)
    jax.block_until_ready(out)

    assert out.shape == (1, 20, 64, 128), out.shape
    assert bool(jnp.all(jnp.isfinite(out)))
    print("KERNEL_OK")
</pallas_src>

<mosaic_0001>
module attributes {stable_mosaic.version = 11 : i64} {
  func.func @kernel(%arg0: i32, %arg1: i32, %arg2: memref<1x256x48xbf16, #tpu.memory_space<vmem>>, %arg3: memref<1x48x16xbf16, #tpu.memory_space<vmem>>, %arg4: memref<1x16xf32, #tpu.memory_space<vmem>>, %arg5: memref<1x16xf32, #tpu.memory_space<vmem>>, %arg6: memref<1x256x16xf32, #tpu.memory_space<vmem>>) attributes {dimension_semantics = [#tpu.dimension_semantics<parallel>, #tpu.dimension_semantics<parallel>], iteration_bounds = array<i64: 1, 4>, scalar_prefetch = 0 : i64, scratch_operands = 0 : i64, tpu.core_type = #tpu.core_type<tc>, window_params = [{transform_indices = @transform_0, window_bounds = array<i64: 1, 256, 48>}, {transform_indices = @transform_1, window_bounds = array<i64: 1, 48, 16>}, {pipeline_mode = #tpu.pipeline_mode<synchronous>, transform_indices = @transform_2, window_bounds = array<i64: 1, 16>}, {pipeline_mode = #tpu.pipeline_mode<synchronous>, transform_indices = @transform_3, window_bounds = array<i64: 1, 16>}, {transform_indices = @transform_4, window_bounds = array<i64: 1, 256, 16>}]} {
    %c0 = arith.constant 0 : index
    %c0_0 = arith.constant 0 : index
    %c0_1 = arith.constant 0 : index
    %0 = vector.load %arg2[%c0, %c0_0, %c0_1] : memref<1x256x48xbf16, #tpu.memory_space<vmem>>, vector<1x256x48xbf16>
    %1 = vector.shape_cast %0 : vector<1x256x48xbf16> to vector<256x48xbf16>
    %c0_2 = arith.constant 0 : index
    %c0_3 = arith.constant 0 : index
    %c0_4 = arith.constant 0 : index
    %2 = vector.load %arg3[%c0_2, %c0_3, %c0_4] : memref<1x48x16xbf16, #tpu.memory_space<vmem>>, vector<1x48x16xbf16>
    %3 = vector.shape_cast %2 : vector<1x48x16xbf16> to vector<48x16xbf16>
    %cst = arith.constant dense<0.000000e+00> : vector<256x16xf32>
    %4 = tpu.matmul %1, %3, %cst {dimension_numbers = #tpu.dot_dimension_numbers<[1], [0], [0], [1], [0, 0, 1, 1], [], []>} : vector<256x48xbf16>, vector<48x16xbf16>, vector<256x16xf32> -> vector<256x16xf32>
    %c0_5 = arith.constant 0 : index
    %c0_6 = arith.constant 0 : index
    %5 = vector.load %arg4[%c0_5, %c0_6] : memref<1x16xf32, #tpu.memory_space<vmem>>, vector<1x16xf32>
    %6 = vector.broadcast %5 : vector<1x16xf32> to vector<256x16xf32>
    %7 = arith.mulf %4, %6 : vector<256x16xf32>
    %c0_7 = arith.constant 0 : index
    %c0_8 = arith.constant 0 : index
    %8 = vector.load %arg5[%c0_7, %c0_8] : memref<1x16xf32, #tpu.memory_space<vmem>>, vector<1x16xf32>
    %9 = vector.broadcast %8 : vector<1x16xf32> to vector<256x16xf32>
    %10 = arith.addf %7, %9 : vector<256x16xf32>
    %cst_9 = arith.constant 0.000000e+00 : f32
    %11 = vector.broadcast %cst_9 : f32 to vector<256x16xf32>
    %12 = arith.cmpf oge, %10, %11 : vector<256x16xf32>
    %cst_10 = arith.constant 0.00999999977 : f32
    %13 = vector.broadcast %cst_10 : f32 to vector<256x16xf32>
    %14 = arith.mulf %13, %10 : vector<256x16xf32>
    %15 = arith.select %12, %10, %14 : vector<256x16xi1>, vector<256x16xf32>
    %c0_11 = arith.constant 0 : index
    %c0_12 = arith.constant 0 : index
    %c0_13 = arith.constant 0 : index
    %16 = vector.load %arg6[%c0_11, %c0_12, %c0_13] : memref<1x256x16xf32, #tpu.memory_space<vmem>>, vector<1x256x16xf32>
    %17 = vector.shape_cast %16 : vector<1x256x16xf32> to vector<256x16xf32>
    %18 = vector.shape_cast %15 : vector<256x16xf32> to vector<1x256x16xf32>
    tpu.vector_store %arg6[%c0_11, %c0_12, %c0_13], %18 {strides = array<i32>} : memref<1x256x16xf32, #tpu.memory_space<vmem>>, vector<1x256x16xf32>,
    return
  }
  func.func @transform_0(%arg0: i32, %arg1: i32) -> (i32, i32, i32) {
    %c0_i32 = arith.constant 0 : i32
    %c0_i32_0 = arith.constant 0 : i32
    return %arg0, %arg1, %c0_i32 : i32, i32, i32
  }
  func.func @transform_1(%arg0: i32, %arg1: i32) -> (i32, i32, i32) {
    %c0_i32 = arith.constant 0 : i32
    %c0_i32_0 = arith.constant 0 : i32
    %c0_i32_1 = arith.constant 0 : i32
    return %arg0, %c0_i32, %c0_i32_0 : i32, i32, i32
  }
  func.func @transform_2(%arg0: i32, %arg1: i32) -> (i32, i32) {
    %c0_i32 = arith.constant 0 : i32
    %c0_i32_0 = arith.constant 0 : i32
    %c0_i32_1 = arith.constant 0 : i32
    return %c0_i32, %c0_i32_0 : i32, i32
  }
  func.func @transform_3(%arg0: i32, %arg1: i32) -> (i32, i32) {
    %c0_i32 = arith.constant 0 : i32
    %c0_i32_0 = arith.constant 0 : i32
    %c0_i32_1 = arith.constant 0 : i32
    return %c0_i32, %c0_i32_0 : i32, i32
  }
  func.func @transform_4(%arg0: i32, %arg1: i32) -> (i32, i32, i32) {
    %c0_i32 = arith.constant 0 : i32
    %c0_i32_0 = arith.constant 0 : i32
    return %arg0, %arg1, %c0_i32 : i32, i32, i32
  }
}

module attributes {stable_mosaic.version = 11 : i64} {
  func.func @kernel(%arg0: i32, %arg1: i32, %arg2: memref<1x256x256xbf16, #tpu.memory_space<vmem>>, %arg3: memref<1x256x32xbf16, #tpu.memory_space<vmem>>, %arg4: memref<1x32xf32, #tpu.memory_space<vmem>>, %arg5: memref<1x32xf32, #tpu.memory_space<vmem>>, %arg6: memref<1x256x32xf32, #tpu.memory_space<vmem>>) attributes {dimension_semantics = [#tpu.dimension_semantics<parallel>, #tpu.dimension_semantics<parallel>], iteration_bounds = array<i64: 1, 1>, scalar_prefetch = 0 : i64, scratch_operands = 0 : i64, tpu.core_type = #tpu.core_type<tc>, window_params = [{transform_indices = @transform_0, window_bounds = array<i64: 1, 256, 256>}, {transform_indices = @transform_1, window_bounds = array<i64: 1, 256, 32>}, {pipeline_mode = #tpu.pipeline_mode<synchronous>, transform_indices = @transform_2, window_bounds = array<i64: 1, 32>}, {pipeline_mode = #tpu.pipeline_mode<synchronous>, transform_indices = @transform_3, window_bounds = array<i64: 1, 32>}, {transform_indices = @transform_4, window_bounds = array<i64: 1, 256, 32>}]} {
    %c0 = arith.constant 0 : index
    %c0_0 = arith.constant 0 : index
    %c0_1 = arith.constant 0 : index
    %0 = vector.load %arg2[%c0, %c0_0, %c0_1] : memref<1x256x256xbf16, #tpu.memory_space<vmem>>, vector<1x256x256xbf16>
    %1 = vector.shape_cast %0 : vector<1x256x256xbf16> to vector<256x256xbf16>
    %c0_2 = arith.constant 0 : index
    %c0_3 = arith.constant 0 : index
    %c0_4 = arith.constant 0 : index
    %2 = vector.load %arg3[%c0_2, %c0_3, %c0_4] : memref<1x256x32xbf16, #tpu.memory_space<vmem>>, vector<1x256x32xbf16>
    %3 = vector.shape_cast %2 : vector<1x256x32xbf16> to vector<256x32xbf16>
    %cst = arith.constant dense<0.000000e+00> : vector<256x32xf32>
    %4 = tpu.matmul %1, %3, %cst {dimension_numbers = #tpu.dot_dimension_numbers<[1], [0], [0], [1], [0, 0, 1, 1], [], []>} : vector<256x256xbf16>, vector<256x32xbf16>, vector<256x32xf32> -> vector<256x32xf32>
    %c0_5 = arith.constant 0 : index
    %c0_6 = arith.constant 0 : index
    %5 = vector.load %arg4[%c0_5, %c0_6] : memref<1x32xf32, #tpu.memory_space<vmem>>, vector<1x32xf32>
    %6 = vector.broadcast %5 : vector<1x32xf32> to vector<256x32xf32>
    %7 = arith.mulf %4, %6 : vector<256x32xf32>
    %c0_7 = arith.constant 0 : index
    %c0_8 = arith.constant 0 : index
    %8 = vector.load %arg5[%c0_7, %c0_8] : memref<1x32xf32, #tpu.memory_space<vmem>>, vector<1x32xf32>
    %9 = vector.broadcast %8 : vector<1x32xf32> to vector<256x32xf32>
    %10 = arith.addf %7, %9 : vector<256x32xf32>
    %cst_9 = arith.constant 0.000000e+00 : f32
    %11 = vector.broadcast %cst_9 : f32 to vector<256x32xf32>
    %12 = arith.cmpf oge, %10, %11 : vector<256x32xf32>
    %cst_10 = arith.constant 0.00999999977 : f32
    %13 = vector.broadcast %cst_10 : f32 to vector<256x32xf32>
    %14 = arith.mulf %13, %10 : vector<256x32xf32>
    %15 = arith.select %12, %10, %14 : vector<256x32xi1>, vector<256x32xf32>
    %c0_11 = arith.constant 0 : index
    %c0_12 = arith.constant 0 : index
    %c0_13 = arith.constant 0 : index
    %16 = vector.load %arg6[%c0_11, %c0_12, %c0_13] : memref<1x256x32xf32, #tpu.memory_space<vmem>>, vector<1x256x32xf32>
    %17 = vector.shape_cast %16 : vector<1x256x32xf32> to vector<256x32xf32>
    %18 = vector.shape_cast %15 : vector<256x32xf32> to vector<1x256x32xf32>
    tpu.vector_store %arg6[%c0_11, %c0_12, %c0_13], %18 {strides = array<i32>} : memref<1x256x32xf32, #tpu.memory_space<vmem>>, vector<1x256x32xf32>,
    return
  }
  func.func @transform_0(%arg0: i32, %arg1: i32) -> (i32, i32, i32) {
    %c0_i32 = arith.constant 0 : i32
    %c0_i32_0 = arith.constant 0 : i32
    return %arg0, %arg1, %c0_i32 : i32, i32, i32
  }
  func.func @transform_1(%arg0: i32, %arg1: i32) -> (i32, i32, i32) {
    %c0_i32 = arith.constant 0 : i32
    %c0_i32_0 = arith.constant 0 : i32
    %c0_i32_1 = arith.constant 0 : i32
    return %arg0, %c0_i32, %c0_i32_0 : i32, i32, i32
  }
  func.func @transform_2(%arg0: i32, %arg1: i32) -> (i32, i32) {
    %c0_i32 = arith.constant 0 : i32
    %c0_i32_0 = arith.constant 0 : i32
    %c0_i32_1 = arith.constant 0 : i32
    return %c0_i32, %c0_i32_0 : i32, i32
  }
  func.func @transform_3(%arg0: i32, %arg1: i32) -> (i32, i32) {
    %c0_i32 = arith.constant 0 : i32
    %c0_i32_0 = arith.constant 0 : i32
    %c0_i32_1 = arith.constant 0 : i32
    return %c0_i32, %c0_i32_0 : i32, i32
  }
  func.func @transform_4(%arg0: i32, %arg1: i32) -> (i32, i32, i32) {
    %c0_i32 = arith.constant 0 : i32
    %c0_i32_0 = arith.constant 0 : i32
    return %arg0, %arg1, %c0_i32 : i32, i32, i32
  }
}

module attributes {stable_mosaic.version = 11 : i64} {
  func.func @kernel(%arg0: i32, %arg1: i32, %arg2: memref<1x64x512xbf16, #tpu.memory_space<vmem>>, %arg3: memref<1x512x64xbf16, #tpu.memory_space<vmem>>, %arg4: memref<1x64xf32, #tpu.memory_space<vmem>>, %arg5: memref<1x64xf32, #tpu.memory_space<vmem>>, %arg6: memref<1x64x64xf32, #tpu.memory_space<vmem>>) attributes {dimension_semantics = [#tpu.dimension_semantics<parallel>, #tpu.dimension_semantics<parallel>], iteration_bounds = array<i64: 1, 1>, scalar_prefetch = 0 : i64, scratch_operands = 0 : i64, tpu.core_type = #tpu.core_type<tc>, window_params = [{transform_indices = @transform_0, window_bounds = array<i64: 1, 64, 512>}, {transform_indices = @transform_1, window_bounds = array<i64: 1, 512, 64>}, {pipeline_mode = #tpu.pipeline_mode<synchronous>, transform_indices = @transform_2, window_bounds = array<i64: 1, 64>}, {pipeline_mode = #tpu.pipeline_mode<synchronous>, transform_indices = @transform_3, window_bounds = array<i64: 1, 64>}, {transform_indices = @transform_4, window_bounds = array<i64: 1, 64, 64>}]} {
    %c0 = arith.constant 0 : index
    %c0_0 = arith.constant 0 : index
    %c0_1 = arith.constant 0 : index
    %0 = vector.load %arg2[%c0, %c0_0, %c0_1] : memref<1x64x512xbf16, #tpu.memory_space<vmem>>, vector<1x64x512xbf16>
    %1 = vector.shape_cast %0 : vector<1x64x512xbf16> to vector<64x512xbf16>
    %c0_2 = arith.constant 0 : index
    %c0_3 = arith.constant 0 : index
    %c0_4 = arith.constant 0 : index
    %2 = vector.load %arg3[%c0_2, %c0_3, %c0_4] : memref<1x512x64xbf16, #tpu.memory_space<vmem>>, vector<1x512x64xbf16>
    %3 = vector.shape_cast %2 : vector<1x512x64xbf16> to vector<512x64xbf16>
    %cst = arith.constant dense<0.000000e+00> : vector<64x64xf32>
    %4 = tpu.matmul %1, %3, %cst {dimension_numbers = #tpu.dot_dimension_numbers<[1], [0], [0], [1], [0, 0, 1, 1], [], []>} : vector<64x512xbf16>, vector<512x64xbf16>, vector<64x64xf32> -> vector<64x64xf32>
    %c0_5 = arith.constant 0 : index
    %c0_6 = arith.constant 0 : index
    %5 = vector.load %arg4[%c0_5, %c0_6] : memref<1x64xf32, #tpu.memory_space<vmem>>, vector<1x64xf32>
    %6 = vector.broadcast %5 : vector<1x64xf32> to vector<64x64xf32>
    %7 = arith.mulf %4, %6 : vector<64x64xf32>
    %c0_7 = arith.constant 0 : index
    %c0_8 = arith.constant 0 : index
    %8 = vector.load %arg5[%c0_7, %c0_8] : memref<1x64xf32, #tpu.memory_space<vmem>>, vector<1x64xf32>
    %9 = vector.broadcast %8 : vector<1x64xf32> to vector<64x64xf32>
    %10 = arith.addf %7, %9 : vector<64x64xf32>
    %cst_9 = arith.constant 0.000000e+00 : f32
    %11 = vector.broadcast %cst_9 : f32 to vector<64x64xf32>
    %12 = arith.cmpf oge, %10, %11 : vector<64x64xf32>
    %cst_10 = arith.constant 0.00999999977 : f32
    %13 = vector.broadcast %cst_10 : f32 to vector<64x64xf32>
    %14 = arith.mulf %13, %10 : vector<64x64xf32>
    %15 = arith.select %12, %10, %14 : vector<64x64xi1>, vector<64x64xf32>
    %c0_11 = arith.constant 0 : index
    %c0_12 = arith.constant 0 : index
    %c0_13 = arith.constant 0 : index
    %16 = vector.load %arg6[%c0_11, %c0_12, %c0_13] : memref<1x64x64xf32, #tpu.memory_space<vmem>>, vector<1x64x64xf32>
    %17 = vector.shape_cast %16 : vector<1x64x64xf32> to vector<64x64xf32>
    %18 = vector.shape_cast %15 : vector<64x64xf32> to vector<1x64x64xf32>
    tpu.vector_store %arg6[%c0_11, %c0_12, %c0_13], %18 {strides = array<i32>} : memref<1x64x64xf32, #tpu.memory_space<vmem>>, vector<1x64x64xf32>,
    return
  }
  func.func @transform_0(%arg0: i32, %arg1: i32) -> (i32, i32, i32) {
    %c0_i32 = arith.constant 0 : i32
    %c0_i32_0 = arith.constant 0 : i32
    return %arg0, %arg1, %c0_i32 : i32, i32, i32
  }
  func.func @transform_1(%arg0: i32, %arg1: i32) -> (i32, i32, i32) {
    %c0_i32 = arith.constant 0 : i32
    %c0_i32_0 = arith.constant 0 : i32
    %c0_i32_1 = arith.constant 0 : i32
    return %arg0, %c0_i32, %c0_i32_0 : i32, i32, i32
  }
  func.func @transform_2(%arg0: i32, %arg1: i32) -> (i32, i32) {
    %c0_i32 = arith.constant 0 : i32
    %c0_i32_0 = arith.constant 0 : i32
    %c0_i32_1 = arith.constant 0 : i32
    return %c0_i32, %c0_i32_0 : i32, i32
  }
  func.func @transform_3(%arg0: i32, %arg1: i32) -> (i32, i32) {
    %c0_i32 = arith.constant 0 : i32
    %c0_i32_0 = arith.constant 0 : i32
    %c0_i32_1 = arith.constant 0 : i32
    return %c0_i32, %c0_i32_0 : i32, i32
  }
  func.func @transform_4(%arg0: i32, %arg1: i32) -> (i32, i32, i32) {
    %c0_i32 = arith.constant 0 : i32
    %c0_i32_0 = arith.constant 0 : i32
    return %arg0, %arg1, %c0_i32 : i32, i32, i32
  }
}

module attributes {stable_mosaic.version = 11 : i64} {
  func.func @kernel(%arg0: i32, %arg1: i32, %arg2: memref<1x16x1024xbf16, #tpu.memory_space<vmem>>, %arg3: memref<1x1024x128xbf16, #tpu.memory_space<vmem>>, %arg4: memref<1x128xf32, #tpu.memory_space<vmem>>, %arg5: memref<1x128xf32, #tpu.memory_space<vmem>>, %arg6: memref<1x16x128xf32, #tpu.memory_space<vmem>>) attributes {dimension_semantics = [#tpu.dimension_semantics<parallel>, #tpu.dimension_semantics<parallel>], iteration_bounds = array<i64: 1, 1>, scalar_prefetch = 0 : i64, scratch_operands = 0 : i64, tpu.core_type = #tpu.core_type<tc>, window_params = [{transform_indices = @transform_0, window_bounds = array<i64: 1, 16, 1024>}, {transform_indices = @transform_1, window_bounds = array<i64: 1, 1024, 128>}, {pipeline_mode = #tpu.pipeline_mode<synchronous>, transform_indices = @transform_2, window_bounds = array<i64: 1, 128>}, {pipeline_mode = #tpu.pipeline_mode<synchronous>, transform_indices = @transform_3, window_bounds = array<i64: 1, 128>}, {transform_indices = @transform_4, window_bounds = array<i64: 1, 16, 128>}]} {
    %c0 = arith.constant 0 : index
    %c0_0 = arith.constant 0 : index
    %c0_1 = arith.constant 0 : index
    %0 = vector.load %arg2[%c0, %c0_0, %c0_1] : memref<1x16x1024xbf16, #tpu.memory_space<vmem>>, vector<1x16x1024xbf16>
    %1 = vector.shape_cast %0 : vector<1x16x1024xbf16> to vector<16x1024xbf16>
    %c0_2 = arith.constant 0 : index
    %c0_3 = arith.constant 0 : index
    %c0_4 = arith.constant 0 : index
    %2 = vector.load %arg3[%c0_2, %c0_3, %c0_4] : memref<1x1024x128xbf16, #tpu.memory_space<vmem>>, vector<1x1024x128xbf16>
    %3 = vector.shape_cast %2 : vector<1x1024x128xbf16> to vector<1024x128xbf16>
    %cst = arith.constant dense<0.000000e+00> : vector<16x128xf32>
    %4 = tpu.matmul %1, %3, %cst {dimension_numbers = #tpu.dot_dimension_numbers<[1], [0], [0], [1], [0, 0, 1, 1], [], []>} : vector<16x1024xbf16>, vector<1024x128xbf16>, vector<16x128xf32> -> vector<16x128xf32>
    %c0_5 = arith.constant 0 : index
    %c0_6 = arith.constant 0 : index
    %5 = vector.load %arg4[%c0_5, %c0_6] : memref<1x128xf32, #tpu.memory_space<vmem>>, vector<1x128xf32>
    %6 = vector.broadcast %5 : vector<1x128xf32> to vector<16x128xf32>
    %7 = arith.mulf %4, %6 : vector<16x128xf32>
    %c0_7 = arith.constant 0 : index
    %c0_8 = arith.constant 0 : index
    %8 = vector.load %arg5[%c0_7, %c0_8] : memref<1x128xf32, #tpu.memory_space<vmem>>, vector<1x128xf32>
    %9 = vector.broadcast %8 : vector<1x128xf32> to vector<16x128xf32>
    %10 = arith.addf %7, %9 : vector<16x128xf32>
    %cst_9 = arith.constant 0.000000e+00 : f32
    %11 = vector.broadcast %cst_9 : f32 to vector<16x128xf32>
    %12 = arith.cmpf oge, %10, %11 : vector<16x128xf32>
    %cst_10 = arith.constant 0.00999999977 : f32
    %13 = vector.broadcast %cst_10 : f32 to vector<16x128xf32>
    %14 = arith.mulf %13, %10 : vector<16x128xf32>
    %15 = arith.select %12, %10, %14 : vector<16x128xi1>, vector<16x128xf32>
    %c0_11 = arith.constant 0 : index
    %c0_12 = arith.constant 0 : index
    %c0_13 = arith.constant 0 : index
    %16 = vector.load %arg6[%c0_11, %c0_12, %c0_13] : memref<1x16x128xf32, #tpu.memory_space<vmem>>, vector<1x16x128xf32>
    %17 = vector.shape_cast %16 : vector<1x16x128xf32> to vector<16x128xf32>
    %18 = vector.shape_cast %15 : vector<16x128xf32> to vector<1x16x128xf32>
    tpu.vector_store %arg6[%c0_11, %c0_12, %c0_13], %18 {strides = array<i32>} : memref<1x16x128xf32, #tpu.memory_space<vmem>>, vector<1x16x128xf32>,
    return
  }
  func.func @transform_0(%arg0: i32, %arg1: i32) -> (i32, i32, i32) {
    %c0_i32 = arith.constant 0 : i32
    %c0_i32_0 = arith.constant 0 : i32
    return %arg0, %arg1, %c0_i32 : i32, i32, i32
  }
  func.func @transform_1(%arg0: i32, %arg1: i32) -> (i32, i32, i32) {
    %c0_i32 = arith.constant 0 : i32
    %c0_i32_0 = arith.constant 0 : i32
    %c0_i32_1 = arith.constant 0 : i32
    return %arg0, %c0_i32, %c0_i32_0 : i32, i32, i32
  }
  func.func @transform_2(%arg0: i32, %arg1: i32) -> (i32, i32) {
    %c0_i32 = arith.constant 0 : i32
    %c0_i32_0 = arith.constant 0 : i32
    %c0_i32_1 = arith.constant 0 : i32
    return %c0_i32, %c0_i32_0 : i32, i32
  }
  func.func @transform_3(%arg0: i32, %arg1: i32) -> (i32, i32) {
    %c0_i32 = arith.constant 0 : i32
    %c0_i32_0 = arith.constant 0 : i32
    %c0_i32_1 = arith.constant 0 : i32
    return %c0_i32, %c0_i32_0 : i32, i32
  }
  func.func @transform_4(%arg0: i32, %arg1: i32) -> (i32, i32, i32) {
    %c0_i32 = arith.constant 0 : i32
    %c0_i32_0 = arith.constant 0 : i32
    return %arg0, %arg1, %c0_i32 : i32, i32, i32
  }
}

module attributes {stable_mosaic.version = 11 : i64} {
  func.func @kernel(%arg0: i32, %arg1: i32, %arg2: memref<1x4x2048xbf16, #tpu.memory_space<vmem>>, %arg3: memref<1x2048x256xbf16, #tpu.memory_space<vmem>>, %arg4: memref<1x256xf32, #tpu.memory_space<vmem>>, %arg5: memref<1x256xf32, #tpu.memory_space<vmem>>, %arg6: memref<1x4x256xf32, #tpu.memory_space<vmem>>) attributes {dimension_semantics = [#tpu.dimension_semantics<parallel>, #tpu.dimension_semantics<parallel>], iteration_bounds = array<i64: 1, 1>, scalar_prefetch = 0 : i64, scratch_operands = 0 : i64, tpu.core_type = #tpu.core_type<tc>, window_params = [{transform_indices = @transform_0, window_bounds = array<i64: 1, 4, 2048>}, {transform_indices = @transform_1, window_bounds = array<i64: 1, 2048, 256>}, {pipeline_mode = #tpu.pipeline_mode<synchronous>, transform_indices = @transform_2, window_bounds = array<i64: 1, 256>}, {pipeline_mode = #tpu.pipeline_mode<synchronous>, transform_indices = @transform_3, window_bounds = array<i64: 1, 256>}, {transform_indices = @transform_4, window_bounds = array<i64: 1, 4, 256>}]} {
    %c0 = arith.constant 0 : index
    %c0_0 = arith.constant 0 : index
    %c0_1 = arith.constant 0 : index
    %0 = vector.load %arg2[%c0, %c0_0, %c0_1] : memref<1x4x2048xbf16, #tpu.memory_space<vmem>>, vector<1x4x2048xbf16>
    %1 = vector.shape_cast %0 : vector<1x4x2048xbf16> to vector<4x2048xbf16>
    %c0_2 = arith.constant 0 : index
    %c0_3 = arith.constant 0 : index
    %c0_4 = arith.constant 0 : index
    %2 = vector.load %arg3[%c0_2, %c0_3, %c0_4] : memref<1x2048x256xbf16, #tpu.memory_space<vmem>>, vector<1x2048x256xbf16>
    %3 = vector.shape_cast %2 : vector<1x2048x256xbf16> to vector<2048x256xbf16>
    %cst = arith.constant dense<0.000000e+00> : vector<4x256xf32>
    %4 = tpu.matmul %1, %3, %cst {dimension_numbers = #tpu.dot_dimension_numbers<[1], [0], [0], [1], [0, 0, 1, 1], [], []>} : vector<4x2048xbf16>, vector<2048x256xbf16>, vector<4x256xf32> -> vector<4x256xf32>
    %c0_5 = arith.constant 0 : index
    %c0_6 = arith.constant 0 : index
    %5 = vector.load %arg4[%c0_5, %c0_6] : memref<1x256xf32, #tpu.memory_space<vmem>>, vector<1x256xf32>
    %6 = vector.broadcast %5 : vector<1x256xf32> to vector<4x256xf32>
    %7 = arith.mulf %4, %6 : vector<4x256xf32>
    %c0_7 = arith.constant 0 : index
    %c0_8 = arith.constant 0 : index
    %8 = vector.load %arg5[%c0_7, %c0_8] : memref<1x256xf32, #tpu.memory_space<vmem>>, vector<1x256xf32>
    %9 = vector.broadcast %8 : vector<1x256xf32> to vector<4x256xf32>
    %10 = arith.addf %7, %9 : vector<4x256xf32>
    %cst_9 = arith.constant 0.000000e+00 : f32
    %11 = vector.broadcast %cst_9 : f32 to vector<4x256xf32>
    %12 = arith.cmpf oge, %10, %11 : vector<4x256xf32>
    %cst_10 = arith.constant 0.00999999977 : f32
    %13 = vector.broadcast %cst_10 : f32 to vector<4x256xf32>
    %14 = arith.mulf %13, %10 : vector<4x256xf32>
    %15 = arith.select %12, %10, %14 : vector<4x256xi1>, vector<4x256xf32>
    %c0_11 = arith.constant 0 : index
    %c0_12 = arith.constant 0 : index
    %c0_13 = arith.constant 0 : index
    %16 = vector.load %arg6[%c0_11, %c0_12, %c0_13] : memref<1x4x256xf32, #tpu.memory_space<vmem>>, vector<1x4x256xf32>
    %17 = vector.shape_cast %16 : vector<1x4x256xf32> to vector<4x256xf32>
    %18 = vector.shape_cast %15 : vector<4x256xf32> to vector<1x4x256xf32>
    tpu.vector_store %arg6[%c0_11, %c0_12, %c0_13], %18 {strides = array<i32>} : memref<1x4x256xf32, #tpu.memory_space<vmem>>, vector<1x4x256xf32>,
    return
  }
  func.func @transform_0(%arg0: i32, %arg1: i32) -> (i32, i32, i32) {
    %c0_i32 = arith.constant 0 : i32
    %c0_i32_0 = arith.constant 0 : i32
    return %arg0, %arg1, %c0_i32 : i32, i32, i32
  }
  func.func @transform_1(%arg0: i32, %arg1: i32) -> (i32, i32, i32) {
    %c0_i32 = arith.constant 0 : i32
    %c0_i32_0 = arith.constant 0 : i32
    %c0_i32_1 = arith.constant 0 : i32
    return %arg0, %c0_i32, %c0_i32_0 : i32, i32, i32
  }
  func.func @transform_2(%arg0: i32, %arg1: i32) -> (i32, i32) {
    %c0_i32 = arith.constant 0 : i32
    %c0_i32_0 = arith.constant 0 : i32
    %c0_i32_1 = arith.constant 0 : i32
    return %c0_i32, %c0_i32_0 : i32, i32
  }
  func.func @transform_3(%arg0: i32, %arg1: i32) -> (i32, i32) {
    %c0_i32 = arith.constant 0 : i32
    %c0_i32_0 = arith.constant 0 : i32
    %c0_i32_1 = arith.constant 0 : i32
    return %c0_i32, %c0_i32_0 : i32, i32
  }
  func.func @transform_4(%arg0: i32, %arg1: i32) -> (i32, i32, i32) {
    %c0_i32 = arith.constant 0 : i32
    %c0_i32_0 = arith.constant 0 : i32
    return %arg0, %arg1, %c0_i32 : i32, i32, i32
  }
}

module attributes {stable_mosaic.version = 11 : i64} {
  func.func @kernel(%arg0: i32, %arg1: i32, %arg2: memref<1x1x4096xbf16, #tpu.memory_space<vmem>>, %arg3: memref<1x4096x512xbf16, #tpu.memory_space<vmem>>, %arg4: memref<1x512xf32, #tpu.memory_space<vmem>>, %arg5: memref<1x512xf32, #tpu.memory_space<vmem>>, %arg6: memref<1x1x512xf32, #tpu.memory_space<vmem>>) attributes {dimension_semantics = [#tpu.dimension_semantics<parallel>, #tpu.dimension_semantics<parallel>], iteration_bounds = array<i64: 1, 1>, scalar_prefetch = 0 : i64, scratch_operands = 0 : i64, tpu.core_type = #tpu.core_type<tc>, window_params = [{transform_indices = @transform_0, window_bounds = array<i64: 1, 1, 4096>}, {transform_indices = @transform_1, window_bounds = array<i64: 1, 4096, 512>}, {pipeline_mode = #tpu.pipeline_mode<synchronous>, transform_indices = @transform_2, window_bounds = array<i64: 1, 512>}, {pipeline_mode = #tpu.pipeline_mode<synchronous>, transform_indices = @transform_3, window_bounds = array<i64: 1, 512>}, {transform_indices = @transform_4, window_bounds = array<i64: 1, 1, 512>}]} {
    %c0 = arith.constant 0 : index
    %c0_0 = arith.constant 0 : index
    %c0_1 = arith.constant 0 : index
    %0 = vector.load %arg2[%c0, %c0_0, %c0_1] : memref<1x1x4096xbf16, #tpu.memory_space<vmem>>, vector<1x1x4096xbf16>
    %1 = vector.shape_cast %0 : vector<1x1x4096xbf16> to vector<1x4096xbf16>
    %c0_2 = arith.constant 0 : index
    %c0_3 = arith.constant 0 : index
    %c0_4 = arith.constant 0 : index
    %2 = vector.load %arg3[%c0_2, %c0_3, %c0_4] : memref<1x4096x512xbf16, #tpu.memory_space<vmem>>, vector<1x4096x512xbf16>
    %3 = vector.shape_cast %2 : vector<1x4096x512xbf16> to vector<4096x512xbf16>
    %cst = arith.constant dense<0.000000e+00> : vector<1x512xf32>
    %4 = tpu.matmul %1, %3, %cst {dimension_numbers = #tpu.dot_dimension_numbers<[1], [0], [0], [1], [0, 0, 1, 1], [], []>} : vector<1x4096xbf16>, vector<4096x512xbf16>, vector<1x512xf32> -> vector<1x512xf32>
    %c0_5 = arith.constant 0 : index
    %c0_6 = arith.constant 0 : index
    %5 = vector.load %arg4[%c0_5, %c0_6] : memref<1x512xf32, #tpu.memory_space<vmem>>, vector<1x512xf32>
    %6 = arith.mulf %4, %5 : vector<1x512xf32>
    %c0_7 = arith.constant 0 : index
    %c0_8 = arith.constant 0 : index
    %7 = vector.load %arg5[%c0_7, %c0_8] : memref<1x512xf32, #tpu.memory_space<vmem>>, vector<1x512xf32>
    %8 = arith.addf %6, %7 : vector<1x512xf32>
    %cst_9 = arith.constant 0.000000e+00 : f32
    %9 = vector.broadcast %cst_9 : f32 to vector<1x512xf32>
    %10 = arith.cmpf oge, %8, %9 : vector<1x512xf32>
    %cst_10 = arith.constant 0.00999999977 : f32
    %11 = vector.broadcast %cst_10 : f32 to vector<1x512xf32>
    %12 = arith.mulf %11, %8 : vector<1x512xf32>
    %13 = arith.select %10, %8, %12 : vector<1x512xi1>, vector<1x512xf32>
    %c0_11 = arith.constant 0 : index
    %c0_12 = arith.constant 0 : index
    %c0_13 = arith.constant 0 : index
    %14 = vector.load %arg6[%c0_11, %c0_12, %c0_13] : memref<1x1x512xf32, #tpu.memory_space<vmem>>, vector<1x1x512xf32>
    %15 = vector.shape_cast %14 : vector<1x1x512xf32> to vector<1x512xf32>
    %16 = vector.shape_cast %13 : vector<1x512xf32> to vector<1x1x512xf32>
    tpu.vector_store %arg6[%c0_11, %c0_12, %c0_13], %16 {strides = array<i32>} : memref<1x1x512xf32, #tpu.memory_space<vmem>>, vector<1x1x512xf32>,
    return
  }
  func.func @transform_0(%arg0: i32, %arg1: i32) -> (i32, i32, i32) {
    %c0_i32 = arith.constant 0 : i32
    %c0_i32_0 = arith.constant 0 : i32
    return %arg0, %arg1, %c0_i32 : i32, i32, i32
  }
  func.func @transform_1(%arg0: i32, %arg1: i32) -> (i32, i32, i32) {
    %c0_i32 = arith.constant 0 : i32
    %c0_i32_0 = arith.constant 0 : i32
    %c0_i32_1 = arith.constant 0 : i32
    return %arg0, %c0_i32, %c0_i32_0 : i32, i32, i32
  }
  func.func @transform_2(%arg0: i32, %arg1: i32) -> (i32, i32) {
    %c0_i32 = arith.constant 0 : i32
    %c0_i32_0 = arith.constant 0 : i32
    %c0_i32_1 = arith.constant 0 : i32
    return %c0_i32, %c0_i32_0 : i32, i32
  }
  func.func @transform_3(%arg0: i32, %arg1: i32) -> (i32, i32) {
    %c0_i32 = arith.constant 0 : i32
    %c0_i32_0 = arith.constant 0 : i32
    %c0_i32_1 = arith.constant 0 : i32
    return %c0_i32, %c0_i32_0 : i32, i32
  }
  func.func @transform_4(%arg0: i32, %arg1: i32) -> (i32, i32, i32) {
    %c0_i32 = arith.constant 0 : i32
    %c0_i32_0 = arith.constant 0 : i32
    return %arg0, %arg1, %c0_i32 : i32, i32, i32
  }
}

module attributes {stable_mosaic.version = 11 : i64} {
  func.func @kernel(%arg0: i32, %arg1: i32, %arg2: memref<1x1x2048xbf16, #tpu.memory_space<vmem>>, %arg3: memref<1x2048x256xbf16, #tpu.memory_space<vmem>>, %arg4: memref<1x256xf32, #tpu.memory_space<vmem>>, %arg5: memref<1x256xf32, #tpu.memory_space<vmem>>, %arg6: memref<1x1x256xf32, #tpu.memory_space<vmem>>) attributes {dimension_semantics = [#tpu.dimension_semantics<parallel>, #tpu.dimension_semantics<parallel>], iteration_bounds = array<i64: 4, 1>, scalar_prefetch = 0 : i64, scratch_operands = 0 : i64, tpu.core_type = #tpu.core_type<tc>, window_params = [{transform_indices = @transform_0, window_bounds = array<i64: 1, 1, 2048>}, {transform_indices = @transform_1, window_bounds = array<i64: 1, 2048, 256>}, {pipeline_mode = #tpu.pipeline_mode<synchronous>, transform_indices = @transform_2, window_bounds = array<i64: 1, 256>}, {pipeline_mode = #tpu.pipeline_mode<synchronous>, transform_indices = @transform_3, window_bounds = array<i64: 1, 256>}, {transform_indices = @transform_4, window_bounds = array<i64: 1, 1, 256>}]} {
    %c0 = arith.constant 0 : index
    %c0_0 = arith.constant 0 : index
    %c0_1 = arith.constant 0 : index
    %0 = vector.load %arg2[%c0, %c0_0, %c0_1] : memref<1x1x2048xbf16, #tpu.memory_space<vmem>>, vector<1x1x2048xbf16>
    %1 = vector.shape_cast %0 : vector<1x1x2048xbf16> to vector<1x2048xbf16>
    %c0_2 = arith.constant 0 : index
    %c0_3 = arith.constant 0 : index
    %c0_4 = arith.constant 0 : index
    %2 = vector.load %arg3[%c0_2, %c0_3, %c0_4] : memref<1x2048x256xbf16, #tpu.memory_space<vmem>>, vector<1x2048x256xbf16>
    %3 = vector.shape_cast %2 : vector<1x2048x256xbf16> to vector<2048x256xbf16>
    %cst = arith.constant dense<0.000000e+00> : vector<1x256xf32>
    %4 = tpu.matmul %1, %3, %cst {dimension_numbers = #tpu.dot_dimension_numbers<[1], [0], [0], [1], [0, 0, 1, 1], [], []>} : vector<1x2048xbf16>, vector<2048x256xbf16>, vector<1x256xf32> -> vector<1x256xf32>
    %c0_5 = arith.constant 0 : index
    %c0_6 = arith.constant 0 : index
    %5 = vector.load %arg4[%c0_5, %c0_6] : memref<1x256xf32, #tpu.memory_space<vmem>>, vector<1x256xf32>
    %6 = arith.mulf %4, %5 : vector<1x256xf32>
    %c0_7 = arith.constant 0 : index
    %c0_8 = arith.constant 0 : index
    %7 = vector.load %arg5[%c0_7, %c0_8] : memref<1x256xf32, #tpu.memory_space<vmem>>, vector<1x256xf32>
    %8 = arith.addf %6, %7 : vector<1x256xf32>
    %cst_9 = arith.constant 0.000000e+00 : f32
    %9 = vector.broadcast %cst_9 : f32 to vector<1x256xf32>
    %10 = arith.cmpf oge, %8, %9 : vector<1x256xf32>
    %cst_10 = arith.constant 0.00999999977 : f32
    %11 = vector.broadcast %cst_10 : f32 to vector<1x256xf32>
    %12 = arith.mulf %11, %8 : vector<1x256xf32>
    %13 = arith.select %10, %8, %12 : vector<1x256xi1>, vector<1x256xf32>
    %c0_11 = arith.constant 0 : index
    %c0_12 = arith.constant 0 : index
    %c0_13 = arith.constant 0 : index
    %14 = vector.load %arg6[%c0_11, %c0_12, %c0_13] : memref<1x1x256xf32, #tpu.memory_space<vmem>>, vector<1x1x256xf32>
    %15 = vector.shape_cast %14 : vector<1x1x256xf32> to vector<1x256xf32>
    %16 = vector.shape_cast %13 : vector<1x256xf32> to vector<1x1x256xf32>
    tpu.vector_store %arg6[%c0_11, %c0_12, %c0_13], %16 {strides = array<i32>} : memref<1x1x256xf32, #tpu.memory_space<vmem>>, vector<1x1x256xf32>,
    return
  }
  func.func @transform_0(%arg0: i32, %arg1: i32) -> (i32, i32, i32) {
    %c0_i32 = arith.constant 0 : i32
    %c0_i32_0 = arith.constant 0 : i32
    return %arg0, %arg1, %c0_i32 : i32, i32, i32
  }
  func.func @transform_1(%arg0: i32, %arg1: i32) -> (i32, i32, i32) {
    %c0_i32 = arith.constant 0 : i32
    %c0_i32_0 = arith.constant 0 : i32
    %c0_i32_1 = arith.constant 0 : i32
    return %arg0, %c0_i32, %c0_i32_0 : i32, i32, i32
  }
  func.func @transform_2(%arg0: i32, %arg1: i32) -> (i32, i32) {
    %c0_i32 = arith.constant 0 : i32
    %c0_i32_0 = arith.constant 0 : i32
    %c0_i32_1 = arith.constant 0 : i32
    return %c0_i32, %c0_i32_0 : i32, i32
  }
  func.func @transform_3(%arg0: i32, %arg1: i32) -> (i32, i32) {
    %c0_i32 = arith.constant 0 : i32
    %c0_i32_0 = arith.constant 0 : i32
    %c0_i32_1 = arith.constant 0 : i32
    return %c0_i32, %c0_i32_0 : i32, i32
  }
  func.func @transform_4(%arg0: i32, %arg1: i32) -> (i32, i32, i32) {
    %c0_i32 = arith.constant 0 : i32
    %c0_i32_0 = arith.constant 0 : i32
    return %arg0, %arg1, %c0_i32 : i32, i32, i32
  }
}

module attributes {stable_mosaic.version = 11 : i64} {
  func.func @kernel(%arg0: i32, %arg1: i32, %arg2: memref<1x4x2048xbf16, #tpu.memory_space<vmem>>, %arg3: memref<1x2048x128xbf16, #tpu.memory_space<vmem>>, %arg4: memref<1x128xf32, #tpu.memory_space<vmem>>, %arg5: memref<1x128xf32, #tpu.memory_space<vmem>>, %arg6: memref<1x4x128xf32, #tpu.memory_space<vmem>>) attributes {dimension_semantics = [#tpu.dimension_semantics<parallel>, #tpu.dimension_semantics<parallel>], iteration_bounds = array<i64: 4, 1>, scalar_prefetch = 0 : i64, scratch_operands = 0 : i64, tpu.core_type = #tpu.core_type<tc>, window_params = [{transform_indices = @transform_0, window_bounds = array<i64: 1, 4, 2048>}, {transform_indices = @transform_1, window_bounds = array<i64: 1, 2048, 128>}, {pipeline_mode = #tpu.pipeline_mode<synchronous>, transform_indices = @transform_2, window_bounds = array<i64: 1, 128>}, {pipeline_mode = #tpu.pipeline_mode<synchronous>, transform_indices = @transform_3, window_bounds = array<i64: 1, 128>}, {transform_indices = @transform_4, window_bounds = array<i64: 1, 4, 128>}]} {
    %c0 = arith.constant 0 : index
    %c0_0 = arith.constant 0 : index
    %c0_1 = arith.constant 0 : index
    %0 = vector.load %arg2[%c0, %c0_0, %c0_1] : memref<1x4x2048xbf16, #tpu.memory_space<vmem>>, vector<1x4x2048xbf16>
    %1 = vector.shape_cast %0 : vector<1x4x2048xbf16> to vector<4x2048xbf16>
    %c0_2 = arith.constant 0 : index
    %c0_3 = arith.constant 0 : index
    %c0_4 = arith.constant 0 : index
    %2 = vector.load %arg3[%c0_2, %c0_3, %c0_4] : memref<1x2048x128xbf16, #tpu.memory_space<vmem>>, vector<1x2048x128xbf16>
    %3 = vector.shape_cast %2 : vector<1x2048x128xbf16> to vector<2048x128xbf16>
    %cst = arith.constant dense<0.000000e+00> : vector<4x128xf32>
    %4 = tpu.matmul %1, %3, %cst {dimension_numbers = #tpu.dot_dimension_numbers<[1], [0], [0], [1], [0, 0, 1, 1], [], []>} : vector<4x2048xbf16>, vector<2048x128xbf16>, vector<4x128xf32> -> vector<4x128xf32>
    %c0_5 = arith.constant 0 : index
    %c0_6 = arith.constant 0 : index
    %5 = vector.load %arg4[%c0_5, %c0_6] : memref<1x128xf32, #tpu.memory_space<vmem>>, vector<1x128xf32>
    %6 = vector.broadcast %5 : vector<1x128xf32> to vector<4x128xf32>
    %7 = arith.mulf %4, %6 : vector<4x128xf32>
    %c0_7 = arith.constant 0 : index
    %c0_8 = arith.constant 0 : index
    %8 = vector.load %arg5[%c0_7, %c0_8] : memref<1x128xf32, #tpu.memory_space<vmem>>, vector<1x128xf32>
    %9 = vector.broadcast %8 : vector<1x128xf32> to vector<4x128xf32>
    %10 = arith.addf %7, %9 : vector<4x128xf32>
    %cst_9 = arith.constant 0.000000e+00 : f32
    %11 = vector.broadcast %cst_9 : f32 to vector<4x128xf32>
    %12 = arith.cmpf oge, %10, %11 : vector<4x128xf32>
    %cst_10 = arith.constant 0.00999999977 : f32
    %13 = vector.broadcast %cst_10 : f32 to vector<4x128xf32>
    %14 = arith.mulf %13, %10 : vector<4x128xf32>
    %15 = arith.select %12, %10, %14 : vector<4x128xi1>, vector<4x128xf32>
    %c0_11 = arith.constant 0 : index
    %c0_12 = arith.constant 0 : index
    %c0_13 = arith.constant 0 : index
    %16 = vector.load %arg6[%c0_11, %c0_12, %c0_13] : memref<1x4x128xf32, #tpu.memory_space<vmem>>, vector<1x4x128xf32>
    %17 = vector.shape_cast %16 : vector<1x4x128xf32> to vector<4x128xf32>
    %18 = vector.shape_cast %15 : vector<4x128xf32> to vector<1x4x128xf32>
    tpu.vector_store %arg6[%c0_11, %c0_12, %c0_13], %18 {strides = array<i32>} : memref<1x4x128xf32, #tpu.memory_space<vmem>>, vector<1x4x128xf32>,
    return
  }
  func.func @transform_0(%arg0: i32, %arg1: i32) -> (i32, i32, i32) {
    %c0_i32 = arith.constant 0 : i32
    %c0_i32_0 = arith.constant 0 : i32
    return %arg0, %arg1, %c0_i32 : i32, i32, i32
  }
  func.func @transform_1(%arg0: i32, %arg1: i32) -> (i32, i32, i32) {
    %c0_i32 = arith.constant 0 : i32
    %c0_i32_0 = arith.constant 0 : i32
    %c0_i32_1 = arith.constant 0 : i32
    return %arg0, %c0_i32, %c0_i32_0 : i32, i32, i32
  }
  func.func @transform_2(%arg0: i32, %arg1: i32) -> (i32, i32) {
    %c0_i32 = arith.constant 0 : i32
    %c0_i32_0 = arith.constant 0 : i32
    %c0_i32_1 = arith.constant 0 : i32
    return %c0_i32, %c0_i32_0 : i32, i32
  }
  func.func @transform_3(%arg0: i32, %arg1: i32) -> (i32, i32) {
    %c0_i32 = arith.constant 0 : i32
    %c0_i32_0 = arith.constant 0 : i32
    %c0_i32_1 = arith.constant 0 : i32
    return %c0_i32, %c0_i32_0 : i32, i32
  }
  func.func @transform_4(%arg0: i32, %arg1: i32) -> (i32, i32, i32) {
    %c0_i32 = arith.constant 0 : i32
    %c0_i32_0 = arith.constant 0 : i32
    return %arg0, %arg1, %c0_i32 : i32, i32, i32
  }
}

module attributes {stable_mosaic.version = 11 : i64} {
  func.func @kernel(%arg0: i32, %arg1: i32, %arg2: memref<1x16x1024xbf16, #tpu.memory_space<vmem>>, %arg3: memref<1x1024x64xbf16, #tpu.memory_space<vmem>>, %arg4: memref<1x64xf32, #tpu.memory_space<vmem>>, %arg5: memref<1x64xf32, #tpu.memory_space<vmem>>, %arg6: memref<1x16x64xf32, #tpu.memory_space<vmem>>) attributes {dimension_semantics = [#tpu.dimension_semantics<parallel>, #tpu.dimension_semantics<parallel>], iteration_bounds = array<i64: 4, 1>, scalar_prefetch = 0 : i64, scratch_operands = 0 : i64, tpu.core_type = #tpu.core_type<tc>, window_params = [{transform_indices = @transform_0, window_bounds = array<i64: 1, 16, 1024>}, {transform_indices = @transform_1, window_bounds = array<i64: 1, 1024, 64>}, {pipeline_mode = #tpu.pipeline_mode<synchronous>, transform_indices = @transform_2, window_bounds = array<i64: 1, 64>}, {pipeline_mode = #tpu.pipeline_mode<synchronous>, transform_indices = @transform_3, window_bounds = array<i64: 1, 64>}, {transform_indices = @transform_4, window_bounds = array<i64: 1, 16, 64>}]} {
    %c0 = arith.constant 0 : index
    %c0_0 = arith.constant 0 : index
    %c0_1 = arith.constant 0 : index
    %0 = vector.load %arg2[%c0, %c0_0, %c0_1] : memref<1x16x1024xbf16, #tpu.memory_space<vmem>>, vector<1x16x1024xbf16>
    %1 = vector.shape_cast %0 : vector<1x16x1024xbf16> to vector<16x1024xbf16>
    %c0_2 = arith.constant 0 : index
    %c0_3 = arith.constant 0 : index
    %c0_4 = arith.constant 0 : index
    %2 = vector.load %arg3[%c0_2, %c0_3, %c0_4] : memref<1x1024x64xbf16, #tpu.memory_space<vmem>>, vector<1x1024x64xbf16>
    %3 = vector.shape_cast %2 : vector<1x1024x64xbf16> to vector<1024x64xbf16>
    %cst = arith.constant dense<0.000000e+00> : vector<16x64xf32>
    %4 = tpu.matmul %1, %3, %cst {dimension_numbers = #tpu.dot_dimension_numbers<[1], [0], [0], [1], [0, 0, 1, 1], [], []>} : vector<16x1024xbf16>, vector<1024x64xbf16>, vector<16x64xf32> -> vector<16x64xf32>
    %c0_5 = arith.constant 0 : index
    %c0_6 = arith.constant 0 : index
    %5 = vector.load %arg4[%c0_5, %c0_6] : memref<1x64xf32, #tpu.memory_space<vmem>>, vector<1x64xf32>
    %6 = vector.broadcast %5 : vector<1x64xf32> to vector<16x64xf32>
    %7 = arith.mulf %4, %6 : vector<16x64xf32>
    %c0_7 = arith.constant 0 : index
    %c0_8 = arith.constant 0 : index
    %8 = vector.load %arg5[%c0_7, %c0_8] : memref<1x64xf32, #tpu.memory_space<vmem>>, vector<1x64xf32>
    %9 = vector.broadcast %8 : vector<1x64xf32> to vector<16x64xf32>
    %10 = arith.addf %7, %9 : vector<16x64xf32>
    %cst_9 = arith.constant 0.000000e+00 : f32
    %11 = vector.broadcast %cst_9 : f32 to vector<16x64xf32>
    %12 = arith.cmpf oge, %10, %11 : vector<16x64xf32>
    %cst_10 = arith.constant 0.00999999977 : f32
    %13 = vector.broadcast %cst_10 : f32 to vector<16x64xf32>
    %14 = arith.mulf %13, %10 : vector<16x64xf32>
    %15 = arith.select %12, %10, %14 : vector<16x64xi1>, vector<16x64xf32>
    %c0_11 = arith.constant 0 : index
    %c0_12 = arith.constant 0 : index
    %c0_13 = arith.constant 0 : index
    %16 = vector.load %arg6[%c0_11, %c0_12, %c0_13] : memref<1x16x64xf32, #tpu.memory_space<vmem>>, vector<1x16x64xf32>
    %17 = vector.shape_cast %16 : vector<1x16x64xf32> to vector<16x64xf32>
    %18 = vector.shape_cast %15 : vector<16x64xf32> to vector<1x16x64xf32>
    tpu.vector_store %arg6[%c0_11, %c0_12, %c0_13], %18 {strides = array<i32>} : memref<1x16x64xf32, #tpu.memory_space<vmem>>, vector<1x16x64xf32>,
    return
  }
  func.func @transform_0(%arg0: i32, %arg1: i32) -> (i32, i32, i32) {
    %c0_i32 = arith.constant 0 : i32
    %c0_i32_0 = arith.constant 0 : i32
    return %arg0, %arg1, %c0_i32 : i32, i32, i32
  }
  func.func @transform_1(%arg0: i32, %arg1: i32) -> (i32, i32, i32) {
    %c0_i32 = arith.constant 0 : i32
    %c0_i32_0 = arith.constant 0 : i32
    %c0_i32_1 = arith.constant 0 : i32
    return %arg0, %c0_i32, %c0_i32_0 : i32, i32, i32
  }
  func.func @transform_2(%arg0: i32, %arg1: i32) -> (i32, i32) {
    %c0_i32 = arith.constant 0 : i32
    %c0_i32_0 = arith.constant 0 : i32
    %c0_i32_1 = arith.constant 0 : i32
    return %c0_i32, %c0_i32_0 : i32, i32
  }
  func.func @transform_3(%arg0: i32, %arg1: i32) -> (i32, i32) {
    %c0_i32 = arith.constant 0 : i32
    %c0_i32_0 = arith.constant 0 : i32
    %c0_i32_1 = arith.constant 0 : i32
    return %c0_i32, %c0_i32_0 : i32, i32
  }
  func.func @transform_4(%arg0: i32, %arg1: i32) -> (i32, i32, i32) {
    %c0_i32 = arith.constant 0 : i32
    %c0_i32_0 = arith.constant 0 : i32
    return %arg0, %arg1, %c0_i32 : i32, i32, i32
  }
}

module attributes {stable_mosaic.version = 11 : i64} {
  func.func @kernel(%arg0: i32, %arg1: i32, %arg2: memref<1x64x512xbf16, #tpu.memory_space<vmem>>, %arg3: memref<1x512x32xbf16, #tpu.memory_space<vmem>>, %arg4: memref<1x32xf32, #tpu.memory_space<vmem>>, %arg5: memref<1x32xf32, #tpu.memory_space<vmem>>, %arg6: memref<1x64x32xf32, #tpu.memory_space<vmem>>) attributes {dimension_semantics = [#tpu.dimension_semantics<parallel>, #tpu.dimension_semantics<parallel>], iteration_bounds = array<i64: 4, 1>, scalar_prefetch = 0 : i64, scratch_operands = 0 : i64, tpu.core_type = #tpu.core_type<tc>, window_params = [{transform_indices = @transform_0, window_bounds = array<i64: 1, 64, 512>}, {transform_indices = @transform_1, window_bounds = array<i64: 1, 512, 32>}, {pipeline_mode = #tpu.pipeline_mode<synchronous>, transform_indices = @transform_2, window_bounds = array<i64: 1, 32>}, {pipeline_mode = #tpu.pipeline_mode<synchronous>, transform_indices = @transform_3, window_bounds = array<i64: 1, 32>}, {transform_indices = @transform_4, window_bounds = array<i64: 1, 64, 32>}]} {
    %c0 = arith.constant 0 : index
    %c0_0 = arith.constant 0 : index
    %c0_1 = arith.constant 0 : index
    %0 = vector.load %arg2[%c0, %c0_0, %c0_1] : memref<1x64x512xbf16, #tpu.memory_space<vmem>>, vector<1x64x512xbf16>
    %1 = vector.shape_cast %0 : vector<1x64x512xbf16> to vector<64x512xbf16>
    %c0_2 = arith.constant 0 : index
    %c0_3 = arith.constant 0 : index
    %c0_4 = arith.constant 0 : index
    %2 = vector.load %arg3[%c0_2, %c0_3, %c0_4] : memref<1x512x32xbf16, #tpu.memory_space<vmem>>, vector<1x512x32xbf16>
    %3 = vector.shape_cast %2 : vector<1x512x32xbf16> to vector<512x32xbf16>
    %cst = arith.constant dense<0.000000e+00> : vector<64x32xf32>
    %4 = tpu.matmul %1, %3, %cst {dimension_numbers = #tpu.dot_dimension_numbers<[1], [0], [0], [1], [0, 0, 1, 1], [], []>} : vector<64x512xbf16>, vector<512x32xbf16>, vector<64x32xf32> -> vector<64x32xf32>
    %c0_5 = arith.constant 0 : index
    %c0_6 = arith.constant 0 : index
    %5 = vector.load %arg4[%c0_5, %c0_6] : memref<1x32xf32, #tpu.memory_space<vmem>>, vector<1x32xf32>
    %6 = vector.broadcast %5 : vector<1x32xf32> to vector<64x32xf32>
    %7 = arith.mulf %4, %6 : vector<64x32xf32>
    %c0_7 = arith.constant 0 : index
    %c0_8 = arith.constant 0 : index
    %8 = vector.load %arg5[%c0_7, %c0_8] : memref<1x32xf32, #tpu.memory_space<vmem>>, vector<1x32xf32>
    %9 = vector.broadcast %8 : vector<1x32xf32> to vector<64x32xf32>
    %10 = arith.addf %7, %9 : vector<64x32xf32>
    %cst_9 = arith.constant 0.000000e+00 : f32
    %11 = vector.broadcast %cst_9 : f32 to vector<64x32xf32>
    %12 = arith.cmpf oge, %10, %11 : vector<64x32xf32>
    %cst_10 = arith.constant 0.00999999977 : f32
    %13 = vector.broadcast %cst_10 : f32 to vector<64x32xf32>
    %14 = arith.mulf %13, %10 : vector<64x32xf32>
    %15 = arith.select %12, %10, %14 : vector<64x32xi1>, vector<64x32xf32>
    %c0_11 = arith.constant 0 : index
    %c0_12 = arith.constant 0 : index
    %c0_13 = arith.constant 0 : index
    %16 = vector.load %arg6[%c0_11, %c0_12, %c0_13] : memref<1x64x32xf32, #tpu.memory_space<vmem>>, vector<1x64x32xf32>
    %17 = vector.shape_cast %16 : vector<1x64x32xf32> to vector<64x32xf32>
    %18 = vector.shape_cast %15 : vector<64x32xf32> to vector<1x64x32xf32>
    tpu.vector_store %arg6[%c0_11, %c0_12, %c0_13], %18 {strides = array<i32>} : memref<1x64x32xf32, #tpu.memory_space<vmem>>, vector<1x64x32xf32>,
    return
  }
  func.func @transform_0(%arg0: i32, %arg1: i32) -> (i32, i32, i32) {
    %c0_i32 = arith.constant 0 : i32
    %c0_i32_0 = arith.constant 0 : i32
    return %arg0, %arg1, %c0_i32 : i32, i32, i32
  }
  func.func @transform_1(%arg0: i32, %arg1: i32) -> (i32, i32, i32) {
    %c0_i32 = arith.constant 0 : i32
    %c0_i32_0 = arith.constant 0 : i32
    %c0_i32_1 = arith.constant 0 : i32
    return %arg0, %c0_i32, %c0_i32_0 : i32, i32, i32
  }
  func.func @transform_2(%arg0: i32, %arg1: i32) -> (i32, i32) {
    %c0_i32 = arith.constant 0 : i32
    %c0_i32_0 = arith.constant 0 : i32
    %c0_i32_1 = arith.constant 0 : i32
    return %c0_i32, %c0_i32_0 : i32, i32
  }
  func.func @transform_3(%arg0: i32, %arg1: i32) -> (i32, i32) {
    %c0_i32 = arith.constant 0 : i32
    %c0_i32_0 = arith.constant 0 : i32
    %c0_i32_1 = arith.constant 0 : i32
    return %c0_i32, %c0_i32_0 : i32, i32
  }
  func.func @transform_4(%arg0: i32, %arg1: i32) -> (i32, i32, i32) {
    %c0_i32 = arith.constant 0 : i32
    %c0_i32_0 = arith.constant 0 : i32
    return %arg0, %arg1, %c0_i32 : i32, i32, i32
  }
}

module attributes {stable_mosaic.version = 11 : i64} {
  func.func @kernel(%arg0: i32, %arg1: i32, %arg2: memref<1x256x256xbf16, #tpu.memory_space<vmem>>, %arg3: memref<1x256x16xbf16, #tpu.memory_space<vmem>>, %arg4: memref<1x16xf32, #tpu.memory_space<vmem>>, %arg5: memref<1x16xf32, #tpu.memory_space<vmem>>, %arg6: memref<1x256x16xf32, #tpu.memory_space<vmem>>) attributes {dimension_semantics = [#tpu.dimension_semantics<parallel>, #tpu.dimension_semantics<parallel>], iteration_bounds = array<i64: 4, 1>, scalar_prefetch = 0 : i64, scratch_operands = 0 : i64, tpu.core_type = #tpu.core_type<tc>, window_params = [{transform_indices = @transform_0, window_bounds = array<i64: 1, 256, 256>}, {transform_indices = @transform_1, window_bounds = array<i64: 1, 256, 16>}, {pipeline_mode = #tpu.pipeline_mode<synchronous>, transform_indices = @transform_2, window_bounds = array<i64: 1, 16>}, {pipeline_mode = #tpu.pipeline_mode<synchronous>, transform_indices = @transform_3, window_bounds = array<i64: 1, 16>}, {transform_indices = @transform_4, window_bounds = array<i64: 1, 256, 16>}]} {
    %c0 = arith.constant 0 : index
    %c0_0 = arith.constant 0 : index
    %c0_1 = arith.constant 0 : index
    %0 = vector.load %arg2[%c0, %c0_0, %c0_1] : memref<1x256x256xbf16, #tpu.memory_space<vmem>>, vector<1x256x256xbf16>
    %1 = vector.shape_cast %0 : vector<1x256x256xbf16> to vector<256x256xbf16>
    %c0_2 = arith.constant 0 : index
    %c0_3 = arith.constant 0 : index
    %c0_4 = arith.constant 0 : index
    %2 = vector.load %arg3[%c0_2, %c0_3, %c0_4] : memref<1x256x16xbf16, #tpu.memory_space<vmem>>, vector<1x256x16xbf16>
    %3 = vector.shape_cast %2 : vector<1x256x16xbf16> to vector<256x16xbf16>
    %cst = arith.constant dense<0.000000e+00> : vector<256x16xf32>
    %4 = tpu.matmul %1, %3, %cst {dimension_numbers = #tpu.dot_dimension_numbers<[1], [0], [0], [1], [0, 0, 1, 1], [], []>} : vector<256x256xbf16>, vector<256x16xbf16>, vector<256x16xf32> -> vector<256x16xf32>
    %c0_5 = arith.constant 0 : index
    %c0_6 = arith.constant 0 : index
    %5 = vector.load %arg4[%c0_5, %c0_6] : memref<1x16xf32, #tpu.memory_space<vmem>>, vector<1x16xf32>
    %6 = vector.broadcast %5 : vector<1x16xf32> to vector<256x16xf32>
    %7 = arith.mulf %4, %6 : vector<256x16xf32>
    %c0_7 = arith.constant 0 : index
    %c0_8 = arith.constant 0 : index
    %8 = vector.load %arg5[%c0_7, %c0_8] : memref<1x16xf32, #tpu.memory_space<vmem>>, vector<1x16xf32>
    %9 = vector.broadcast %8 : vector<1x16xf32> to vector<256x16xf32>
    %10 = arith.addf %7, %9 : vector<256x16xf32>
    %cst_9 = arith.constant 0.000000e+00 : f32
    %11 = vector.broadcast %cst_9 : f32 to vector<256x16xf32>
    %12 = arith.cmpf oge, %10, %11 : vector<256x16xf32>
    %cst_10 = arith.constant 0.00999999977 : f32
    %13 = vector.broadcast %cst_10 : f32 to vector<256x16xf32>
    %14 = arith.mulf %13, %10 : vector<256x16xf32>
    %15 = arith.select %12, %10, %14 : vector<256x16xi1>, vector<256x16xf32>
    %c0_11 = arith.constant 0 : index
    %c0_12 = arith.constant 0 : index
    %c0_13 = arith.constant 0 : index
    %16 = vector.load %arg6[%c0_11, %c0_12, %c0_13] : memref<1x256x16xf32, #tpu.memory_space<vmem>>, vector<1x256x16xf32>
    %17 = vector.shape_cast %16 : vector<1x256x16xf32> to vector<256x16xf32>
    %18 = vector.shape_cast %15 : vector<256x16xf32> to vector<1x256x16xf32>
    tpu.vector_store %arg6[%c0_11, %c0_12, %c0_13], %18 {strides = array<i32>} : memref<1x256x16xf32, #tpu.memory_space<vmem>>, vector<1x256x16xf32>,
    return
  }
  func.func @transform_0(%arg0: i32, %arg1: i32) -> (i32, i32, i32) {
    %c0_i32 = arith.constant 0 : i32
    %c0_i32_0 = arith.constant 0 : i32
    return %arg0, %arg1, %c0_i32 : i32, i32, i32
  }
  func.func @transform_1(%arg0: i32, %arg1: i32) -> (i32, i32, i32) {
    %c0_i32 = arith.constant 0 : i32
    %c0_i32_0 = arith.constant 0 : i32
    %c0_i32_1 = arith.constant 0 : i32
    return %arg0, %c0_i32, %c0_i32_0 : i32, i32, i32
  }
  func.func @transform_2(%arg0: i32, %arg1: i32) -> (i32, i32) {
    %c0_i32 = arith.constant 0 : i32
    %c0_i32_0 = arith.constant 0 : i32
    %c0_i32_1 = arith.constant 0 : i32
    return %c0_i32, %c0_i32_0 : i32, i32
  }
  func.func @transform_3(%arg0: i32, %arg1: i32) -> (i32, i32) {
    %c0_i32 = arith.constant 0 : i32
    %c0_i32_0 = arith.constant 0 : i32
    %c0_i32_1 = arith.constant 0 : i32
    return %c0_i32, %c0_i32_0 : i32, i32
  }
  func.func @transform_4(%arg0: i32, %arg1: i32) -> (i32, i32, i32) {
    %c0_i32 = arith.constant 0 : i32
    %c0_i32_0 = arith.constant 0 : i32
    return %arg0, %arg1, %c0_i32 : i32, i32, i32
  }
}

module attributes {stable_mosaic.version = 11 : i64} {
  func.func @kernel(%arg0: i32, %arg1: i32, %arg2: memref<1x256x64xbf16, #tpu.memory_space<vmem>>, %arg3: memref<1x64x20xbf16, #tpu.memory_space<vmem>>, %arg4: memref<1x20xf32, #tpu.memory_space<vmem>>, %arg5: memref<1x20xf32, #tpu.memory_space<vmem>>, %arg6: memref<1x256x20xf32, #tpu.memory_space<vmem>>) attributes {dimension_semantics = [#tpu.dimension_semantics<parallel>, #tpu.dimension_semantics<parallel>], iteration_bounds = array<i64: 8, 4>, scalar_prefetch = 0 : i64, scratch_operands = 0 : i64, tpu.core_type = #tpu.core_type<tc>, window_params = [{transform_indices = @transform_0, window_bounds = array<i64: 1, 256, 64>}, {transform_indices = @transform_1, window_bounds = array<i64: 1, 64, 20>}, {pipeline_mode = #tpu.pipeline_mode<synchronous>, transform_indices = @transform_2, window_bounds = array<i64: 1, 20>}, {pipeline_mode = #tpu.pipeline_mode<synchronous>, transform_indices = @transform_3, window_bounds = array<i64: 1, 20>}, {transform_indices = @transform_4, window_bounds = array<i64: 1, 256, 20>}]} {
    %c0 = arith.constant 0 : index
    %c0_0 = arith.constant 0 : index
    %c0_1 = arith.constant 0 : index
    %0 = vector.load %arg2[%c0, %c0_0, %c0_1] : memref<1x256x64xbf16, #tpu.memory_space<vmem>>, vector<1x256x64xbf16>
    %1 = vector.shape_cast %0 : vector<1x256x64xbf16> to vector<256x64xbf16>
    %c0_2 = arith.constant 0 : index
    %c0_3 = arith.constant 0 : index
    %c0_4 = arith.constant 0 : index
    %2 = vector.load %arg3[%c0_2, %c0_3, %c0_4] : memref<1x64x20xbf16, #tpu.memory_space<vmem>>, vector<1x64x20xbf16>
    %3 = vector.shape_cast %2 : vector<1x64x20xbf16> to vector<64x20xbf16>
    %cst = arith.constant dense<0.000000e+00> : vector<256x20xf32>
    %4 = tpu.matmul %1, %3, %cst {dimension_numbers = #tpu.dot_dimension_numbers<[1], [0], [0], [1], [0, 0, 1, 1], [], []>} : vector<256x64xbf16>, vector<64x20xbf16>, vector<256x20xf32> -> vector<256x20xf32>
    %c0_5 = arith.constant 0 : index
    %c0_6 = arith.constant 0 : index
    %5 = vector.load %arg4[%c0_5, %c0_6] : memref<1x20xf32, #tpu.memory_space<vmem>>, vector<1x20xf32>
    %6 = vector.broadcast %5 : vector<1x20xf32> to vector<256x20xf32>
    %7 = arith.mulf %4, %6 : vector<256x20xf32>
    %c0_7 = arith.constant 0 : index
    %c0_8 = arith.constant 0 : index
    %8 = vector.load %arg5[%c0_7, %c0_8] : memref<1x20xf32, #tpu.memory_space<vmem>>, vector<1x20xf32>
    %9 = vector.broadcast %8 : vector<1x20xf32> to vector<256x20xf32>
    %10 = arith.addf %7, %9 : vector<256x20xf32>
    %c0_9 = arith.constant 0 : index
    %c0_10 = arith.constant 0 : index
    %c0_11 = arith.constant 0 : index
    %11 = vector.load %arg6[%c0_9, %c0_10, %c0_11] : memref<1x256x20xf32, #tpu.memory_space<vmem>>, vector<1x256x20xf32>
    %12 = vector.shape_cast %11 : vector<1x256x20xf32> to vector<256x20xf32>
    %13 = vector.shape_cast %10 : vector<256x20xf32> to vector<1x256x20xf32>
    tpu.vector_store %arg6[%c0_9, %c0_10, %c0_11], %13 {strides = array<i32>} : memref<1x256x20xf32, #tpu.memory_space<vmem>>, vector<1x256x20xf32>,
    return
  }
  func.func @transform_0(%arg0: i32, %arg1: i32) -> (i32, i32, i32) {
    %c0_i32 = arith.constant 0 : i32
    %c0_i32_0 = arith.constant 0 : i32
    return %arg0, %arg1, %c0_i32 : i32, i32, i32
  }
  func.func @transform_1(%arg0: i32, %arg1: i32) -> (i32, i32, i32) {
    %c0_i32 = arith.constant 0 : i32
    %c0_i32_0 = arith.constant 0 : i32
    %c0_i32_1 = arith.constant 0 : i32
    return %arg0, %c0_i32, %c0_i32_0 : i32, i32, i32
  }
  func.func @transform_2(%arg0: i32, %arg1: i32) -> (i32, i32) {
    %c0_i32 = arith.constant 0 : i32
    %c0_i32_0 = arith.constant 0 : i32
    %c0_i32_1 = arith.constant 0 : i32
    return %c0_i32, %c0_i32_0 : i32, i32
  }
  func.func @transform_3(%arg0: i32, %arg1: i32) -> (i32, i32) {
    %c0_i32 = arith.constant 0 : i32
    %c0_i32_0 = arith.constant 0 : i32
    %c0_i32_1 = arith.constant 0 : i32
    return %c0_i32, %c0_i32_0 : i32, i32
  }
  func.func @transform_4(%arg0: i32, %arg1: i32) -> (i32, i32, i32) {
    %c0_i32 = arith.constant 0 : i32
    %c0_i32_0 = arith.constant 0 : i32
    return %arg0, %arg1, %c0_i32 : i32, i32, i32
  }
}

</mosaic_0001>

<bundles_post_ra>
// kernel: _lambda_.12
= control target key start
LH: loop header
LB: loop body
LE: loop exit
PB: predicated region body
PF: predicated region fallthrough
CT: control target
= control target key end

     0   :  { %s1117_s15 = smov 0   ;;  %s1119_s16 = smov 0   ;;  %s1337_s0 = inlined_call_operand.vmem [shape: bf16[1,1024,48], index: 0, kind: input, shape index: {}]   ;;  %s1338_s1 = inlined_call_operand.vmem [shape: bf16[1,48,16], index: 1, kind: input, shape index: {}]   ;;  %s1339_s2 = inlined_call_operand.vmem [shape: f32[1,16], index: 2, kind: input, shape index: {}]   ;;  %s1340_s3 = inlined_call_operand.vmem [shape: f32[1,16], index: 3, kind: input, shape index: {}]   ;;  %s1341_s4 = inlined_call_operand.vmem [shape: f32[1,1024,16], index: 4, kind: output, shape index: {}]  }
   0x1   :  { %s1121_s17 = smov 0  }
   0x2 LB: > { %s23_s18 = sadd.s32 1, %s1086_s16  ;;  %p918_p0 = scmp.ge.s32.totalorder %s1090_s17, 1  ;;  %s1090_s17 = sphi %s1121_s17, %s14_s17   ;;  %s1086_s16 = sphi %s1119_s16, %s1343_s16   ;;  %s1082_s15 = sphi %s1117_s15, %s1342_s15  }
   0x3   : > { %p24_p1 = scmp.ge.s32.totalorder %s23_s18, 4  ;;  %p193_p2 = scmp.lt.s32.totalorder %s1090_s17, 5 }
   0x5   : > { %s1345_s18 = smov (%p24_p1, %s23_s18), 0  ;;  %p194_p3 = pnand %p918_p0, %p193_p2 }
   0x6   : > { %v1049_v0 = vld [vmem:[%s1338_s1] sm:$0xff] (!%p194_p3)   ;;  %s919_s21 = sshll.u32 (!%p194_p3), %s1082_s15, 5  ;;  %v1050_v1 = vld [vmem:[%s1338_s1 + $0x8] sm:$0xff] (!%p194_p3)   ;;  %v1051_v2 = vld [vmem:[%s1338_s1 + $0x10] sm:$0xff] (!%p194_p3)   ;;  %vm394_vm0 = vcmask (!%p194_p3), 392192   ;;  %vm778_vm1 = vcmask (!%p194_p3), 130048  }
   0x7   : > { %197 = sbr.rel (%p194_p3) target bundleno = 276 (0x114), region = 36  ;;  %p235_p4 = scmp.lt.s32.totalorder (!%p194_p3), %s919_s21, 127  ;;  %981 = vmatprep.subr.bf16.mxu0 (!%p194_p3), %v1049_v0  ;;  %1019 = vmatprep.subr.bf16.mxu1 (!%p194_p3), %v1049_v0  ;;  %v1187_v19 = vld [vmem:[%s1339_s2] ss:$0 sm:$0xff] (!%p194_p3) }
   0x8   : > { %982 = vmatpush3.bf16.msra.mxu0 (!%p194_p3), %v1049_v0  ;;  %1022 = vmatpush3.bf16.msra.mxu1 (!%p194_p3), %v1049_v0  ;;  %v1192_v21 = vld [vmem:[%s1340_s3] ss:$0 sm:$0xff] (!%p194_p3) }
   0x9   : > { %983 = vmatprep.subr.bf16.mxu0 (!%p194_p3), %v1050_v1  ;;  %1020 = vmatprep.subr.bf16.mxu1 (!%p194_p3), %v1050_v1 }
   0xc   : > { %984 = vmatpush3.bf16.msra.mxu0 (!%p194_p3), %v1050_v1  ;;  %1023 = vmatpush3.bf16.msra.mxu1 (!%p194_p3), %v1050_v1 }
   0xd   : > { %985 = vmatprep.subr.bf16.mxu0 (!%p194_p3), %v1051_v2  ;;  %1021 = vmatprep.subr.bf16.mxu1 (!%p194_p3), %v1051_v2 }
   0xe   : > { %s1347_s21 = smov (!%p235_p4, %s919_s21), 127 }
   0xf   : > { %s920_s26 = sshll.u32 %s1347_s21, 2  ;;  %s922_s8 = sshll.u32 %s1347_s21, 3 }
  0x10   : > { %s1150_s29 = scalar_lea.vmem %s1337_s0, %s920_s26  ;;  %986 = vmatpush3.bf16.msra.mxu0 %v1051_v2  ;;  %1024 = vmatpush3.bf16.msra.mxu1 %v1051_v2  ;;  %s1210_s11 = scalar_lea.vmem %s1341_s4, %s922_s8 }
  0x11   : > { %v1052_v3 = vld [vmem:[%s1150_s29] sm:$0xff]   ;;  %v1054_v5 = vld [vmem:[%s1150_s29 + $0x8] sm:$0xff]   ;;  %v1056_v7 = vld [vmem:[%s1150_s29 + $0x10] sm:$0xff]  }
  0x12   : > { %v1053_v4 = vld [vmem:[%s1150_s29 + $0x40] sm:$0xff]   ;;  %987 = vmatprep.mubr.msk.bf16.mxu0 %vm394_vm0, %v1052_v3  ;;  %v1055_v6 = vld [vmem:[%s1150_s29 + $0x48] sm:$0xff]   ;;  %v1057_v8 = vld [vmem:[%s1150_s29 + $0x50] sm:$0xff]  }
  0x13   : > { %1003 = vmatprep.mubr.msk.bf16.mxu1 %vm394_vm0, %v1053_v4  ;;  %988 = vmatmul.mubr.msk.bf16.vlgmr.msra.gmra.mrb[0].mxu0 %vm394_vm0, %v1054_v5  ;;  %v1058_v9 = vld [vmem:[%s1150_s29 + $0x18] sm:$0xff]   ;;  %v1060_v11 = vld [vmem:[%s1150_s29 + $0x20] sm:$0xff]   ;;  %v1062_v13 = vld [vmem:[%s1150_s29 + $0x28] sm:$0xff]  }
  0x14   : > { %1004 = vmatmul.mubr.msk.bf16.vlgmr.msra.gmra.mrb[0].mxu1 %vm394_vm0, %v1055_v6  ;;  %991 = vmatprep.mubr.msk.bf16.mxu0 %vm394_vm0, %v1056_v7  ;;  %v1059_v10 = vld [vmem:[%s1150_s29 + $0x58] sm:$0xff]   ;;  %v1061_v12 = vld [vmem:[%s1150_s29 + $0x60] sm:$0xff]   ;;  %v1063_v14 = vld [vmem:[%s1150_s29 + $0x68] sm:$0xff]  }
  0x15   : > { %1007 = vmatprep.mubr.msk.bf16.mxu1 %vm394_vm0, %v1057_v8  ;;  %v1064_v15 = vld [vmem:[%s1150_s29 + $0x30] sm:$0xff]   ;;  %v1066_v17 = vld [vmem:[%s1150_s29 + $0x38] sm:$0xff]  }
  0x16   : > { %v1065_v16 = vld [vmem:[%s1150_s29 + $0x70] sm:$0xff]   ;;  %v1067_v18 = vld [vmem:[%s1150_s29 + $0x78] sm:$0xff]  }
  0x1b   : > { %992 = vmatmul.mubr.msk.bf16.gmra.mrb[4].mxu0 %vm394_vm0, %v1058_v9 }
  0x1c   : > { %1008 = vmatmul.mubr.msk.bf16.gmra.mrb[4].mxu1 %vm394_vm0, %v1059_v10  ;;  %995 = vmatprep.mubr.msk.bf16.mxu0 %vm394_vm0, %v1060_v11 }
  0x1d   : > { %1011 = vmatprep.mubr.msk.bf16.mxu1 %vm394_vm0, %v1061_v12 }
  0x23   : > { %996 = vmatmul.mubr.msk.bf16.gmra.mrb[8].mxu0 %vm394_vm0, %v1062_v13 }
  0x24   : > { %1012 = vmatmul.mubr.msk.bf16.gmra.mrb[8].mxu1 %vm394_vm0, %v1063_v14  ;;  %999 = vmatprep.mubr.msk.bf16.mxu0 %vm394_vm0, %v1064_v15 }
  0x25   : > { %1015 = vmatprep.mubr.msk.bf16.mxu1 %vm394_vm0, %v1065_v16 }
  0x2b   : > { %1000 = vmatmul.mubr.msk.bf16.gmra.mrb[12].mxu0 %vm394_vm0, %v1066_v17 }
  0x2c   : > { %1016 = vmatmul.mubr.msk.bf16.gmra.mrb[12].mxu1 %vm394_vm0, %v1067_v18 }
  0xe6   : > { %v989_v20 = vpop.f32.mrb[0].mxu0 }
  0xe7   : > { %v1005_v22 = vpop.f32.mrb[0].mxu1  ;;  %v613_v23 = vmul.f32 %v989_v20, %v1187_v19  ;;  %v477_v25 = vpop.f32.mrb[1].mxu0 }
  0xe8   : > { %v629_v24 = vmul.f32 %v1005_v22, %v1187_v19  ;;  %v541_v26 = vpop.f32.mrb[1].mxu1  ;;  %v611_v27 = vmul.f32 %v1187_v19, %v477_v25  ;;  %v990_v29 = vpop.f32.mrb[2].mxu0 }
  0xe9   : > { %v627_v28 = vmul.f32 %v1187_v19, %v541_v26  ;;  %v1006_v30 = vpop.f32.mrb[2].mxu1  ;;  %v652_v31 = vadd.f32 %v1192_v21, %v613_v23  ;;  %v614_v33 = vmul.f32 %v990_v29, %v1187_v19  ;;  %v480_v35 = vpop.f32.mrb[3].mxu0 }
  0xea   : > { %v668_v32 = vadd.f32 %v1192_v21, %v629_v24  ;;  %v630_v34 = vmul.f32 %v1006_v30, %v1187_v19  ;;  %v544_v36 = vpop.f32.mrb[3].mxu1  ;;  %v650_v37 = vadd.f32 %v1192_v21, %v611_v27  ;;  %v612_v39 = vmul.f32 %v1187_v19, %v480_v35 }
  0xeb   : > { %v666_v38 = vadd.f32 %v1192_v21, %v627_v28  ;;  %v628_v40 = vmul.f32 %v1187_v19, %v544_v36  ;;  %vm684_vm2 = vcmp.ge.f32.partialorder %v652_v31, 0.0  ;;  %v716_v41 = vmul.f32 0.01, %v652_v31 }
  0xec   : > { %vm700_vm3 = vcmp.ge.f32.partialorder %v668_v32, 0.0  ;;  %v732_v42 = vmul.f32 0.01, %v668_v32  ;;  %vm682_vm4 = vcmp.ge.f32.partialorder %v650_v37, 0.0  ;;  %v714_v43 = vmul.f32 0.01, %v650_v37 }
  0xed   : > { %vm698_vm5 = vcmp.ge.f32.partialorder %v666_v38, 0.0  ;;  %v730_v44 = vmul.f32 0.01, %v666_v38  ;;  %v748_v45 = vsel %vm684_vm2, %v652_v31, %v716_v41  ;;  %v653_v47 = vadd.f32 %v1192_v21, %v614_v33 }
  0xee   : > { %v764_v46 = vsel %vm700_vm3, %v668_v32, %v732_v42  ;;  %v669_v48 = vadd.f32 %v1192_v21, %v630_v34  ;;  %781 = vst.msk [vmem:[%s1210_s11 + $0x10] sm:$0xff] %vm778_vm1, %v748_v45  ;;  %v746_v49 = vsel %vm682_vm4, %v650_v37, %v714_v43  ;;  %v651_v51 = vadd.f32 %v1192_v21, %v612_v39  ;;  %v993_v53 = vpop.f32.mrb[4].mxu0 }
  0xef   : > { %797 = vst.msk [vmem:[%s1210_s11 + $0x90] sm:$0xff] %vm778_vm1, %v764_v46  ;;  %v762_v50 = vsel %vm698_vm5, %v666_v38, %v730_v44  ;;  %v667_v52 = vadd.f32 %v1192_v21, %v628_v40  ;;  %v1009_v54 = vpop.f32.mrb[4].mxu1  ;;  %779 = vst.msk [vmem:[%s1210_s11] sm:$0xff] %vm778_vm1, %v746_v49  ;;  %vm685_vm6 = vcmp.ge.f32.partialorder %v653_v47, 0.0  ;;  %v717_v55 = vmul.f32 0.01, %v653_v47 }
  0xf0   : > { %795 = vst.msk [vmem:[%s1210_s11 + $0x80] sm:$0xff] %vm778_vm1, %v762_v50  ;;  %vm701_vm7 = vcmp.ge.f32.partialorder %v669_v48, 0.0  ;;  %v733_v56 = vmul.f32 0.01, %v669_v48  ;;  %vm683_vm8 = vcmp.ge.f32.partialorder %v651_v51, 0.0  ;;  %v617_v61 = vmul.f32 %v993_v53, %v1187_v19  ;;  %v493_v63 = vpop.f32.mrb[5].mxu0 }
  0xf1   : > { %v715_v57 = vmul.f32 0.01, %v651_v51  ;;  %vm699_vm9 = vcmp.ge.f32.partialorder %v667_v52, 0.0  ;;  %v731_v58 = vmul.f32 0.01, %v667_v52  ;;  %v749_v59 = vsel %vm685_vm6, %v653_v47, %v717_v55  ;;  %v557_v0 = vpop.f32.mrb[5].mxu1 }
  0xf2   : > { %v765_v60 = vsel %vm701_vm7, %v669_v48, %v733_v56  ;;  %v633_v62 = vmul.f32 %v1009_v54, %v1187_v19  ;;  %782 = vst.msk [vmem:[%s1210_s11 + $0x18] sm:$0xff] %vm778_vm1, %v749_v59  ;;  %v615_v3 = vmul.f32 %v1187_v19, %v493_v63  ;;  %v631_v4 = vmul.f32 %v1187_v19, %v557_v0  ;;  %v994_v5 = vpop.f32.mrb[6].mxu0  ;;  %v1010_v6 = vpop.f32.mrb[6].mxu1 }
  0xf3   : > { %798 = vst.msk [vmem:[%s1210_s11 + $0x98] sm:$0xff] %vm778_vm1, %v765_v60  ;;  %v747_v1 = vsel %vm683_vm8, %v651_v51, %v715_v57  ;;  %v763_v2 = vsel %vm699_vm9, %v667_v52, %v731_v58  ;;  %v656_v7 = vadd.f32 %v1192_v21, %v617_v61  ;;  %v618_v9 = vmul.f32 %v994_v5, %v1187_v19  ;;  %v496_v11 = vpop.f32.mrb[7].mxu0  ;;  %v560_v12 = vpop.f32.mrb[7].mxu1 }
  0xf4   : > { %780 = vst.msk [vmem:[%s1210_s11 + $0x8] sm:$0xff] %vm778_vm1, %v747_v1  ;;  %796 = vst.msk [vmem:[%s1210_s11 + $0x88] sm:$0xff] %vm778_vm1, %v763_v2  ;;  %v672_v8 = vadd.f32 %v1192_v21, %v633_v62  ;;  %v634_v10 = vmul.f32 %v1010_v6, %v1187_v19  ;;  %v654_v13 = vadd.f32 %v1192_v21, %v615_v3 }
  0xf5   : > { %v670_v14 = vadd.f32 %v1192_v21, %v631_v4  ;;  %v616_v15 = vmul.f32 %v1187_v19, %v496_v11  ;;  %v632_v16 = vmul.f32 %v1187_v19, %v560_v12  ;;  %vm688_vm10 = vcmp.ge.f32.partialorder %v656_v7, 0.0 }
  0xf6   : > { %v720_v17 = vmul.f32 0.01, %v656_v7  ;;  %vm704_vm11 = vcmp.ge.f32.partialorder %v672_v8, 0.0  ;;  %v736_v18 = vmul.f32 0.01, %v672_v8  ;;  %vm686_vm12 = vcmp.ge.f32.partialorder %v654_v13, 0.0 }
  0xf7   : > { %v718_v20 = vmul.f32 0.01, %v654_v13  ;;  %vm702_vm13 = vcmp.ge.f32.partialorder %v670_v14, 0.0  ;;  %v734_v22 = vmul.f32 0.01, %v670_v14  ;;  %v657_v25 = vadd.f32 %v1192_v21, %v618_v9  ;;  %v997_v27 = vpop.f32.mrb[8].mxu0 }
  0xf8   : > { %v752_v23 = vsel %vm688_vm10, %v656_v7, %v720_v17  ;;  %v768_v24 = vsel %vm704_vm11, %v672_v8, %v736_v18  ;;  %v673_v26 = vadd.f32 %v1192_v21, %v634_v10  ;;  %v1013_v28 = vpop.f32.mrb[8].mxu1  ;;  %v655_v31 = vadd.f32 %v1192_v21, %v616_v15  ;;  %v509_v33 = vpop.f32.mrb[9].mxu0 }
  0xf9   : > { %785 = vst.msk [vmem:[%s1210_s11 + $0x30] sm:$0xff] %vm778_vm1, %v752_v23  ;;  %801 = vst.msk [vmem:[%s1210_s11 + $0xb0] sm:$0xff] %vm778_vm1, %v768_v24  ;;  %v750_v29 = vsel %vm686_vm12, %v654_v13, %v718_v20  ;;  %v766_v30 = vsel %vm702_vm13, %v670_v14, %v734_v22  ;;  %v671_v32 = vadd.f32 %v1192_v21, %v632_v16  ;;  %v573_v34 = vpop.f32.mrb[9].mxu1  ;;  %vm689_vm14 = vcmp.ge.f32.partialorder %v657_v25, 0.0  ;;  %v998_v43 = vpop.f32.mrb[10].mxu0 }
  0xfa   : > { %783 = vst.msk [vmem:[%s1210_s11 + $0x20] sm:$0xff] %vm778_vm1, %v750_v29  ;;  %799 = vst.msk [vmem:[%s1210_s11 + $0xa0] sm:$0xff] %vm778_vm1, %v766_v30  ;;  %v721_v35 = vmul.f32 0.01, %v657_v25  ;;  %vm705_vm15 = vcmp.ge.f32.partialorder %v673_v26, 0.0  ;;  %vm687_vm0 = vcmp.ge.f32.partialorder %v655_v31, 0.0  ;;  %v621_v41 = vmul.f32 %v997_v27, %v1187_v19 }
  0xfb   : > { %v737_v36 = vmul.f32 0.01, %v673_v26  ;;  %v719_v37 = vmul.f32 0.01, %v655_v31  ;;  %vm703_vm2 = vcmp.ge.f32.partialorder %v671_v32, 0.0  ;;  %v637_v42 = vmul.f32 %v1013_v28, %v1187_v19  ;;  %v1014_v44 = vpop.f32.mrb[10].mxu1 }
  0xfc   : > { %v735_v38 = vmul.f32 0.01, %v671_v32  ;;  %v753_v39 = vsel %vm689_vm14, %v657_v25, %v721_v35  ;;  %v619_v47 = vmul.f32 %v1187_v19, %v509_v33  ;;  %v635_v48 = vmul.f32 %v1187_v19, %v573_v34  ;;  %v512_v49 = vpop.f32.mrb[11].mxu0  ;;  %v576_v50 = vpop.f32.mrb[11].mxu1 }
  0xfd   : > { %v769_v40 = vsel %vm705_vm15, %v673_v26, %v737_v36  ;;  %786 = vst.msk [vmem:[%s1210_s11 + $0x38] sm:$0xff] %vm778_vm1, %v753_v39  ;;  %v751_v45 = vsel %vm687_vm0, %v655_v31, %v719_v37  ;;  %v660_v51 = vadd.f32 %v1192_v21, %v621_v41  ;;  %v676_v52 = vadd.f32 %v1192_v21, %v637_v42 }
  0xfe   : > { %802 = vst.msk [vmem:[%s1210_s11 + $0xb8] sm:$0xff] %vm778_vm1, %v769_v40  ;;  %v767_v46 = vsel %vm703_vm2, %v671_v32, %v735_v38  ;;  %784 = vst.msk [vmem:[%s1210_s11 + $0x28] sm:$0xff] %vm778_vm1, %v751_v45  ;;  %v622_v53 = vmul.f32 %v998_v43, %v1187_v19  ;;  %v638_v54 = vmul.f32 %v1014_v44, %v1187_v19  ;;  %v1001_v59 = vpop.f32.mrb[12].mxu0 }
  0xff   : > { %800 = vst.msk [vmem:[%s1210_s11 + $0xa8] sm:$0xff] %vm778_vm1, %v767_v46  ;;  %v658_v55 = vadd.f32 %v1192_v21, %v619_v47  ;;  %v674_v56 = vadd.f32 %v1192_v21, %v635_v48  ;;  %v620_v57 = vmul.f32 %v1187_v19, %v512_v49  ;;  %v636_v58 = vmul.f32 %v1187_v19, %v576_v50  ;;  %v1017_v60 = vpop.f32.mrb[12].mxu1  ;;  %v525_v5 = vpop.f32.mrb[13].mxu0 }
 0x100   : > { %vm692_vm3 = vcmp.ge.f32.partialorder %v660_v51, 0.0  ;;  %v724_v61 = vmul.f32 0.01, %v660_v51  ;;  %vm708_vm4 = vcmp.ge.f32.partialorder %v676_v52, 0.0  ;;  %v740_v62 = vmul.f32 0.01, %v676_v52 }
 0x101   : > { %vm690_vm5 = vcmp.ge.f32.partialorder %v658_v55, 0.0  ;;  %v722_v63 = vmul.f32 0.01, %v658_v55  ;;  %vm706_vm6 = vcmp.ge.f32.partialorder %v674_v56, 0.0  ;;  %v738_v0 = vmul.f32 0.01, %v674_v56 }
 0x102   : > { %v756_v1 = vsel %vm692_vm3, %v660_v51, %v724_v61  ;;  %v772_v2 = vsel %vm708_vm4, %v676_v52, %v740_v62  ;;  %v661_v3 = vadd.f32 %v1192_v21, %v622_v53  ;;  %v677_v4 = vadd.f32 %v1192_v21, %v638_v54  ;;  %v589_v6 = vpop.f32.mrb[13].mxu1  ;;  %v1002_v11 = vpop.f32.mrb[14].mxu0 }
 0x103   : > { %789 = vst.msk [vmem:[%s1210_s11 + $0x50] sm:$0xff] %vm778_vm1, %v756_v1  ;;  %805 = vst.msk [vmem:[%s1210_s11 + $0xd0] sm:$0xff] %vm778_vm1, %v772_v2  ;;  %v754_v7 = vsel %vm690_vm5, %v658_v55, %v722_v63  ;;  %v770_v8 = vsel %vm706_vm6, %v674_v56, %v738_v0  ;;  %v659_v9 = vadd.f32 %v1192_v21, %v620_v57  ;;  %v1018_v12 = vpop.f32.mrb[14].mxu1  ;;  %v528_v23 = vpop.f32.mrb[15].mxu0 }
 0x104   : > { %v675_v10 = vadd.f32 %v1192_v21, %v636_v58  ;;  %787 = vst.msk [vmem:[%s1210_s11 + $0x40] sm:$0xff] %vm778_vm1, %v754_v7  ;;  %803 = vst.msk [vmem:[%s1210_s11 + $0xc0] sm:$0xff] %vm778_vm1, %v770_v8  ;;  %vm693_vm7 = vcmp.ge.f32.partialorder %v661_v3, 0.0  ;;  %v725_v13 = vmul.f32 0.01, %v661_v3  ;;  %vm709_vm8 = vcmp.ge.f32.partialorder %v677_v4, 0.0 }
 0x105   : > { %v741_v14 = vmul.f32 0.01, %v677_v4  ;;  %vm691_vm9 = vcmp.ge.f32.partialorder %v659_v9, 0.0  ;;  %v723_v15 = vmul.f32 0.01, %v659_v9  ;;  %v625_v20 = vmul.f32 %v1001_v59, %v1187_v19  ;;  %v592_v24 = vpop.f32.mrb[15].mxu1 }
 0x106   : > { %vm707_vm10 = vcmp.ge.f32.partialorder %v675_v10, 0.0  ;;  %v739_v16 = vmul.f32 0.01, %v675_v10  ;;  %v757_v17 = vsel %vm693_vm7, %v661_v3, %v725_v13  ;;  %v641_v22 = vmul.f32 %v1017_v60, %v1187_v19 }
 0x107   : > { %v773_v18 = vsel %vm709_vm8, %v677_v4, %v741_v14  ;;  %790 = vst.msk [vmem:[%s1210_s11 + $0x58] sm:$0xff] %vm778_vm1, %v757_v17  ;;  %v755_v25 = vsel %vm691_vm9, %v659_v9, %v723_v15  ;;  %v623_v27 = vmul.f32 %v1187_v19, %v525_v5  ;;  %v639_v28 = vmul.f32 %v1187_v19, %v589_v6 }
 0x108   : > { %806 = vst.msk [vmem:[%s1210_s11 + $0xd8] sm:$0xff] %vm778_vm1, %v773_v18  ;;  %v771_v26 = vsel %vm707_vm10, %v675_v10, %v739_v16  ;;  %788 = vst.msk [vmem:[%s1210_s11 + $0x48] sm:$0xff] %vm778_vm1, %v755_v25  ;;  %v664_v29 = vadd.f32 %v1192_v21, %v625_v20  ;;  %v680_v30 = vadd.f32 %v1192_v21, %v641_v22 }
 0x109   : > { %804 = vst.msk [vmem:[%s1210_s11 + $0xc8] sm:$0xff] %vm778_vm1, %v771_v26  ;;  %v626_v31 = vmul.f32 %v1002_v11, %v1187_v19  ;;  %v642_v32 = vmul.f32 %v1018_v12, %v1187_v19  ;;  %v662_v33 = vadd.f32 %v1192_v21, %v623_v27  ;;  %v678_v34 = vadd.f32 %v1192_v21, %v639_v28 }
 0x10a   : > { %v624_v35 = vmul.f32 %v1187_v19, %v528_v23  ;;  %v640_v36 = vmul.f32 %v1187_v19, %v592_v24  ;;  %vm696_vm11 = vcmp.ge.f32.partialorder %v664_v29, 0.0  ;;  %v728_v37 = vmul.f32 0.01, %v664_v29 }
 0x10b   : > { %vm712_vm12 = vcmp.ge.f32.partialorder %v680_v30, 0.0  ;;  %v744_v38 = vmul.f32 0.01, %v680_v30  ;;  %vm694_vm13 = vcmp.ge.f32.partialorder %v662_v33, 0.0  ;;  %v726_v39 = vmul.f32 0.01, %v662_v33 }
 0x10c   : > { %vm710_vm14 = vcmp.ge.f32.partialorder %v678_v34, 0.0  ;;  %v742_v40 = vmul.f32 0.01, %v678_v34  ;;  %v760_v41 = vsel %vm696_vm11, %v664_v29, %v728_v37  ;;  %v665_v43 = vadd.f32 %v1192_v21, %v626_v31 }
 0x10d   : > { %v776_v42 = vsel %vm712_vm12, %v680_v30, %v744_v38  ;;  %v681_v44 = vadd.f32 %v1192_v21, %v642_v32  ;;  %793 = vst.msk [vmem:[%s1210_s11 + $0x70] sm:$0xff] %vm778_vm1, %v760_v41  ;;  %v758_v19 = vsel %vm694_vm13, %v662_v33, %v726_v39  ;;  %v663_v46 = vadd.f32 %v1192_v21, %v624_v35 }
 0x10e   : > { %809 = vst.msk [vmem:[%s1210_s11 + $0xf0] sm:$0xff] %vm778_vm1, %v776_v42  ;;  %v774_v45 = vsel %vm710_vm14, %v678_v34, %v742_v40  ;;  %v679_v47 = vadd.f32 %v1192_v21, %v640_v36  ;;  %791 = vst.msk [vmem:[%s1210_s11 + $0x60] sm:$0xff] %vm778_vm1, %v758_v19  ;;  %vm697_vm15 = vcmp.ge.f32.partialorder %v665_v43, 0.0  ;;  %v729_v48 = vmul.f32 0.01, %v665_v43 }
 0x10f   : > { %807 = vst.msk [vmem:[%s1210_s11 + $0xe0] sm:$0xff] %vm778_vm1, %v774_v45  ;;  %vm713_vm0 = vcmp.ge.f32.partialorder %v681_v44, 0.0  ;;  %v745_v49 = vmul.f32 0.01, %v681_v44  ;;  %vm695_vm2 = vcmp.ge.f32.partialorder %v663_v46, 0.0 }
 0x110   : > { %v727_v50 = vmul.f32 0.01, %v663_v46  ;;  %vm711_vm3 = vcmp.ge.f32.partialorder %v679_v47, 0.0  ;;  %v743_v51 = vmul.f32 0.01, %v679_v47  ;;  %v761_v52 = vsel %vm697_vm15, %v665_v43, %v729_v48 }
 0x111   : > { %v777_v53 = vsel %vm713_vm0, %v681_v44, %v745_v49  ;;  %794 = vst.msk [vmem:[%s1210_s11 + $0x78] sm:$0xff] %vm778_vm1, %v761_v52 }
 0x112   : > { %810 = vst.msk [vmem:[%s1210_s11 + $0xf8] sm:$0xff] %vm778_vm1, %v777_v53  ;;  %v759_v21 = vsel %vm695_vm2, %v663_v46, %v727_v50  ;;  %v775_v54 = vsel %vm711_vm3, %v679_v47, %v743_v51 }
 0x113   : > { %792 = vst.msk [vmem:[%s1210_s11 + $0x68] sm:$0xff] %vm778_vm1, %v759_v21  ;;  %808 = vst.msk [vmem:[%s1210_s11 + $0xe8] sm:$0xff] %vm778_vm1, %v775_v54 }
 0x114 PF: > { %s14_s17 = sadd.s32 1, %s1090_s17   ;;  %s1342_s15 = smov %s1086_s16 }
 0x115   : > { %p11_p5 = scmp.ge.s32.totalorder %s14_s17, 6   ;;  %s1343_s16 = smov %s1345_s18 }
 0x117   :  { %13 = sbr.rel (!%p11_p5) target bundleno = 2 (0x2), region = 69 }

// kernel: _lambda_.13
= control target key start
LH: loop header
LB: loop body
LE: loop exit
PB: predicated region body
PF: predicated region fallthrough
CT: control target
= control target key end

     0   :  { %vm673_vm0 = vcmask 261120   ;;  %s1323_s1 = inlined_call_operand.vmem [shape: bf16[1,256,32], index: 1, kind: input, shape index: {}]   ;;  %s1324_s0 = inlined_call_operand.vmem [shape: bf16[1,256,256], index: 0, kind: input, shape index: {}]   ;;  %s1325_s2 = inlined_call_operand.vmem [shape: f32[1,32], index: 2, kind: input, shape index: {}]   ;;  %s1326_s3 = inlined_call_operand.vmem [shape: f32[1,32], index: 3, kind: input, shape index: {}]   ;;  %s1327_s4 = inlined_call_operand.vmem [shape: f32[1,256,32], index: 4, kind: output, shape index: {}]  }
   0x1   :  { %v888_v0 = vld [vmem:[%s1323_s1 + $0x40] sm:$0xff]   ;;  %v890_v2 = vld [vmem:[%s1323_s1 + $0x48] sm:$0xff]   ;;  %v892_v4 = vld [vmem:[%s1323_s1 + $0x50] sm:$0xff]  }
   0x2   :  { %v889_v1 = vld [vmem:[%s1323_s1] sm:$0xff]   ;;  %760 = vmatprep.subr.bf16.mxu0 %v888_v0  ;;  %872 = vmatprep.subr.bf16.mxu1 %v888_v0  ;;  %v891_v3 = vld [vmem:[%s1323_s1 + $0x8] sm:$0xff]   ;;  %v893_v5 = vld [vmem:[%s1323_s1 + $0x10] sm:$0xff]  }
   0x3   :  { %761 = vmatpush3.bf16.msra.mxu0 %v889_v1  ;;  %880 = vmatpush3.bf16.msra.mxu1 %v889_v1  ;;  %v894_v6 = vld [vmem:[%s1323_s1 + $0x58] sm:$0xff]   ;;  %v896_v8 = vld [vmem:[%s1323_s1 + $0x60] sm:$0xff]   ;;  %v898_v10 = vld [vmem:[%s1323_s1 + $0x68] sm:$0xff]  }
   0x4   :  { %762 = vmatprep.subr.bf16.mxu0 %v890_v2  ;;  %873 = vmatprep.subr.bf16.mxu1 %v890_v2  ;;  %v895_v7 = vld [vmem:[%s1323_s1 + $0x18] sm:$0xff]   ;;  %v897_v9 = vld [vmem:[%s1323_s1 + $0x20] sm:$0xff]   ;;  %v899_v13 = vld [vmem:[%s1323_s1 + $0x28] sm:$0xff]  }
   0x5   :  { %v906_v11 = vld [vmem:[%s1324_s0 + $0x4] ss:$8 sps:$4 sm:$0xff]   ;;  %v900_v14 = vld [vmem:[%s1323_s1 + $0x70] sm:$0xff]   ;;  %v902_v16 = vld [vmem:[%s1323_s1 + $0x78] sm:$0xff]  }
   0x6   :  { %v909_v12 = vld [vmem:[%s1324_s0 + $0x84] ss:$8 sps:$4 sm:$0xff]   ;;  %370 = vmatprep.mubr.bf16.mxu0 %v906_v11  ;;  %v901_v15 = vld [vmem:[%s1323_s1 + $0x30] sm:$0xff]   ;;  %v903_v17 = vld [vmem:[%s1323_s1 + $0x38] sm:$0xff]  }
   0x7   :  { %763 = vmatpush3.bf16.msra.mxu0 %v891_v3  ;;  %881 = vmatpush3.bf16.msra.mxu1 %v891_v3  ;;  %v904_v18 = vld [vmem:[%s1324_s0] ss:$8 sps:$4 sm:$0xff]   ;;  %v910_v20 = vld [vmem:[%s1324_s0 + $0x14] ss:$8 sps:$4 sm:$0xff]   ;;  %v914_v22 = vld [vmem:[%s1324_s0 + $0x10] ss:$8 sps:$4 sm:$0xff]  }
   0x8   :  { %764 = vmatprep.subr.bf16.mxu0 %v892_v4  ;;  %874 = vmatprep.subr.bf16.mxu1 %v892_v4  ;;  %v907_v19 = vld [vmem:[%s1324_s0 + $0x80] ss:$8 sps:$4 sm:$0xff]   ;;  %v912_v21 = vld [vmem:[%s1324_s0 + $0x94] ss:$8 sps:$4 sm:$0xff]   ;;  %v915_v23 = vld [vmem:[%s1324_s0 + $0x90] ss:$8 sps:$4 sm:$0xff]  }
   0x9   :  { %434 = vmatprep.mubr.bf16.mxu1 %v909_v12  ;;  %v916_v24 = vld [vmem:[%s1324_s0 + $0x24] ss:$8 sps:$4 sm:$0xff]   ;;  %v920_v26 = vld [vmem:[%s1324_s0 + $0x20] ss:$8 sps:$4 sm:$0xff]   ;;  %v922_v28 = vld [vmem:[%s1324_s0 + $0x34] ss:$8 sps:$4 sm:$0xff]  }
   0xa   :  { %v918_v25 = vld [vmem:[%s1324_s0 + $0xa4] ss:$8 sps:$4 sm:$0xff]   ;;  %v921_v27 = vld [vmem:[%s1324_s0 + $0xa0] ss:$8 sps:$4 sm:$0xff]   ;;  %v924_v29 = vld [vmem:[%s1324_s0 + $0xb4] ss:$8 sps:$4 sm:$0xff]  }
   0xb   :  { %765 = vmatpush3.bf16.msra.mxu0 %v893_v5  ;;  %882 = vmatpush3.bf16.msra.mxu1 %v893_v5  ;;  %v926_v30 = vld [vmem:[%s1324_s0 + $0x30] ss:$8 sps:$4 sm:$0xff]   ;;  %v928_v32 = vld [vmem:[%s1324_s0 + $0x44] ss:$8 sps:$4 sm:$0xff]   ;;  %v932_v34 = vld [vmem:[%s1324_s0 + $0x40] ss:$8 sps:$4 sm:$0xff]  }
   0xc   :  { %766 = vmatprep.subr.bf16.mxu0 %v894_v6  ;;  %875 = vmatprep.subr.bf16.mxu1 %v894_v6  ;;  %v927_v31 = vld [vmem:[%s1324_s0 + $0xb0] ss:$8 sps:$4 sm:$0xff]   ;;  %v930_v33 = vld [vmem:[%s1324_s0 + $0xc4] ss:$8 sps:$4 sm:$0xff]   ;;  %v933_v35 = vld [vmem:[%s1324_s0 + $0xc0] ss:$8 sps:$4 sm:$0xff]  }
   0xd   :  { %v934_v36 = vld [vmem:[%s1324_s0 + $0x54] ss:$8 sps:$4 sm:$0xff]   ;;  %v938_v38 = vld [vmem:[%s1324_s0 + $0x50] ss:$8 sps:$4 sm:$0xff]   ;;  %v940_v40 = vld [vmem:[%s1324_s0 + $0x64] ss:$8 sps:$4 sm:$0xff]  }
   0xe   :  { %v936_v37 = vld [vmem:[%s1324_s0 + $0xd4] ss:$8 sps:$4 sm:$0xff]   ;;  %v939_v39 = vld [vmem:[%s1324_s0 + $0xd0] ss:$8 sps:$4 sm:$0xff]   ;;  %v942_v41 = vld [vmem:[%s1324_s0 + $0xe4] ss:$8 sps:$4 sm:$0xff]  }
   0xf   :  { %767 = vmatpush3.bf16.msra.mxu0 %v895_v7  ;;  %883 = vmatpush3.bf16.msra.mxu1 %v895_v7  ;;  %v944_v42 = vld [vmem:[%s1324_s0 + $0x60] ss:$8 sps:$4 sm:$0xff]   ;;  %v946_v44 = vld [vmem:[%s1324_s0 + $0x74] ss:$8 sps:$4 sm:$0xff]   ;;  %v950_v46 = vld [vmem:[%s1324_s0 + $0x70] ss:$8 sps:$4 sm:$0xff]  }
  0x10   :  { %768 = vmatprep.subr.bf16.mxu0 %v896_v8  ;;  %876 = vmatprep.subr.bf16.mxu1 %v896_v8  ;;  %v945_v43 = vld [vmem:[%s1324_s0 + $0xe0] ss:$8 sps:$4 sm:$0xff]   ;;  %v948_v45 = vld [vmem:[%s1324_s0 + $0xf4] ss:$8 sps:$4 sm:$0xff]   ;;  %v951_v47 = vld [vmem:[%s1324_s0 + $0xf0] ss:$8 sps:$4 sm:$0xff]  }
  0x11   :  { %v1124_v51 = vld [vmem:[%s1325_s2] ss:$0 sm:$0xff] }
  0x12   :  { %v1129_v57 = vld [vmem:[%s1326_s3] ss:$0 sm:$0xff] }
  0x13   :  { %769 = vmatpush3.bf16.msra.mxu0 %v897_v9  ;;  %884 = vmatpush3.bf16.msra.mxu1 %v897_v9 }
  0x14   :  { %770 = vmatprep.subr.bf16.mxu0 %v898_v10  ;;  %877 = vmatprep.subr.bf16.mxu1 %v898_v10 }
  0x17   :  { %771 = vmatpush3.bf16.msra.mxu0 %v899_v13  ;;  %885 = vmatpush3.bf16.msra.mxu1 %v899_v13 }
  0x18   :  { %772 = vmatprep.subr.bf16.mxu0 %v900_v14  ;;  %878 = vmatprep.subr.bf16.mxu1 %v900_v14 }
  0x1b   :  { %773 = vmatpush3.bf16.msra.mxu0 %v901_v15  ;;  %886 = vmatpush3.bf16.msra.mxu1 %v901_v15 }
  0x1c   :  { %774 = vmatprep.subr.bf16.mxu0 %v902_v16  ;;  %879 = vmatprep.subr.bf16.mxu1 %v902_v16 }
  0x1f   :  { %775 = vmatpush3.bf16.msra.mxu0 %v903_v17  ;;  %887 = vmatpush3.bf16.msra.mxu1 %v903_v17 }
  0x22   :  { %371 = vmatmul.mubr.bf16.vlgmr.msra.gmra.mrb[0].mxu0 %v904_v18  ;;  %435 = vmatmul.mubr.bf16.vlgmr.msra.gmra.mrb[0].mxu1 %v907_v19 }
  0x23   :  { %378 = vmatprep.mubr.bf16.mxu0 %v910_v20  ;;  %442 = vmatprep.mubr.bf16.mxu1 %v912_v21 }
  0x2a   :  { %379 = vmatmul.mubr.bf16.gmra.mrb[4].mxu0 %v914_v22  ;;  %443 = vmatmul.mubr.bf16.gmra.mrb[4].mxu1 %v915_v23 }
  0x2b   :  { %386 = vmatprep.mubr.bf16.mxu0 %v916_v24  ;;  %450 = vmatprep.mubr.bf16.mxu1 %v918_v25 }
  0x32   :  { %387 = vmatmul.mubr.bf16.gmra.mrb[8].mxu0 %v920_v26  ;;  %451 = vmatmul.mubr.bf16.gmra.mrb[8].mxu1 %v921_v27 }
  0x33   :  { %394 = vmatprep.mubr.bf16.mxu0 %v922_v28  ;;  %458 = vmatprep.mubr.bf16.mxu1 %v924_v29 }
  0x3a   :  { %395 = vmatmul.mubr.bf16.gmra.mrb[12].mxu0 %v926_v30  ;;  %459 = vmatmul.mubr.bf16.gmra.mrb[12].mxu1 %v927_v31 }
  0x3b   :  { %402 = vmatprep.mubr.bf16.mxu0 %v928_v32  ;;  %466 = vmatprep.mubr.bf16.mxu1 %v930_v33 }
  0x42   :  { %403 = vmatmul.mubr.bf16.gmra.mrb[16].mxu0 %v932_v34  ;;  %467 = vmatmul.mubr.bf16.gmra.mrb[16].mxu1 %v933_v35 }
  0x43   :  { %410 = vmatprep.mubr.bf16.mxu0 %v934_v36  ;;  %474 = vmatprep.mubr.bf16.mxu1 %v936_v37 }
  0x4a   :  { %411 = vmatmul.mubr.bf16.gmra.mrb[20].mxu0 %v938_v38  ;;  %475 = vmatmul.mubr.bf16.gmra.mrb[20].mxu1 %v939_v39 }
  0x4b   :  { %418 = vmatprep.mubr.bf16.mxu0 %v940_v40  ;;  %482 = vmatprep.mubr.bf16.mxu1 %v942_v41 }
  0x52   :  { %419 = vmatmul.mubr.bf16.gmra.mrb[24].mxu0 %v944_v42  ;;  %483 = vmatmul.mubr.bf16.gmra.mrb[24].mxu1 %v945_v43 }
  0x53   :  { %426 = vmatprep.mubr.bf16.mxu0 %v946_v44  ;;  %490 = vmatprep.mubr.bf16.mxu1 %v948_v45 }
  0x5a   :  { %427 = vmatmul.mubr.bf16.gmra.mrb[28].mxu0 %v950_v46  ;;  %491 = vmatmul.mubr.bf16.gmra.mrb[28].mxu1 %v951_v47 }
  0xf5   :  { %v776_v48 = vpop.f32.mrb[0].mxu0  ;;  %v824_v49 = vpop.f32.mrb[0].mxu1 }
  0xf6   :  { %v777_v50 = vpop.f32.mrb[1].mxu0  ;;  %v825_v52 = vpop.f32.mrb[1].mxu1 }
  0xf7   :  { %v778_v53 = vadd.f32 %v777_v50, %v776_v48  ;;  %v826_v54 = vadd.f32 %v825_v52, %v824_v49  ;;  %v779_v55 = vpop.f32.mrb[2].mxu0  ;;  %v827_v56 = vpop.f32.mrb[2].mxu1 }
  0xf8   :  { %v780_v58 = vpop.f32.mrb[3].mxu0  ;;  %v828_v59 = vpop.f32.mrb[3].mxu1 }
  0xf9   :  { %v506_v60 = vmul.f32 %v778_v53, %v1124_v51  ;;  %v522_v61 = vmul.f32 %v826_v54, %v1124_v51  ;;  %v781_v62 = vadd.f32 %v780_v58, %v779_v55  ;;  %v829_v63 = vadd.f32 %v828_v59, %v827_v56 }
  0xfb   :  { %v545_v0 = vadd.f32 %v1129_v57, %v506_v60  ;;  %v561_v1 = vadd.f32 %v1129_v57, %v522_v61  ;;  %v507_v2 = vmul.f32 %v781_v62, %v1124_v51  ;;  %v523_v3 = vmul.f32 %v829_v63, %v1124_v51 }
  0xfd   :  { %vm577_vm1 = vcmp.ge.f32.partialorder %v545_v0, 0.0  ;;  %v609_v4 = vmul.f32 0.01, %v545_v0  ;;  %vm593_vm2 = vcmp.ge.f32.partialorder %v561_v1, 0.0  ;;  %v625_v5 = vmul.f32 0.01, %v561_v1 }
  0xfe   :  { %v546_v6 = vadd.f32 %v1129_v57, %v507_v2  ;;  %v562_v7 = vadd.f32 %v1129_v57, %v523_v3  ;;  %v782_v8 = vpop.f32.mrb[4].mxu0  ;;  %v830_v9 = vpop.f32.mrb[4].mxu1 }
  0xff   :  { %v641_v10 = vsel %vm577_vm1, %v545_v0, %v609_v4  ;;  %v657_v11 = vsel %vm593_vm2, %v561_v1, %v625_v5  ;;  %v783_v12 = vpop.f32.mrb[5].mxu0  ;;  %v831_v13 = vpop.f32.mrb[5].mxu1 }
 0x100   :  { %674 = vst.msk [vmem:[%s1327_s4] sm:$0xff] %vm673_vm0, %v641_v10  ;;  %690 = vst.msk [vmem:[%s1327_s4 + $0x80] sm:$0xff] %vm673_vm0, %v657_v11  ;;  %vm578_vm3 = vcmp.ge.f32.partialorder %v546_v6, 0.0  ;;  %v610_v14 = vmul.f32 0.01, %v546_v6  ;;  %vm594_vm4 = vcmp.ge.f32.partialorder %v562_v7, 0.0  ;;  %v784_v16 = vadd.f32 %v783_v12, %v782_v8 }
 0x101   :  { %v626_v15 = vmul.f32 0.01, %v562_v7  ;;  %v832_v17 = vadd.f32 %v831_v13, %v830_v9  ;;  %v785_v18 = vpop.f32.mrb[6].mxu0  ;;  %v833_v19 = vpop.f32.mrb[6].mxu1 }
 0x102   :  { %v642_v20 = vsel %vm578_vm3, %v546_v6, %v610_v14  ;;  %v786_v22 = vpop.f32.mrb[7].mxu0  ;;  %v834_v23 = vpop.f32.mrb[7].mxu1  ;;  %v508_v24 = vmul.f32 %v784_v16, %v1124_v51 }
 0x103   :  { %v658_v21 = vsel %vm594_vm4, %v562_v7, %v626_v15  ;;  %675 = vst.msk [vmem:[%s1327_s4 + $0x8] sm:$0xff] %vm673_vm0, %v642_v20  ;;  %v524_v25 = vmul.f32 %v832_v17, %v1124_v51  ;;  %v787_v26 = vadd.f32 %v786_v22, %v785_v18  ;;  %v835_v27 = vadd.f32 %v834_v23, %v833_v19 }
 0x104   :  { %691 = vst.msk [vmem:[%s1327_s4 + $0x88] sm:$0xff] %vm673_vm0, %v658_v21  ;;  %v547_v28 = vadd.f32 %v1129_v57, %v508_v24 }
 0x105   :  { %v563_v29 = vadd.f32 %v1129_v57, %v524_v25  ;;  %v509_v30 = vmul.f32 %v787_v26, %v1124_v51  ;;  %v525_v31 = vmul.f32 %v835_v27, %v1124_v51  ;;  %v788_v32 = vpop.f32.mrb[8].mxu0  ;;  %v836_v33 = vpop.f32.mrb[8].mxu1 }
 0x106   :  { %v789_v34 = vpop.f32.mrb[9].mxu0  ;;  %v837_v35 = vpop.f32.mrb[9].mxu1  ;;  %vm579_vm5 = vcmp.ge.f32.partialorder %v547_v28, 0.0  ;;  %v611_v36 = vmul.f32 0.01, %v547_v28 }
 0x107   :  { %vm595_vm6 = vcmp.ge.f32.partialorder %v563_v29, 0.0  ;;  %v627_v37 = vmul.f32 0.01, %v563_v29  ;;  %v548_v38 = vadd.f32 %v1129_v57, %v509_v30  ;;  %v564_v39 = vadd.f32 %v1129_v57, %v525_v31  ;;  %v791_v42 = vpop.f32.mrb[10].mxu0  ;;  %v839_v43 = vpop.f32.mrb[10].mxu1 }
 0x108   :  { %v790_v40 = vadd.f32 %v789_v34, %v788_v32  ;;  %v838_v41 = vadd.f32 %v837_v35, %v836_v33  ;;  %v643_v44 = vsel %vm579_vm5, %v547_v28, %v611_v36  ;;  %v792_v46 = vpop.f32.mrb[11].mxu0  ;;  %v840_v47 = vpop.f32.mrb[11].mxu1 }
 0x109   :  { %v659_v45 = vsel %vm595_vm6, %v563_v29, %v627_v37  ;;  %676 = vst.msk [vmem:[%s1327_s4 + $0x10] sm:$0xff] %vm673_vm0, %v643_v44  ;;  %vm580_vm7 = vcmp.ge.f32.partialorder %v548_v38, 0.0  ;;  %v612_v48 = vmul.f32 0.01, %v548_v38  ;;  %vm596_vm8 = vcmp.ge.f32.partialorder %v564_v39, 0.0 }
 0x10a   :  { %692 = vst.msk [vmem:[%s1327_s4 + $0x90] sm:$0xff] %vm673_vm0, %v659_v45  ;;  %v628_v49 = vmul.f32 0.01, %v564_v39  ;;  %v510_v50 = vmul.f32 %v790_v40, %v1124_v51  ;;  %v526_v52 = vmul.f32 %v838_v41, %v1124_v51  ;;  %v793_v53 = vadd.f32 %v792_v46, %v791_v42 }
 0x10b   :  { %v841_v54 = vadd.f32 %v840_v47, %v839_v43  ;;  %v644_v55 = vsel %vm580_vm7, %v548_v38, %v612_v48 }
 0x10c   :  { %v660_v56 = vsel %vm596_vm8, %v564_v39, %v628_v49  ;;  %677 = vst.msk [vmem:[%s1327_s4 + $0x18] sm:$0xff] %vm673_vm0, %v644_v55  ;;  %v549_v58 = vadd.f32 %v1129_v57, %v510_v50  ;;  %v565_v59 = vadd.f32 %v1129_v57, %v526_v52  ;;  %v511_v60 = vmul.f32 %v793_v53, %v1124_v51 }
 0x10d   :  { %693 = vst.msk [vmem:[%s1327_s4 + $0x98] sm:$0xff] %vm673_vm0, %v660_v56  ;;  %v527_v61 = vmul.f32 %v841_v54, %v1124_v51  ;;  %v794_v62 = vpop.f32.mrb[12].mxu0  ;;  %v842_v63 = vpop.f32.mrb[12].mxu1 }
 0x10e   :  { %v795_v0 = vpop.f32.mrb[13].mxu0  ;;  %v843_v1 = vpop.f32.mrb[13].mxu1  ;;  %vm581_vm9 = vcmp.ge.f32.partialorder %v549_v58, 0.0  ;;  %v613_v2 = vmul.f32 0.01, %v549_v58  ;;  %vm597_vm10 = vcmp.ge.f32.partialorder %v565_v59, 0.0  ;;  %v550_v4 = vadd.f32 %v1129_v57, %v511_v60 }
 0x10f   :  { %v629_v3 = vmul.f32 0.01, %v565_v59  ;;  %v566_v5 = vadd.f32 %v1129_v57, %v527_v61  ;;  %v796_v6 = vadd.f32 %v795_v0, %v794_v62  ;;  %v844_v7 = vadd.f32 %v843_v1, %v842_v63  ;;  %v797_v8 = vpop.f32.mrb[14].mxu0  ;;  %v845_v9 = vpop.f32.mrb[14].mxu1 }
 0x110   :  { %v645_v10 = vsel %vm581_vm9, %v549_v58, %v613_v2  ;;  %v798_v12 = vpop.f32.mrb[15].mxu0  ;;  %v846_v13 = vpop.f32.mrb[15].mxu1  ;;  %vm582_vm11 = vcmp.ge.f32.partialorder %v550_v4, 0.0  ;;  %v614_v14 = vmul.f32 0.01, %v550_v4 }
 0x111   :  { %v661_v11 = vsel %vm597_vm10, %v565_v59, %v629_v3  ;;  %678 = vst.msk [vmem:[%s1327_s4 + $0x20] sm:$0xff] %vm673_vm0, %v645_v10  ;;  %vm598_vm12 = vcmp.ge.f32.partialorder %v566_v5, 0.0  ;;  %v630_v15 = vmul.f32 0.01, %v566_v5  ;;  %v512_v16 = vmul.f32 %v796_v6, %v1124_v51 }
 0x112   :  { %694 = vst.msk [vmem:[%s1327_s4 + $0xa0] sm:$0xff] %vm673_vm0, %v661_v11  ;;  %v528_v17 = vmul.f32 %v844_v7, %v1124_v51  ;;  %v799_v18 = vadd.f32 %v798_v12, %v797_v8  ;;  %v847_v19 = vadd.f32 %v846_v13, %v845_v9  ;;  %v646_v20 = vsel %vm582_vm11, %v550_v4, %v614_v14 }
 0x113   :  { %v662_v21 = vsel %vm598_vm12, %v566_v5, %v630_v15  ;;  %679 = vst.msk [vmem:[%s1327_s4 + $0x28] sm:$0xff] %vm673_vm0, %v646_v20  ;;  %v551_v22 = vadd.f32 %v1129_v57, %v512_v16 }
 0x114   :  { %695 = vst.msk [vmem:[%s1327_s4 + $0xa8] sm:$0xff] %vm673_vm0, %v662_v21  ;;  %v567_v23 = vadd.f32 %v1129_v57, %v528_v17  ;;  %v513_v24 = vmul.f32 %v799_v18, %v1124_v51  ;;  %v529_v25 = vmul.f32 %v847_v19, %v1124_v51 }
 0x115   :  { %v800_v26 = vpop.f32.mrb[16].mxu0  ;;  %v848_v27 = vpop.f32.mrb[16].mxu1  ;;  %vm583_vm13 = vcmp.ge.f32.partialorder %v551_v22, 0.0  ;;  %v615_v30 = vmul.f32 0.01, %v551_v22 }
 0x116   :  { %v801_v28 = vpop.f32.mrb[17].mxu0  ;;  %v849_v29 = vpop.f32.mrb[17].mxu1  ;;  %vm599_vm14 = vcmp.ge.f32.partialorder %v567_v23, 0.0  ;;  %v631_v31 = vmul.f32 0.01, %v567_v23  ;;  %v552_v32 = vadd.f32 %v1129_v57, %v513_v24  ;;  %v568_v33 = vadd.f32 %v1129_v57, %v529_v25 }
 0x117   :  { %v802_v34 = vadd.f32 %v801_v28, %v800_v26  ;;  %v850_v35 = vadd.f32 %v849_v29, %v848_v27  ;;  %v803_v36 = vpop.f32.mrb[18].mxu0  ;;  %v851_v37 = vpop.f32.mrb[18].mxu1  ;;  %v647_v38 = vsel %vm583_vm13, %v551_v22, %v615_v30 }
 0x118   :  { %v663_v39 = vsel %vm599_vm14, %v567_v23, %v631_v31  ;;  %v804_v40 = vpop.f32.mrb[19].mxu0  ;;  %v852_v41 = vpop.f32.mrb[19].mxu1  ;;  %680 = vst.msk [vmem:[%s1327_s4 + $0x30] sm:$0xff] %vm673_vm0, %v647_v38  ;;  %vm584_vm15 = vcmp.ge.f32.partialorder %v552_v32, 0.0  ;;  %v616_v42 = vmul.f32 0.01, %v552_v32 }
 0x119   :  { %696 = vst.msk [vmem:[%s1327_s4 + $0xb0] sm:$0xff] %vm673_vm0, %v663_v39  ;;  %vm600_vm1 = vcmp.ge.f32.partialorder %v568_v33, 0.0  ;;  %v632_v43 = vmul.f32 0.01, %v568_v33  ;;  %v514_v44 = vmul.f32 %v802_v34, %v1124_v51  ;;  %v530_v45 = vmul.f32 %v850_v35, %v1124_v51 }
 0x11a   :  { %v805_v46 = vadd.f32 %v804_v40, %v803_v36  ;;  %v853_v47 = vadd.f32 %v852_v41, %v851_v37  ;;  %v648_v48 = vsel %vm584_vm15, %v552_v32, %v616_v42 }
 0x11b   :  { %v664_v49 = vsel %vm600_vm1, %v568_v33, %v632_v43  ;;  %681 = vst.msk [vmem:[%s1327_s4 + $0x38] sm:$0xff] %vm673_vm0, %v648_v48  ;;  %v553_v50 = vadd.f32 %v1129_v57, %v514_v44  ;;  %v569_v52 = vadd.f32 %v1129_v57, %v530_v45 }
 0x11c   :  { %697 = vst.msk [vmem:[%s1327_s4 + $0xb8] sm:$0xff] %vm673_vm0, %v664_v49  ;;  %v515_v53 = vmul.f32 %v805_v46, %v1124_v51  ;;  %v531_v54 = vmul.f32 %v853_v47, %v1124_v51 }
 0x11d   :  { %v806_v55 = vpop.f32.mrb[20].mxu0  ;;  %v854_v56 = vpop.f32.mrb[20].mxu1  ;;  %vm585_vm2 = vcmp.ge.f32.partialorder %v553_v50, 0.0  ;;  %v617_v60 = vmul.f32 0.01, %v553_v50  ;;  %vm601_vm3 = vcmp.ge.f32.partialorder %v569_v52, 0.0 }
 0x11e   :  { %v807_v58 = vpop.f32.mrb[21].mxu0  ;;  %v855_v59 = vpop.f32.mrb[21].mxu1  ;;  %v633_v61 = vmul.f32 0.01, %v569_v52  ;;  %v554_v62 = vadd.f32 %v1129_v57, %v515_v53  ;;  %v570_v63 = vadd.f32 %v1129_v57, %v531_v54 }
 0x11f   :  { %v808_v0 = vadd.f32 %v807_v58, %v806_v55  ;;  %v856_v1 = vadd.f32 %v855_v59, %v854_v56  ;;  %v809_v2 = vpop.f32.mrb[22].mxu0  ;;  %v857_v3 = vpop.f32.mrb[22].mxu1  ;;  %v649_v4 = vsel %vm585_vm2, %v553_v50, %v617_v60 }
 0x120   :  { %v665_v5 = vsel %vm601_vm3, %v569_v52, %v633_v61  ;;  %v810_v6 = vpop.f32.mrb[23].mxu0  ;;  %v858_v7 = vpop.f32.mrb[23].mxu1  ;;  %682 = vst.msk [vmem:[%s1327_s4 + $0x40] sm:$0xff] %vm673_vm0, %v649_v4  ;;  %vm586_vm4 = vcmp.ge.f32.partialorder %v554_v62, 0.0  ;;  %v618_v8 = vmul.f32 0.01, %v554_v62 }
 0x121   :  { %698 = vst.msk [vmem:[%s1327_s4 + $0xc0] sm:$0xff] %vm673_vm0, %v665_v5  ;;  %vm602_vm5 = vcmp.ge.f32.partialorder %v570_v63, 0.0  ;;  %v634_v9 = vmul.f32 0.01, %v570_v63  ;;  %v516_v10 = vmul.f32 %v808_v0, %v1124_v51  ;;  %v532_v11 = vmul.f32 %v856_v1, %v1124_v51 }
 0x122   :  { %v811_v12 = vadd.f32 %v810_v6, %v809_v2  ;;  %v859_v13 = vadd.f32 %v858_v7, %v857_v3  ;;  %v650_v14 = vsel %vm586_vm4, %v554_v62, %v618_v8 }
 0x123   :  { %v666_v15 = vsel %vm602_vm5, %v570_v63, %v634_v9  ;;  %683 = vst.msk [vmem:[%s1327_s4 + $0x48] sm:$0xff] %vm673_vm0, %v650_v14  ;;  %v555_v16 = vadd.f32 %v1129_v57, %v516_v10  ;;  %v571_v17 = vadd.f32 %v1129_v57, %v532_v11 }
 0x124   :  { %699 = vst.msk [vmem:[%s1327_s4 + $0xc8] sm:$0xff] %vm673_vm0, %v666_v15  ;;  %v517_v18 = vmul.f32 %v811_v12, %v1124_v51  ;;  %v533_v19 = vmul.f32 %v859_v13, %v1124_v51 }
 0x125   :  { %v812_v20 = vpop.f32.mrb[24].mxu0  ;;  %v860_v21 = vpop.f32.mrb[24].mxu1  ;;  %vm587_vm6 = vcmp.ge.f32.partialorder %v555_v16, 0.0  ;;  %v619_v24 = vmul.f32 0.01, %v555_v16  ;;  %vm603_vm7 = vcmp.ge.f32.partialorder %v571_v17, 0.0 }
 0x126   :  { %v813_v22 = vpop.f32.mrb[25].mxu0  ;;  %v861_v23 = vpop.f32.mrb[25].mxu1  ;;  %v635_v25 = vmul.f32 0.01, %v571_v17  ;;  %v556_v26 = vadd.f32 %v1129_v57, %v517_v18  ;;  %v572_v27 = vadd.f32 %v1129_v57, %v533_v19 }
 0x127   :  { %v814_v28 = vadd.f32 %v813_v22, %v812_v20  ;;  %v862_v29 = vadd.f32 %v861_v23, %v860_v21  ;;  %v815_v30 = vpop.f32.mrb[26].mxu0  ;;  %v863_v31 = vpop.f32.mrb[26].mxu1  ;;  %v651_v32 = vsel %vm587_vm6, %v555_v16, %v619_v24 }
 0x128   :  { %v667_v33 = vsel %vm603_vm7, %v571_v17, %v635_v25  ;;  %v816_v34 = vpop.f32.mrb[27].mxu0  ;;  %v864_v35 = vpop.f32.mrb[27].mxu1  ;;  %684 = vst.msk [vmem:[%s1327_s4 + $0x50] sm:$0xff] %vm673_vm0, %v651_v32  ;;  %vm588_vm8 = vcmp.ge.f32.partialorder %v556_v26, 0.0  ;;  %v620_v36 = vmul.f32 0.01, %v556_v26 }
 0x129   :  { %700 = vst.msk [vmem:[%s1327_s4 + $0xd0] sm:$0xff] %vm673_vm0, %v667_v33  ;;  %vm604_vm9 = vcmp.ge.f32.partialorder %v572_v27, 0.0  ;;  %v636_v37 = vmul.f32 0.01, %v572_v27  ;;  %v518_v38 = vmul.f32 %v814_v28, %v1124_v51  ;;  %v534_v39 = vmul.f32 %v862_v29, %v1124_v51 }
 0x12a   :  { %v817_v40 = vadd.f32 %v816_v34, %v815_v30  ;;  %v865_v41 = vadd.f32 %v864_v35, %v863_v31  ;;  %v652_v42 = vsel %vm588_vm8, %v556_v26, %v620_v36 }
 0x12b   :  { %v668_v43 = vsel %vm604_vm9, %v572_v27, %v636_v37  ;;  %685 = vst.msk [vmem:[%s1327_s4 + $0x58] sm:$0xff] %vm673_vm0, %v652_v42  ;;  %v557_v44 = vadd.f32 %v1129_v57, %v518_v38  ;;  %v573_v45 = vadd.f32 %v1129_v57, %v534_v39 }
 0x12c   :  { %701 = vst.msk [vmem:[%s1327_s4 + $0xd8] sm:$0xff] %vm673_vm0, %v668_v43  ;;  %v519_v46 = vmul.f32 %v817_v40, %v1124_v51  ;;  %v535_v47 = vmul.f32 %v865_v41, %v1124_v51 }
 0x12d   :  { %v818_v48 = vpop.f32.mrb[28].mxu0  ;;  %v866_v49 = vpop.f32.mrb[28].mxu1  ;;  %vm589_vm10 = vcmp.ge.f32.partialorder %v557_v44, 0.0  ;;  %v621_v53 = vmul.f32 0.01, %v557_v44  ;;  %vm605_vm11 = vcmp.ge.f32.partialorder %v573_v45, 0.0 }
 0x12e   :  { %v819_v50 = vpop.f32.mrb[29].mxu0  ;;  %v867_v52 = vpop.f32.mrb[29].mxu1  ;;  %v637_v54 = vmul.f32 0.01, %v573_v45  ;;  %v558_v55 = vadd.f32 %v1129_v57, %v519_v46  ;;  %v574_v56 = vadd.f32 %v1129_v57, %v535_v47 }
 0x12f   :  { %v820_v58 = vadd.f32 %v819_v50, %v818_v48  ;;  %v868_v59 = vadd.f32 %v867_v52, %v866_v49  ;;  %v821_v60 = vpop.f32.mrb[30].mxu0  ;;  %v869_v61 = vpop.f32.mrb[30].mxu1  ;;  %v653_v62 = vsel %vm589_vm10, %v557_v44, %v621_v53 }
 0x130   :  { %v669_v63 = vsel %vm605_vm11, %v573_v45, %v637_v54  ;;  %v822_v0 = vpop.f32.mrb[31].mxu0  ;;  %v870_v1 = vpop.f32.mrb[31].mxu1  ;;  %686 = vst.msk [vmem:[%s1327_s4 + $0x60] sm:$0xff] %vm673_vm0, %v653_v62  ;;  %vm590_vm12 = vcmp.ge.f32.partialorder %v558_v55, 0.0  ;;  %v622_v2 = vmul.f32 0.01, %v558_v55 }
 0x131   :  { %702 = vst.msk [vmem:[%s1327_s4 + $0xe0] sm:$0xff] %vm673_vm0, %v669_v63  ;;  %vm606_vm13 = vcmp.ge.f32.partialorder %v574_v56, 0.0  ;;  %v638_v3 = vmul.f32 0.01, %v574_v56  ;;  %v520_v4 = vmul.f32 %v820_v58, %v1124_v51  ;;  %v536_v5 = vmul.f32 %v868_v59, %v1124_v51 }
 0x132   :  { %v823_v6 = vadd.f32 %v822_v0, %v821_v60  ;;  %v871_v7 = vadd.f32 %v870_v1, %v869_v61  ;;  %v654_v8 = vsel %vm590_vm12, %v558_v55, %v622_v2 }
 0x133   :  { %v670_v9 = vsel %vm606_vm13, %v574_v56, %v638_v3  ;;  %687 = vst.msk [vmem:[%s1327_s4 + $0x68] sm:$0xff] %vm673_vm0, %v654_v8  ;;  %v559_v10 = vadd.f32 %v1129_v57, %v520_v4  ;;  %v575_v11 = vadd.f32 %v1129_v57, %v536_v5 }
 0x134   :  { %703 = vst.msk [vmem:[%s1327_s4 + $0xe8] sm:$0xff] %vm673_vm0, %v670_v9  ;;  %v521_v12 = vmul.f32 %v823_v6, %v1124_v51  ;;  %v537_v13 = vmul.f32 %v871_v7, %v1124_v51 }
 0x135   :  { %vm591_vm14 = vcmp.ge.f32.partialorder %v559_v10, 0.0  ;;  %v623_v14 = vmul.f32 0.01, %v559_v10  ;;  %vm607_vm15 = vcmp.ge.f32.partialorder %v575_v11, 0.0  ;;  %v639_v15 = vmul.f32 0.01, %v575_v11 }
 0x136   :  { %v560_v16 = vadd.f32 %v1129_v57, %v521_v12  ;;  %v576_v17 = vadd.f32 %v1129_v57, %v537_v13 }
 0x137   :  { %v655_v18 = vsel %vm591_vm14, %v559_v10, %v623_v14  ;;  %v671_v19 = vsel %vm607_vm15, %v575_v11, %v639_v15 }
 0x138   :  { %688 = vst.msk [vmem:[%s1327_s4 + $0x70] sm:$0xff] %vm673_vm0, %v655_v18  ;;  %704 = vst.msk [vmem:[%s1327_s4 + $0xf0] sm:$0xff] %vm673_vm0, %v671_v19  ;;  %vm592_vm1 = vcmp.ge.f32.partialorder %v560_v16, 0.0  ;;  %v624_v51 = vmul.f32 0.01, %v560_v16  ;;  %vm608_vm2 = vcmp.ge.f32.partialorder %v576_v17, 0.0 }
 0x139   :  { %v640_v20 = vmul.f32 0.01, %v576_v17 }
 0x13a   :  { %v656_v21 = vsel %vm592_vm1, %v560_v16, %v624_v51 }
 0x13b   :  { %v672_v22 = vsel %vm608_vm2, %v576_v17, %v640_v20  ;;  %689 = vst.msk [vmem:[%s1327_s4 + $0x78] sm:$0xff] %vm673_vm0, %v656_v21 }
 0x13c   :  { %705 = vst.msk [vmem:[%s1327_s4 + $0xf8] sm:$0xff] %vm673_vm0, %v672_v22 }

// kernel: _lambda_.14
= control target key start
LH: loop header
LB: loop body
LE: loop exit
PB: predicated region body
PF: predicated region fallthrough
CT: control target
= control target key end

     0   :  { %vm554_vm0 = vcmask 523264   ;;  %s980_s1 = inlined_call_operand.vmem [shape: bf16[1,512,64], index: 1, kind: input, shape index: {}]   ;;  %s981_s0 = inlined_call_operand.vmem [shape: bf16[1,64,512], index: 0, kind: input, shape index: {}]   ;;  %s982_s2 = inlined_call_operand.vmem [shape: f32[1,64], index: 2, kind: input, shape index: {}]   ;;  %s983_s3 = inlined_call_operand.vmem [shape: f32[1,64], index: 3, kind: input, shape index: {}]   ;;  %s984_s4 = inlined_call_operand.vmem [shape: f32[1,64,64], index: 4, kind: output, shape index: {}]  }
   0x1   :  { %v697_v0 = vld [vmem:[%s980_s1 + $0x40] sm:$0xff]   ;;  %v701_v4 = vld [vmem:[%s980_s1 + $0x48] sm:$0xff]   ;;  %v705_v8 = vld [vmem:[%s980_s1 + $0x50] sm:$0xff]  }
   0x2   :  { %v698_v1 = vld [vmem:[%s980_s1 + $0xc0] sm:$0xff]   ;;  %617 = vmatprep.subr.bf16.mxu0 %v697_v0  ;;  %v702_v5 = vld [vmem:[%s980_s1 + $0xc8] sm:$0xff]   ;;  %v706_v9 = vld [vmem:[%s980_s1 + $0xd0] sm:$0xff]  }
   0x3   :  { %v699_v2 = vld [vmem:[%s980_s1] sm:$0xff]   ;;  %657 = vmatprep.subr.bf16.mxu1 %v698_v1  ;;  %v703_v6 = vld [vmem:[%s980_s1 + $0x8] sm:$0xff]   ;;  %v707_v10 = vld [vmem:[%s980_s1 + $0x10] sm:$0xff]  }
   0x4   :  { %v700_v3 = vld [vmem:[%s980_s1 + $0x80] sm:$0xff]   ;;  %618 = vmatpush3.bf16.msra.mxu0 %v699_v2  ;;  %v704_v7 = vld [vmem:[%s980_s1 + $0x88] sm:$0xff]   ;;  %v708_v11 = vld [vmem:[%s980_s1 + $0x90] sm:$0xff]  }
   0x5   :  { %658 = vmatpush3.bf16.msra.mxu1 %v700_v3  ;;  %619 = vmatprep.subr.bf16.mxu0 %v701_v4  ;;  %v709_v12 = vld [vmem:[%s980_s1 + $0x58] sm:$0xff]   ;;  %v713_v16 = vld [vmem:[%s980_s1 + $0x60] sm:$0xff]   ;;  %v717_v20 = vld [vmem:[%s980_s1 + $0x68] sm:$0xff]  }
   0x6   :  { %659 = vmatprep.subr.bf16.mxu1 %v702_v5  ;;  %v710_v13 = vld [vmem:[%s980_s1 + $0xd8] sm:$0xff]   ;;  %v714_v17 = vld [vmem:[%s980_s1 + $0xe0] sm:$0xff]   ;;  %v718_v21 = vld [vmem:[%s980_s1 + $0xe8] sm:$0xff]  }
   0x7   :  { %v711_v14 = vld [vmem:[%s980_s1 + $0x18] sm:$0xff]   ;;  %v715_v18 = vld [vmem:[%s980_s1 + $0x20] sm:$0xff]   ;;  %v719_v22 = vld [vmem:[%s980_s1 + $0x28] sm:$0xff]  }
   0x8   :  { %620 = vmatpush3.bf16.msra.mxu0 %v703_v6  ;;  %v712_v15 = vld [vmem:[%s980_s1 + $0x98] sm:$0xff]   ;;  %v716_v19 = vld [vmem:[%s980_s1 + $0xa0] sm:$0xff]   ;;  %v720_v23 = vld [vmem:[%s980_s1 + $0xa8] sm:$0xff]  }
   0x9   :  { %660 = vmatpush3.bf16.msra.mxu1 %v704_v7  ;;  %621 = vmatprep.subr.bf16.mxu0 %v705_v8  ;;  %v721_v24 = vld [vmem:[%s980_s1 + $0x70] sm:$0xff]   ;;  %v725_v28 = vld [vmem:[%s980_s1 + $0x78] sm:$0xff]   ;;  %v925_v57 = vld [vmem:[%s982_s2] ss:$0 sm:$0xff] }
   0xa   :  { %661 = vmatprep.subr.bf16.mxu1 %v706_v9  ;;  %v722_v25 = vld [vmem:[%s980_s1 + $0xf0] sm:$0xff]   ;;  %v726_v29 = vld [vmem:[%s980_s1 + $0xf8] sm:$0xff]   ;;  %v930_v62 = vld [vmem:[%s983_s3] ss:$0 sm:$0xff] }
   0xb   :  { %v723_v26 = vld [vmem:[%s980_s1 + $0x30] sm:$0xff]   ;;  %v727_v30 = vld [vmem:[%s980_s1 + $0x38] sm:$0xff]  }
   0xc   :  { %622 = vmatpush3.bf16.msra.mxu0 %v707_v10  ;;  %v724_v27 = vld [vmem:[%s980_s1 + $0xb0] sm:$0xff]   ;;  %v728_v31 = vld [vmem:[%s980_s1 + $0xb8] sm:$0xff]  }
   0xd   :  { %662 = vmatpush3.bf16.msra.mxu1 %v708_v11  ;;  %623 = vmatprep.subr.bf16.mxu0 %v709_v12  ;;  %v729_v32 = vld [vmem:[%s981_s0] ss:$16 sps:$4 sm:$0xff]   ;;  %v731_v33 = vld [vmem:[%s981_s0 + $0x4] ss:$16 sps:$4 sm:$0xff]   ;;  %v732_v34 = vld [vmem:[%s981_s0 + $0x8] ss:$16 sps:$4 sm:$0xff]  }
   0xe   :  { %663 = vmatprep.subr.bf16.mxu1 %v710_v13  ;;  %v734_v35 = vld [vmem:[%s981_s0 + $0xc] ss:$16 sps:$4 sm:$0xff]   ;;  %402 = vmatprep.mubr.bf16.mxu0 %v731_v33  ;;  %v735_v36 = vld [vmem:[%s981_s0 + $0x24] ss:$16 sps:$4 sm:$0xff]   ;;  %v739_v38 = vld [vmem:[%s981_s0 + $0x20] ss:$16 sps:$4 sm:$0xff]  }
   0xf   :  { %467 = vmatprep.mubr.bf16.mxu1 %v734_v35  ;;  %v737_v37 = vld [vmem:[%s981_s0 + $0x2c] ss:$16 sps:$4 sm:$0xff]   ;;  %v740_v39 = vld [vmem:[%s981_s0 + $0x28] ss:$16 sps:$4 sm:$0xff]   ;;  %v741_v40 = vld [vmem:[%s981_s0 + $0x44] ss:$16 sps:$4 sm:$0xff]  }
  0x10   :  { %624 = vmatpush3.bf16.msra.mxu0 %v711_v14  ;;  %v743_v41 = vld [vmem:[%s981_s0 + $0x4c] ss:$16 sps:$4 sm:$0xff]   ;;  %v745_v42 = vld [vmem:[%s981_s0 + $0x40] ss:$16 sps:$4 sm:$0xff]   ;;  %v746_v43 = vld [vmem:[%s981_s0 + $0x48] ss:$16 sps:$4 sm:$0xff]  }
  0x11   :  { %664 = vmatpush3.bf16.msra.mxu1 %v712_v15  ;;  %625 = vmatprep.subr.bf16.mxu0 %v713_v16  ;;  %v747_v44 = vld [vmem:[%s981_s0 + $0x64] ss:$16 sps:$4 sm:$0xff]   ;;  %v749_v45 = vld [vmem:[%s981_s0 + $0x6c] ss:$16 sps:$4 sm:$0xff]   ;;  %v751_v46 = vld [vmem:[%s981_s0 + $0x60] ss:$16 sps:$4 sm:$0xff]  }
  0x12   :  { %665 = vmatprep.subr.bf16.mxu1 %v714_v17  ;;  %v752_v47 = vld [vmem:[%s981_s0 + $0x68] ss:$16 sps:$4 sm:$0xff]  }
  0x14   :  { %626 = vmatpush3.bf16.msra.mxu0 %v715_v18 }
  0x15   :  { %666 = vmatpush3.bf16.msra.mxu1 %v716_v19  ;;  %627 = vmatprep.subr.bf16.mxu0 %v717_v20 }
  0x16   :  { %667 = vmatprep.subr.bf16.mxu1 %v718_v21 }
  0x18   :  { %628 = vmatpush3.bf16.msra.mxu0 %v719_v22 }
  0x19   :  { %668 = vmatpush3.bf16.msra.mxu1 %v720_v23  ;;  %629 = vmatprep.subr.bf16.mxu0 %v721_v24 }
  0x1a   :  { %669 = vmatprep.subr.bf16.mxu1 %v722_v25 }
  0x1c   :  { %630 = vmatpush3.bf16.msra.mxu0 %v723_v26 }
  0x1d   :  { %670 = vmatpush3.bf16.msra.mxu1 %v724_v27  ;;  %631 = vmatprep.subr.bf16.mxu0 %v725_v28 }
  0x1e   :  { %671 = vmatprep.subr.bf16.mxu1 %v726_v29 }
  0x20   :  { %632 = vmatpush3.bf16.msra.mxu0 %v727_v30 }
  0x21   :  { %672 = vmatpush3.bf16.msra.mxu1 %v728_v31 }
  0x23   :  { %403 = vmatmul.mubr.bf16.vlgmr.msra.gmra.mrb[0].mxu0 %v729_v32 }
  0x24   :  { %468 = vmatmul.mubr.bf16.vlgmr.msra.gmra.mrb[0].mxu1 %v732_v34  ;;  %410 = vmatprep.mubr.bf16.mxu0 %v735_v36 }
  0x25   :  { %475 = vmatprep.mubr.bf16.mxu1 %v737_v37 }
  0x2b   :  { %411 = vmatmul.mubr.bf16.gmra.mrb[4].mxu0 %v739_v38 }
  0x2c   :  { %476 = vmatmul.mubr.bf16.gmra.mrb[4].mxu1 %v740_v39  ;;  %418 = vmatprep.mubr.bf16.mxu0 %v741_v40 }
  0x2d   :  { %483 = vmatprep.mubr.bf16.mxu1 %v743_v41 }
  0x33   :  { %419 = vmatmul.mubr.bf16.gmra.mrb[8].mxu0 %v745_v42 }
  0x34   :  { %484 = vmatmul.mubr.bf16.gmra.mrb[8].mxu1 %v746_v43  ;;  %426 = vmatprep.mubr.bf16.mxu0 %v747_v44 }
  0x35   :  { %491 = vmatprep.mubr.bf16.mxu1 %v749_v45 }
  0x3b   :  { %427 = vmatmul.mubr.bf16.gmra.mrb[12].mxu0 %v751_v46 }
  0x3c   :  { %492 = vmatmul.mubr.bf16.gmra.mrb[12].mxu1 %v752_v47 }
  0xf6   :  { %v633_v48 = vpop.f32.mrb[0].mxu0 }
  0xf7   :  { %v673_v49 = vpop.f32.mrb[0].mxu1  ;;  %v634_v50 = vpop.f32.mrb[1].mxu0 }
  0xf8   :  { %v635_v51 = vadd.f32 %v634_v50, %v633_v48  ;;  %v674_v52 = vpop.f32.mrb[1].mxu1  ;;  %v636_v53 = vpop.f32.mrb[2].mxu0 }
  0xf9   :  { %v675_v54 = vadd.f32 %v674_v52, %v673_v49  ;;  %v676_v55 = vpop.f32.mrb[2].mxu1  ;;  %v637_v56 = vpop.f32.mrb[3].mxu0 }
  0xfa   :  { %v638_v58 = vadd.f32 %v637_v56, %v636_v53  ;;  %v677_v59 = vpop.f32.mrb[3].mxu1 }
  0xfb   :  { %v470_v60 = vadd.f32 %v675_v54, %v635_v51  ;;  %v678_v61 = vadd.f32 %v677_v59, %v676_v55 }
  0xfd   :  { %v507_v63 = vmul.f32 %v925_v57, %v470_v60  ;;  %v473_v0 = vadd.f32 %v678_v61, %v638_v58 }
  0xfe   :  { %v639_v1 = vpop.f32.mrb[4].mxu0 }
  0xff   :  { %v522_v2 = vadd.f32 %v930_v62, %v507_v63  ;;  %v508_v3 = vmul.f32 %v925_v57, %v473_v0  ;;  %v679_v4 = vpop.f32.mrb[4].mxu1  ;;  %v640_v5 = vpop.f32.mrb[5].mxu0 }
 0x100   :  { %v641_v6 = vadd.f32 %v640_v5, %v639_v1  ;;  %v680_v7 = vpop.f32.mrb[5].mxu1  ;;  %v642_v8 = vpop.f32.mrb[6].mxu0 }
 0x101   :  { %vm530_vm1 = vcmp.ge.f32.partialorder %v522_v2, 0.0  ;;  %v538_v9 = vmul.f32 0.01, %v522_v2  ;;  %v523_v10 = vadd.f32 %v930_v62, %v508_v3  ;;  %v681_v11 = vadd.f32 %v680_v7, %v679_v4  ;;  %v682_v12 = vpop.f32.mrb[6].mxu1  ;;  %v643_v13 = vpop.f32.mrb[7].mxu0 }
 0x102   :  { %v644_v14 = vadd.f32 %v643_v13, %v642_v8  ;;  %v683_v15 = vpop.f32.mrb[7].mxu1 }
 0x103   :  { %v546_v16 = vsel %vm530_vm1, %v522_v2, %v538_v9  ;;  %vm531_vm2 = vcmp.ge.f32.partialorder %v523_v10, 0.0  ;;  %v539_v17 = vmul.f32 0.01, %v523_v10  ;;  %v478_v18 = vadd.f32 %v681_v11, %v641_v6 }
 0x104   :  { %555 = vst.msk [vmem:[%s984_s4] sm:$0xff] %vm554_vm0, %v546_v16  ;;  %v684_v19 = vadd.f32 %v683_v15, %v682_v12 }
 0x105   :  { %v547_v20 = vsel %vm531_vm2, %v523_v10, %v539_v17  ;;  %v509_v21 = vmul.f32 %v925_v57, %v478_v18 }
 0x106   :  { %556 = vst.msk [vmem:[%s984_s4 + $0x8] sm:$0xff] %vm554_vm0, %v547_v20  ;;  %v481_v22 = vadd.f32 %v684_v19, %v644_v14  ;;  %v645_v23 = vpop.f32.mrb[8].mxu0 }
 0x107   :  { %v524_v24 = vadd.f32 %v930_v62, %v509_v21  ;;  %v685_v25 = vpop.f32.mrb[8].mxu1  ;;  %v646_v26 = vpop.f32.mrb[9].mxu0 }
 0x108   :  { %v510_v27 = vmul.f32 %v925_v57, %v481_v22  ;;  %v647_v28 = vadd.f32 %v646_v26, %v645_v23  ;;  %v686_v29 = vpop.f32.mrb[9].mxu1  ;;  %v648_v30 = vpop.f32.mrb[10].mxu0 }
 0x109   :  { %vm532_vm3 = vcmp.ge.f32.partialorder %v524_v24, 0.0  ;;  %v540_v31 = vmul.f32 0.01, %v524_v24  ;;  %v687_v32 = vadd.f32 %v686_v29, %v685_v25  ;;  %v688_v33 = vpop.f32.mrb[10].mxu1  ;;  %v649_v34 = vpop.f32.mrb[11].mxu0 }
 0x10a   :  { %v525_v35 = vadd.f32 %v930_v62, %v510_v27  ;;  %v650_v36 = vadd.f32 %v649_v34, %v648_v30  ;;  %v689_v37 = vpop.f32.mrb[11].mxu1 }
 0x10b   :  { %v548_v38 = vsel %vm532_vm3, %v524_v24, %v540_v31  ;;  %v486_v39 = vadd.f32 %v687_v32, %v647_v28  ;;  %v690_v40 = vadd.f32 %v689_v37, %v688_v33 }
 0x10c   :  { %557 = vst.msk [vmem:[%s984_s4 + $0x10] sm:$0xff] %vm554_vm0, %v548_v38  ;;  %vm533_vm4 = vcmp.ge.f32.partialorder %v525_v35, 0.0  ;;  %v541_v41 = vmul.f32 0.01, %v525_v35 }
 0x10d   :  { %v511_v42 = vmul.f32 %v925_v57, %v486_v39  ;;  %v489_v43 = vadd.f32 %v690_v40, %v650_v36 }
 0x10e   :  { %v549_v44 = vsel %vm533_vm4, %v525_v35, %v541_v41  ;;  %v651_v45 = vpop.f32.mrb[12].mxu0 }
 0x10f   :  { %558 = vst.msk [vmem:[%s984_s4 + $0x18] sm:$0xff] %vm554_vm0, %v549_v44  ;;  %v526_v46 = vadd.f32 %v930_v62, %v511_v42  ;;  %v512_v47 = vmul.f32 %v925_v57, %v489_v43  ;;  %v691_v48 = vpop.f32.mrb[12].mxu1  ;;  %v652_v49 = vpop.f32.mrb[13].mxu0 }
 0x110   :  { %v653_v50 = vadd.f32 %v652_v49, %v651_v45  ;;  %v692_v51 = vpop.f32.mrb[13].mxu1  ;;  %v654_v52 = vpop.f32.mrb[14].mxu0 }
 0x111   :  { %vm534_vm5 = vcmp.ge.f32.partialorder %v526_v46, 0.0  ;;  %v542_v53 = vmul.f32 0.01, %v526_v46  ;;  %v527_v54 = vadd.f32 %v930_v62, %v512_v47  ;;  %v693_v55 = vadd.f32 %v692_v51, %v691_v48  ;;  %v694_v56 = vpop.f32.mrb[14].mxu1  ;;  %v655_v58 = vpop.f32.mrb[15].mxu0 }
 0x112   :  { %v656_v59 = vadd.f32 %v655_v58, %v654_v52  ;;  %v695_v60 = vpop.f32.mrb[15].mxu1 }
 0x113   :  { %v550_v61 = vsel %vm534_vm5, %v526_v46, %v542_v53  ;;  %vm535_vm6 = vcmp.ge.f32.partialorder %v527_v54, 0.0  ;;  %v543_v63 = vmul.f32 0.01, %v527_v54  ;;  %v494_v0 = vadd.f32 %v693_v55, %v653_v50 }
 0x114   :  { %559 = vst.msk [vmem:[%s984_s4 + $0x20] sm:$0xff] %vm554_vm0, %v550_v61  ;;  %v696_v1 = vadd.f32 %v695_v60, %v694_v56 }
 0x115   :  { %v551_v2 = vsel %vm535_vm6, %v527_v54, %v543_v63  ;;  %v513_v3 = vmul.f32 %v925_v57, %v494_v0 }
 0x116   :  { %560 = vst.msk [vmem:[%s984_s4 + $0x28] sm:$0xff] %vm554_vm0, %v551_v2  ;;  %v497_v4 = vadd.f32 %v696_v1, %v656_v59 }
 0x117   :  { %v528_v5 = vadd.f32 %v930_v62, %v513_v3 }
 0x118   :  { %v514_v6 = vmul.f32 %v925_v57, %v497_v4 }
 0x119   :  { %vm536_vm7 = vcmp.ge.f32.partialorder %v528_v5, 0.0  ;;  %v544_v7 = vmul.f32 0.01, %v528_v5 }
 0x11a   :  { %v529_v8 = vadd.f32 %v930_v62, %v514_v6 }
 0x11b   :  { %v552_v9 = vsel %vm536_vm7, %v528_v5, %v544_v7 }
 0x11c   :  { %561 = vst.msk [vmem:[%s984_s4 + $0x30] sm:$0xff] %vm554_vm0, %v552_v9  ;;  %vm537_vm8 = vcmp.ge.f32.partialorder %v529_v8, 0.0  ;;  %v545_v10 = vmul.f32 0.01, %v529_v8 }
 0x11e   :  { %v553_v11 = vsel %vm537_vm8, %v529_v8, %v545_v10 }
 0x11f   :  { %562 = vst.msk [vmem:[%s984_s4 + $0x38] sm:$0xff] %vm554_vm0, %v553_v11 }

// kernel: _lambda_.15
= control target key start
LH: loop header
LB: loop body
LE: loop exit
PB: predicated region body
PF: predicated region fallthrough
CT: control target
= control target key end

     0   :  { %s1251_s1 = inlined_call_operand.vmem [shape: bf16[1,1024,128], index: 1, kind: input, shape index: {}]   ;;  %s1252_s0 = inlined_call_operand.vmem [shape: bf16[1,16,1024], index: 0, kind: input, shape index: {}]   ;;  %s1253_s2 = inlined_call_operand.vmem [shape: f32[1,128], index: 2, kind: input, shape index: {}]   ;;  %s1254_s3 = inlined_call_operand.vmem [shape: f32[1,128], index: 3, kind: input, shape index: {}]   ;;  %s1255_s4 = inlined_call_operand.vmem [shape: f32[1,16,128], index: 4, kind: output, shape index: {}]  }
   0x1   :  { %v934_v0 = vld [vmem:[%s1251_s1 + $0x40] sm:$0xff]   ;;  %v938_v4 = vld [vmem:[%s1251_s1 + $0x48] sm:$0xff]   ;;  %v942_v8 = vld [vmem:[%s1251_s1 + $0x50] sm:$0xff]  }
   0x2   :  { %v935_v1 = vld [vmem:[%s1251_s1 + $0xc0] sm:$0xff]   ;;  %846 = vmatprep.subr.bf16.mxu0 %v934_v0  ;;  %v939_v5 = vld [vmem:[%s1251_s1 + $0xc8] sm:$0xff]   ;;  %v943_v9 = vld [vmem:[%s1251_s1 + $0xd0] sm:$0xff]  }
   0x3   :  { %v936_v2 = vld [vmem:[%s1251_s1] sm:$0xff]   ;;  %868 = vmatprep.subr.bf16.mxu1 %v935_v1  ;;  %v940_v6 = vld [vmem:[%s1251_s1 + $0x8] sm:$0xff]   ;;  %v944_v10 = vld [vmem:[%s1251_s1 + $0x10] sm:$0xff]  }
   0x4   :  { %v937_v3 = vld [vmem:[%s1251_s1 + $0x80] sm:$0xff]   ;;  %847 = vmatpush3.bf16.msra.mxu0 %v936_v2  ;;  %v941_v7 = vld [vmem:[%s1251_s1 + $0x88] sm:$0xff]   ;;  %v945_v11 = vld [vmem:[%s1251_s1 + $0x90] sm:$0xff]  }
   0x5   :  { %869 = vmatpush3.bf16.msra.mxu1 %v937_v3  ;;  %848 = vmatprep.subr.bf16.mxu0 %v938_v4  ;;  %v946_v12 = vld [vmem:[%s1251_s1 + $0x58] sm:$0xff]   ;;  %v950_v16 = vld [vmem:[%s1251_s1 + $0x60] sm:$0xff]   ;;  %v954_v20 = vld [vmem:[%s1251_s1 + $0x68] sm:$0xff]  }
   0x6   :  { %870 = vmatprep.subr.bf16.mxu1 %v939_v5  ;;  %v947_v13 = vld [vmem:[%s1251_s1 + $0xd8] sm:$0xff]   ;;  %v951_v17 = vld [vmem:[%s1251_s1 + $0xe0] sm:$0xff]   ;;  %v955_v21 = vld [vmem:[%s1251_s1 + $0xe8] sm:$0xff]  }
   0x7   :  { %v948_v14 = vld [vmem:[%s1251_s1 + $0x18] sm:$0xff]   ;;  %v952_v18 = vld [vmem:[%s1251_s1 + $0x20] sm:$0xff]   ;;  %v956_v22 = vld [vmem:[%s1251_s1 + $0x28] sm:$0xff]  }
   0x8   :  { %849 = vmatpush3.bf16.msra.mxu0 %v940_v6  ;;  %v949_v15 = vld [vmem:[%s1251_s1 + $0x98] sm:$0xff]   ;;  %v953_v19 = vld [vmem:[%s1251_s1 + $0xa0] sm:$0xff]   ;;  %v957_v23 = vld [vmem:[%s1251_s1 + $0xa8] sm:$0xff]  }
   0x9   :  { %871 = vmatpush3.bf16.msra.mxu1 %v941_v7  ;;  %850 = vmatprep.subr.bf16.mxu0 %v942_v8  ;;  %v958_v24 = vld [vmem:[%s1251_s1 + $0x70] sm:$0xff]   ;;  %v962_v28 = vld [vmem:[%s1251_s1 + $0x78] sm:$0xff]   ;;  %v18_v32 = vld [vmem:[%s1252_s0] sm:$0xff] }
   0xa   :  { %872 = vmatprep.subr.bf16.mxu1 %v943_v9  ;;  %v959_v25 = vld [vmem:[%s1251_s1 + $0xf0] sm:$0xff]   ;;  %v963_v29 = vld [vmem:[%s1251_s1 + $0xf8] sm:$0xff]   ;;  %v22_v33 = vld [vmem:[%s1252_s0 + $0x20] sm:$0xff] }
   0xb   :  { %v960_v26 = vld [vmem:[%s1251_s1 + $0x30] sm:$0xff]   ;;  %v964_v30 = vld [vmem:[%s1251_s1 + $0x38] sm:$0xff]   ;;  %v19_v34 = vld [vmem:[%s1252_s0 + $0x8] sm:$0xff]  ;;  %v772_v35 = vcombine.low %v18_v32, %v22_v33  ;;  %v773_v36 = vcombine.high %v18_v32, %v22_v33 }
   0xc   :  { %851 = vmatpush3.bf16.msra.mxu0 %v944_v10  ;;  %v961_v27 = vld [vmem:[%s1251_s1 + $0xb0] sm:$0xff]   ;;  %v965_v31 = vld [vmem:[%s1251_s1 + $0xb8] sm:$0xff]   ;;  %v23_v37 = vld [vmem:[%s1252_s0 + $0x28] sm:$0xff] }
   0xd   :  { %873 = vmatpush3.bf16.msra.mxu1 %v945_v11  ;;  %852 = vmatprep.subr.bf16.mxu0 %v946_v12  ;;  %v774_v38 = vcombine.low %v19_v34, %v23_v37  ;;  %v775_v39 = vcombine.high %v19_v34, %v23_v37  ;;  %v966_v40 = vld [vmem:[%s1251_s1 + $0x140] sm:$0xff]   ;;  %v970_v44 = vld [vmem:[%s1251_s1 + $0x148] sm:$0xff]   ;;  %v974_v48 = vld [vmem:[%s1251_s1 + $0x150] sm:$0xff]  }
   0xe   :  { %874 = vmatprep.subr.bf16.mxu1 %v947_v13  ;;  %610 = vmatprep.mubr.bf16.mxu0 %v773_v36  ;;  %v967_v41 = vld [vmem:[%s1251_s1 + $0x1c0] sm:$0xff]   ;;  %v971_v45 = vld [vmem:[%s1251_s1 + $0x1c8] sm:$0xff]   ;;  %v975_v49 = vld [vmem:[%s1251_s1 + $0x1d0] sm:$0xff]  }
   0xf   :  { %651 = vmatprep.mubr.bf16.mxu1 %v775_v39  ;;  %v968_v42 = vld [vmem:[%s1251_s1 + $0x100] sm:$0xff]   ;;  %v972_v46 = vld [vmem:[%s1251_s1 + $0x108] sm:$0xff]   ;;  %v976_v50 = vld [vmem:[%s1251_s1 + $0x110] sm:$0xff]  }
  0x10   :  { %853 = vmatpush3.bf16.msra.mxu0 %v948_v14  ;;  %v969_v43 = vld [vmem:[%s1251_s1 + $0x180] sm:$0xff]   ;;  %v973_v47 = vld [vmem:[%s1251_s1 + $0x188] sm:$0xff]   ;;  %v977_v51 = vld [vmem:[%s1251_s1 + $0x190] sm:$0xff]  }
  0x11   :  { %875 = vmatpush3.bf16.msra.mxu1 %v949_v15  ;;  %854 = vmatprep.subr.bf16.mxu0 %v950_v16  ;;  %v978_v52 = vld [vmem:[%s1251_s1 + $0x158] sm:$0xff]   ;;  %v982_v56 = vld [vmem:[%s1251_s1 + $0x160] sm:$0xff]   ;;  %v986_v60 = vld [vmem:[%s1251_s1 + $0x168] sm:$0xff]  }
  0x12   :  { %876 = vmatprep.subr.bf16.mxu1 %v951_v17  ;;  %v979_v53 = vld [vmem:[%s1251_s1 + $0x1d8] sm:$0xff]   ;;  %v983_v57 = vld [vmem:[%s1251_s1 + $0x1e0] sm:$0xff]   ;;  %v987_v61 = vld [vmem:[%s1251_s1 + $0x1e8] sm:$0xff]  }
  0x13   :  { %v980_v54 = vld [vmem:[%s1251_s1 + $0x118] sm:$0xff]   ;;  %v984_v58 = vld [vmem:[%s1251_s1 + $0x120] sm:$0xff]   ;;  %v988_v62 = vld [vmem:[%s1251_s1 + $0x128] sm:$0xff]  }
  0x14   :  { %855 = vmatpush3.bf16.msra.mxu0 %v952_v18  ;;  %v981_v55 = vld [vmem:[%s1251_s1 + $0x198] sm:$0xff]   ;;  %v985_v59 = vld [vmem:[%s1251_s1 + $0x1a0] sm:$0xff]   ;;  %v989_v63 = vld [vmem:[%s1251_s1 + $0x1a8] sm:$0xff]  }
  0x15   :  { %877 = vmatpush3.bf16.msra.mxu1 %v953_v19  ;;  %856 = vmatprep.subr.bf16.mxu0 %v954_v20  ;;  %v990_v0 = vld [vmem:[%s1251_s1 + $0x170] sm:$0xff]   ;;  %v994_v4 = vld [vmem:[%s1251_s1 + $0x178] sm:$0xff]  }
  0x16   :  { %878 = vmatprep.subr.bf16.mxu1 %v955_v21  ;;  %v991_v1 = vld [vmem:[%s1251_s1 + $0x1f0] sm:$0xff]   ;;  %v995_v5 = vld [vmem:[%s1251_s1 + $0x1f8] sm:$0xff]  }
  0x17   :  { %v992_v2 = vld [vmem:[%s1251_s1 + $0x130] sm:$0xff]   ;;  %v996_v6 = vld [vmem:[%s1251_s1 + $0x138] sm:$0xff]  }
  0x18   :  { %857 = vmatpush3.bf16.msra.mxu0 %v956_v22  ;;  %v993_v3 = vld [vmem:[%s1251_s1 + $0x1b0] sm:$0xff]   ;;  %v997_v7 = vld [vmem:[%s1251_s1 + $0x1b8] sm:$0xff]  }
  0x19   :  { %879 = vmatpush3.bf16.msra.mxu1 %v957_v23  ;;  %858 = vmatprep.subr.bf16.mxu0 %v958_v24  ;;  %v20_v8 = vld [vmem:[%s1252_s0 + $0x10] sm:$0xff]  ;;  %v21_v12 = vld [vmem:[%s1252_s0 + $0x18] sm:$0xff] }
  0x1a   :  { %880 = vmatprep.subr.bf16.mxu1 %v959_v25  ;;  %v24_v9 = vld [vmem:[%s1252_s0 + $0x30] sm:$0xff]  ;;  %v25_v13 = vld [vmem:[%s1252_s0 + $0x38] sm:$0xff] }
  0x1b   :  { %v776_v10 = vcombine.low %v20_v8, %v24_v9  ;;  %v777_v11 = vcombine.high %v20_v8, %v24_v9  ;;  %v778_v14 = vcombine.low %v21_v12, %v25_v13  ;;  %v779_v15 = vcombine.high %v21_v12, %v25_v13 }
  0x1c   :  { %859 = vmatpush3.bf16.msra.mxu0 %v960_v26 }
  0x1d   :  { %881 = vmatpush3.bf16.msra.mxu1 %v961_v27  ;;  %860 = vmatprep.subr.bf16.mxu0 %v962_v28 }
  0x1e   :  { %882 = vmatprep.subr.bf16.mxu1 %v963_v29 }
  0x20   :  { %861 = vmatpush3.bf16.msra.mxu0 %v964_v30 }
  0x21   :  { %883 = vmatpush3.bf16.msra.mxu1 %v965_v31  ;;  %890 = vmatprep.subr.bf16.mxu0 %v966_v40 }
  0x22   :  { %912 = vmatprep.subr.bf16.mxu1 %v967_v41 }
  0x23   :  { %611 = vmatmul.mubr.bf16.vlgmr.msra.gmra.mrb[0].mxu0 %v772_v35 }
  0x24   :  { %652 = vmatmul.mubr.bf16.vlgmr.msra.gmra.mrb[0].mxu1 %v774_v38  ;;  %891 = vmatpush3.bf16.msra.mxu0 %v968_v42  ;;  %v844_v42 = vld [vmem:[%s1253_s2] ss:$0 sm:$0xff] }
  0x25   :  { %913 = vmatpush3.bf16.msra.mxu1 %v969_v43  ;;  %892 = vmatprep.subr.bf16.mxu0 %v970_v44 }
  0x26   :  { %914 = vmatprep.subr.bf16.mxu1 %v971_v45  ;;  %692 = vmatprep.mubr.bf16.mxu0 %v777_v11 }
  0x27   :  { %733 = vmatprep.mubr.bf16.mxu1 %v779_v15 }
  0x28   :  { %893 = vmatpush3.bf16.msra.mxu0 %v972_v46  ;;  %v845_v46 = vld [vmem:[%s1254_s3] ss:$0 sm:$0xff] }
  0x29   :  { %915 = vmatpush3.bf16.msra.mxu1 %v973_v47  ;;  %894 = vmatprep.subr.bf16.mxu0 %v974_v48 }
  0x2a   :  { %916 = vmatprep.subr.bf16.mxu1 %v975_v49 }
  0x2c   :  { %895 = vmatpush3.bf16.msra.mxu0 %v976_v50 }
  0x2d   :  { %917 = vmatpush3.bf16.msra.mxu1 %v977_v51  ;;  %896 = vmatprep.subr.bf16.mxu0 %v978_v52 }
  0x2e   :  { %918 = vmatprep.subr.bf16.mxu1 %v979_v53 }
  0x30   :  { %897 = vmatpush3.bf16.msra.mxu0 %v980_v54 }
  0x31   :  { %919 = vmatpush3.bf16.msra.mxu1 %v981_v55  ;;  %898 = vmatprep.subr.bf16.mxu0 %v982_v56 }
  0x32   :  { %920 = vmatprep.subr.bf16.mxu1 %v983_v57 }
  0x34   :  { %899 = vmatpush3.bf16.msra.mxu0 %v984_v58 }
  0x35   :  { %921 = vmatpush3.bf16.msra.mxu1 %v985_v59  ;;  %900 = vmatprep.subr.bf16.mxu0 %v986_v60 }
  0x36   :  { %922 = vmatprep.subr.bf16.mxu1 %v987_v61 }
  0x38   :  { %901 = vmatpush3.bf16.msra.mxu0 %v988_v62 }
  0x39   :  { %923 = vmatpush3.bf16.msra.mxu1 %v989_v63  ;;  %902 = vmatprep.subr.bf16.mxu0 %v990_v0 }
  0x3a   :  { %924 = vmatprep.subr.bf16.mxu1 %v991_v1 }
  0x3c   :  { %903 = vmatpush3.bf16.msra.mxu0 %v992_v2 }
  0x3d   :  { %925 = vmatpush3.bf16.msra.mxu1 %v993_v3  ;;  %904 = vmatprep.subr.bf16.mxu0 %v994_v4 }
  0x3e   :  { %926 = vmatprep.subr.bf16.mxu1 %v995_v5 }
  0x40   :  { %905 = vmatpush3.bf16.msra.mxu0 %v996_v6 }
  0x41   :  { %927 = vmatpush3.bf16.msra.mxu1 %v997_v7 }
  0x43   :  { %693 = vmatmul.mubr.bf16.vlgmr.msra.gmra.mrb[4].mxu0 %v776_v10 }
  0x44   :  { %734 = vmatmul.mubr.bf16.vlgmr.msra.gmra.mrb[4].mxu1 %v778_v14 }
  0xf6   :  { %v862_v16 = vpop.f32.mrb[0].mxu0 }
  0xf7   :  { %v884_v17 = vpop.f32.mrb[0].mxu1  ;;  %v863_v18 = vpop.f32.mrb[1].mxu0 }
  0xf8   :  { %v864_v19 = vadd.f32 %v863_v18, %v862_v16  ;;  %v885_v20 = vpop.f32.mrb[1].mxu1  ;;  %v865_v21 = vpop.f32.mrb[2].mxu0 }
  0xf9   :  { %v886_v22 = vadd.f32 %v885_v20, %v884_v17  ;;  %v887_v23 = vpop.f32.mrb[2].mxu1  ;;  %v866_v24 = vpop.f32.mrb[3].mxu0 }
  0xfa   :  { %v867_v25 = vadd.f32 %v866_v24, %v865_v21  ;;  %v888_v26 = vpop.f32.mrb[3].mxu1 }
  0xfb   :  { %v654_v27 = vadd.f32 %v886_v22, %v864_v19  ;;  %v889_v28 = vadd.f32 %v888_v26, %v887_v23 }
  0xfd   :  { %v657_v29 = vadd.f32 %v889_v28, %v867_v25 }
 0x116   :  { %v906_v30 = vpop.f32.mrb[4].mxu0 }
 0x117   :  { %v928_v31 = vpop.f32.mrb[4].mxu1  ;;  %v907_v32 = vpop.f32.mrb[5].mxu0 }
 0x118   :  { %v908_v33 = vadd.f32 %v907_v32, %v906_v30  ;;  %v929_v34 = vpop.f32.mrb[5].mxu1  ;;  %v909_v35 = vpop.f32.mrb[6].mxu0 }
 0x119   :  { %v930_v36 = vadd.f32 %v929_v34, %v928_v31  ;;  %v931_v37 = vpop.f32.mrb[6].mxu1  ;;  %v910_v38 = vpop.f32.mrb[7].mxu0 }
 0x11a   :  { %v695_v39 = vadd.f32 %v908_v33, %v654_v27  ;;  %v911_v40 = vadd.f32 %v910_v38, %v909_v35  ;;  %v932_v41 = vpop.f32.mrb[7].mxu1 }
 0x11b   :  { %v933_v43 = vadd.f32 %v932_v41, %v931_v37 }
 0x11c   :  { %v736_v44 = vadd.f32 %v930_v36, %v695_v39  ;;  %v698_v45 = vadd.f32 %v911_v40, %v657_v29 }
 0x11e   :  { %v749_v47 = vmul.f32 %v844_v42, %v736_v44  ;;  %v739_v48 = vadd.f32 %v933_v43, %v698_v45 }
 0x120   :  { %v758_v49 = vadd.f32 %v845_v46, %v749_v47  ;;  %v750_v50 = vmul.f32 %v844_v42, %v739_v48 }
 0x122   :  { %vm760_vm0 = vcmp.ge.f32.partialorder %v758_v49, 0.0  ;;  %v762_v51 = vmul.f32 0.01, %v758_v49  ;;  %v759_v52 = vadd.f32 %v845_v46, %v750_v50 }
 0x124   :  { %v764_v53 = vsel %vm760_vm0, %v758_v49, %v762_v51  ;;  %vm761_vm1 = vcmp.ge.f32.partialorder %v759_v52, 0.0  ;;  %v763_v54 = vmul.f32 0.01, %v759_v52 }
 0x125   :  { %766 = vst [vmem:[%s1255_s4] sm:$0xff] %v764_v53 }
 0x126   :  { %v765_v55 = vsel %vm761_vm1, %v759_v52, %v763_v54 }
 0x127   :  { %767 = vst [vmem:[%s1255_s4 + $0x8] sm:$0xff] %v765_v55 }

// kernel: squeeze.10
= control target key start
LH: loop header
LB: loop body
LE: loop exit
PB: predicated region body
PF: predicated region fallthrough
CT: control target
= control target key end

     0   :  { %v55_v7 = vmov 0.0   ;;  %s84_s0 = inlined_call_operand.vmem [shape: f32[1,4,256], index: 0, kind: input, shape index: {}]   ;;  %s85_s1 = inlined_call_operand.vmem [shape: bf16[1,2,2,256], index: 1, kind: output, shape index: {}]  }
   0x1   :  { %v50_v0 = vld [vmem:[%s84_s0 + $0x4] sm:$0xf]  ;;  %v8_v1 = vld [vmem:[%s84_s0] sm:$0xf] }
   0x2   :  { %7 = vst [vmem:[#allocation1 + $0x8] sm:$0xf] %v50_v0  ;;  %9 = vst [vmem:[#allocation1] sm:$0xf] %v8_v1 }
   0x9   :  { %v10_v2 = vld [vmem:[#allocation1] sm:$0xf]   ;;  %v15_v3 = vld [vmem:[#allocation1 + $0x8] sm:$0xf]  }
   0xa   :  { %11 = vst [vmem:[#allocation0] sm:$0x3] %v10_v2   ;;  %13 = vst [vmem:[#allocation0 + $0xe] sm:$0xc] %v10_v2  }
   0xb   :  { %17 = vst [vmem:[#allocation0 + $0x8] sm:$0x3] %v15_v3   ;;  %19 = vst [vmem:[#allocation0 + $0x16] sm:$0xc] %v15_v3  }
  0x11   :  { %v24_v4 = vld [vmem:[#allocation0] sm:$0x3]  ;;  %v35_v6 = vld [vmem:[#allocation0 + $0x10] sm:$0x3] }
  0x12   :  { %v29_v5 = vld [vmem:[#allocation0 + $0x8] sm:$0x3]  ;;  %v25_v8 = vpack.c.bf16 %v55_v7, %v24_v4  ;;  %v36_v10 = vpack.c.bf16 %v55_v7, %v35_v6  ;;  %v42_v11 = vld [vmem:[#allocation0 + $0x18] sm:$0x3] }
  0x13   :  { %v30_v9 = vpack.c.bf16 %v55_v7, %v29_v5  ;;  %v43_v12 = vpack.c.bf16 %v55_v7, %v42_v11 }
  0x14   :  { %27 = vst [vmem:[%s85_s1] sm:$0x1] %v25_v8  ;;  %52 = vst [vmem:[%s85_s1 + $0x2] sm:$0x1] %v36_v10 }
  0x15   :  { %51 = vst [vmem:[%s85_s1 + $0x1] sm:$0x1] %v30_v9  ;;  %53 = vst [vmem:[%s85_s1 + $0x3] sm:$0x1] %v43_v12 }

// kernel: _lambda_.16
= control target key start
LH: loop header
LB: loop body
LE: loop exit
PB: predicated region body
PF: predicated region fallthrough
CT: control target
= control target key end

     0   :  { %v2687_v36 = vmov 1983009808   ;;  %v285_v38 = vlaneseq  ;;  %s3557_s1 = inlined_call_operand.vmem [shape: bf16[1,2048,256], index: 1, kind: input, shape index: {}]   ;;  %s3558_s0 = inlined_call_operand.vmem [shape: bf16[1,4,2048], index: 0, kind: input, shape index: {}]   ;;  %s3559_s2 = inlined_call_operand.vmem [shape: f32[1,256], index: 2, kind: input, shape index: {}]   ;;  %s3560_s3 = inlined_call_operand.vmem [shape: f32[1,256], index: 3, kind: input, shape index: {}]   ;;  %s3561_s4 = inlined_call_operand.vmem [shape: f32[1,4,256], index: 4, kind: output, shape index: {}]  }
   0x1   :  { %v2299_v0 = vld [vmem:[%s3557_s1 + $0x4] ss:$8 sps:$4 sm:$0xff]   ;;  %v2303_v2 = vld [vmem:[%s3557_s1] ss:$8 sps:$4 sm:$0xff]   ;;  %v2305_v4 = vld [vmem:[%s3557_s1 + $0x14] ss:$8 sps:$4 sm:$0xff]   ;;  %v283_v37 = vunpack.c.l.s4 %v2687_v36 }
   0x2   :  { %v2301_v1 = vld [vmem:[%s3557_s1 + $0x404] ss:$8 sps:$4 sm:$0xff]   ;;  %1645 = vmatprep.subr.bf16.mxu1 %v2299_v0  ;;  %v2304_v3 = vld [vmem:[%s3557_s1 + $0x400] ss:$8 sps:$4 sm:$0xff]   ;;  %v2307_v5 = vld [vmem:[%s3557_s1 + $0x414] ss:$8 sps:$4 sm:$0xff]  }
   0x3   :  { %1809 = vmatprep.subr.bf16.mxu0 %v2301_v1  ;;  %1646 = vmatpush1.bf16.msra.mxu1 %v2303_v2  ;;  %v2309_v6 = vld [vmem:[%s3557_s1 + $0x10] ss:$8 sps:$4 sm:$0xff]   ;;  %v2311_v8 = vld [vmem:[%s3557_s1 + $0x24] ss:$8 sps:$4 sm:$0xff]   ;;  %v2315_v10 = vld [vmem:[%s3557_s1 + $0x20] ss:$8 sps:$4 sm:$0xff]   ;;  %v284_v42 = vunpack.c.0.s8 %v283_v37 }
   0x4   :  { %1810 = vmatpush1.bf16.msra.mxu0 %v2304_v3  ;;  %1647 = vmatprep.subr.bf16.mxu1 %v2305_v4  ;;  %v2310_v7 = vld [vmem:[%s3557_s1 + $0x410] ss:$8 sps:$4 sm:$0xff]   ;;  %v2313_v9 = vld [vmem:[%s3557_s1 + $0x424] ss:$8 sps:$4 sm:$0xff]   ;;  %v2316_v11 = vld [vmem:[%s3557_s1 + $0x420] ss:$8 sps:$4 sm:$0xff]  }
   0x5   :  { %1811 = vmatprep.subr.bf16.mxu0 %v2307_v5  ;;  %v2317_v12 = vld [vmem:[%s3557_s1 + $0x34] ss:$8 sps:$4 sm:$0xff]   ;;  %v2321_v14 = vld [vmem:[%s3557_s1 + $0x30] ss:$8 sps:$4 sm:$0xff]   ;;  %v2323_v16 = vld [vmem:[%s3557_s1 + $0x44] ss:$8 sps:$4 sm:$0xff]  }
   0x6   :  { %v2319_v13 = vld [vmem:[%s3557_s1 + $0x434] ss:$8 sps:$4 sm:$0xff]   ;;  %v2322_v15 = vld [vmem:[%s3557_s1 + $0x430] ss:$8 sps:$4 sm:$0xff]   ;;  %v2325_v17 = vld [vmem:[%s3557_s1 + $0x444] ss:$8 sps:$4 sm:$0xff]  }
   0x7   :  { %1648 = vmatpush1.bf16.msra.mxu1 %v2309_v6  ;;  %v2327_v18 = vld [vmem:[%s3557_s1 + $0x40] ss:$8 sps:$4 sm:$0xff]   ;;  %v2329_v20 = vld [vmem:[%s3557_s1 + $0x54] ss:$8 sps:$4 sm:$0xff]   ;;  %v2333_v22 = vld [vmem:[%s3557_s1 + $0x50] ss:$8 sps:$4 sm:$0xff]  }
   0x8   :  { %1812 = vmatpush1.bf16.msra.mxu0 %v2310_v7  ;;  %1649 = vmatprep.subr.bf16.mxu1 %v2311_v8  ;;  %v2328_v19 = vld [vmem:[%s3557_s1 + $0x440] ss:$8 sps:$4 sm:$0xff]   ;;  %v2331_v21 = vld [vmem:[%s3557_s1 + $0x454] ss:$8 sps:$4 sm:$0xff]   ;;  %v2334_v23 = vld [vmem:[%s3557_s1 + $0x450] ss:$8 sps:$4 sm:$0xff]  }
   0x9   :  { %1813 = vmatprep.subr.bf16.mxu0 %v2313_v9  ;;  %v2335_v24 = vld [vmem:[%s3557_s1 + $0x64] ss:$8 sps:$4 sm:$0xff]   ;;  %v2339_v26 = vld [vmem:[%s3557_s1 + $0x60] ss:$8 sps:$4 sm:$0xff]   ;;  %v2341_v28 = vld [vmem:[%s3557_s1 + $0x74] ss:$8 sps:$4 sm:$0xff]  }
   0xa   :  { %v2337_v25 = vld [vmem:[%s3557_s1 + $0x464] ss:$8 sps:$4 sm:$0xff]   ;;  %v2340_v27 = vld [vmem:[%s3557_s1 + $0x460] ss:$8 sps:$4 sm:$0xff]   ;;  %v2343_v29 = vld [vmem:[%s3557_s1 + $0x474] ss:$8 sps:$4 sm:$0xff]  }
   0xb   :  { %1650 = vmatpush1.bf16.msra.mxu1 %v2315_v10  ;;  %v2345_v30 = vld [vmem:[%s3557_s1 + $0x70] ss:$8 sps:$4 sm:$0xff]   ;;  %v2347_v32 = vld [vmem:[%s3557_s1 + $0x84] ss:$8 sps:$4 sm:$0xff]   ;;  %v2351_v34 = vld [vmem:[%s3557_s1 + $0x80] ss:$8 sps:$4 sm:$0xff]  }
   0xc   :  { %1814 = vmatpush1.bf16.msra.mxu0 %v2316_v11  ;;  %1651 = vmatprep.subr.bf16.mxu1 %v2317_v12  ;;  %v2346_v31 = vld [vmem:[%s3557_s1 + $0x470] ss:$8 sps:$4 sm:$0xff]   ;;  %v2349_v33 = vld [vmem:[%s3557_s1 + $0x484] ss:$8 sps:$4 sm:$0xff]   ;;  %v2352_v35 = vld [vmem:[%s3557_s1 + $0x480] ss:$8 sps:$4 sm:$0xff]  }
   0xd   :  { %1815 = vmatprep.subr.bf16.mxu0 %v2319_v13  ;;  %v2353_v39 = vld [vmem:[%s3557_s1 + $0x94] ss:$8 sps:$4 sm:$0xff]   ;;  %v2357_v41 = vld [vmem:[%s3557_s1 + $0x90] ss:$8 sps:$4 sm:$0xff]   ;;  %v2830_v43 = vshrl.u32 %v285_v38, 7  ;;  %v17_v52 = vld [vmem:[%s3558_s0] sm:$0xff] }
   0xe   :  { %v2355_v40 = vld [vmem:[%s3557_s1 + $0x494] ss:$8 sps:$4 sm:$0xff]   ;;  %v2358_v44 = vld [vmem:[%s3557_s1 + $0x490] ss:$8 sps:$4 sm:$0xff]   ;;  %v2359_v45 = vld [vmem:[%s3557_s1 + $0xa4] ss:$8 sps:$4 sm:$0xff]   ;;  %v281_v10 = vcombine.high %v17_v52, %v17_v52 }
   0xf   :  { %1652 = vmatpush1.bf16.msra.mxu1 %v2321_v14  ;;  %v2361_v46 = vld [vmem:[%s3557_s1 + $0x4a4] ss:$8 sps:$4 sm:$0xff]   ;;  %v2363_v47 = vld [vmem:[%s3557_s1 + $0xa0] ss:$8 sps:$4 sm:$0xff]   ;;  %v2848_v49 = vsub.s32 %v284_v42, %v2830_v43  ;;  %v2365_v50 = vld [vmem:[%s3557_s1 + $0xb4] ss:$8 sps:$4 sm:$0xff]  }
  0x10   :  { %1816 = vmatpush1.bf16.msra.mxu0 %v2322_v15  ;;  %1653 = vmatprep.subr.bf16.mxu1 %v2323_v16  ;;  %v2364_v48 = vld [vmem:[%s3557_s1 + $0x4a0] ss:$8 sps:$4 sm:$0xff]   ;;  %v2367_v51 = vld [vmem:[%s3557_s1 + $0x4b4] ss:$8 sps:$4 sm:$0xff]   ;;  %v2369_v53 = vld [vmem:[%s3557_s1 + $0xb0] ss:$8 sps:$4 sm:$0xff]  }
  0x11   :  { %1817 = vmatprep.subr.bf16.mxu0 %v2325_v17  ;;  %v288_v54 = vrot.slane %v17_v52, %v2848_v49  ;;  %v2370_v55 = vld [vmem:[%s3557_s1 + $0x4b0] ss:$8 sps:$4 sm:$0xff]   ;;  %v2371_v57 = vld [vmem:[%s3557_s1 + $0xc4] ss:$8 sps:$4 sm:$0xff]   ;;  %v2375_v62 = vld [vmem:[%s3557_s1 + $0xc0] ss:$8 sps:$4 sm:$0xff]   ;;  %v2925_v16 = vrot.slane %v281_v10, %v2848_v49 }
  0x12   :  { %v19_v56 = vld [vmem:[%s3558_s0 + $0x10] sm:$0xff]  ;;  %v2373_v58 = vld [vmem:[%s3557_s1 + $0x4c4] ss:$8 sps:$4 sm:$0xff]   ;;  %v2376_v63 = vld [vmem:[%s3557_s1 + $0x4c0] ss:$8 sps:$4 sm:$0xff]  }
  0x13   :  { %1654 = vmatpush1.bf16.msra.mxu1 %v2327_v18  ;;  %v296_v59 = vcombine.high %v288_v54, %v288_v54  ;;  %v322_v60 = vrot.slane %v19_v56, %v2848_v49  ;;  %v2377_v0 = vld [vmem:[%s3557_s1 + $0xd4] ss:$8 sps:$4 sm:$0xff]   ;;  %v2381_v2 = vld [vmem:[%s3557_s1 + $0xd0] ss:$8 sps:$4 sm:$0xff]   ;;  %v2383_v4 = vld [vmem:[%s3557_s1 + $0xe4] ss:$8 sps:$4 sm:$0xff]   ;;  %v315_v11 = vcombine.high %v19_v56, %v19_v56 }
  0x14   :  { %1818 = vmatpush1.bf16.msra.mxu0 %v2328_v19  ;;  %1655 = vmatprep.subr.bf16.mxu1 %v2329_v20  ;;  %v2379_v1 = vld [vmem:[%s3557_s1 + $0x4d4] ss:$8 sps:$4 sm:$0xff]   ;;  %v2382_v3 = vld [vmem:[%s3557_s1 + $0x4d0] ss:$8 sps:$4 sm:$0xff]   ;;  %v2385_v5 = vld [vmem:[%s3557_s1 + $0x4e4] ss:$8 sps:$4 sm:$0xff]  }
  0x15   :  { %1819 = vmatprep.subr.bf16.mxu0 %v2331_v21  ;;  %1677 = vmatprep.mubr.bf16.mxu1 %v296_v59  ;;  %v330_v61 = vcombine.high %v322_v60, %v322_v60  ;;  %v2387_v6 = vld [vmem:[%s3557_s1 + $0xe0] ss:$8 sps:$4 sm:$0xff]   ;;  %v2389_v8 = vld [vmem:[%s3557_s1 + $0xf4] ss:$8 sps:$4 sm:$0xff]   ;;  %v2393_v12 = vld [vmem:[%s3557_s1 + $0xf0] ss:$8 sps:$4 sm:$0xff]   ;;  %v2928_v17 = vrot.slane %v315_v11, %v2848_v49 }
  0x16   :  { %v2388_v7 = vld [vmem:[%s3557_s1 + $0x4e0] ss:$8 sps:$4 sm:$0xff]   ;;  %v2391_v9 = vld [vmem:[%s3557_s1 + $0x4f4] ss:$8 sps:$4 sm:$0xff]   ;;  %v2394_v13 = vld [vmem:[%s3557_s1 + $0x4f0] ss:$8 sps:$4 sm:$0xff]  }
  0x17   :  { %1656 = vmatpush1.bf16.msra.mxu1 %v2333_v22  ;;  %1841 = vmatprep.mubr.bf16.mxu0 %v330_v61  ;;  %v2398_v14 = vld [vmem:[%s3557_s1 + $0x104] ss:$8 sps:$4 sm:$0xff]   ;;  %v2396_v18 = vld [vmem:[%s3557_s1 + $0x100] ss:$8 sps:$4 sm:$0xff]   ;;  %v2405_v20 = vld [vmem:[%s3557_s1 + $0x114] ss:$8 sps:$4 sm:$0xff]   ;;  %v297_v22 = vcombine.high %v2925_v16, %v2925_v16 }
  0x18   :  { %1820 = vmatpush1.bf16.msra.mxu0 %v2334_v23  ;;  %1657 = vmatprep.subr.bf16.mxu1 %v2335_v24  ;;  %v2402_v15 = vld [vmem:[%s3557_s1 + $0x504] ss:$8 sps:$4 sm:$0xff]   ;;  %v2400_v19 = vld [vmem:[%s3557_s1 + $0x500] ss:$8 sps:$4 sm:$0xff]   ;;  %v2408_v21 = vld [vmem:[%s3557_s1 + $0x514] ss:$8 sps:$4 sm:$0xff]   ;;  %v331_v23 = vcombine.high %v2928_v17, %v2928_v17 }
  0x19   :  { %1821 = vmatprep.subr.bf16.mxu0 %v2337_v25  ;;  %v2403_v24 = vld [vmem:[%s3557_s1 + $0x110] ss:$8 sps:$4 sm:$0xff]   ;;  %v2421_v36 = vld [vmem:[%s3557_s1 + $0x140] ss:$8 sps:$4 sm:$0xff]   ;;  %v2429_v38 = vld [vmem:[%s3557_s1 + $0x154] ss:$8 sps:$4 sm:$0xff]  }
  0x1a   :  { %v2406_v25 = vld [vmem:[%s3557_s1 + $0x510] ss:$8 sps:$4 sm:$0xff]   ;;  %v2424_v37 = vld [vmem:[%s3557_s1 + $0x540] ss:$8 sps:$4 sm:$0xff]   ;;  %v2435_v42 = vld [vmem:[%s3557_s1 + $0x164] ss:$8 sps:$4 sm:$0xff]  }
  0x1b   :  { %1658 = vmatpush1.bf16.msra.mxu1 %v2339_v26  ;;  %v2411_v26 = vld [vmem:[%s3557_s1 + $0x124] ss:$8 sps:$4 sm:$0xff]   ;;  %v2453_v56 = vld [vmem:[%s3557_s1 + $0x194] ss:$8 sps:$4 sm:$0xff]   ;;  %v2454_v59 = vld [vmem:[%s3557_s1 + $0x590] ss:$8 sps:$4 sm:$0xff]  }
  0x1c   :  { %1822 = vmatpush1.bf16.msra.mxu0 %v2340_v27  ;;  %1659 = vmatprep.subr.bf16.mxu1 %v2341_v28  ;;  %v2414_v27 = vld [vmem:[%s3557_s1 + $0x524] ss:$8 sps:$4 sm:$0xff]   ;;  %v2409_v28 = vld [vmem:[%s3557_s1 + $0x120] ss:$8 sps:$4 sm:$0xff]   ;;  %v2475_v10 = vld [vmem:[%s3557_s1 + $0x1d0] ss:$8 sps:$4 sm:$0xff]  }
  0x1d   :  { %1823 = vmatprep.subr.bf16.mxu0 %v2343_v29  ;;  %v2412_v29 = vld [vmem:[%s3557_s1 + $0x520] ss:$8 sps:$4 sm:$0xff]   ;;  %v2447_v52 = vld [vmem:[%s3557_s1 + $0x184] ss:$8 sps:$4 sm:$0xff]   ;;  %v2478_v11 = vld [vmem:[%s3557_s1 + $0x5d0] ss:$8 sps:$4 sm:$0xff]  }
  0x1e   :  { %v2462_v61 = vld [vmem:[%s3557_s1 + $0x5a4] ss:$8 sps:$4 sm:$0xff]  }
  0x1f   :  { %1660 = vmatpush1.bf16.msra.mxu1 %v2345_v30  ;;  %v2417_v30 = vld [vmem:[%s3557_s1 + $0x134] ss:$8 sps:$4 sm:$0xff]  }
  0x20   :  { %1824 = vmatpush1.bf16.msra.mxu0 %v2346_v31  ;;  %1661 = vmatprep.subr.bf16.mxu1 %v2347_v32  ;;  %v2420_v31 = vld [vmem:[%s3557_s1 + $0x534] ss:$8 sps:$4 sm:$0xff]   ;;  %v2415_v32 = vld [vmem:[%s3557_s1 + $0x130] ss:$8 sps:$4 sm:$0xff]  }
  0x21   :  { %1825 = vmatprep.subr.bf16.mxu0 %v2349_v33  ;;  %v2418_v33 = vld [vmem:[%s3557_s1 + $0x530] ss:$8 sps:$4 sm:$0xff]  }
  0x23   :  { %1662 = vmatpush1.bf16.msra.mxu1 %v2351_v34  ;;  %v2423_v34 = vld [vmem:[%s3557_s1 + $0x144] ss:$8 sps:$4 sm:$0xff]  }
  0x24   :  { %1826 = vmatpush1.bf16.msra.mxu0 %v2352_v35  ;;  %1663 = vmatprep.subr.bf16.mxu1 %v2353_v39  ;;  %v2426_v35 = vld [vmem:[%s3557_s1 + $0x544] ss:$8 sps:$4 sm:$0xff]   ;;  %v2432_v39 = vld [vmem:[%s3557_s1 + $0x554] ss:$8 sps:$4 sm:$0xff]  }
  0x25   :  { %1827 = vmatprep.subr.bf16.mxu0 %v2355_v40  ;;  %v2427_v40 = vld [vmem:[%s3557_s1 + $0x150] ss:$8 sps:$4 sm:$0xff]  }
  0x27   :  { %1664 = vmatpush1.bf16.msra.mxu1 %v2357_v41  ;;  %v2430_v41 = vld [vmem:[%s3557_s1 + $0x550] ss:$8 sps:$4 sm:$0xff]  }
  0x28   :  { %1828 = vmatpush1.bf16.msra.mxu0 %v2358_v44  ;;  %1665 = vmatprep.subr.bf16.mxu1 %v2359_v45  ;;  %v2438_v44 = vld [vmem:[%s3557_s1 + $0x564] ss:$8 sps:$4 sm:$0xff]   ;;  %v2433_v45 = vld [vmem:[%s3557_s1 + $0x160] ss:$8 sps:$4 sm:$0xff]  }
  0x29   :  { %1829 = vmatprep.subr.bf16.mxu0 %v2361_v46  ;;  %v2436_v46 = vld [vmem:[%s3557_s1 + $0x560] ss:$8 sps:$4 sm:$0xff]  }
  0x2b   :  { %1666 = vmatpush1.bf16.msra.mxu1 %v2363_v47  ;;  %v2441_v47 = vld [vmem:[%s3557_s1 + $0x174] ss:$8 sps:$4 sm:$0xff]  }
  0x2c   :  { %1830 = vmatpush1.bf16.msra.mxu0 %v2364_v48  ;;  %1667 = vmatprep.subr.bf16.mxu1 %v2365_v50  ;;  %v2444_v48 = vld [vmem:[%s3557_s1 + $0x574] ss:$8 sps:$4 sm:$0xff]   ;;  %v2439_v50 = vld [vmem:[%s3557_s1 + $0x170] ss:$8 sps:$4 sm:$0xff]  }
  0x2d   :  { %1831 = vmatprep.subr.bf16.mxu0 %v2367_v51  ;;  %v2442_v51 = vld [vmem:[%s3557_s1 + $0x570] ss:$8 sps:$4 sm:$0xff]  }
  0x2f   :  { %1668 = vmatpush1.bf16.msra.mxu1 %v2369_v53  ;;  %v2450_v53 = vld [vmem:[%s3557_s1 + $0x584] ss:$8 sps:$4 sm:$0xff]  }
  0x30   :  { %1832 = vmatpush1.bf16.msra.mxu0 %v2370_v55  ;;  %1669 = vmatprep.subr.bf16.mxu1 %v2371_v57  ;;  %v2448_v55 = vld [vmem:[%s3557_s1 + $0x580] ss:$8 sps:$4 sm:$0xff]   ;;  %v2456_v57 = vld [vmem:[%s3557_s1 + $0x594] ss:$8 sps:$4 sm:$0xff]  }
  0x31   :  { %1833 = vmatprep.subr.bf16.mxu0 %v2373_v58  ;;  %v2451_v58 = vld [vmem:[%s3557_s1 + $0x190] ss:$8 sps:$4 sm:$0xff]  }
  0x33   :  { %1670 = vmatpush1.bf16.msra.mxu1 %v2375_v62  ;;  %v2457_v62 = vld [vmem:[%s3557_s1 + $0x1a0] ss:$8 sps:$4 sm:$0xff]  }
  0x34   :  { %1834 = vmatpush1.bf16.msra.mxu0 %v2376_v63  ;;  %1671 = vmatprep.subr.bf16.mxu1 %v2377_v0  ;;  %v2460_v63 = vld [vmem:[%s3557_s1 + $0x5a0] ss:$8 sps:$4 sm:$0xff]   ;;  %v2465_v0 = vld [vmem:[%s3557_s1 + $0x1b4] ss:$8 sps:$4 sm:$0xff]  }
  0x35   :  { %1835 = vmatprep.subr.bf16.mxu0 %v2379_v1  ;;  %v2468_v1 = vld [vmem:[%s3557_s1 + $0x5b4] ss:$8 sps:$4 sm:$0xff]  }
  0x37   :  { %1672 = vmatpush1.bf16.msra.mxu1 %v2381_v2  ;;  %v2463_v2 = vld [vmem:[%s3557_s1 + $0x1b0] ss:$8 sps:$4 sm:$0xff]  }
  0x38   :  { %1836 = vmatpush1.bf16.msra.mxu0 %v2382_v3  ;;  %1673 = vmatprep.subr.bf16.mxu1 %v2383_v4  ;;  %v2466_v3 = vld [vmem:[%s3557_s1 + $0x5b0] ss:$8 sps:$4 sm:$0xff]   ;;  %v2471_v4 = vld [vmem:[%s3557_s1 + $0x1c4] ss:$8 sps:$4 sm:$0xff]  }
  0x39   :  { %1837 = vmatprep.subr.bf16.mxu0 %v2385_v5  ;;  %v2474_v5 = vld [vmem:[%s3557_s1 + $0x5c4] ss:$8 sps:$4 sm:$0xff]  }
  0x3b   :  { %1674 = vmatpush1.bf16.msra.mxu1 %v2387_v6  ;;  %v2469_v6 = vld [vmem:[%s3557_s1 + $0x1c0] ss:$8 sps:$4 sm:$0xff]  }
  0x3c   :  { %1838 = vmatpush1.bf16.msra.mxu0 %v2388_v7  ;;  %1675 = vmatprep.subr.bf16.mxu1 %v2389_v8  ;;  %v2472_v7 = vld [vmem:[%s3557_s1 + $0x5c0] ss:$8 sps:$4 sm:$0xff]   ;;  %v2477_v8 = vld [vmem:[%s3557_s1 + $0x1d4] ss:$8 sps:$4 sm:$0xff]  }
  0x3d   :  { %1839 = vmatprep.subr.bf16.mxu0 %v2391_v9  ;;  %v2480_v9 = vld [vmem:[%s3557_s1 + $0x5d4] ss:$8 sps:$4 sm:$0xff]  }
  0x3f   :  { %1676 = vmatpush1.bf16.msra.mxu1 %v2393_v12  ;;  %v2483_v12 = vld [vmem:[%s3557_s1 + $0x1e4] ss:$8 sps:$4 sm:$0xff]  }
  0x40   :  { %1840 = vmatpush1.bf16.msra.mxu0 %v2394_v13  ;;  %1686 = vmatprep.subr.bf16.mxu1 %v2398_v14  ;;  %v2486_v13 = vld [vmem:[%s3557_s1 + $0x5e4] ss:$8 sps:$4 sm:$0xff]   ;;  %v2481_v14 = vld [vmem:[%s3557_s1 + $0x1e0] ss:$8 sps:$4 sm:$0xff]  }
  0x41   :  { %1850 = vmatprep.subr.bf16.mxu0 %v2402_v15  ;;  %v2484_v15 = vld [vmem:[%s3557_s1 + $0x5e0] ss:$8 sps:$4 sm:$0xff]  }
  0x42   :  { %1678 = vmatmul.mubr.bf16.vlgmr.msra.gmra.mrb[0].mxu1 %v288_v54  ;;  %v2445_v54 = vld [vmem:[%s3557_s1 + $0x180] ss:$8 sps:$4 sm:$0xff]  }
  0x43   :  { %1842 = vmatmul.mubr.bf16.vlgmr.msra.gmra.mrb[0].mxu0 %v322_v60  ;;  %1687 = vmatpush1.bf16.msra.mxu1 %v2396_v18  ;;  %v2459_v60 = vld [vmem:[%s3557_s1 + $0x1a4] ss:$8 sps:$4 sm:$0xff]   ;;  %v2489_v18 = vld [vmem:[%s3557_s1 + $0x1f4] ss:$8 sps:$4 sm:$0xff]  }
  0x44   :  { %1851 = vmatpush1.bf16.msra.mxu0 %v2400_v19  ;;  %1688 = vmatprep.subr.bf16.mxu1 %v2405_v20  ;;  %v2492_v19 = vld [vmem:[%s3557_s1 + $0x5f4] ss:$8 sps:$4 sm:$0xff]   ;;  %v2487_v20 = vld [vmem:[%s3557_s1 + $0x1f0] ss:$8 sps:$4 sm:$0xff]  }
  0x45   :  { %1852 = vmatprep.subr.bf16.mxu0 %v2408_v21  ;;  %1718 = vmatprep.mubr.bf16.mxu1 %v297_v22  ;;  %v2490_v21 = vld [vmem:[%s3557_s1 + $0x5f0] ss:$8 sps:$4 sm:$0xff]   ;;  %v2495_v22 = vld [vmem:[%s3557_s1 + $0x204] ss:$8 sps:$4 sm:$0xff]  }
  0x46   :  { %1882 = vmatprep.mubr.bf16.mxu0 %v331_v23  ;;  %v2498_v23 = vld [vmem:[%s3557_s1 + $0x604] ss:$8 sps:$4 sm:$0xff]  }
  0x47   :  { %1689 = vmatpush1.bf16.msra.mxu1 %v2403_v24  ;;  %v2493_v24 = vld [vmem:[%s3557_s1 + $0x200] ss:$8 sps:$4 sm:$0xff]  }
  0x48   :  { %1853 = vmatpush1.bf16.msra.mxu0 %v2406_v25  ;;  %1690 = vmatprep.subr.bf16.mxu1 %v2411_v26  ;;  %v2496_v25 = vld [vmem:[%s3557_s1 + $0x600] ss:$8 sps:$4 sm:$0xff]   ;;  %v2501_v26 = vld [vmem:[%s3557_s1 + $0x214] ss:$8 sps:$4 sm:$0xff]  }
  0x49   :  { %1854 = vmatprep.subr.bf16.mxu0 %v2414_v27  ;;  %v3138_v27 = vld [vmem:[%s3558_s0 + $0x8] sm:$0xff] }
  0x4b   :  { %1691 = vmatpush1.bf16.msra.mxu1 %v2409_v28  ;;  %v2504_v28 = vld [vmem:[%s3557_s1 + $0x614] ss:$8 sps:$4 sm:$0xff]  }
  0x4c   :  { %1855 = vmatpush1.bf16.msra.mxu0 %v2412_v29  ;;  %1692 = vmatprep.subr.bf16.mxu1 %v2417_v30  ;;  %v3145_v29 = vrot.slane %v3138_v27, %v2848_v49  ;;  %v3150_v30 = vld [vmem:[%s3558_s0 + $0x18] sm:$0xff] }
  0x4d   :  { %1856 = vmatprep.subr.bf16.mxu0 %v2420_v31  ;;  %v2499_v31 = vld [vmem:[%s3557_s1 + $0x210] ss:$8 sps:$4 sm:$0xff]  }
  0x4f   :  { %1693 = vmatpush1.bf16.msra.mxu1 %v2415_v32  ;;  %v2502_v32 = vld [vmem:[%s3557_s1 + $0x610] ss:$8 sps:$4 sm:$0xff]  }
  0x50   :  { %1857 = vmatpush1.bf16.msra.mxu0 %v2418_v33  ;;  %1694 = vmatprep.subr.bf16.mxu1 %v2423_v34  ;;  %v313_v33 = vcombine.high %v3145_v29, %v3145_v29  ;;  %v3164_v34 = vrot.slane %v3150_v30, %v2848_v49 }
  0x51   :  { %1858 = vmatprep.subr.bf16.mxu0 %v2426_v35 }
  0x52   :  { %v347_v35 = vcombine.high %v3164_v34, %v3164_v34 }
  0x53   :  { %1695 = vmatpush1.bf16.msra.mxu1 %v2421_v36  ;;  %v2505_v36 = vld [vmem:[%s3557_s1 + $0x220] ss:$8 sps:$4 sm:$0xff]  }
  0x54   :  { %1859 = vmatpush1.bf16.msra.mxu0 %v2424_v37  ;;  %1696 = vmatprep.subr.bf16.mxu1 %v2429_v38  ;;  %v2508_v37 = vld [vmem:[%s3557_s1 + $0x620] ss:$8 sps:$4 sm:$0xff]   ;;  %v2513_v38 = vld [vmem:[%s3557_s1 + $0x234] ss:$8 sps:$4 sm:$0xff]  }
  0x55   :  { %1860 = vmatprep.subr.bf16.mxu0 %v2432_v39  ;;  %v2516_v39 = vld [vmem:[%s3557_s1 + $0x634] ss:$8 sps:$4 sm:$0xff]  }
  0x57   :  { %1697 = vmatpush1.bf16.msra.mxu1 %v2427_v40  ;;  %v2511_v40 = vld [vmem:[%s3557_s1 + $0x230] ss:$8 sps:$4 sm:$0xff]  }
  0x58   :  { %1861 = vmatpush1.bf16.msra.mxu0 %v2430_v41  ;;  %1698 = vmatprep.subr.bf16.mxu1 %v2435_v42  ;;  %v2514_v41 = vld [vmem:[%s3557_s1 + $0x630] ss:$8 sps:$4 sm:$0xff]   ;;  %v2519_v42 = vld [vmem:[%s3557_s1 + $0x244] ss:$8 sps:$4 sm:$0xff]  }
  0x59   :  { %1862 = vmatprep.subr.bf16.mxu0 %v2438_v44  ;;  %v2522_v44 = vld [vmem:[%s3557_s1 + $0x644] ss:$8 sps:$4 sm:$0xff]  }
  0x5b   :  { %1699 = vmatpush1.bf16.msra.mxu1 %v2433_v45  ;;  %v2517_v45 = vld [vmem:[%s3557_s1 + $0x240] ss:$8 sps:$4 sm:$0xff]  }
  0x5c   :  { %1863 = vmatpush1.bf16.msra.mxu0 %v2436_v46  ;;  %1700 = vmatprep.subr.bf16.mxu1 %v2441_v47  ;;  %v2520_v46 = vld [vmem:[%s3557_s1 + $0x640] ss:$8 sps:$4 sm:$0xff]   ;;  %v2525_v47 = vld [vmem:[%s3557_s1 + $0x254] ss:$8 sps:$4 sm:$0xff]  }
  0x5d   :  { %1864 = vmatprep.subr.bf16.mxu0 %v2444_v48  ;;  %v2528_v48 = vld [vmem:[%s3557_s1 + $0x654] ss:$8 sps:$4 sm:$0xff]  }
  0x5f   :  { %1701 = vmatpush1.bf16.msra.mxu1 %v2439_v50  ;;  %v2523_v50 = vld [vmem:[%s3557_s1 + $0x250] ss:$8 sps:$4 sm:$0xff]  }
  0x60   :  { %1865 = vmatpush1.bf16.msra.mxu0 %v2442_v51  ;;  %1702 = vmatprep.subr.bf16.mxu1 %v2447_v52  ;;  %v2526_v51 = vld [vmem:[%s3557_s1 + $0x650] ss:$8 sps:$4 sm:$0xff]   ;;  %v2531_v52 = vld [vmem:[%s3557_s1 + $0x264] ss:$8 sps:$4 sm:$0xff]  }
  0x61   :  { %1866 = vmatprep.subr.bf16.mxu0 %v2450_v53  ;;  %v2534_v53 = vld [vmem:[%s3557_s1 + $0x664] ss:$8 sps:$4 sm:$0xff]  }
  0x63   :  { %1703 = vmatpush1.bf16.msra.mxu1 %v2445_v54  ;;  %v2529_v54 = vld [vmem:[%s3557_s1 + $0x260] ss:$8 sps:$4 sm:$0xff]  }
  0x64   :  { %1867 = vmatpush1.bf16.msra.mxu0 %v2448_v55  ;;  %1704 = vmatprep.subr.bf16.mxu1 %v2453_v56  ;;  %v2532_v55 = vld [vmem:[%s3557_s1 + $0x660] ss:$8 sps:$4 sm:$0xff]   ;;  %v2537_v56 = vld [vmem:[%s3557_s1 + $0x274] ss:$8 sps:$4 sm:$0xff]  }
  0x65   :  { %1868 = vmatprep.subr.bf16.mxu0 %v2456_v57  ;;  %v2540_v57 = vld [vmem:[%s3557_s1 + $0x674] ss:$8 sps:$4 sm:$0xff]  }
  0x67   :  { %1705 = vmatpush1.bf16.msra.mxu1 %v2451_v58  ;;  %v2535_v58 = vld [vmem:[%s3557_s1 + $0x270] ss:$8 sps:$4 sm:$0xff]  }
  0x68   :  { %1869 = vmatpush1.bf16.msra.mxu0 %v2454_v59  ;;  %1706 = vmatprep.subr.bf16.mxu1 %v2459_v60  ;;  %v2538_v59 = vld [vmem:[%s3557_s1 + $0x670] ss:$8 sps:$4 sm:$0xff]   ;;  %v2543_v60 = vld [vmem:[%s3557_s1 + $0x284] ss:$8 sps:$4 sm:$0xff]  }
  0x69   :  { %1870 = vmatprep.subr.bf16.mxu0 %v2462_v61  ;;  %v2546_v61 = vld [vmem:[%s3557_s1 + $0x684] ss:$8 sps:$4 sm:$0xff]  }
  0x6b   :  { %1707 = vmatpush1.bf16.msra.mxu1 %v2457_v62  ;;  %v2541_v62 = vld [vmem:[%s3557_s1 + $0x280] ss:$8 sps:$4 sm:$0xff]  }
  0x6c   :  { %1871 = vmatpush1.bf16.msra.mxu0 %v2460_v63  ;;  %1708 = vmatprep.subr.bf16.mxu1 %v2465_v0  ;;  %v2544_v63 = vld [vmem:[%s3557_s1 + $0x680] ss:$8 sps:$4 sm:$0xff]   ;;  %v2549_v0 = vld [vmem:[%s3557_s1 + $0x294] ss:$8 sps:$4 sm:$0xff]  }
  0x6d   :  { %1872 = vmatprep.subr.bf16.mxu0 %v2468_v1  ;;  %v2552_v1 = vld [vmem:[%s3557_s1 + $0x694] ss:$8 sps:$4 sm:$0xff]  }
  0x6f   :  { %1709 = vmatpush1.bf16.msra.mxu1 %v2463_v2  ;;  %v2547_v2 = vld [vmem:[%s3557_s1 + $0x290] ss:$8 sps:$4 sm:$0xff]  }
  0x70   :  { %1873 = vmatpush1.bf16.msra.mxu0 %v2466_v3  ;;  %1710 = vmatprep.subr.bf16.mxu1 %v2471_v4  ;;  %v2550_v3 = vld [vmem:[%s3557_s1 + $0x690] ss:$8 sps:$4 sm:$0xff]   ;;  %v2555_v4 = vld [vmem:[%s3557_s1 + $0x2a4] ss:$8 sps:$4 sm:$0xff]  }
  0x71   :  { %1874 = vmatprep.subr.bf16.mxu0 %v2474_v5  ;;  %v2558_v5 = vld [vmem:[%s3557_s1 + $0x6a4] ss:$8 sps:$4 sm:$0xff]  }
  0x73   :  { %1711 = vmatpush1.bf16.msra.mxu1 %v2469_v6  ;;  %v2553_v6 = vld [vmem:[%s3557_s1 + $0x2a0] ss:$8 sps:$4 sm:$0xff]  }
  0x74   :  { %1875 = vmatpush1.bf16.msra.mxu0 %v2472_v7  ;;  %1712 = vmatprep.subr.bf16.mxu1 %v2477_v8  ;;  %v2556_v7 = vld [vmem:[%s3557_s1 + $0x6a0] ss:$8 sps:$4 sm:$0xff]   ;;  %v2561_v8 = vld [vmem:[%s3557_s1 + $0x2b4] ss:$8 sps:$4 sm:$0xff]  }
  0x75   :  { %1876 = vmatprep.subr.bf16.mxu0 %v2480_v9  ;;  %v2564_v9 = vld [vmem:[%s3557_s1 + $0x6b4] ss:$8 sps:$4 sm:$0xff]  }
  0x77   :  { %1713 = vmatpush1.bf16.msra.mxu1 %v2475_v10  ;;  %v2559_v10 = vld [vmem:[%s3557_s1 + $0x2b0] ss:$8 sps:$4 sm:$0xff]  }
  0x78   :  { %1877 = vmatpush1.bf16.msra.mxu0 %v2478_v11  ;;  %1714 = vmatprep.subr.bf16.mxu1 %v2483_v12  ;;  %v2562_v11 = vld [vmem:[%s3557_s1 + $0x6b0] ss:$8 sps:$4 sm:$0xff]   ;;  %v2567_v12 = vld [vmem:[%s3557_s1 + $0x2c4] ss:$8 sps:$4 sm:$0xff]  }
  0x79   :  { %1878 = vmatprep.subr.bf16.mxu0 %v2486_v13  ;;  %v2570_v13 = vld [vmem:[%s3557_s1 + $0x6c4] ss:$8 sps:$4 sm:$0xff]  }
  0x7b   :  { %1715 = vmatpush1.bf16.msra.mxu1 %v2481_v14  ;;  %v2565_v14 = vld [vmem:[%s3557_s1 + $0x2c0] ss:$8 sps:$4 sm:$0xff]  }
  0x7c   :  { %1879 = vmatpush1.bf16.msra.mxu0 %v2484_v15  ;;  %1716 = vmatprep.subr.bf16.mxu1 %v2489_v18  ;;  %v2568_v15 = vld [vmem:[%s3557_s1 + $0x6c0] ss:$8 sps:$4 sm:$0xff]   ;;  %v2573_v18 = vld [vmem:[%s3557_s1 + $0x2d4] ss:$8 sps:$4 sm:$0xff]  }
  0x7d   :  { %1880 = vmatprep.subr.bf16.mxu0 %v2492_v19  ;;  %v2576_v19 = vld [vmem:[%s3557_s1 + $0x6d4] ss:$8 sps:$4 sm:$0xff]  }
  0x7f   :  { %1717 = vmatpush1.bf16.msra.mxu1 %v2487_v20  ;;  %v2571_v20 = vld [vmem:[%s3557_s1 + $0x2d0] ss:$8 sps:$4 sm:$0xff]  }
  0x80   :  { %1881 = vmatpush1.bf16.msra.mxu0 %v2490_v21  ;;  %1727 = vmatprep.subr.bf16.mxu1 %v2495_v22  ;;  %v2574_v21 = vld [vmem:[%s3557_s1 + $0x6d0] ss:$8 sps:$4 sm:$0xff]   ;;  %v2579_v22 = vld [vmem:[%s3557_s1 + $0x2e4] ss:$8 sps:$4 sm:$0xff]  }
  0x81   :  { %1891 = vmatprep.subr.bf16.mxu0 %v2498_v23  ;;  %v2582_v23 = vld [vmem:[%s3557_s1 + $0x6e4] ss:$8 sps:$4 sm:$0xff]  }
  0x82   :  { %1719 = vmatmul.mubr.bf16.vlgmr.msra.gmra.mrb[0].mxu1 %v2925_v16  ;;  %v2507_v16 = vld [vmem:[%s3557_s1 + $0x224] ss:$8 sps:$4 sm:$0xff]  }
  0x83   :  { %1883 = vmatmul.mubr.bf16.vlgmr.msra.gmra.mrb[0].mxu0 %v2928_v17  ;;  %1728 = vmatpush1.bf16.msra.mxu1 %v2493_v24  ;;  %v2510_v17 = vld [vmem:[%s3557_s1 + $0x624] ss:$8 sps:$4 sm:$0xff]   ;;  %v2577_v24 = vld [vmem:[%s3557_s1 + $0x2e0] ss:$8 sps:$4 sm:$0xff]  }
  0x84   :  { %1892 = vmatpush1.bf16.msra.mxu0 %v2496_v25  ;;  %1729 = vmatprep.subr.bf16.mxu1 %v2501_v26  ;;  %v2580_v25 = vld [vmem:[%s3557_s1 + $0x6e0] ss:$8 sps:$4 sm:$0xff]   ;;  %v2585_v26 = vld [vmem:[%s3557_s1 + $0x2f4] ss:$8 sps:$4 sm:$0xff]  }
  0x85   :  { %1893 = vmatprep.subr.bf16.mxu0 %v2504_v28  ;;  %1759 = vmatprep.mubr.bf16.mxu1 %v313_v33  ;;  %v2588_v28 = vld [vmem:[%s3557_s1 + $0x6f4] ss:$8 sps:$4 sm:$0xff]   ;;  %v2583_v33 = vld [vmem:[%s3557_s1 + $0x2f0] ss:$8 sps:$4 sm:$0xff]  }
  0x86   :  { %1923 = vmatprep.mubr.bf16.mxu0 %v347_v35 }
  0x87   :  { %1730 = vmatpush1.bf16.msra.mxu1 %v2499_v31  ;;  %v298_v31 = vcombine.high %v3138_v27, %v3138_v27  ;;  %v2594_v27 = vld [vmem:[%s3557_s1 + $0x704] ss:$8 sps:$4 sm:$0xff]  }
  0x88   :  { %1894 = vmatpush1.bf16.msra.mxu0 %v2502_v32  ;;  %1731 = vmatprep.subr.bf16.mxu1 %v2507_v16  ;;  %v332_v32 = vcombine.high %v3150_v30, %v3150_v30  ;;  %v2586_v16 = vld [vmem:[%s3557_s1 + $0x6f0] ss:$8 sps:$4 sm:$0xff]  }
  0x89   :  { %1895 = vmatprep.subr.bf16.mxu0 %v2510_v17  ;;  %v2591_v17 = vld [vmem:[%s3557_s1 + $0x304] ss:$8 sps:$4 sm:$0xff]   ;;  %v3347_v30 = vrot.slane %v298_v31, %v2848_v49  ;;  %v2670_v31 = vld [vmem:[%s3557_s1 + $0x7d0] ss:$8 sps:$4 sm:$0xff]  }
  0x8a   :  { %v3350_v35 = vrot.slane %v332_v32, %v2848_v49  ;;  %v2600_v49 = vld [vmem:[%s3557_s1 + $0x714] ss:$8 sps:$4 sm:$0xff]   ;;  %v2675_v32 = vld [vmem:[%s3557_s1 + $0x3e4] ss:$8 sps:$4 sm:$0xff]  }
  0x8b   :  { %1732 = vmatpush1.bf16.msra.mxu1 %v2505_v36  ;;  %v2589_v36 = vld [vmem:[%s3557_s1 + $0x300] ss:$8 sps:$4 sm:$0xff]  }
  0x8c   :  { %1896 = vmatpush1.bf16.msra.mxu0 %v2508_v37  ;;  %1733 = vmatprep.subr.bf16.mxu1 %v2513_v38  ;;  %v2592_v37 = vld [vmem:[%s3557_s1 + $0x700] ss:$8 sps:$4 sm:$0xff]   ;;  %v2597_v38 = vld [vmem:[%s3557_s1 + $0x314] ss:$8 sps:$4 sm:$0xff]  }
  0x8d   :  { %1897 = vmatprep.subr.bf16.mxu0 %v2516_v39  ;;  %v314_v39 = vcombine.high %v3347_v30, %v3347_v30 }
  0x8f   :  { %1734 = vmatpush1.bf16.msra.mxu1 %v2511_v40  ;;  %v348_v40 = vcombine.high %v3350_v35, %v3350_v35 }
  0x90   :  { %1898 = vmatpush1.bf16.msra.mxu0 %v2514_v41  ;;  %1735 = vmatprep.subr.bf16.mxu1 %v2519_v42  ;;  %v2595_v41 = vld [vmem:[%s3557_s1 + $0x310] ss:$8 sps:$4 sm:$0xff]  }
  0x91   :  { %1899 = vmatprep.subr.bf16.mxu0 %v2522_v44  ;;  %v2598_v42 = vld [vmem:[%s3557_s1 + $0x710] ss:$8 sps:$4 sm:$0xff]   ;;  %v2603_v44 = vld [vmem:[%s3557_s1 + $0x324] ss:$8 sps:$4 sm:$0xff]  }
  0x93   :  { %1736 = vmatpush1.bf16.msra.mxu1 %v2517_v45  ;;  %v2604_v45 = vld [vmem:[%s3557_s1 + $0x720] ss:$8 sps:$4 sm:$0xff]  }
  0x94   :  { %1900 = vmatpush1.bf16.msra.mxu0 %v2520_v46  ;;  %1737 = vmatprep.subr.bf16.mxu1 %v2525_v47  ;;  %v2609_v46 = vld [vmem:[%s3557_s1 + $0x334] ss:$8 sps:$4 sm:$0xff]  }
  0x95   :  { %1901 = vmatprep.subr.bf16.mxu0 %v2528_v48  ;;  %v2612_v47 = vld [vmem:[%s3557_s1 + $0x734] ss:$8 sps:$4 sm:$0xff]   ;;  %v2607_v48 = vld [vmem:[%s3557_s1 + $0x330] ss:$8 sps:$4 sm:$0xff]  }
  0x97   :  { %1738 = vmatpush1.bf16.msra.mxu1 %v2523_v50  ;;  %v2610_v50 = vld [vmem:[%s3557_s1 + $0x730] ss:$8 sps:$4 sm:$0xff]  }
  0x98   :  { %1902 = vmatpush1.bf16.msra.mxu0 %v2526_v51  ;;  %1739 = vmatprep.subr.bf16.mxu1 %v2531_v52  ;;  %v2615_v51 = vld [vmem:[%s3557_s1 + $0x344] ss:$8 sps:$4 sm:$0xff]  }
  0x99   :  { %1903 = vmatprep.subr.bf16.mxu0 %v2534_v53  ;;  %v2618_v52 = vld [vmem:[%s3557_s1 + $0x744] ss:$8 sps:$4 sm:$0xff]   ;;  %v2613_v53 = vld [vmem:[%s3557_s1 + $0x340] ss:$8 sps:$4 sm:$0xff]  }
  0x9b   :  { %1740 = vmatpush1.bf16.msra.mxu1 %v2529_v54  ;;  %v2616_v54 = vld [vmem:[%s3557_s1 + $0x740] ss:$8 sps:$4 sm:$0xff]  }
  0x9c   :  { %1904 = vmatpush1.bf16.msra.mxu0 %v2532_v55  ;;  %1741 = vmatprep.subr.bf16.mxu1 %v2537_v56  ;;  %v2621_v55 = vld [vmem:[%s3557_s1 + $0x354] ss:$8 sps:$4 sm:$0xff]  }
  0x9d   :  { %1905 = vmatprep.subr.bf16.mxu0 %v2540_v57  ;;  %v2624_v56 = vld [vmem:[%s3557_s1 + $0x754] ss:$8 sps:$4 sm:$0xff]   ;;  %v2619_v57 = vld [vmem:[%s3557_s1 + $0x350] ss:$8 sps:$4 sm:$0xff]  }
  0x9f   :  { %1742 = vmatpush1.bf16.msra.mxu1 %v2535_v58  ;;  %v2622_v58 = vld [vmem:[%s3557_s1 + $0x750] ss:$8 sps:$4 sm:$0xff]  }
  0xa0   :  { %1906 = vmatpush1.bf16.msra.mxu0 %v2538_v59  ;;  %1743 = vmatprep.subr.bf16.mxu1 %v2543_v60  ;;  %v2627_v59 = vld [vmem:[%s3557_s1 + $0x364] ss:$8 sps:$4 sm:$0xff]  }
  0xa1   :  { %1907 = vmatprep.subr.bf16.mxu0 %v2546_v61  ;;  %v2630_v60 = vld [vmem:[%s3557_s1 + $0x764] ss:$8 sps:$4 sm:$0xff]   ;;  %v2625_v61 = vld [vmem:[%s3557_s1 + $0x360] ss:$8 sps:$4 sm:$0xff]  }
  0xa3   :  { %1744 = vmatpush1.bf16.msra.mxu1 %v2541_v62  ;;  %v2628_v62 = vld [vmem:[%s3557_s1 + $0x760] ss:$8 sps:$4 sm:$0xff]  }
  0xa4   :  { %1908 = vmatpush1.bf16.msra.mxu0 %v2544_v63  ;;  %1745 = vmatprep.subr.bf16.mxu1 %v2549_v0  ;;  %v2633_v63 = vld [vmem:[%s3557_s1 + $0x374] ss:$8 sps:$4 sm:$0xff]  }
  0xa5   :  { %1909 = vmatprep.subr.bf16.mxu0 %v2552_v1  ;;  %v2636_v0 = vld [vmem:[%s3557_s1 + $0x774] ss:$8 sps:$4 sm:$0xff]   ;;  %v2631_v1 = vld [vmem:[%s3557_s1 + $0x370] ss:$8 sps:$4 sm:$0xff]  }
  0xa7   :  { %1746 = vmatpush1.bf16.msra.mxu1 %v2547_v2  ;;  %v2634_v2 = vld [vmem:[%s3557_s1 + $0x770] ss:$8 sps:$4 sm:$0xff]  }
  0xa8   :  { %1910 = vmatpush1.bf16.msra.mxu0 %v2550_v3  ;;  %1747 = vmatprep.subr.bf16.mxu1 %v2555_v4  ;;  %v2639_v3 = vld [vmem:[%s3557_s1 + $0x384] ss:$8 sps:$4 sm:$0xff]  }
  0xa9   :  { %1911 = vmatprep.subr.bf16.mxu0 %v2558_v5  ;;  %v2642_v4 = vld [vmem:[%s3557_s1 + $0x784] ss:$8 sps:$4 sm:$0xff]   ;;  %v2637_v5 = vld [vmem:[%s3557_s1 + $0x380] ss:$8 sps:$4 sm:$0xff]  }
  0xab   :  { %1748 = vmatpush1.bf16.msra.mxu1 %v2553_v6  ;;  %v2640_v6 = vld [vmem:[%s3557_s1 + $0x780] ss:$8 sps:$4 sm:$0xff]  }
  0xac   :  { %1912 = vmatpush1.bf16.msra.mxu0 %v2556_v7  ;;  %1749 = vmatprep.subr.bf16.mxu1 %v2561_v8  ;;  %v2645_v7 = vld [vmem:[%s3557_s1 + $0x394] ss:$8 sps:$4 sm:$0xff]  }
  0xad   :  { %1913 = vmatprep.subr.bf16.mxu0 %v2564_v9  ;;  %v2648_v8 = vld [vmem:[%s3557_s1 + $0x794] ss:$8 sps:$4 sm:$0xff]   ;;  %v2643_v9 = vld [vmem:[%s3557_s1 + $0x390] ss:$8 sps:$4 sm:$0xff]  }
  0xaf   :  { %1750 = vmatpush1.bf16.msra.mxu1 %v2559_v10  ;;  %v2646_v10 = vld [vmem:[%s3557_s1 + $0x790] ss:$8 sps:$4 sm:$0xff]  }
  0xb0   :  { %1914 = vmatpush1.bf16.msra.mxu0 %v2562_v11  ;;  %1751 = vmatprep.subr.bf16.mxu1 %v2567_v12  ;;  %v2651_v11 = vld [vmem:[%s3557_s1 + $0x3a4] ss:$8 sps:$4 sm:$0xff]  }
  0xb1   :  { %1915 = vmatprep.subr.bf16.mxu0 %v2570_v13  ;;  %v2654_v12 = vld [vmem:[%s3557_s1 + $0x7a4] ss:$8 sps:$4 sm:$0xff]   ;;  %v2649_v13 = vld [vmem:[%s3557_s1 + $0x3a0] ss:$8 sps:$4 sm:$0xff]  }
  0xb3   :  { %1752 = vmatpush1.bf16.msra.mxu1 %v2565_v14  ;;  %v2652_v14 = vld [vmem:[%s3557_s1 + $0x7a0] ss:$8 sps:$4 sm:$0xff]  }
  0xb4   :  { %1916 = vmatpush1.bf16.msra.mxu0 %v2568_v15  ;;  %1753 = vmatprep.subr.bf16.mxu1 %v2573_v18  ;;  %v2657_v15 = vld [vmem:[%s3557_s1 + $0x3b4] ss:$8 sps:$4 sm:$0xff]  }
  0xb5   :  { %1917 = vmatprep.subr.bf16.mxu0 %v2576_v19  ;;  %v2660_v18 = vld [vmem:[%s3557_s1 + $0x7b4] ss:$8 sps:$4 sm:$0xff]   ;;  %v2655_v19 = vld [vmem:[%s3557_s1 + $0x3b0] ss:$8 sps:$4 sm:$0xff]  }
  0xb7   :  { %1754 = vmatpush1.bf16.msra.mxu1 %v2571_v20  ;;  %v2658_v20 = vld [vmem:[%s3557_s1 + $0x7b0] ss:$8 sps:$4 sm:$0xff]  }
  0xb8   :  { %1918 = vmatpush1.bf16.msra.mxu0 %v2574_v21  ;;  %1755 = vmatprep.subr.bf16.mxu1 %v2579_v22  ;;  %v2663_v21 = vld [vmem:[%s3557_s1 + $0x3c4] ss:$8 sps:$4 sm:$0xff]  }
  0xb9   :  { %1919 = vmatprep.subr.bf16.mxu0 %v2582_v23  ;;  %v2666_v22 = vld [vmem:[%s3557_s1 + $0x7c4] ss:$8 sps:$4 sm:$0xff]   ;;  %v2661_v23 = vld [vmem:[%s3557_s1 + $0x3c0] ss:$8 sps:$4 sm:$0xff]  }
  0xbb   :  { %1756 = vmatpush1.bf16.msra.mxu1 %v2577_v24  ;;  %v2664_v24 = vld [vmem:[%s3557_s1 + $0x7c0] ss:$8 sps:$4 sm:$0xff]  }
  0xbc   :  { %1920 = vmatpush1.bf16.msra.mxu0 %v2580_v25  ;;  %1757 = vmatprep.subr.bf16.mxu1 %v2585_v26  ;;  %v2669_v25 = vld [vmem:[%s3557_s1 + $0x3d4] ss:$8 sps:$4 sm:$0xff]  }
  0xbd   :  { %1921 = vmatprep.subr.bf16.mxu0 %v2588_v28  ;;  %v2672_v26 = vld [vmem:[%s3557_s1 + $0x7d4] ss:$8 sps:$4 sm:$0xff]   ;;  %v2667_v28 = vld [vmem:[%s3557_s1 + $0x3d0] ss:$8 sps:$4 sm:$0xff]  }
  0xbf   :  { %1758 = vmatpush1.bf16.msra.mxu1 %v2583_v33  ;;  %v2678_v33 = vld [vmem:[%s3557_s1 + $0x7e4] ss:$8 sps:$4 sm:$0xff]  }
  0xc0   :  { %1922 = vmatpush1.bf16.msra.mxu0 %v2586_v16  ;;  %1768 = vmatprep.subr.bf16.mxu1 %v2591_v17  ;;  %v2673_v16 = vld [vmem:[%s3557_s1 + $0x3e0] ss:$8 sps:$4 sm:$0xff]  }
  0xc1   :  { %1932 = vmatprep.subr.bf16.mxu0 %v2594_v27  ;;  %v2676_v17 = vld [vmem:[%s3557_s1 + $0x7e0] ss:$8 sps:$4 sm:$0xff]   ;;  %v2681_v27 = vld [vmem:[%s3557_s1 + $0x3f4] ss:$8 sps:$4 sm:$0xff]  }
  0xc2   :  { %1760 = vmatmul.mubr.bf16.vlgmr.msra.gmra.mrb[0].mxu1 %v3145_v29  ;;  %v2606_v29 = vld [vmem:[%s3557_s1 + $0x724] ss:$8 sps:$4 sm:$0xff]  }
  0xc3   :  { %1924 = vmatmul.mubr.bf16.vlgmr.msra.gmra.mrb[0].mxu0 %v3164_v34  ;;  %1769 = vmatpush1.bf16.msra.mxu1 %v2589_v36  ;;  %v2601_v34 = vld [vmem:[%s3557_s1 + $0x320] ss:$8 sps:$4 sm:$0xff]   ;;  %v2684_v36 = vld [vmem:[%s3557_s1 + $0x7f4] ss:$8 sps:$4 sm:$0xff]  }
  0xc4   :  { %1933 = vmatpush1.bf16.msra.mxu0 %v2592_v37  ;;  %1770 = vmatprep.subr.bf16.mxu1 %v2597_v38  ;;  %v2679_v37 = vld [vmem:[%s3557_s1 + $0x3f0] ss:$8 sps:$4 sm:$0xff]  }
  0xc5   :  { %1934 = vmatprep.subr.bf16.mxu0 %v2600_v49  ;;  %1800 = vmatprep.mubr.bf16.mxu1 %v314_v39  ;;  %v2682_v38 = vld [vmem:[%s3557_s1 + $0x7f0] ss:$8 sps:$4 sm:$0xff]   ;;  %v1977_v49 = vsub.s32 0, %v2830_v43  ;;  %v1973_v39 = vld [vmem:[%s3559_s2] sm:$0x3] }
  0xc6   :  { %1964 = vmatprep.mubr.bf16.mxu0 %v348_v40  ;;  %v1981_v40 = vsub.s32 1, %v2830_v43 }
  0xc7   :  { %1771 = vmatpush1.bf16.msra.mxu1 %v2595_v41  ;;  %v1987_v41 = vld [vmem:[%s3560_s3] sm:$0x3] }
  0xc8   :  { %1935 = vmatpush1.bf16.msra.mxu0 %v2598_v42  ;;  %1772 = vmatprep.subr.bf16.mxu1 %v2603_v44  ;;  %v1978_v42 = vrot.slane %v1973_v39, %v1977_v49 }
  0xc9   :  { %1936 = vmatprep.subr.bf16.mxu0 %v2606_v29 }
  0xcb   :  { %1773 = vmatpush1.bf16.msra.mxu1 %v2601_v34  ;;  %v1982_v34 = vrot.slane %v1973_v39, %v1981_v40 }
  0xcc   :  { %1937 = vmatpush1.bf16.msra.mxu0 %v2604_v45  ;;  %1774 = vmatprep.subr.bf16.mxu1 %v2609_v46 }
  0xcd   :  { %1938 = vmatprep.subr.bf16.mxu0 %v2612_v47 }
  0xcf   :  { %1775 = vmatpush1.bf16.msra.mxu1 %v2607_v48  ;;  %v1996_v48 = vrot.slane %v1987_v41, %v1981_v40 }
  0xd0   :  { %1939 = vmatpush1.bf16.msra.mxu0 %v2610_v50  ;;  %1776 = vmatprep.subr.bf16.mxu1 %v2615_v51 }
  0xd1   :  { %1940 = vmatprep.subr.bf16.mxu0 %v2618_v52 }
  0xd3   :  { %1777 = vmatpush1.bf16.msra.mxu1 %v2613_v53 }
  0xd4   :  { %1941 = vmatpush1.bf16.msra.mxu0 %v2616_v54  ;;  %1778 = vmatprep.subr.bf16.mxu1 %v2621_v55 }
  0xd5   :  { %1942 = vmatprep.subr.bf16.mxu0 %v2624_v56 }
  0xd7   :  { %1779 = vmatpush1.bf16.msra.mxu1 %v2619_v57 }
  0xd8   :  { %1943 = vmatpush1.bf16.msra.mxu0 %v2622_v58  ;;  %1780 = vmatprep.subr.bf16.mxu1 %v2627_v59 }
  0xd9   :  { %1944 = vmatprep.subr.bf16.mxu0 %v2630_v60 }
  0xdb   :  { %1781 = vmatpush1.bf16.msra.mxu1 %v2625_v61 }
  0xdc   :  { %1945 = vmatpush1.bf16.msra.mxu0 %v2628_v62  ;;  %1782 = vmatprep.subr.bf16.mxu1 %v2633_v63 }
  0xdd   :  { %1946 = vmatprep.subr.bf16.mxu0 %v2636_v0 }
  0xdf   :  { %1783 = vmatpush1.bf16.msra.mxu1 %v2631_v1 }
  0xe0   :  { %1947 = vmatpush1.bf16.msra.mxu0 %v2634_v2  ;;  %1784 = vmatprep.subr.bf16.mxu1 %v2639_v3 }
  0xe1   :  { %1948 = vmatprep.subr.bf16.mxu0 %v2642_v4 }
  0xe3   :  { %1785 = vmatpush1.bf16.msra.mxu1 %v2637_v5 }
  0xe4   :  { %1949 = vmatpush1.bf16.msra.mxu0 %v2640_v6  ;;  %1786 = vmatprep.subr.bf16.mxu1 %v2645_v7 }
  0xe5   :  { %1950 = vmatprep.subr.bf16.mxu0 %v2648_v8 }
  0xe7   :  { %1787 = vmatpush1.bf16.msra.mxu1 %v2643_v9 }
  0xe8   :  { %1951 = vmatpush1.bf16.msra.mxu0 %v2646_v10  ;;  %1788 = vmatprep.subr.bf16.mxu1 %v2651_v11 }
  0xe9   :  { %1952 = vmatprep.subr.bf16.mxu0 %v2654_v12 }
  0xeb   :  { %1789 = vmatpush1.bf16.msra.mxu1 %v2649_v13 }
  0xec   :  { %1953 = vmatpush1.bf16.msra.mxu0 %v2652_v14  ;;  %1790 = vmatprep.subr.bf16.mxu1 %v2657_v15 }
  0xed   :  { %1954 = vmatprep.subr.bf16.mxu0 %v2660_v18 }
  0xef   :  { %1791 = vmatpush1.bf16.msra.mxu1 %v2655_v19 }
  0xf0   :  { %1955 = vmatpush1.bf16.msra.mxu0 %v2658_v20  ;;  %1792 = vmatprep.subr.bf16.mxu1 %v2663_v21 }
  0xf1   :  { %1956 = vmatprep.subr.bf16.mxu0 %v2666_v22 }
  0xf3   :  { %1793 = vmatpush1.bf16.msra.mxu1 %v2661_v23 }
  0xf4   :  { %1957 = vmatpush1.bf16.msra.mxu0 %v2664_v24  ;;  %1794 = vmatprep.subr.bf16.mxu1 %v2669_v25 }
  0xf5   :  { %1958 = vmatprep.subr.bf16.mxu0 %v2672_v26 }
  0xf7   :  { %1795 = vmatpush1.bf16.msra.mxu1 %v2667_v28 }
  0xf8   :  { %1959 = vmatpush1.bf16.msra.mxu0 %v2670_v31  ;;  %1796 = vmatprep.subr.bf16.mxu1 %v2675_v32 }
  0xf9   :  { %1960 = vmatprep.subr.bf16.mxu0 %v2678_v33 }
  0xfb   :  { %1797 = vmatpush1.bf16.msra.mxu1 %v2673_v16 }
  0xfc   :  { %1961 = vmatpush1.bf16.msra.mxu0 %v2676_v17  ;;  %1798 = vmatprep.subr.bf16.mxu1 %v2681_v27 }
  0xfd   :  { %1962 = vmatprep.subr.bf16.mxu0 %v2684_v36 }
  0xff   :  { %1799 = vmatpush1.bf16.msra.mxu1 %v2679_v37 }
 0x100   :  { %1963 = vmatpush1.bf16.msra.mxu0 %v2682_v38 }
 0x102   :  { %1801 = vmatmul.mubr.bf16.vlgmr.msra.gmra.mrb[0].mxu1 %v3347_v30  ;;  %v1992_v30 = vrot.slane %v1987_v41, %v1977_v49 }
 0x103   :  { %1965 = vmatmul.mubr.bf16.vlgmr.msra.gmra.mrb[0].mxu0 %v3350_v35 }
 0x1d5   :  { %v1802_v44 = vpop.f32.mrb[0].mxu1 }
 0x1d6   :  { %v1966_v29 = vpop.f32.mrb[0].mxu0  ;;  %v1804_v46 = vpop.f32.mrb[1].mxu1 }
 0x1d7   :  { %v2272_v45 = vadd.f32 %v1966_v29, %v1802_v44  ;;  %v1968_v35 = vpop.f32.mrb[1].mxu0  ;;  %v1806_v50 = vpop.f32.mrb[2].mxu1 }
 0x1d8   :  { %v2273_v47 = vadd.f32 %v1968_v35, %v1804_v46  ;;  %v1970_v51 = vpop.f32.mrb[2].mxu0  ;;  %v1807_v53 = vpop.f32.mrb[3].mxu1 }
 0x1d9   :  { %v1985_v52 = vmul.f32 %v2272_v45, %v1978_v42  ;;  %v1971_v54 = vpop.f32.mrb[3].mxu0 }
 0x1da   :  { %v1986_v43 = vmul.f32 %v2273_v47, %v1982_v34 }
 0x1db   :  { %v1999_v55 = vadd.f32 %v1992_v30, %v1985_v52 }
 0x1dc   :  { %v2000_v56 = vadd.f32 %v1996_v48, %v1986_v43 }
 0x1dd   :  { %vm2001_vm0 = vcmp.ge.f32.partialorder %v1999_v55, 0.0  ;;  %v2003_v57 = vmul.f32 0.01, %v1999_v55 }
 0x1de   :  { %vm2002_vm1 = vcmp.ge.f32.partialorder %v2000_v56, 0.0  ;;  %v2004_v58 = vmul.f32 0.01, %v2000_v56 }
 0x1df   :  { %v2005_v59 = vsel %vm2001_vm0, %v1999_v55, %v2003_v57 }
 0x1e0   :  { %v2006_v60 = vsel %vm2002_vm1, %v2000_v56, %v2004_v58 }
 0x1e1   :  { %v2009_v61 = vcombine.low %v2005_v59, %v2006_v60 }
 0x1e3   :  { %2011 = vst [vmem:[%s3561_s4] sm:$0xff] %v2009_v61 }

// kernel: _lambda_.18
= control target key start
LH: loop header
LB: loop body
LE: loop exit
PB: predicated region body
PF: predicated region fallthrough
CT: control target
= control target key end

     0   :  { %s3138_s15 = smov 0   ;;  %s3140_s16 = smov 0   ;;  %s3516_s0 = inlined_call_operand.vmem [shape: bf16[4,1,2048], index: 0, kind: input, shape index: {}]   ;;  %s3517_s1 = inlined_call_operand.vmem [shape: bf16[4,2048,256], index: 1, kind: input, shape index: {}]   ;;  %s3518_s2 = inlined_call_operand.vmem [shape: f32[1,256], index: 2, kind: input, shape index: {}]   ;;  %s3519_s3 = inlined_call_operand.vmem [shape: f32[1,256], index: 3, kind: input, shape index: {}]   ;;  %s3520_s4 = inlined_call_operand.vmem [shape: f32[4,1,256], index: 4, kind: output, shape index: {}]  }
   0x1   :  { %s3142_s17 = smov 0  }
   0x2 LB: > { %s26_s18 = sadd.s32 1, %s3106_s16  ;;  %p2387_p0 = scmp.ge.s32.totalorder %s3110_s17, 1  ;;  %s3110_s17 = sphi %s3142_s17, %s14_s17   ;;  %s3106_s16 = sphi %s3140_s16, %s3522_s16   ;;  %s3102_s15 = sphi %s3138_s15, %s3521_s15  }
   0x3   : > { %p28_p1 = scmp.ge.s32.totalorder %s26_s18, 4  ;;  %p191_p2 = scmp.lt.s32.totalorder %s3110_s17, 5 }
   0x5   : > { %s3524_s18 = smov (%p28_p1, %s26_s18), 0  ;;  %p192_p3 = pnand %p2387_p0, %p191_p2 }
   0x6   : > { %p228_p4 = scmp.lt.s32.totalorder (!%p192_p3), %s3102_s15, 3  ;;  %v3112_v36 = vmov (!%p192_p3), 1966171168   ;;  %v513_v38 = vlaneseq (!%p192_p3) }
   0x7   : > { %195 = sbr.rel (%p192_p3) target bundleno = 504 (0x1f8), region = 36  ;;  %v511_v37 = vunpack.c.l.s4 (!%p192_p3), %v3112_v36 }
   0x8   : > { %v3204_v43 = vshrl.u32 (!%p192_p3), %v513_v38, 7  ;;  %vm2285_vm2 = vcmp.lt.s32.totalorder (!%p192_p3), %v513_v38, 256 }
   0x9   : > { %v512_v42 = vunpack.c.0.s8 (!%p192_p3), %v511_v37 }
   0xb   : > { %v3216_v49 = vsub.s32 (!%p192_p3), %v512_v42, %v3204_v43 }
   0xe   : > { %s3526_s15 = smov (!%p228_p4, %s3102_s15), 3 }
   0xf   : > { %s2650_s19 = sshll.u32 %s3526_s15, 11  ;;  %s2388_s23 = sshll.u32 %s3526_s15, 4 }
  0x10   : > { %s3162_s22 = scalar_lea.vmem %s3517_s1, %s2650_s19  ;;  %s235_s26 = scalar_lea.vmem %s3516_s0, %s2388_s23 }
  0x11   : > { %v2702_v0 = vld [vmem:[%s3162_s22 + $0x4] ss:$8 sps:$4 sm:$0xff]   ;;  %v2706_v2 = vld [vmem:[%s3162_s22] ss:$8 sps:$4 sm:$0xff]   ;;  %v2708_v4 = vld [vmem:[%s3162_s22 + $0x14] ss:$8 sps:$4 sm:$0xff]  }
  0x12   : > { %v2704_v1 = vld [vmem:[%s3162_s22 + $0x404] ss:$8 sps:$4 sm:$0xff]   ;;  %1903 = vmatprep.subr.bf16.mxu1 %v2702_v0  ;;  %v2707_v3 = vld [vmem:[%s3162_s22 + $0x400] ss:$8 sps:$4 sm:$0xff]   ;;  %v2710_v5 = vld [vmem:[%s3162_s22 + $0x414] ss:$8 sps:$4 sm:$0xff]  }
  0x13   : > { %2067 = vmatprep.subr.bf16.mxu0 %v2704_v1  ;;  %1904 = vmatpush1.bf16.msra.mxu1 %v2706_v2  ;;  %v2712_v6 = vld [vmem:[%s3162_s22 + $0x10] ss:$8 sps:$4 sm:$0xff]   ;;  %v2714_v8 = vld [vmem:[%s3162_s22 + $0x24] ss:$8 sps:$4 sm:$0xff]   ;;  %v2718_v10 = vld [vmem:[%s3162_s22 + $0x20] ss:$8 sps:$4 sm:$0xff]  }
  0x14   : > { %2068 = vmatpush1.bf16.msra.mxu0 %v2707_v3  ;;  %1905 = vmatprep.subr.bf16.mxu1 %v2708_v4  ;;  %v2713_v7 = vld [vmem:[%s3162_s22 + $0x410] ss:$8 sps:$4 sm:$0xff]   ;;  %v2716_v9 = vld [vmem:[%s3162_s22 + $0x424] ss:$8 sps:$4 sm:$0xff]   ;;  %v2719_v11 = vld [vmem:[%s3162_s22 + $0x420] ss:$8 sps:$4 sm:$0xff]  }
  0x15   : > { %2069 = vmatprep.subr.bf16.mxu0 %v2710_v5  ;;  %v2720_v12 = vld [vmem:[%s3162_s22 + $0x34] ss:$8 sps:$4 sm:$0xff]   ;;  %v2724_v14 = vld [vmem:[%s3162_s22 + $0x30] ss:$8 sps:$4 sm:$0xff]   ;;  %v2726_v16 = vld [vmem:[%s3162_s22 + $0x44] ss:$8 sps:$4 sm:$0xff]  }
  0x16   : > { %v2722_v13 = vld [vmem:[%s3162_s22 + $0x434] ss:$8 sps:$4 sm:$0xff]   ;;  %v2725_v15 = vld [vmem:[%s3162_s22 + $0x430] ss:$8 sps:$4 sm:$0xff]   ;;  %v2728_v17 = vld [vmem:[%s3162_s22 + $0x444] ss:$8 sps:$4 sm:$0xff]  }
  0x17   : > { %1906 = vmatpush1.bf16.msra.mxu1 %v2712_v6  ;;  %v2730_v18 = vld [vmem:[%s3162_s22 + $0x40] ss:$8 sps:$4 sm:$0xff]   ;;  %v2732_v20 = vld [vmem:[%s3162_s22 + $0x54] ss:$8 sps:$4 sm:$0xff]   ;;  %v2736_v22 = vld [vmem:[%s3162_s22 + $0x50] ss:$8 sps:$4 sm:$0xff]  }
  0x18   : > { %2070 = vmatpush1.bf16.msra.mxu0 %v2713_v7  ;;  %1907 = vmatprep.subr.bf16.mxu1 %v2714_v8  ;;  %v2731_v19 = vld [vmem:[%s3162_s22 + $0x440] ss:$8 sps:$4 sm:$0xff]   ;;  %v2734_v21 = vld [vmem:[%s3162_s22 + $0x454] ss:$8 sps:$4 sm:$0xff]   ;;  %v2737_v23 = vld [vmem:[%s3162_s22 + $0x450] ss:$8 sps:$4 sm:$0xff]  }
  0x19   : > { %2071 = vmatprep.subr.bf16.mxu0 %v2716_v9  ;;  %v2738_v24 = vld [vmem:[%s3162_s22 + $0x64] ss:$8 sps:$4 sm:$0xff]   ;;  %v2742_v26 = vld [vmem:[%s3162_s22 + $0x60] ss:$8 sps:$4 sm:$0xff]   ;;  %v2744_v28 = vld [vmem:[%s3162_s22 + $0x74] ss:$8 sps:$4 sm:$0xff]  }
  0x1a   : > { %v2740_v25 = vld [vmem:[%s3162_s22 + $0x464] ss:$8 sps:$4 sm:$0xff]   ;;  %v2743_v27 = vld [vmem:[%s3162_s22 + $0x460] ss:$8 sps:$4 sm:$0xff]   ;;  %v2746_v29 = vld [vmem:[%s3162_s22 + $0x474] ss:$8 sps:$4 sm:$0xff]  }
  0x1b   : > { %1908 = vmatpush1.bf16.msra.mxu1 %v2718_v10  ;;  %v2748_v30 = vld [vmem:[%s3162_s22 + $0x70] ss:$8 sps:$4 sm:$0xff]   ;;  %v2750_v32 = vld [vmem:[%s3162_s22 + $0x84] ss:$8 sps:$4 sm:$0xff]   ;;  %v2754_v34 = vld [vmem:[%s3162_s22 + $0x80] ss:$8 sps:$4 sm:$0xff]  }
  0x1c   : > { %2072 = vmatpush1.bf16.msra.mxu0 %v2719_v11  ;;  %1909 = vmatprep.subr.bf16.mxu1 %v2720_v12  ;;  %v2749_v31 = vld [vmem:[%s3162_s22 + $0x470] ss:$8 sps:$4 sm:$0xff]   ;;  %v2752_v33 = vld [vmem:[%s3162_s22 + $0x484] ss:$8 sps:$4 sm:$0xff]   ;;  %v2755_v35 = vld [vmem:[%s3162_s22 + $0x480] ss:$8 sps:$4 sm:$0xff]  }
  0x1d   : > { %2073 = vmatprep.subr.bf16.mxu0 %v2722_v13  ;;  %v2756_v39 = vld [vmem:[%s3162_s22 + $0x94] ss:$8 sps:$4 sm:$0xff]   ;;  %v2760_v41 = vld [vmem:[%s3162_s22 + $0x90] ss:$8 sps:$4 sm:$0xff]   ;;  %v2762_v45 = vld [vmem:[%s3162_s22 + $0xa4] ss:$8 sps:$4 sm:$0xff]  }
  0x1e   : > { %v2758_v40 = vld [vmem:[%s3162_s22 + $0x494] ss:$8 sps:$4 sm:$0xff]   ;;  %v2761_v44 = vld [vmem:[%s3162_s22 + $0x490] ss:$8 sps:$4 sm:$0xff]   ;;  %v2764_v46 = vld [vmem:[%s3162_s22 + $0x4a4] ss:$8 sps:$4 sm:$0xff]  }
  0x1f   : > { %1910 = vmatpush1.bf16.msra.mxu1 %v2724_v14  ;;  %v2766_v47 = vld [vmem:[%s3162_s22 + $0xa0] ss:$8 sps:$4 sm:$0xff]   ;;  %v2768_v50 = vld [vmem:[%s3162_s22 + $0xb4] ss:$8 sps:$4 sm:$0xff]   ;;  %v2772_v53 = vld [vmem:[%s3162_s22 + $0xb0] ss:$8 sps:$4 sm:$0xff]  }
  0x20   : > { %2074 = vmatpush1.bf16.msra.mxu0 %v2725_v15  ;;  %1911 = vmatprep.subr.bf16.mxu1 %v2726_v16  ;;  %v2767_v48 = vld [vmem:[%s3162_s22 + $0x4a0] ss:$8 sps:$4 sm:$0xff]   ;;  %v2770_v51 = vld [vmem:[%s3162_s22 + $0x4b4] ss:$8 sps:$4 sm:$0xff]   ;;  %v2773_v55 = vld [vmem:[%s3162_s22 + $0x4b0] ss:$8 sps:$4 sm:$0xff]  }
  0x21   : > { %2075 = vmatprep.subr.bf16.mxu0 %v2728_v17  ;;  %v3220_v52 = vld [vmem:[%s235_s26] sm:$0xff]  ;;  %v3226_v56 = vld [vmem:[%s235_s26 + $0x8] sm:$0xff]  ;;  %v2780_v1 = vld [vmem:[%s3162_s22 + $0xd4] ss:$8 sps:$4 sm:$0xff]   ;;  %s2391_s5 = sshll.u32 %s3526_s15, 1 }
  0x22   : > { %v516_v54 = vrot.slane %v3220_v52, %v3216_v49  ;;  %v2774_v57 = vld [vmem:[%s3162_s22 + $0xc4] ss:$8 sps:$4 sm:$0xff]   ;;  %v565_v60 = vrot.slane %v3226_v56, %v3216_v49  ;;  %v2778_v63 = vld [vmem:[%s3162_s22 + $0xc0] ss:$8 sps:$4 sm:$0xff]   ;;  %v2782_v2 = vld [vmem:[%s3162_s22 + $0x4d4] ss:$8 sps:$4 sm:$0xff]   ;;  %s248_s8 = scalar_lea.vmem %s3520_s4, %s2391_s5 }
  0x23   : > { %1912 = vmatpush1.bf16.msra.mxu1 %v2730_v18  ;;  %v2776_v58 = vld [vmem:[%s3162_s22 + $0x4c4] ss:$8 sps:$4 sm:$0xff]   ;;  %v2779_v0 = vld [vmem:[%s3162_s22 + $0x4c0] ss:$8 sps:$4 sm:$0xff]   ;;  %v2784_v4 = vld [vmem:[%s3162_s22 + $0xd0] ss:$8 sps:$4 sm:$0xff]  }
  0x24   : > { %2076 = vmatpush1.bf16.msra.mxu0 %v2731_v19  ;;  %1913 = vmatprep.subr.bf16.mxu1 %v2732_v20  ;;  %v524_v59 = vcombine.high %v516_v54, %v516_v54  ;;  %v573_v62 = vcombine.high %v565_v60, %v565_v60  ;;  %v2785_v5 = vld [vmem:[%s3162_s22 + $0x4d0] ss:$8 sps:$4 sm:$0xff]   ;;  %v2786_v6 = vld [vmem:[%s3162_s22 + $0xe4] ss:$8 sps:$4 sm:$0xff]   ;;  %v2790_v8 = vld [vmem:[%s3162_s22 + $0xe0] ss:$8 sps:$4 sm:$0xff]   ;;  %v3251_v16 = vrot.slane %v516_v54, %v3216_v49 }
  0x25   : > { %2077 = vmatprep.subr.bf16.mxu0 %v2734_v21  ;;  %v2788_v7 = vld [vmem:[%s3162_s22 + $0x4e4] ss:$8 sps:$4 sm:$0xff]   ;;  %v2791_v9 = vld [vmem:[%s3162_s22 + $0x4e0] ss:$8 sps:$4 sm:$0xff]   ;;  %v2792_v10 = vld [vmem:[%s3162_s22 + $0xf4] ss:$8 sps:$4 sm:$0xff]   ;;  %v3254_v17 = vrot.slane %v565_v60, %v3216_v49 }
  0x26   : > { %v546_v61 = vrot.slane %v524_v59, %v3216_v49  ;;  %v595_v3 = vrot.slane %v573_v62, %v3216_v49  ;;  %v2794_v11 = vld [vmem:[%s3162_s22 + $0x4f4] ss:$8 sps:$4 sm:$0xff]   ;;  %v2796_v12 = vld [vmem:[%s3162_s22 + $0xf0] ss:$8 sps:$4 sm:$0xff]   ;;  %v2801_v14 = vld [vmem:[%s3162_s22 + $0x104] ss:$8 sps:$4 sm:$0xff]  }
  0x27   : > { %1914 = vmatpush1.bf16.msra.mxu1 %v2736_v22  ;;  %v2797_v13 = vld [vmem:[%s3162_s22 + $0x4f0] ss:$8 sps:$4 sm:$0xff]   ;;  %v2805_v15 = vld [vmem:[%s3162_s22 + $0x504] ss:$8 sps:$4 sm:$0xff]   ;;  %v2799_v18 = vld [vmem:[%s3162_s22 + $0x100] ss:$8 sps:$4 sm:$0xff]  }
  0x28   : > { %2078 = vmatpush1.bf16.msra.mxu0 %v2737_v23  ;;  %1915 = vmatprep.subr.bf16.mxu1 %v2738_v24  ;;  %v2803_v19 = vld [vmem:[%s3162_s22 + $0x500] ss:$8 sps:$4 sm:$0xff]   ;;  %v2808_v20 = vld [vmem:[%s3162_s22 + $0x114] ss:$8 sps:$4 sm:$0xff]   ;;  %v556_v22 = vcombine.high %v546_v61, %v546_v61  ;;  %v605_v23 = vcombine.high %v595_v3, %v595_v3  ;;  %v2806_v24 = vld [vmem:[%s3162_s22 + $0x110] ss:$8 sps:$4 sm:$0xff]  }
  0x29   : > { %2079 = vmatprep.subr.bf16.mxu0 %v2740_v25  ;;  %1935 = vmatprep.mubr.bf16.mxu1 %v546_v61  ;;  %v2811_v21 = vld [vmem:[%s3162_s22 + $0x514] ss:$8 sps:$4 sm:$0xff]   ;;  %v2809_v25 = vld [vmem:[%s3162_s22 + $0x510] ss:$8 sps:$4 sm:$0xff]   ;;  %v2824_v36 = vld [vmem:[%s3162_s22 + $0x140] ss:$8 sps:$4 sm:$0xff]  }
  0x2a   : > { %2099 = vmatprep.mubr.bf16.mxu0 %v595_v3  ;;  %v2827_v37 = vld [vmem:[%s3162_s22 + $0x540] ss:$8 sps:$4 sm:$0xff]   ;;  %v2833_v42 = vld [vmem:[%s3162_s22 + $0x550] ss:$8 sps:$4 sm:$0xff]   ;;  %v2850_v54 = vld [vmem:[%s3162_s22 + $0x184] ss:$8 sps:$4 sm:$0xff]  }
  0x2b   : > { %1916 = vmatpush1.bf16.msra.mxu1 %v2742_v26  ;;  %v2814_v26 = vld [vmem:[%s3162_s22 + $0x124] ss:$8 sps:$4 sm:$0xff]   ;;  %v2856_v59 = vld [vmem:[%s3162_s22 + $0x194] ss:$8 sps:$4 sm:$0xff]   ;;  %v2854_v61 = vld [vmem:[%s3162_s22 + $0x190] ss:$8 sps:$4 sm:$0xff]  }
  0x2c   : > { %2080 = vmatpush1.bf16.msra.mxu0 %v2743_v27  ;;  %1917 = vmatprep.subr.bf16.mxu1 %v2744_v28  ;;  %v2817_v27 = vld [vmem:[%s3162_s22 + $0x524] ss:$8 sps:$4 sm:$0xff]   ;;  %v2812_v28 = vld [vmem:[%s3162_s22 + $0x120] ss:$8 sps:$4 sm:$0xff]   ;;  %v2859_v60 = vld [vmem:[%s3162_s22 + $0x594] ss:$8 sps:$4 sm:$0xff]  }
  0x2d   : > { %2081 = vmatprep.subr.bf16.mxu0 %v2746_v29  ;;  %v2815_v29 = vld [vmem:[%s3162_s22 + $0x520] ss:$8 sps:$4 sm:$0xff]   ;;  %v2857_v62 = vld [vmem:[%s3162_s22 + $0x590] ss:$8 sps:$4 sm:$0xff]   ;;  %v2868_v3 = vld [vmem:[%s3162_s22 + $0x1b4] ss:$8 sps:$4 sm:$0xff]  }
  0x2f   : > { %1918 = vmatpush1.bf16.msra.mxu1 %v2748_v30  ;;  %v2820_v30 = vld [vmem:[%s3162_s22 + $0x134] ss:$8 sps:$4 sm:$0xff]  }
  0x30   : > { %2082 = vmatpush1.bf16.msra.mxu0 %v2749_v31  ;;  %1919 = vmatprep.subr.bf16.mxu1 %v2750_v32  ;;  %v2823_v31 = vld [vmem:[%s3162_s22 + $0x534] ss:$8 sps:$4 sm:$0xff]   ;;  %v2818_v32 = vld [vmem:[%s3162_s22 + $0x130] ss:$8 sps:$4 sm:$0xff]  }
  0x31   : > { %2083 = vmatprep.subr.bf16.mxu0 %v2752_v33  ;;  %v2821_v33 = vld [vmem:[%s3162_s22 + $0x530] ss:$8 sps:$4 sm:$0xff]  }
  0x33   : > { %1920 = vmatpush1.bf16.msra.mxu1 %v2754_v34  ;;  %v2826_v34 = vld [vmem:[%s3162_s22 + $0x144] ss:$8 sps:$4 sm:$0xff]  }
  0x34   : > { %2084 = vmatpush1.bf16.msra.mxu0 %v2755_v35  ;;  %1921 = vmatprep.subr.bf16.mxu1 %v2756_v39  ;;  %v2829_v35 = vld [vmem:[%s3162_s22 + $0x544] ss:$8 sps:$4 sm:$0xff]   ;;  %v2832_v39 = vld [vmem:[%s3162_s22 + $0x154] ss:$8 sps:$4 sm:$0xff]  }
  0x35   : > { %2085 = vmatprep.subr.bf16.mxu0 %v2758_v40  ;;  %v2835_v40 = vld [vmem:[%s3162_s22 + $0x554] ss:$8 sps:$4 sm:$0xff]  }
  0x37   : > { %1922 = vmatpush1.bf16.msra.mxu1 %v2760_v41  ;;  %v2830_v41 = vld [vmem:[%s3162_s22 + $0x150] ss:$8 sps:$4 sm:$0xff]  }
  0x38   : > { %2086 = vmatpush1.bf16.msra.mxu0 %v2761_v44  ;;  %1923 = vmatprep.subr.bf16.mxu1 %v2762_v45  ;;  %v2838_v44 = vld [vmem:[%s3162_s22 + $0x164] ss:$8 sps:$4 sm:$0xff]  }
  0x39   : > { %2087 = vmatprep.subr.bf16.mxu0 %v2764_v46  ;;  %v2841_v45 = vld [vmem:[%s3162_s22 + $0x564] ss:$8 sps:$4 sm:$0xff]   ;;  %v2836_v46 = vld [vmem:[%s3162_s22 + $0x160] ss:$8 sps:$4 sm:$0xff]  }
  0x3b   : > { %1924 = vmatpush1.bf16.msra.mxu1 %v2766_v47  ;;  %v2839_v47 = vld [vmem:[%s3162_s22 + $0x560] ss:$8 sps:$4 sm:$0xff]  }
  0x3c   : > { %2088 = vmatpush1.bf16.msra.mxu0 %v2767_v48  ;;  %1925 = vmatprep.subr.bf16.mxu1 %v2768_v50  ;;  %v2844_v48 = vld [vmem:[%s3162_s22 + $0x174] ss:$8 sps:$4 sm:$0xff]  }
  0x3d   : > { %2089 = vmatprep.subr.bf16.mxu0 %v2770_v51  ;;  %v2847_v50 = vld [vmem:[%s3162_s22 + $0x574] ss:$8 sps:$4 sm:$0xff]   ;;  %v2842_v51 = vld [vmem:[%s3162_s22 + $0x170] ss:$8 sps:$4 sm:$0xff]  }
  0x3f   : > { %1926 = vmatpush1.bf16.msra.mxu1 %v2772_v53  ;;  %v2845_v53 = vld [vmem:[%s3162_s22 + $0x570] ss:$8 sps:$4 sm:$0xff]  }
  0x40   : > { %2090 = vmatpush1.bf16.msra.mxu0 %v2773_v55  ;;  %1927 = vmatprep.subr.bf16.mxu1 %v2774_v57  ;;  %v2853_v55 = vld [vmem:[%s3162_s22 + $0x584] ss:$8 sps:$4 sm:$0xff]   ;;  %v2848_v57 = vld [vmem:[%s3162_s22 + $0x180] ss:$8 sps:$4 sm:$0xff]  }
  0x41   : > { %2091 = vmatprep.subr.bf16.mxu0 %v2776_v58  ;;  %v2851_v58 = vld [vmem:[%s3162_s22 + $0x580] ss:$8 sps:$4 sm:$0xff]  }
  0x43   : > { %1928 = vmatpush1.bf16.msra.mxu1 %v2778_v63  ;;  %v2862_v63 = vld [vmem:[%s3162_s22 + $0x1a4] ss:$8 sps:$4 sm:$0xff]  }
  0x44   : > { %2092 = vmatpush1.bf16.msra.mxu0 %v2779_v0  ;;  %1929 = vmatprep.subr.bf16.mxu1 %v2780_v1  ;;  %v2865_v0 = vld [vmem:[%s3162_s22 + $0x5a4] ss:$8 sps:$4 sm:$0xff]   ;;  %v2860_v1 = vld [vmem:[%s3162_s22 + $0x1a0] ss:$8 sps:$4 sm:$0xff]  }
  0x45   : > { %2093 = vmatprep.subr.bf16.mxu0 %v2782_v2  ;;  %v2863_v2 = vld [vmem:[%s3162_s22 + $0x5a0] ss:$8 sps:$4 sm:$0xff]  }
  0x47   : > { %1930 = vmatpush1.bf16.msra.mxu1 %v2784_v4  ;;  %v2871_v4 = vld [vmem:[%s3162_s22 + $0x5b4] ss:$8 sps:$4 sm:$0xff]  }
  0x48   : > { %2094 = vmatpush1.bf16.msra.mxu0 %v2785_v5  ;;  %1931 = vmatprep.subr.bf16.mxu1 %v2786_v6  ;;  %v2866_v5 = vld [vmem:[%s3162_s22 + $0x1b0] ss:$8 sps:$4 sm:$0xff]  }
  0x49   : > { %2095 = vmatprep.subr.bf16.mxu0 %v2788_v7  ;;  %v2869_v6 = vld [vmem:[%s3162_s22 + $0x5b0] ss:$8 sps:$4 sm:$0xff]   ;;  %v2874_v7 = vld [vmem:[%s3162_s22 + $0x1c4] ss:$8 sps:$4 sm:$0xff]  }
  0x4b   : > { %1932 = vmatpush1.bf16.msra.mxu1 %v2790_v8  ;;  %v2877_v8 = vld [vmem:[%s3162_s22 + $0x5c4] ss:$8 sps:$4 sm:$0xff]  }
  0x4c   : > { %2096 = vmatpush1.bf16.msra.mxu0 %v2791_v9  ;;  %1933 = vmatprep.subr.bf16.mxu1 %v2792_v10  ;;  %v2872_v9 = vld [vmem:[%s3162_s22 + $0x1c0] ss:$8 sps:$4 sm:$0xff]  }
  0x4d   : > { %2097 = vmatprep.subr.bf16.mxu0 %v2794_v11  ;;  %v2875_v10 = vld [vmem:[%s3162_s22 + $0x5c0] ss:$8 sps:$4 sm:$0xff]   ;;  %v2880_v11 = vld [vmem:[%s3162_s22 + $0x1d4] ss:$8 sps:$4 sm:$0xff]  }
  0x4f   : > { %1934 = vmatpush1.bf16.msra.mxu1 %v2796_v12  ;;  %v2883_v12 = vld [vmem:[%s3162_s22 + $0x5d4] ss:$8 sps:$4 sm:$0xff]  }
  0x50   : > { %2098 = vmatpush1.bf16.msra.mxu0 %v2797_v13  ;;  %1944 = vmatprep.subr.bf16.mxu1 %v2801_v14  ;;  %v2878_v13 = vld [vmem:[%s3162_s22 + $0x1d0] ss:$8 sps:$4 sm:$0xff]  }
  0x51   : > { %2108 = vmatprep.subr.bf16.mxu0 %v2805_v15  ;;  %v2881_v14 = vld [vmem:[%s3162_s22 + $0x5d0] ss:$8 sps:$4 sm:$0xff]   ;;  %v2886_v15 = vld [vmem:[%s3162_s22 + $0x1e4] ss:$8 sps:$4 sm:$0xff]  }
  0x52   : > { %1936 = vmatmul.mubr.bf16.vlgmr.msra.gmra.mrb[0].mxu1 %v3251_v16 }
  0x53   : > { %2100 = vmatmul.mubr.bf16.vlgmr.msra.gmra.mrb[0].mxu0 %v3254_v17  ;;  %1945 = vmatpush1.bf16.msra.mxu1 %v2799_v18  ;;  %v2889_v18 = vld [vmem:[%s3162_s22 + $0x5e4] ss:$8 sps:$4 sm:$0xff]  }
  0x54   : > { %2109 = vmatpush1.bf16.msra.mxu0 %v2803_v19  ;;  %1946 = vmatprep.subr.bf16.mxu1 %v2808_v20  ;;  %v509_v19 = vcombine.high %v3220_v52, %v3220_v52  ;;  %v558_v20 = vcombine.high %v3226_v56, %v3226_v56  ;;  %v2890_v52 = vld [vmem:[%s3162_s22 + $0x1f0] ss:$8 sps:$4 sm:$0xff]  }
  0x55   : > { %2110 = vmatprep.subr.bf16.mxu0 %v2811_v21  ;;  %1976 = vmatprep.mubr.bf16.mxu1 %v556_v22  ;;  %v2884_v21 = vld [vmem:[%s3162_s22 + $0x1e0] ss:$8 sps:$4 sm:$0xff]   ;;  %v2893_v56 = vld [vmem:[%s3162_s22 + $0x5f0] ss:$8 sps:$4 sm:$0xff]  }
  0x56   : > { %2140 = vmatprep.mubr.bf16.mxu0 %v605_v23  ;;  %v2887_v22 = vld [vmem:[%s3162_s22 + $0x5e0] ss:$8 sps:$4 sm:$0xff]   ;;  %v2892_v23 = vld [vmem:[%s3162_s22 + $0x1f4] ss:$8 sps:$4 sm:$0xff]  }
  0x57   : > { %1947 = vmatpush1.bf16.msra.mxu1 %v2806_v24  ;;  %v2895_v24 = vld [vmem:[%s3162_s22 + $0x5f4] ss:$8 sps:$4 sm:$0xff]  }
  0x58   : > { %2111 = vmatpush1.bf16.msra.mxu0 %v2809_v25  ;;  %1948 = vmatprep.subr.bf16.mxu1 %v2814_v26  ;;  %v3323_v25 = vrot.slane %v509_v19, %v3216_v49  ;;  %v3326_v26 = vrot.slane %v558_v20, %v3216_v49  ;;  %v2967_v19 = vld [vmem:[%s3162_s22 + $0x6b4] ss:$8 sps:$4 sm:$0xff]   ;;  %v2962_v20 = vld [vmem:[%s3162_s22 + $0x2b0] ss:$8 sps:$4 sm:$0xff]  }
  0x59   : > { %2112 = vmatprep.subr.bf16.mxu0 %v2817_v27  ;;  %v2898_v27 = vld [vmem:[%s3162_s22 + $0x204] ss:$8 sps:$4 sm:$0xff]  }
  0x5b   : > { %1949 = vmatpush1.bf16.msra.mxu1 %v2812_v28  ;;  %v2901_v28 = vld [vmem:[%s3162_s22 + $0x604] ss:$8 sps:$4 sm:$0xff]  }
  0x5c   : > { %2113 = vmatpush1.bf16.msra.mxu0 %v2815_v29  ;;  %1950 = vmatprep.subr.bf16.mxu1 %v2820_v30  ;;  %v525_v29 = vcombine.high %v3323_v25, %v3323_v25  ;;  %v574_v30 = vcombine.high %v3326_v26, %v3326_v26 }
  0x5d   : > { %2114 = vmatprep.subr.bf16.mxu0 %v2823_v31  ;;  %v554_v31 = vcombine.high %v3251_v16, %v3251_v16 }
  0x5e   : > { %v3348_v16 = vrot.slane %v574_v30, %v3216_v49  ;;  %v2982_v30 = vld [vmem:[%s3162_s22 + $0x2e4] ss:$8 sps:$4 sm:$0xff]  }
  0x5f   : > { %1951 = vmatpush1.bf16.msra.mxu1 %v2818_v32  ;;  %v603_v32 = vcombine.high %v3254_v17, %v3254_v17  ;;  %v2902_v17 = vld [vmem:[%s3162_s22 + $0x210] ss:$8 sps:$4 sm:$0xff]  }
  0x60   : > { %2115 = vmatpush1.bf16.msra.mxu0 %v2821_v33  ;;  %1952 = vmatprep.subr.bf16.mxu1 %v2826_v34  ;;  %v2896_v33 = vld [vmem:[%s3162_s22 + $0x200] ss:$8 sps:$4 sm:$0xff]  }
  0x61   : > { %2116 = vmatprep.subr.bf16.mxu0 %v2829_v35  ;;  %v2899_v34 = vld [vmem:[%s3162_s22 + $0x600] ss:$8 sps:$4 sm:$0xff]   ;;  %v2904_v35 = vld [vmem:[%s3162_s22 + $0x214] ss:$8 sps:$4 sm:$0xff]  }
  0x63   : > { %1953 = vmatpush1.bf16.msra.mxu1 %v2824_v36  ;;  %v2907_v36 = vld [vmem:[%s3162_s22 + $0x614] ss:$8 sps:$4 sm:$0xff]  }
  0x64   : > { %2117 = vmatpush1.bf16.msra.mxu0 %v2827_v37  ;;  %1954 = vmatprep.subr.bf16.mxu1 %v2832_v39  ;;  %v3345_v37 = vrot.slane %v525_v29, %v3216_v49  ;;  %v2905_v39 = vld [vmem:[%s3162_s22 + $0x610] ss:$8 sps:$4 sm:$0xff]  }
  0x65   : > { %2118 = vmatprep.subr.bf16.mxu0 %v2835_v40  ;;  %v2910_v40 = vld [vmem:[%s3162_s22 + $0x224] ss:$8 sps:$4 sm:$0xff]   ;;  %v2977_v29 = vld [vmem:[%s3162_s22 + $0x6d0] ss:$8 sps:$4 sm:$0xff]  }
  0x67   : > { %1955 = vmatpush1.bf16.msra.mxu1 %v2830_v41  ;;  %v2913_v41 = vld [vmem:[%s3162_s22 + $0x624] ss:$8 sps:$4 sm:$0xff]  }
  0x68   : > { %2119 = vmatpush1.bf16.msra.mxu0 %v2833_v42  ;;  %1956 = vmatprep.subr.bf16.mxu1 %v2838_v44  ;;  %v2908_v42 = vld [vmem:[%s3162_s22 + $0x220] ss:$8 sps:$4 sm:$0xff]  }
  0x69   : > { %2120 = vmatprep.subr.bf16.mxu0 %v2841_v45  ;;  %v2911_v44 = vld [vmem:[%s3162_s22 + $0x620] ss:$8 sps:$4 sm:$0xff]   ;;  %v2916_v45 = vld [vmem:[%s3162_s22 + $0x234] ss:$8 sps:$4 sm:$0xff]  }
  0x6b   : > { %1957 = vmatpush1.bf16.msra.mxu1 %v2836_v46  ;;  %v2919_v46 = vld [vmem:[%s3162_s22 + $0x634] ss:$8 sps:$4 sm:$0xff]  }
  0x6c   : > { %2121 = vmatpush1.bf16.msra.mxu0 %v2839_v47  ;;  %1958 = vmatprep.subr.bf16.mxu1 %v2844_v48  ;;  %v2914_v47 = vld [vmem:[%s3162_s22 + $0x230] ss:$8 sps:$4 sm:$0xff]  }
  0x6d   : > { %2122 = vmatprep.subr.bf16.mxu0 %v2847_v50  ;;  %v2917_v48 = vld [vmem:[%s3162_s22 + $0x630] ss:$8 sps:$4 sm:$0xff]   ;;  %v2922_v50 = vld [vmem:[%s3162_s22 + $0x244] ss:$8 sps:$4 sm:$0xff]  }
  0x6f   : > { %1959 = vmatpush1.bf16.msra.mxu1 %v2842_v51  ;;  %v2925_v51 = vld [vmem:[%s3162_s22 + $0x644] ss:$8 sps:$4 sm:$0xff]  }
  0x70   : > { %2123 = vmatpush1.bf16.msra.mxu0 %v2845_v53  ;;  %1960 = vmatprep.subr.bf16.mxu1 %v2850_v54  ;;  %v2920_v53 = vld [vmem:[%s3162_s22 + $0x240] ss:$8 sps:$4 sm:$0xff]  }
  0x71   : > { %2124 = vmatprep.subr.bf16.mxu0 %v2853_v55  ;;  %v2923_v54 = vld [vmem:[%s3162_s22 + $0x640] ss:$8 sps:$4 sm:$0xff]   ;;  %v2928_v55 = vld [vmem:[%s3162_s22 + $0x254] ss:$8 sps:$4 sm:$0xff]  }
  0x73   : > { %1961 = vmatpush1.bf16.msra.mxu1 %v2848_v57  ;;  %v2931_v57 = vld [vmem:[%s3162_s22 + $0x654] ss:$8 sps:$4 sm:$0xff]  }
  0x74   : > { %2125 = vmatpush1.bf16.msra.mxu0 %v2851_v58  ;;  %1962 = vmatprep.subr.bf16.mxu1 %v2856_v59  ;;  %v2926_v58 = vld [vmem:[%s3162_s22 + $0x250] ss:$8 sps:$4 sm:$0xff]  }
  0x75   : > { %2126 = vmatprep.subr.bf16.mxu0 %v2859_v60  ;;  %v2929_v59 = vld [vmem:[%s3162_s22 + $0x650] ss:$8 sps:$4 sm:$0xff]   ;;  %v2934_v60 = vld [vmem:[%s3162_s22 + $0x264] ss:$8 sps:$4 sm:$0xff]  }
  0x77   : > { %1963 = vmatpush1.bf16.msra.mxu1 %v2854_v61  ;;  %v2937_v61 = vld [vmem:[%s3162_s22 + $0x664] ss:$8 sps:$4 sm:$0xff]  }
  0x78   : > { %2127 = vmatpush1.bf16.msra.mxu0 %v2857_v62  ;;  %1964 = vmatprep.subr.bf16.mxu1 %v2862_v63  ;;  %v2932_v62 = vld [vmem:[%s3162_s22 + $0x260] ss:$8 sps:$4 sm:$0xff]  }
  0x79   : > { %2128 = vmatprep.subr.bf16.mxu0 %v2865_v0  ;;  %v2935_v63 = vld [vmem:[%s3162_s22 + $0x660] ss:$8 sps:$4 sm:$0xff]   ;;  %v2940_v0 = vld [vmem:[%s3162_s22 + $0x274] ss:$8 sps:$4 sm:$0xff]  }
  0x7b   : > { %1965 = vmatpush1.bf16.msra.mxu1 %v2860_v1  ;;  %v2943_v1 = vld [vmem:[%s3162_s22 + $0x674] ss:$8 sps:$4 sm:$0xff]  }
  0x7c   : > { %2129 = vmatpush1.bf16.msra.mxu0 %v2863_v2  ;;  %1966 = vmatprep.subr.bf16.mxu1 %v2868_v3  ;;  %v2938_v2 = vld [vmem:[%s3162_s22 + $0x270] ss:$8 sps:$4 sm:$0xff]  }
  0x7d   : > { %2130 = vmatprep.subr.bf16.mxu0 %v2871_v4  ;;  %v2941_v3 = vld [vmem:[%s3162_s22 + $0x670] ss:$8 sps:$4 sm:$0xff]   ;;  %v2946_v4 = vld [vmem:[%s3162_s22 + $0x284] ss:$8 sps:$4 sm:$0xff]  }
  0x7f   : > { %1967 = vmatpush1.bf16.msra.mxu1 %v2866_v5  ;;  %v2949_v5 = vld [vmem:[%s3162_s22 + $0x684] ss:$8 sps:$4 sm:$0xff]  }
  0x80   : > { %2131 = vmatpush1.bf16.msra.mxu0 %v2869_v6  ;;  %1968 = vmatprep.subr.bf16.mxu1 %v2874_v7  ;;  %v2944_v6 = vld [vmem:[%s3162_s22 + $0x280] ss:$8 sps:$4 sm:$0xff]  }
  0x81   : > { %2132 = vmatprep.subr.bf16.mxu0 %v2877_v8  ;;  %v2947_v7 = vld [vmem:[%s3162_s22 + $0x680] ss:$8 sps:$4 sm:$0xff]   ;;  %v2952_v8 = vld [vmem:[%s3162_s22 + $0x294] ss:$8 sps:$4 sm:$0xff]  }
  0x83   : > { %1969 = vmatpush1.bf16.msra.mxu1 %v2872_v9  ;;  %v2955_v9 = vld [vmem:[%s3162_s22 + $0x694] ss:$8 sps:$4 sm:$0xff]  }
  0x84   : > { %2133 = vmatpush1.bf16.msra.mxu0 %v2875_v10  ;;  %1970 = vmatprep.subr.bf16.mxu1 %v2880_v11  ;;  %v2950_v10 = vld [vmem:[%s3162_s22 + $0x290] ss:$8 sps:$4 sm:$0xff]  }
  0x85   : > { %2134 = vmatprep.subr.bf16.mxu0 %v2883_v12  ;;  %v2953_v11 = vld [vmem:[%s3162_s22 + $0x690] ss:$8 sps:$4 sm:$0xff]   ;;  %v2958_v12 = vld [vmem:[%s3162_s22 + $0x2a4] ss:$8 sps:$4 sm:$0xff]  }
  0x87   : > { %1971 = vmatpush1.bf16.msra.mxu1 %v2878_v13  ;;  %v2961_v13 = vld [vmem:[%s3162_s22 + $0x6a4] ss:$8 sps:$4 sm:$0xff]  }
  0x88   : > { %2135 = vmatpush1.bf16.msra.mxu0 %v2881_v14  ;;  %1972 = vmatprep.subr.bf16.mxu1 %v2886_v15  ;;  %v2956_v14 = vld [vmem:[%s3162_s22 + $0x2a0] ss:$8 sps:$4 sm:$0xff]  }
  0x89   : > { %2136 = vmatprep.subr.bf16.mxu0 %v2889_v18  ;;  %v2959_v15 = vld [vmem:[%s3162_s22 + $0x6a0] ss:$8 sps:$4 sm:$0xff]   ;;  %v2964_v18 = vld [vmem:[%s3162_s22 + $0x2b4] ss:$8 sps:$4 sm:$0xff]  }
  0x8b   : > { %1973 = vmatpush1.bf16.msra.mxu1 %v2884_v21  ;;  %v2965_v21 = vld [vmem:[%s3162_s22 + $0x6b0] ss:$8 sps:$4 sm:$0xff]  }
  0x8c   : > { %2137 = vmatpush1.bf16.msra.mxu0 %v2887_v22  ;;  %1974 = vmatprep.subr.bf16.mxu1 %v2892_v23  ;;  %v2970_v22 = vld [vmem:[%s3162_s22 + $0x2c4] ss:$8 sps:$4 sm:$0xff]  }
  0x8d   : > { %2138 = vmatprep.subr.bf16.mxu0 %v2895_v24  ;;  %v2973_v23 = vld [vmem:[%s3162_s22 + $0x6c4] ss:$8 sps:$4 sm:$0xff]   ;;  %v2968_v24 = vld [vmem:[%s3162_s22 + $0x2c0] ss:$8 sps:$4 sm:$0xff]  }
  0x8f   : > { %1975 = vmatpush1.bf16.msra.mxu1 %v2890_v52  ;;  %v2971_v52 = vld [vmem:[%s3162_s22 + $0x6c0] ss:$8 sps:$4 sm:$0xff]  }
  0x90   : > { %2139 = vmatpush1.bf16.msra.mxu0 %v2893_v56  ;;  %1985 = vmatprep.subr.bf16.mxu1 %v2898_v27  ;;  %v2976_v56 = vld [vmem:[%s3162_s22 + $0x2d4] ss:$8 sps:$4 sm:$0xff]  }
  0x91   : > { %2149 = vmatprep.subr.bf16.mxu0 %v2901_v28  ;;  %v2979_v27 = vld [vmem:[%s3162_s22 + $0x6d4] ss:$8 sps:$4 sm:$0xff]   ;;  %v2974_v28 = vld [vmem:[%s3162_s22 + $0x2d0] ss:$8 sps:$4 sm:$0xff]  }
  0x92   : > { %1977 = vmatmul.mubr.bf16.vlgmr.msra.gmra.mrb[0].mxu1 %v554_v31  ;;  %v2985_v31 = vld [vmem:[%s3162_s22 + $0x6e4] ss:$8 sps:$4 sm:$0xff]  }
  0x93   : > { %2141 = vmatmul.mubr.bf16.vlgmr.msra.gmra.mrb[0].mxu0 %v603_v32  ;;  %1986 = vmatpush1.bf16.msra.mxu1 %v2896_v33  ;;  %v2980_v32 = vld [vmem:[%s3162_s22 + $0x2e0] ss:$8 sps:$4 sm:$0xff]  }
  0x94   : > { %2150 = vmatpush1.bf16.msra.mxu0 %v2899_v34  ;;  %1987 = vmatprep.subr.bf16.mxu1 %v2904_v35  ;;  %v2983_v33 = vld [vmem:[%s3162_s22 + $0x6e0] ss:$8 sps:$4 sm:$0xff]   ;;  %v2988_v34 = vld [vmem:[%s3162_s22 + $0x2f4] ss:$8 sps:$4 sm:$0xff]  }
  0x95   : > { %2151 = vmatprep.subr.bf16.mxu0 %v2907_v36  ;;  %2017 = vmatprep.mubr.bf16.mxu1 %v3345_v37  ;;  %v2991_v35 = vld [vmem:[%s3162_s22 + $0x6f4] ss:$8 sps:$4 sm:$0xff]   ;;  %v2986_v36 = vld [vmem:[%s3162_s22 + $0x2f0] ss:$8 sps:$4 sm:$0xff]  }
  0x96   : > { %2181 = vmatprep.mubr.bf16.mxu0 %v3348_v16 }
  0x97   : > { %1988 = vmatpush1.bf16.msra.mxu1 %v2902_v17  ;;  %v2989_v17 = vld [vmem:[%s3162_s22 + $0x6f0] ss:$8 sps:$4 sm:$0xff]  }
  0x98   : > { %2152 = vmatpush1.bf16.msra.mxu0 %v2905_v39  ;;  %1989 = vmatprep.subr.bf16.mxu1 %v2910_v40  ;;  %v2994_v39 = vld [vmem:[%s3162_s22 + $0x304] ss:$8 sps:$4 sm:$0xff]  }
  0x99   : > { %2153 = vmatprep.subr.bf16.mxu0 %v2913_v41  ;;  %v2997_v40 = vld [vmem:[%s3162_s22 + $0x704] ss:$8 sps:$4 sm:$0xff]   ;;  %v3414_v41 = vrot.slane %v3323_v25, %v3216_v49  ;;  %v557_v25 = vcombine.high %v3345_v37, %v3345_v37 }
  0x9a   : > { %v3006_v37 = vld [vmem:[%s3162_s22 + $0x324] ss:$8 sps:$4 sm:$0xff]  }
  0x9b   : > { %1990 = vmatpush1.bf16.msra.mxu1 %v2908_v42  ;;  %v3418_v42 = vrot.slane %v3326_v26, %v3216_v49  ;;  %v2998_v26 = vld [vmem:[%s3162_s22 + $0x310] ss:$8 sps:$4 sm:$0xff]  }
  0x9c   : > { %2154 = vmatpush1.bf16.msra.mxu0 %v2911_v44  ;;  %1991 = vmatprep.subr.bf16.mxu1 %v2916_v45  ;;  %v2992_v44 = vld [vmem:[%s3162_s22 + $0x300] ss:$8 sps:$4 sm:$0xff]  }
  0x9d   : > { %2155 = vmatprep.subr.bf16.mxu0 %v2919_v46  ;;  %v2995_v45 = vld [vmem:[%s3162_s22 + $0x700] ss:$8 sps:$4 sm:$0xff]   ;;  %v3000_v46 = vld [vmem:[%s3162_s22 + $0x314] ss:$8 sps:$4 sm:$0xff]  }
  0x9f   : > { %1992 = vmatpush1.bf16.msra.mxu1 %v2914_v47  ;;  %v3003_v47 = vld [vmem:[%s3162_s22 + $0x714] ss:$8 sps:$4 sm:$0xff]  }
  0xa0   : > { %2156 = vmatpush1.bf16.msra.mxu0 %v2917_v48  ;;  %1993 = vmatprep.subr.bf16.mxu1 %v2922_v50  ;;  %v606_v48 = vcombine.high %v3348_v16, %v3348_v16  ;;  %v3001_v50 = vld [vmem:[%s3162_s22 + $0x710] ss:$8 sps:$4 sm:$0xff]   ;;  %v3004_v16 = vld [vmem:[%s3162_s22 + $0x320] ss:$8 sps:$4 sm:$0xff]  }
  0xa1   : > { %2157 = vmatprep.subr.bf16.mxu0 %v2925_v51  ;;  %v3009_v51 = vld [vmem:[%s3162_s22 + $0x724] ss:$8 sps:$4 sm:$0xff]  }
  0xa3   : > { %1994 = vmatpush1.bf16.msra.mxu1 %v2920_v53  ;;  %v3007_v53 = vld [vmem:[%s3162_s22 + $0x720] ss:$8 sps:$4 sm:$0xff]  }
  0xa4   : > { %2158 = vmatpush1.bf16.msra.mxu0 %v2923_v54  ;;  %1995 = vmatprep.subr.bf16.mxu1 %v2928_v55  ;;  %v3012_v54 = vld [vmem:[%s3162_s22 + $0x334] ss:$8 sps:$4 sm:$0xff]  }
  0xa5   : > { %2159 = vmatprep.subr.bf16.mxu0 %v2931_v57  ;;  %v3015_v55 = vld [vmem:[%s3162_s22 + $0x734] ss:$8 sps:$4 sm:$0xff]   ;;  %v3010_v57 = vld [vmem:[%s3162_s22 + $0x330] ss:$8 sps:$4 sm:$0xff]  }
  0xa7   : > { %1996 = vmatpush1.bf16.msra.mxu1 %v2926_v58  ;;  %v3013_v58 = vld [vmem:[%s3162_s22 + $0x730] ss:$8 sps:$4 sm:$0xff]  }
  0xa8   : > { %2160 = vmatpush1.bf16.msra.mxu0 %v2929_v59  ;;  %1997 = vmatprep.subr.bf16.mxu1 %v2934_v60  ;;  %v3018_v59 = vld [vmem:[%s3162_s22 + $0x344] ss:$8 sps:$4 sm:$0xff]  }
  0xa9   : > { %2161 = vmatprep.subr.bf16.mxu0 %v2937_v61  ;;  %v3021_v60 = vld [vmem:[%s3162_s22 + $0x744] ss:$8 sps:$4 sm:$0xff]   ;;  %v3016_v61 = vld [vmem:[%s3162_s22 + $0x340] ss:$8 sps:$4 sm:$0xff]  }
  0xab   : > { %1998 = vmatpush1.bf16.msra.mxu1 %v2932_v62  ;;  %v3019_v62 = vld [vmem:[%s3162_s22 + $0x740] ss:$8 sps:$4 sm:$0xff]  }
  0xac   : > { %2162 = vmatpush1.bf16.msra.mxu0 %v2935_v63  ;;  %1999 = vmatprep.subr.bf16.mxu1 %v2940_v0  ;;  %v3024_v63 = vld [vmem:[%s3162_s22 + $0x354] ss:$8 sps:$4 sm:$0xff]  }
  0xad   : > { %2163 = vmatprep.subr.bf16.mxu0 %v2943_v1  ;;  %v3027_v0 = vld [vmem:[%s3162_s22 + $0x754] ss:$8 sps:$4 sm:$0xff]   ;;  %v3022_v1 = vld [vmem:[%s3162_s22 + $0x350] ss:$8 sps:$4 sm:$0xff]  }
  0xaf   : > { %2000 = vmatpush1.bf16.msra.mxu1 %v2938_v2  ;;  %v3025_v2 = vld [vmem:[%s3162_s22 + $0x750] ss:$8 sps:$4 sm:$0xff]  }
  0xb0   : > { %2164 = vmatpush1.bf16.msra.mxu0 %v2941_v3  ;;  %2001 = vmatprep.subr.bf16.mxu1 %v2946_v4  ;;  %v3030_v3 = vld [vmem:[%s3162_s22 + $0x364] ss:$8 sps:$4 sm:$0xff]  }
  0xb1   : > { %2165 = vmatprep.subr.bf16.mxu0 %v2949_v5  ;;  %v3033_v4 = vld [vmem:[%s3162_s22 + $0x764] ss:$8 sps:$4 sm:$0xff]   ;;  %v3028_v5 = vld [vmem:[%s3162_s22 + $0x360] ss:$8 sps:$4 sm:$0xff]  }
  0xb3   : > { %2002 = vmatpush1.bf16.msra.mxu1 %v2944_v6  ;;  %v3031_v6 = vld [vmem:[%s3162_s22 + $0x760] ss:$8 sps:$4 sm:$0xff]  }
  0xb4   : > { %2166 = vmatpush1.bf16.msra.mxu0 %v2947_v7  ;;  %2003 = vmatprep.subr.bf16.mxu1 %v2952_v8  ;;  %v3036_v7 = vld [vmem:[%s3162_s22 + $0x374] ss:$8 sps:$4 sm:$0xff]  }
  0xb5   : > { %2167 = vmatprep.subr.bf16.mxu0 %v2955_v9  ;;  %v3039_v8 = vld [vmem:[%s3162_s22 + $0x774] ss:$8 sps:$4 sm:$0xff]   ;;  %v3034_v9 = vld [vmem:[%s3162_s22 + $0x370] ss:$8 sps:$4 sm:$0xff]  }
  0xb7   : > { %2004 = vmatpush1.bf16.msra.mxu1 %v2950_v10  ;;  %v3037_v10 = vld [vmem:[%s3162_s22 + $0x770] ss:$8 sps:$4 sm:$0xff]  }
  0xb8   : > { %2168 = vmatpush1.bf16.msra.mxu0 %v2953_v11  ;;  %2005 = vmatprep.subr.bf16.mxu1 %v2958_v12  ;;  %v3042_v11 = vld [vmem:[%s3162_s22 + $0x384] ss:$8 sps:$4 sm:$0xff]  }
  0xb9   : > { %2169 = vmatprep.subr.bf16.mxu0 %v2961_v13  ;;  %v3045_v12 = vld [vmem:[%s3162_s22 + $0x784] ss:$8 sps:$4 sm:$0xff]   ;;  %v3040_v13 = vld [vmem:[%s3162_s22 + $0x380] ss:$8 sps:$4 sm:$0xff]  }
  0xbb   : > { %2006 = vmatpush1.bf16.msra.mxu1 %v2956_v14  ;;  %v3043_v14 = vld [vmem:[%s3162_s22 + $0x780] ss:$8 sps:$4 sm:$0xff]  }
  0xbc   : > { %2170 = vmatpush1.bf16.msra.mxu0 %v2959_v15  ;;  %2007 = vmatprep.subr.bf16.mxu1 %v2964_v18  ;;  %v3048_v15 = vld [vmem:[%s3162_s22 + $0x394] ss:$8 sps:$4 sm:$0xff]  }
  0xbd   : > { %2171 = vmatprep.subr.bf16.mxu0 %v2967_v19  ;;  %v3051_v18 = vld [vmem:[%s3162_s22 + $0x794] ss:$8 sps:$4 sm:$0xff]   ;;  %v3046_v19 = vld [vmem:[%s3162_s22 + $0x390] ss:$8 sps:$4 sm:$0xff]  }
  0xbf   : > { %2008 = vmatpush1.bf16.msra.mxu1 %v2962_v20  ;;  %v3049_v20 = vld [vmem:[%s3162_s22 + $0x790] ss:$8 sps:$4 sm:$0xff]  }
  0xc0   : > { %2172 = vmatpush1.bf16.msra.mxu0 %v2965_v21  ;;  %2009 = vmatprep.subr.bf16.mxu1 %v2970_v22  ;;  %v3054_v21 = vld [vmem:[%s3162_s22 + $0x3a4] ss:$8 sps:$4 sm:$0xff]  }
  0xc1   : > { %2173 = vmatprep.subr.bf16.mxu0 %v2973_v23  ;;  %v3057_v22 = vld [vmem:[%s3162_s22 + $0x7a4] ss:$8 sps:$4 sm:$0xff]   ;;  %v3052_v23 = vld [vmem:[%s3162_s22 + $0x3a0] ss:$8 sps:$4 sm:$0xff]  }
  0xc3   : > { %2010 = vmatpush1.bf16.msra.mxu1 %v2968_v24  ;;  %v3055_v24 = vld [vmem:[%s3162_s22 + $0x7a0] ss:$8 sps:$4 sm:$0xff]  }
  0xc4   : > { %2174 = vmatpush1.bf16.msra.mxu0 %v2971_v52  ;;  %2011 = vmatprep.subr.bf16.mxu1 %v2976_v56  ;;  %v3060_v52 = vld [vmem:[%s3162_s22 + $0x3b4] ss:$8 sps:$4 sm:$0xff]  }
  0xc5   : > { %2175 = vmatprep.subr.bf16.mxu0 %v2979_v27  ;;  %v3063_v56 = vld [vmem:[%s3162_s22 + $0x7b4] ss:$8 sps:$4 sm:$0xff]   ;;  %v3058_v27 = vld [vmem:[%s3162_s22 + $0x3b0] ss:$8 sps:$4 sm:$0xff]  }
  0xc7   : > { %2012 = vmatpush1.bf16.msra.mxu1 %v2974_v28  ;;  %v3061_v28 = vld [vmem:[%s3162_s22 + $0x7b0] ss:$8 sps:$4 sm:$0xff]  }
  0xc8   : > { %2176 = vmatpush1.bf16.msra.mxu0 %v2977_v29  ;;  %2013 = vmatprep.subr.bf16.mxu1 %v2982_v30  ;;  %v3066_v29 = vld [vmem:[%s3162_s22 + $0x3c4] ss:$8 sps:$4 sm:$0xff]  }
  0xc9   : > { %2177 = vmatprep.subr.bf16.mxu0 %v2985_v31  ;;  %v3069_v30 = vld [vmem:[%s3162_s22 + $0x7c4] ss:$8 sps:$4 sm:$0xff]   ;;  %v3064_v31 = vld [vmem:[%s3162_s22 + $0x3c0] ss:$8 sps:$4 sm:$0xff]  }
  0xcb   : > { %2014 = vmatpush1.bf16.msra.mxu1 %v2980_v32  ;;  %v3067_v32 = vld [vmem:[%s3162_s22 + $0x7c0] ss:$8 sps:$4 sm:$0xff]  }
  0xcc   : > { %2178 = vmatpush1.bf16.msra.mxu0 %v2983_v33  ;;  %2015 = vmatprep.subr.bf16.mxu1 %v2988_v34  ;;  %v3072_v33 = vld [vmem:[%s3162_s22 + $0x3d4] ss:$8 sps:$4 sm:$0xff]  }
  0xcd   : > { %2179 = vmatprep.subr.bf16.mxu0 %v2991_v35  ;;  %v3075_v34 = vld [vmem:[%s3162_s22 + $0x7d4] ss:$8 sps:$4 sm:$0xff]   ;;  %v3070_v35 = vld [vmem:[%s3162_s22 + $0x3d0] ss:$8 sps:$4 sm:$0xff]  }
  0xcf   : > { %2016 = vmatpush1.bf16.msra.mxu1 %v2986_v36  ;;  %v3073_v36 = vld [vmem:[%s3162_s22 + $0x7d0] ss:$8 sps:$4 sm:$0xff]  }
  0xd0   : > { %2180 = vmatpush1.bf16.msra.mxu0 %v2989_v17  ;;  %2026 = vmatprep.subr.bf16.mxu1 %v2994_v39  ;;  %v3078_v17 = vld [vmem:[%s3162_s22 + $0x3e4] ss:$8 sps:$4 sm:$0xff]  }
  0xd1   : > { %2190 = vmatprep.subr.bf16.mxu0 %v2997_v40  ;;  %v3081_v39 = vld [vmem:[%s3162_s22 + $0x7e4] ss:$8 sps:$4 sm:$0xff]   ;;  %v3076_v40 = vld [vmem:[%s3162_s22 + $0x3e0] ss:$8 sps:$4 sm:$0xff]  }
  0xd2   : > { %2018 = vmatmul.mubr.bf16.vlgmr.msra.gmra.mrb[0].mxu1 %v3414_v41 }
  0xd3   : > { %2182 = vmatmul.mubr.bf16.vlgmr.msra.gmra.mrb[0].mxu0 %v3418_v42  ;;  %2027 = vmatpush1.bf16.msra.mxu1 %v2992_v44  ;;  %v3079_v44 = vld [vmem:[%s3162_s22 + $0x7e0] ss:$8 sps:$4 sm:$0xff]  }
  0xd4   : > { %2191 = vmatpush1.bf16.msra.mxu0 %v2995_v45  ;;  %2028 = vmatprep.subr.bf16.mxu1 %v3000_v46  ;;  %v3084_v45 = vld [vmem:[%s3162_s22 + $0x3f4] ss:$8 sps:$4 sm:$0xff]  }
  0xd5   : > { %2192 = vmatprep.subr.bf16.mxu0 %v3003_v47  ;;  %2058 = vmatprep.mubr.bf16.mxu1 %v557_v25  ;;  %v3087_v46 = vld [vmem:[%s3162_s22 + $0x7f4] ss:$8 sps:$4 sm:$0xff]   ;;  %v3082_v47 = vld [vmem:[%s3162_s22 + $0x3f0] ss:$8 sps:$4 sm:$0xff]  }
  0xd6   : > { %2222 = vmatprep.mubr.bf16.mxu0 %v606_v48  ;;  %v3085_v25 = vld [vmem:[%s3162_s22 + $0x7f0] ss:$8 sps:$4 sm:$0xff]   ;;  %v555_v48 = vcombine.high %v3414_v41, %v3414_v41 }
  0xd7   : > { %2029 = vmatpush1.bf16.msra.mxu1 %v2998_v26  ;;  %v604_v26 = vcombine.high %v3418_v42, %v3418_v42 }
  0xd8   : > { %2193 = vmatpush1.bf16.msra.mxu0 %v3001_v50  ;;  %2030 = vmatprep.subr.bf16.mxu1 %v3006_v37  ;;  %v2235_v50 = vsub.s32 0, %v3204_v43  ;;  %v2231_v37 = vld [vmem:[%s3518_s2] sm:$0x3] }
  0xd9   : > { %2194 = vmatprep.subr.bf16.mxu0 %v3009_v51  ;;  %v2239_v51 = vsub.s32 1, %v3204_v43 }
  0xda   : > { %v2236_v41 = vrot.slane %v2231_v37, %v2235_v50 }
  0xdb   : > { %2031 = vmatpush1.bf16.msra.mxu1 %v3004_v16  ;;  %v2245_v16 = vld [vmem:[%s3519_s3] sm:$0x3]  ;;  %v2240_v42 = vrot.slane %v2231_v37, %v2239_v51 }
  0xdc   : > { %2195 = vmatpush1.bf16.msra.mxu0 %v3007_v53  ;;  %2032 = vmatprep.subr.bf16.mxu1 %v3012_v54 }
  0xdd   : > { %2196 = vmatprep.subr.bf16.mxu0 %v3015_v55 }
  0xdf   : > { %2033 = vmatpush1.bf16.msra.mxu1 %v3010_v57  ;;  %v2250_v57 = vrot.slane %v2245_v16, %v2235_v50 }
  0xe0   : > { %2197 = vmatpush1.bf16.msra.mxu0 %v3013_v58  ;;  %2034 = vmatprep.subr.bf16.mxu1 %v3018_v59 }
  0xe1   : > { %2198 = vmatprep.subr.bf16.mxu0 %v3021_v60 }
  0xe3   : > { %2035 = vmatpush1.bf16.msra.mxu1 %v3016_v61  ;;  %v2254_v61 = vrot.slane %v2245_v16, %v2239_v51 }
  0xe4   : > { %2199 = vmatpush1.bf16.msra.mxu0 %v3019_v62  ;;  %2036 = vmatprep.subr.bf16.mxu1 %v3024_v63 }
  0xe5   : > { %2200 = vmatprep.subr.bf16.mxu0 %v3027_v0 }
  0xe7   : > { %2037 = vmatpush1.bf16.msra.mxu1 %v3022_v1 }
  0xe8   : > { %2201 = vmatpush1.bf16.msra.mxu0 %v3025_v2  ;;  %2038 = vmatprep.subr.bf16.mxu1 %v3030_v3 }
  0xe9   : > { %2202 = vmatprep.subr.bf16.mxu0 %v3033_v4 }
  0xeb   : > { %2039 = vmatpush1.bf16.msra.mxu1 %v3028_v5 }
  0xec   : > { %2203 = vmatpush1.bf16.msra.mxu0 %v3031_v6  ;;  %2040 = vmatprep.subr.bf16.mxu1 %v3036_v7 }
  0xed   : > { %2204 = vmatprep.subr.bf16.mxu0 %v3039_v8 }
  0xef   : > { %2041 = vmatpush1.bf16.msra.mxu1 %v3034_v9 }
  0xf0   : > { %2205 = vmatpush1.bf16.msra.mxu0 %v3037_v10  ;;  %2042 = vmatprep.subr.bf16.mxu1 %v3042_v11 }
  0xf1   : > { %2206 = vmatprep.subr.bf16.mxu0 %v3045_v12 }
  0xf3   : > { %2043 = vmatpush1.bf16.msra.mxu1 %v3040_v13 }
  0xf4   : > { %2207 = vmatpush1.bf16.msra.mxu0 %v3043_v14  ;;  %2044 = vmatprep.subr.bf16.mxu1 %v3048_v15 }
  0xf5   : > { %2208 = vmatprep.subr.bf16.mxu0 %v3051_v18 }
  0xf7   : > { %2045 = vmatpush1.bf16.msra.mxu1 %v3046_v19 }
  0xf8   : > { %2209 = vmatpush1.bf16.msra.mxu0 %v3049_v20  ;;  %2046 = vmatprep.subr.bf16.mxu1 %v3054_v21 }
  0xf9   : > { %2210 = vmatprep.subr.bf16.mxu0 %v3057_v22 }
  0xfb   : > { %2047 = vmatpush1.bf16.msra.mxu1 %v3052_v23 }
  0xfc   : > { %2211 = vmatpush1.bf16.msra.mxu0 %v3055_v24  ;;  %2048 = vmatprep.subr.bf16.mxu1 %v3060_v52 }
  0xfd   : > { %2212 = vmatprep.subr.bf16.mxu0 %v3063_v56 }
  0xff   : > { %2049 = vmatpush1.bf16.msra.mxu1 %v3058_v27 }
 0x100   : > { %2213 = vmatpush1.bf16.msra.mxu0 %v3061_v28  ;;  %2050 = vmatprep.subr.bf16.mxu1 %v3066_v29 }
 0x101   : > { %2214 = vmatprep.subr.bf16.mxu0 %v3069_v30 }
 0x103   : > { %2051 = vmatpush1.bf16.msra.mxu1 %v3064_v31 }
 0x104   : > { %2215 = vmatpush1.bf16.msra.mxu0 %v3067_v32  ;;  %2052 = vmatprep.subr.bf16.mxu1 %v3072_v33 }
 0x105   : > { %2216 = vmatprep.subr.bf16.mxu0 %v3075_v34 }
 0x107   : > { %2053 = vmatpush1.bf16.msra.mxu1 %v3070_v35 }
 0x108   : > { %2217 = vmatpush1.bf16.msra.mxu0 %v3073_v36  ;;  %2054 = vmatprep.subr.bf16.mxu1 %v3078_v17 }
 0x109   : > { %2218 = vmatprep.subr.bf16.mxu0 %v3081_v39 }
 0x10b   : > { %2055 = vmatpush1.bf16.msra.mxu1 %v3076_v40 }
 0x10c   : > { %2219 = vmatpush1.bf16.msra.mxu0 %v3079_v44  ;;  %2056 = vmatprep.subr.bf16.mxu1 %v3084_v45 }
 0x10d   : > { %2220 = vmatprep.subr.bf16.mxu0 %v3087_v46 }
 0x10f   : > { %2057 = vmatpush1.bf16.msra.mxu1 %v3082_v47 }
 0x110   : > { %2221 = vmatpush1.bf16.msra.mxu0 %v3085_v25 }
 0x112   : > { %2059 = vmatmul.mubr.bf16.vlgmr.msra.gmra.mrb[0].mxu1 %v555_v48 }
 0x113   : > { %2223 = vmatmul.mubr.bf16.vlgmr.msra.gmra.mrb[0].mxu0 %v604_v26 }
 0x1e5   : > { %v2060_v53 = vpop.f32.mrb[0].mxu1 }
 0x1e6   : > { %v2224_v54 = vpop.f32.mrb[0].mxu0  ;;  %v2062_v58 = vpop.f32.mrb[1].mxu1 }
 0x1e7   : > { %v2651_v55 = vadd.f32 %v2224_v54, %v2060_v53  ;;  %v2226_v59 = vpop.f32.mrb[1].mxu0  ;;  %v2064_v62 = vpop.f32.mrb[2].mxu1 }
 0x1e8   : > { %v2652_v60 = vadd.f32 %v2226_v59, %v2062_v58  ;;  %v2228_v63 = vpop.f32.mrb[2].mxu0  ;;  %v2065_v1 = vpop.f32.mrb[3].mxu1 }
 0x1e9   : > { %v2243_v0 = vmul.f32 %v2651_v55, %v2236_v41  ;;  %v2229_v43 = vpop.f32.mrb[3].mxu0 }
 0x1ea   : > { %v2244_v2 = vmul.f32 %v2652_v60, %v2240_v42 }
 0x1eb   : > { %v2257_v3 = vadd.f32 %v2250_v57, %v2243_v0 }
 0x1ec   : > { %v2258_v4 = vadd.f32 %v2254_v61, %v2244_v2 }
 0x1ed   : > { %vm2259_vm0 = vcmp.ge.f32.partialorder %v2257_v3, 0.0  ;;  %v2261_v5 = vmul.f32 0.01, %v2257_v3 }
 0x1ee   : > { %vm2260_vm1 = vcmp.ge.f32.partialorder %v2258_v4, 0.0  ;;  %v2262_v6 = vmul.f32 0.01, %v2258_v4 }
 0x1ef   : > { %v2263_v7 = vsel %vm2259_vm0, %v2257_v3, %v2261_v5 }
 0x1f0   : > { %v2264_v8 = vsel %vm2260_vm1, %v2258_v4, %v2262_v6 }
 0x1f1   : > { %v2267_v9 = vcombine.low %v2263_v7, %v2264_v8 }
 0x1f3   : > { %v2274_v10 = vrot.slane %v2267_v9, %v3216_v49 }
 0x1f5   : > { %v2281_v11 = vrot.slane %v2274_v10, %v3216_v49 }
 0x1f7   : > { %2287 = vst.msk [vmem:[%s248_s8] sm:$0x3] %vm2285_vm2, %v2281_v11 }
 0x1f8 PF: > { %s14_s17 = sadd.s32 1, %s3110_s17   ;;  %s3521_s15 = smov %s3106_s16 }
 0x1f9   : > { %p11_p5 = scmp.ge.s32.totalorder %s14_s17, 6   ;;  %s3522_s16 = smov %s3524_s18 }
 0x1fb   :  { %13 = sbr.rel (!%p11_p5) target bundleno = 2 (0x2), region = 69 }

// kernel: _lambda_.17
= control target key start
LH: loop header
LB: loop body
LE: loop exit
PB: predicated region body
PF: predicated region fallthrough
CT: control target
= control target key end

     0   :  { %v10498_v36 = vmov 1966171168   ;;  %v1053_v38 = vlaneseq  ;;  %s13797_s1 = inlined_call_operand.vmem [shape: bf16[1,4096,512], index: 1, kind: input, shape index: {}]   ;;  %s13798_s0 = inlined_call_operand.vmem [shape: bf16[1,1,4096], index: 0, kind: input, shape index: {}]   ;;  %s13799_s2 = inlined_call_operand.vmem [shape: f32[1,512], index: 2, kind: input, shape index: {}]   ;;  %s13800_s3 = inlined_call_operand.vmem [shape: f32[1,512], index: 3, kind: input, shape index: {}]   ;;  %s13801_s4 = inlined_call_operand.vmem [shape: f32[1,1,512], index: 4, kind: output, shape index: {}]  }
   0x1   :  { %v8956_v0 = vld [vmem:[%s13797_s1 + $0x4] ss:$16 sps:$4 sm:$0xff]   ;;  %v8958_v1 = vld [vmem:[%s13797_s1 + $0xc] ss:$16 sps:$4 sm:$0xff]   ;;  %v8960_v2 = vld [vmem:[%s13797_s1] ss:$16 sps:$4 sm:$0xff]   ;;  %v1051_v37 = vunpack.c.l.s4 %v10498_v36 }
   0x2   :  { %6397 = vmatprep.subr.bf16.mxu0 %v8956_v0  ;;  %v8961_v3 = vld [vmem:[%s13797_s1 + $0x8] ss:$16 sps:$4 sm:$0xff]   ;;  %7053 = vmatprep.subr.bf16.mxu1 %v8958_v1  ;;  %v8962_v4 = vld [vmem:[%s13797_s1 + $0x24] ss:$16 sps:$4 sm:$0xff]   ;;  %v8964_v5 = vld [vmem:[%s13797_s1 + $0x2c] ss:$16 sps:$4 sm:$0xff]  }
   0x3   :  { %6398 = vmatpush1.bf16.msra.mxu0 %v8960_v2  ;;  %7054 = vmatpush1.bf16.msra.mxu1 %v8961_v3  ;;  %v8966_v6 = vld [vmem:[%s13797_s1 + $0x20] ss:$16 sps:$4 sm:$0xff]   ;;  %v8967_v7 = vld [vmem:[%s13797_s1 + $0x28] ss:$16 sps:$4 sm:$0xff]   ;;  %v8968_v8 = vld [vmem:[%s13797_s1 + $0x44] ss:$16 sps:$4 sm:$0xff]   ;;  %v1052_v42 = vunpack.c.0.s8 %v1051_v37 }
   0x4   :  { %6399 = vmatprep.subr.bf16.mxu0 %v8962_v4  ;;  %7055 = vmatprep.subr.bf16.mxu1 %v8964_v5  ;;  %v8970_v9 = vld [vmem:[%s13797_s1 + $0x4c] ss:$16 sps:$4 sm:$0xff]   ;;  %v8972_v10 = vld [vmem:[%s13797_s1 + $0x40] ss:$16 sps:$4 sm:$0xff]   ;;  %v8973_v11 = vld [vmem:[%s13797_s1 + $0x48] ss:$16 sps:$4 sm:$0xff]  }
   0x5   :  { %v8974_v12 = vld [vmem:[%s13797_s1 + $0x64] ss:$16 sps:$4 sm:$0xff]   ;;  %v8976_v13 = vld [vmem:[%s13797_s1 + $0x6c] ss:$16 sps:$4 sm:$0xff]   ;;  %v8978_v14 = vld [vmem:[%s13797_s1 + $0x60] ss:$16 sps:$4 sm:$0xff]  }
   0x6   :  { %v8979_v15 = vld [vmem:[%s13797_s1 + $0x68] ss:$16 sps:$4 sm:$0xff]   ;;  %v8980_v16 = vld [vmem:[%s13797_s1 + $0x84] ss:$16 sps:$4 sm:$0xff]   ;;  %v8982_v17 = vld [vmem:[%s13797_s1 + $0x8c] ss:$16 sps:$4 sm:$0xff]  }
   0x7   :  { %6400 = vmatpush1.bf16.msra.mxu0 %v8966_v6  ;;  %7056 = vmatpush1.bf16.msra.mxu1 %v8967_v7  ;;  %v8984_v18 = vld [vmem:[%s13797_s1 + $0x80] ss:$16 sps:$4 sm:$0xff]   ;;  %v8985_v19 = vld [vmem:[%s13797_s1 + $0x88] ss:$16 sps:$4 sm:$0xff]   ;;  %v8986_v20 = vld [vmem:[%s13797_s1 + $0xa4] ss:$16 sps:$4 sm:$0xff]  }
   0x8   :  { %6401 = vmatprep.subr.bf16.mxu0 %v8968_v8  ;;  %7057 = vmatprep.subr.bf16.mxu1 %v8970_v9  ;;  %v8988_v21 = vld [vmem:[%s13797_s1 + $0xac] ss:$16 sps:$4 sm:$0xff]   ;;  %v8990_v22 = vld [vmem:[%s13797_s1 + $0xa0] ss:$16 sps:$4 sm:$0xff]   ;;  %v8991_v23 = vld [vmem:[%s13797_s1 + $0xa8] ss:$16 sps:$4 sm:$0xff]  }
   0x9   :  { %v8992_v24 = vld [vmem:[%s13797_s1 + $0xc4] ss:$16 sps:$4 sm:$0xff]   ;;  %v8994_v25 = vld [vmem:[%s13797_s1 + $0xcc] ss:$16 sps:$4 sm:$0xff]   ;;  %v8996_v26 = vld [vmem:[%s13797_s1 + $0xc0] ss:$16 sps:$4 sm:$0xff]  }
   0xa   :  { %v8997_v27 = vld [vmem:[%s13797_s1 + $0xc8] ss:$16 sps:$4 sm:$0xff]   ;;  %v8998_v28 = vld [vmem:[%s13797_s1 + $0xe4] ss:$16 sps:$4 sm:$0xff]   ;;  %v9000_v29 = vld [vmem:[%s13797_s1 + $0xec] ss:$16 sps:$4 sm:$0xff]  }
   0xb   :  { %6402 = vmatpush1.bf16.msra.mxu0 %v8972_v10  ;;  %7058 = vmatpush1.bf16.msra.mxu1 %v8973_v11  ;;  %v9002_v30 = vld [vmem:[%s13797_s1 + $0xe0] ss:$16 sps:$4 sm:$0xff]   ;;  %v9003_v31 = vld [vmem:[%s13797_s1 + $0xe8] ss:$16 sps:$4 sm:$0xff]   ;;  %v9004_v32 = vld [vmem:[%s13797_s1 + $0x104] ss:$16 sps:$4 sm:$0xff]  }
   0xc   :  { %6403 = vmatprep.subr.bf16.mxu0 %v8974_v12  ;;  %7059 = vmatprep.subr.bf16.mxu1 %v8976_v13  ;;  %v9006_v33 = vld [vmem:[%s13797_s1 + $0x10c] ss:$16 sps:$4 sm:$0xff]   ;;  %v9008_v34 = vld [vmem:[%s13797_s1 + $0x100] ss:$16 sps:$4 sm:$0xff]   ;;  %v9009_v35 = vld [vmem:[%s13797_s1 + $0x108] ss:$16 sps:$4 sm:$0xff]  }
   0xd   :  { %v9010_v39 = vld [vmem:[%s13797_s1 + $0x124] ss:$16 sps:$4 sm:$0xff]   ;;  %v9012_v40 = vld [vmem:[%s13797_s1 + $0x12c] ss:$16 sps:$4 sm:$0xff]   ;;  %v9014_v41 = vld [vmem:[%s13797_s1 + $0x120] ss:$16 sps:$4 sm:$0xff]  }
   0xe   :  { %v10642_v43 = vshrl.u32 %v1053_v38, 7  ;;  %v9015_v44 = vld [vmem:[%s13797_s1 + $0x128] ss:$16 sps:$4 sm:$0xff]   ;;  %v9016_v45 = vld [vmem:[%s13797_s1 + $0x144] ss:$16 sps:$4 sm:$0xff]   ;;  %vm7804_vm4 = vcmp.lt.s32.totalorder %v1053_v38, 512 }
   0xf   :  { %6404 = vmatpush1.bf16.msra.mxu0 %v8978_v14  ;;  %7060 = vmatpush1.bf16.msra.mxu1 %v8979_v15  ;;  %v9018_v46 = vld [vmem:[%s13797_s1 + $0x14c] ss:$16 sps:$4 sm:$0xff]   ;;  %v9020_v47 = vld [vmem:[%s13797_s1 + $0x140] ss:$16 sps:$4 sm:$0xff]   ;;  %v9021_v48 = vld [vmem:[%s13797_s1 + $0x148] ss:$16 sps:$4 sm:$0xff]  }
  0x10   :  { %6405 = vmatprep.subr.bf16.mxu0 %v8980_v16  ;;  %7061 = vmatprep.subr.bf16.mxu1 %v8982_v17  ;;  %v10660_v49 = vsub.s32 %v1052_v42, %v10642_v43  ;;  %v9022_v50 = vld [vmem:[%s13797_s1 + $0x164] ss:$16 sps:$4 sm:$0xff]   ;;  %v9024_v51 = vld [vmem:[%s13797_s1 + $0x16c] ss:$16 sps:$4 sm:$0xff]   ;;  %v9026_v53 = vld [vmem:[%s13797_s1 + $0x160] ss:$16 sps:$4 sm:$0xff]  }
  0x11   :  { %v10671_v52 = vld [vmem:[%s13798_s0] sm:$0xff]  ;;  %v9027_v55 = vld [vmem:[%s13797_s1 + $0x168] ss:$16 sps:$4 sm:$0xff]   ;;  %v9030_v57 = vld [vmem:[%s13797_s1 + $0x18c] ss:$16 sps:$4 sm:$0xff]  }
  0x12   :  { %v1056_v54 = vrot.slane %v10671_v52, %v10660_v49  ;;  %v9028_v56 = vld [vmem:[%s13797_s1 + $0x184] ss:$16 sps:$4 sm:$0xff]   ;;  %v9032_v59 = vld [vmem:[%s13797_s1 + $0x180] ss:$16 sps:$4 sm:$0xff]   ;;  %v9033_v61 = vld [vmem:[%s13797_s1 + $0x188] ss:$16 sps:$4 sm:$0xff]  }
  0x13   :  { %6406 = vmatpush1.bf16.msra.mxu0 %v8984_v18  ;;  %7062 = vmatpush1.bf16.msra.mxu1 %v8985_v19  ;;  %v9034_v62 = vld [vmem:[%s13797_s1 + $0x1a4] ss:$16 sps:$4 sm:$0xff]   ;;  %v9036_v63 = vld [vmem:[%s13797_s1 + $0x1ac] ss:$16 sps:$4 sm:$0xff]   ;;  %v9038_v0 = vld [vmem:[%s13797_s1 + $0x1a0] ss:$16 sps:$4 sm:$0xff]  }
  0x14   :  { %6407 = vmatprep.subr.bf16.mxu0 %v8986_v20  ;;  %7063 = vmatprep.subr.bf16.mxu1 %v8988_v21  ;;  %v1064_v58 = vcombine.high %v1056_v54, %v1056_v54  ;;  %v9039_v1 = vld [vmem:[%s13797_s1 + $0x1a8] ss:$16 sps:$4 sm:$0xff]   ;;  %v9040_v2 = vld [vmem:[%s13797_s1 + $0x1c4] ss:$16 sps:$4 sm:$0xff]   ;;  %v9042_v3 = vld [vmem:[%s13797_s1 + $0x1cc] ss:$16 sps:$4 sm:$0xff]   ;;  %v10740_v13 = vrot.slane %v1056_v54, %v10660_v49 }
  0x15   :  { %v9044_v4 = vld [vmem:[%s13797_s1 + $0x1c0] ss:$16 sps:$4 sm:$0xff]   ;;  %v9045_v5 = vld [vmem:[%s13797_s1 + $0x1c8] ss:$16 sps:$4 sm:$0xff]   ;;  %v9046_v6 = vld [vmem:[%s13797_s1 + $0x1e4] ss:$16 sps:$4 sm:$0xff]  }
  0x16   :  { %v1086_v60 = vrot.slane %v1064_v58, %v10660_v49  ;;  %v9048_v7 = vld [vmem:[%s13797_s1 + $0x1ec] ss:$16 sps:$4 sm:$0xff]   ;;  %v9050_v8 = vld [vmem:[%s13797_s1 + $0x1e0] ss:$16 sps:$4 sm:$0xff]   ;;  %v9051_v9 = vld [vmem:[%s13797_s1 + $0x1e8] ss:$16 sps:$4 sm:$0xff]  }
  0x17   :  { %6408 = vmatpush1.bf16.msra.mxu0 %v8990_v22  ;;  %7064 = vmatpush1.bf16.msra.mxu1 %v8991_v23  ;;  %v9054_v10 = vld [vmem:[%s13797_s1 + $0x204] ss:$16 sps:$4 sm:$0xff]   ;;  %v9057_v11 = vld [vmem:[%s13797_s1 + $0x20c] ss:$16 sps:$4 sm:$0xff]   ;;  %v9052_v12 = vld [vmem:[%s13797_s1 + $0x200] ss:$16 sps:$4 sm:$0xff]  }
  0x18   :  { %6409 = vmatprep.subr.bf16.mxu0 %v8992_v24  ;;  %7065 = vmatprep.subr.bf16.mxu1 %v8994_v25  ;;  %v9055_v14 = vld [vmem:[%s13797_s1 + $0x208] ss:$16 sps:$4 sm:$0xff]   ;;  %v9060_v15 = vld [vmem:[%s13797_s1 + $0x224] ss:$16 sps:$4 sm:$0xff]   ;;  %v9063_v16 = vld [vmem:[%s13797_s1 + $0x22c] ss:$16 sps:$4 sm:$0xff]   ;;  %v1096_v17 = vcombine.high %v1086_v60, %v1086_v60 }
  0x19   :  { %6429 = vmatprep.mubr.bf16.mxu0 %v1086_v60  ;;  %7085 = vmatprep.mubr.bf16.mxu1 %v1086_v60  ;;  %v9058_v18 = vld [vmem:[%s13797_s1 + $0x220] ss:$16 sps:$4 sm:$0xff]   ;;  %v9061_v19 = vld [vmem:[%s13797_s1 + $0x228] ss:$16 sps:$4 sm:$0xff]   ;;  %v9066_v20 = vld [vmem:[%s13797_s1 + $0x244] ss:$16 sps:$4 sm:$0xff]  }
  0x1a   :  { %v9069_v21 = vld [vmem:[%s13797_s1 + $0x24c] ss:$16 sps:$4 sm:$0xff]   ;;  %v9064_v22 = vld [vmem:[%s13797_s1 + $0x240] ss:$16 sps:$4 sm:$0xff]   ;;  %v9067_v23 = vld [vmem:[%s13797_s1 + $0x248] ss:$16 sps:$4 sm:$0xff]  }
  0x1b   :  { %6410 = vmatpush1.bf16.msra.mxu0 %v8996_v26  ;;  %7066 = vmatpush1.bf16.msra.mxu1 %v8997_v27  ;;  %v9072_v24 = vld [vmem:[%s13797_s1 + $0x264] ss:$16 sps:$4 sm:$0xff]   ;;  %v9075_v25 = vld [vmem:[%s13797_s1 + $0x26c] ss:$16 sps:$4 sm:$0xff]   ;;  %v9070_v26 = vld [vmem:[%s13797_s1 + $0x260] ss:$16 sps:$4 sm:$0xff]  }
  0x1c   :  { %6411 = vmatprep.subr.bf16.mxu0 %v8998_v28  ;;  %7067 = vmatprep.subr.bf16.mxu1 %v9000_v29  ;;  %v9073_v27 = vld [vmem:[%s13797_s1 + $0x268] ss:$16 sps:$4 sm:$0xff]   ;;  %v9078_v28 = vld [vmem:[%s13797_s1 + $0x284] ss:$16 sps:$4 sm:$0xff]   ;;  %v9081_v29 = vld [vmem:[%s13797_s1 + $0x28c] ss:$16 sps:$4 sm:$0xff]  }
  0x1d   :  { %v9090_v36 = vld [vmem:[%s13797_s1 + $0x2c4] ss:$16 sps:$4 sm:$0xff]   ;;  %v9093_v37 = vld [vmem:[%s13797_s1 + $0x2cc] ss:$16 sps:$4 sm:$0xff]   ;;  %v9106_v54 = vld [vmem:[%s13797_s1 + $0x320] ss:$16 sps:$4 sm:$0xff]  }
  0x1e   :  { %v9099_v42 = vld [vmem:[%s13797_s1 + $0x2ec] ss:$16 sps:$4 sm:$0xff]   ;;  %v9112_v58 = vld [vmem:[%s13797_s1 + $0x340] ss:$16 sps:$4 sm:$0xff]   ;;  %v9120_v60 = vld [vmem:[%s13797_s1 + $0x364] ss:$16 sps:$4 sm:$0xff]  }
  0x1f   :  { %6412 = vmatpush1.bf16.msra.mxu0 %v9002_v30  ;;  %7068 = vmatpush1.bf16.msra.mxu1 %v9003_v31  ;;  %v9076_v30 = vld [vmem:[%s13797_s1 + $0x280] ss:$16 sps:$4 sm:$0xff]   ;;  %v9079_v31 = vld [vmem:[%s13797_s1 + $0x288] ss:$16 sps:$4 sm:$0xff]  }
  0x20   :  { %6413 = vmatprep.subr.bf16.mxu0 %v9004_v32  ;;  %7069 = vmatprep.subr.bf16.mxu1 %v9006_v33  ;;  %v9084_v32 = vld [vmem:[%s13797_s1 + $0x2a4] ss:$16 sps:$4 sm:$0xff]   ;;  %v9087_v33 = vld [vmem:[%s13797_s1 + $0x2ac] ss:$16 sps:$4 sm:$0xff]  }
  0x23   :  { %6414 = vmatpush1.bf16.msra.mxu0 %v9008_v34  ;;  %7070 = vmatpush1.bf16.msra.mxu1 %v9009_v35  ;;  %v9082_v34 = vld [vmem:[%s13797_s1 + $0x2a0] ss:$16 sps:$4 sm:$0xff]   ;;  %v9085_v35 = vld [vmem:[%s13797_s1 + $0x2a8] ss:$16 sps:$4 sm:$0xff]  }
  0x24   :  { %6415 = vmatprep.subr.bf16.mxu0 %v9010_v39  ;;  %7071 = vmatprep.subr.bf16.mxu1 %v9012_v40  ;;  %v9088_v39 = vld [vmem:[%s13797_s1 + $0x2c0] ss:$16 sps:$4 sm:$0xff]   ;;  %v9091_v40 = vld [vmem:[%s13797_s1 + $0x2c8] ss:$16 sps:$4 sm:$0xff]  }
  0x27   :  { %6416 = vmatpush1.bf16.msra.mxu0 %v9014_v41  ;;  %7072 = vmatpush1.bf16.msra.mxu1 %v9015_v44  ;;  %v9096_v41 = vld [vmem:[%s13797_s1 + $0x2e4] ss:$16 sps:$4 sm:$0xff]   ;;  %v9094_v44 = vld [vmem:[%s13797_s1 + $0x2e0] ss:$16 sps:$4 sm:$0xff]  }
  0x28   :  { %6417 = vmatprep.subr.bf16.mxu0 %v9016_v45  ;;  %7073 = vmatprep.subr.bf16.mxu1 %v9018_v46  ;;  %v9097_v45 = vld [vmem:[%s13797_s1 + $0x2e8] ss:$16 sps:$4 sm:$0xff]   ;;  %v9102_v46 = vld [vmem:[%s13797_s1 + $0x304] ss:$16 sps:$4 sm:$0xff]  }
  0x2b   :  { %6418 = vmatpush1.bf16.msra.mxu0 %v9020_v47  ;;  %7074 = vmatpush1.bf16.msra.mxu1 %v9021_v48  ;;  %v9105_v47 = vld [vmem:[%s13797_s1 + $0x30c] ss:$16 sps:$4 sm:$0xff]   ;;  %v9100_v48 = vld [vmem:[%s13797_s1 + $0x300] ss:$16 sps:$4 sm:$0xff]  }
  0x2c   :  { %6419 = vmatprep.subr.bf16.mxu0 %v9022_v50  ;;  %7075 = vmatprep.subr.bf16.mxu1 %v9024_v51  ;;  %v9103_v50 = vld [vmem:[%s13797_s1 + $0x308] ss:$16 sps:$4 sm:$0xff]   ;;  %v9108_v51 = vld [vmem:[%s13797_s1 + $0x324] ss:$16 sps:$4 sm:$0xff]  }
  0x2f   :  { %6420 = vmatpush1.bf16.msra.mxu0 %v9026_v53  ;;  %7076 = vmatpush1.bf16.msra.mxu1 %v9027_v55  ;;  %v9111_v53 = vld [vmem:[%s13797_s1 + $0x32c] ss:$16 sps:$4 sm:$0xff]   ;;  %v9109_v55 = vld [vmem:[%s13797_s1 + $0x328] ss:$16 sps:$4 sm:$0xff]  }
  0x30   :  { %6421 = vmatprep.subr.bf16.mxu0 %v9028_v56  ;;  %7077 = vmatprep.subr.bf16.mxu1 %v9030_v57  ;;  %v9114_v56 = vld [vmem:[%s13797_s1 + $0x344] ss:$16 sps:$4 sm:$0xff]   ;;  %v9117_v57 = vld [vmem:[%s13797_s1 + $0x34c] ss:$16 sps:$4 sm:$0xff]  }
  0x33   :  { %6422 = vmatpush1.bf16.msra.mxu0 %v9032_v59  ;;  %7078 = vmatpush1.bf16.msra.mxu1 %v9033_v61  ;;  %v9115_v59 = vld [vmem:[%s13797_s1 + $0x348] ss:$16 sps:$4 sm:$0xff]   ;;  %v9123_v61 = vld [vmem:[%s13797_s1 + $0x36c] ss:$16 sps:$4 sm:$0xff]  }
  0x34   :  { %6423 = vmatprep.subr.bf16.mxu0 %v9034_v62  ;;  %7079 = vmatprep.subr.bf16.mxu1 %v9036_v63  ;;  %v9118_v62 = vld [vmem:[%s13797_s1 + $0x360] ss:$16 sps:$4 sm:$0xff]   ;;  %v9121_v63 = vld [vmem:[%s13797_s1 + $0x368] ss:$16 sps:$4 sm:$0xff]  }
  0x37   :  { %6424 = vmatpush1.bf16.msra.mxu0 %v9038_v0  ;;  %7080 = vmatpush1.bf16.msra.mxu1 %v9039_v1  ;;  %v9126_v0 = vld [vmem:[%s13797_s1 + $0x384] ss:$16 sps:$4 sm:$0xff]   ;;  %v9129_v1 = vld [vmem:[%s13797_s1 + $0x38c] ss:$16 sps:$4 sm:$0xff]  }
  0x38   :  { %6425 = vmatprep.subr.bf16.mxu0 %v9040_v2  ;;  %7081 = vmatprep.subr.bf16.mxu1 %v9042_v3  ;;  %v9124_v2 = vld [vmem:[%s13797_s1 + $0x380] ss:$16 sps:$4 sm:$0xff]   ;;  %v9127_v3 = vld [vmem:[%s13797_s1 + $0x388] ss:$16 sps:$4 sm:$0xff]  }
  0x3b   :  { %6426 = vmatpush1.bf16.msra.mxu0 %v9044_v4  ;;  %7082 = vmatpush1.bf16.msra.mxu1 %v9045_v5  ;;  %v9132_v4 = vld [vmem:[%s13797_s1 + $0x3a4] ss:$16 sps:$4 sm:$0xff]   ;;  %v9135_v5 = vld [vmem:[%s13797_s1 + $0x3ac] ss:$16 sps:$4 sm:$0xff]  }
  0x3c   :  { %6427 = vmatprep.subr.bf16.mxu0 %v9046_v6  ;;  %7083 = vmatprep.subr.bf16.mxu1 %v9048_v7  ;;  %v9130_v6 = vld [vmem:[%s13797_s1 + $0x3a0] ss:$16 sps:$4 sm:$0xff]   ;;  %v9133_v7 = vld [vmem:[%s13797_s1 + $0x3a8] ss:$16 sps:$4 sm:$0xff]  }
  0x3f   :  { %6428 = vmatpush1.bf16.msra.mxu0 %v9050_v8  ;;  %7084 = vmatpush1.bf16.msra.mxu1 %v9051_v9  ;;  %v9138_v8 = vld [vmem:[%s13797_s1 + $0x3c4] ss:$16 sps:$4 sm:$0xff]   ;;  %v9141_v9 = vld [vmem:[%s13797_s1 + $0x3cc] ss:$16 sps:$4 sm:$0xff]  }
  0x40   :  { %6438 = vmatprep.subr.bf16.mxu0 %v9054_v10  ;;  %7094 = vmatprep.subr.bf16.mxu1 %v9057_v11  ;;  %v1049_v10 = vcombine.high %v10671_v52, %v10671_v52  ;;  %v9136_v11 = vld [vmem:[%s13797_s1 + $0x3c0] ss:$16 sps:$4 sm:$0xff]   ;;  %v9147_v52 = vld [vmem:[%s13797_s1 + $0x3ec] ss:$16 sps:$4 sm:$0xff]  }
  0x42   :  { %6430 = vmatmul.mubr.bf16.vlgmr.msra.gmra.mrb[0].mxu0 %v10740_v13  ;;  %7086 = vmatmul.mubr.bf16.vlgmr.msra.gmra.mrb[0].mxu1 %v10740_v13 }
  0x43   :  { %6439 = vmatpush1.bf16.msra.mxu0 %v9052_v12  ;;  %7095 = vmatpush1.bf16.msra.mxu1 %v9055_v14  ;;  %v9139_v12 = vld [vmem:[%s13797_s1 + $0x3c8] ss:$16 sps:$4 sm:$0xff]   ;;  %v9144_v14 = vld [vmem:[%s13797_s1 + $0x3e4] ss:$16 sps:$4 sm:$0xff]  }
  0x44   :  { %6440 = vmatprep.subr.bf16.mxu0 %v9060_v15  ;;  %7096 = vmatprep.subr.bf16.mxu1 %v9063_v16  ;;  %v10924_v15 = vrot.slane %v1049_v10, %v10660_v49  ;;  %v9142_v16 = vld [vmem:[%s13797_s1 + $0x3e0] ss:$16 sps:$4 sm:$0xff]  }
  0x45   :  { %6470 = vmatprep.mubr.bf16.mxu0 %v1096_v17  ;;  %7126 = vmatprep.mubr.bf16.mxu1 %v1096_v17  ;;  %v9145_v17 = vld [vmem:[%s13797_s1 + $0x3e8] ss:$16 sps:$4 sm:$0xff]   ;;  %v9220_v10 = vld [vmem:[%s13797_s1 + $0x580] ss:$16 sps:$4 sm:$0xff]  }
  0x47   :  { %6441 = vmatpush1.bf16.msra.mxu0 %v9058_v18  ;;  %7097 = vmatpush1.bf16.msra.mxu1 %v9061_v19  ;;  %v9150_v18 = vld [vmem:[%s13797_s1 + $0x404] ss:$16 sps:$4 sm:$0xff]   ;;  %v9153_v19 = vld [vmem:[%s13797_s1 + $0x40c] ss:$16 sps:$4 sm:$0xff]  }
  0x48   :  { %6442 = vmatprep.subr.bf16.mxu0 %v9066_v20  ;;  %7098 = vmatprep.subr.bf16.mxu1 %v9069_v21  ;;  %v1065_v20 = vcombine.high %v10924_v15, %v10924_v15  ;;  %v9148_v21 = vld [vmem:[%s13797_s1 + $0x400] ss:$16 sps:$4 sm:$0xff]  }
  0x4b   :  { %6443 = vmatpush1.bf16.msra.mxu0 %v9064_v22  ;;  %7099 = vmatpush1.bf16.msra.mxu1 %v9067_v23  ;;  %v1094_v22 = vcombine.high %v10740_v13, %v10740_v13  ;;  %v9151_v23 = vld [vmem:[%s13797_s1 + $0x408] ss:$16 sps:$4 sm:$0xff]   ;;  %v9154_v13 = vld [vmem:[%s13797_s1 + $0x420] ss:$16 sps:$4 sm:$0xff]  }
  0x4c   :  { %6444 = vmatprep.subr.bf16.mxu0 %v9072_v24  ;;  %7100 = vmatprep.subr.bf16.mxu1 %v9075_v25  ;;  %v9156_v24 = vld [vmem:[%s13797_s1 + $0x424] ss:$16 sps:$4 sm:$0xff]   ;;  %v9159_v25 = vld [vmem:[%s13797_s1 + $0x42c] ss:$16 sps:$4 sm:$0xff]  }
  0x4f   :  { %6445 = vmatpush1.bf16.msra.mxu0 %v9070_v26  ;;  %7101 = vmatpush1.bf16.msra.mxu1 %v9073_v27  ;;  %v10955_v26 = vrot.slane %v1065_v20, %v10660_v49  ;;  %v9157_v27 = vld [vmem:[%s13797_s1 + $0x428] ss:$16 sps:$4 sm:$0xff]  }
  0x50   :  { %6446 = vmatprep.subr.bf16.mxu0 %v9078_v28  ;;  %7102 = vmatprep.subr.bf16.mxu1 %v9081_v29  ;;  %v9162_v28 = vld [vmem:[%s13797_s1 + $0x444] ss:$16 sps:$4 sm:$0xff]   ;;  %v9165_v29 = vld [vmem:[%s13797_s1 + $0x44c] ss:$16 sps:$4 sm:$0xff]   ;;  %v9235_v20 = vld [vmem:[%s13797_s1 + $0x5c8] ss:$16 sps:$4 sm:$0xff]  }
  0x53   :  { %6447 = vmatpush1.bf16.msra.mxu0 %v9076_v30  ;;  %7103 = vmatpush1.bf16.msra.mxu1 %v9079_v31  ;;  %v9160_v30 = vld [vmem:[%s13797_s1 + $0x440] ss:$16 sps:$4 sm:$0xff]   ;;  %v9163_v31 = vld [vmem:[%s13797_s1 + $0x448] ss:$16 sps:$4 sm:$0xff]  }
  0x54   :  { %6448 = vmatprep.subr.bf16.mxu0 %v9084_v32  ;;  %7104 = vmatprep.subr.bf16.mxu1 %v9087_v33  ;;  %v9168_v32 = vld [vmem:[%s13797_s1 + $0x464] ss:$16 sps:$4 sm:$0xff]   ;;  %v9171_v33 = vld [vmem:[%s13797_s1 + $0x46c] ss:$16 sps:$4 sm:$0xff]  }
  0x57   :  { %6449 = vmatpush1.bf16.msra.mxu0 %v9082_v34  ;;  %7105 = vmatpush1.bf16.msra.mxu1 %v9085_v35  ;;  %v9166_v34 = vld [vmem:[%s13797_s1 + $0x460] ss:$16 sps:$4 sm:$0xff]   ;;  %v9169_v35 = vld [vmem:[%s13797_s1 + $0x468] ss:$16 sps:$4 sm:$0xff]  }
  0x58   :  { %6450 = vmatprep.subr.bf16.mxu0 %v9090_v36  ;;  %7106 = vmatprep.subr.bf16.mxu1 %v9093_v37  ;;  %v9174_v36 = vld [vmem:[%s13797_s1 + $0x484] ss:$16 sps:$4 sm:$0xff]   ;;  %v9177_v37 = vld [vmem:[%s13797_s1 + $0x48c] ss:$16 sps:$4 sm:$0xff]  }
  0x5b   :  { %6451 = vmatpush1.bf16.msra.mxu0 %v9088_v39  ;;  %7107 = vmatpush1.bf16.msra.mxu1 %v9091_v40  ;;  %v9172_v39 = vld [vmem:[%s13797_s1 + $0x480] ss:$16 sps:$4 sm:$0xff]   ;;  %v9175_v40 = vld [vmem:[%s13797_s1 + $0x488] ss:$16 sps:$4 sm:$0xff]  }
  0x5c   :  { %6452 = vmatprep.subr.bf16.mxu0 %v9096_v41  ;;  %7108 = vmatprep.subr.bf16.mxu1 %v9099_v42  ;;  %v9180_v41 = vld [vmem:[%s13797_s1 + $0x4a4] ss:$16 sps:$4 sm:$0xff]   ;;  %v9183_v42 = vld [vmem:[%s13797_s1 + $0x4ac] ss:$16 sps:$4 sm:$0xff]  }
  0x5f   :  { %6453 = vmatpush1.bf16.msra.mxu0 %v9094_v44  ;;  %7109 = vmatpush1.bf16.msra.mxu1 %v9097_v45  ;;  %v9178_v44 = vld [vmem:[%s13797_s1 + $0x4a0] ss:$16 sps:$4 sm:$0xff]   ;;  %v9181_v45 = vld [vmem:[%s13797_s1 + $0x4a8] ss:$16 sps:$4 sm:$0xff]  }
  0x60   :  { %6454 = vmatprep.subr.bf16.mxu0 %v9102_v46  ;;  %7110 = vmatprep.subr.bf16.mxu1 %v9105_v47  ;;  %v9186_v46 = vld [vmem:[%s13797_s1 + $0x4c4] ss:$16 sps:$4 sm:$0xff]   ;;  %v9189_v47 = vld [vmem:[%s13797_s1 + $0x4cc] ss:$16 sps:$4 sm:$0xff]  }
  0x63   :  { %6455 = vmatpush1.bf16.msra.mxu0 %v9100_v48  ;;  %7111 = vmatpush1.bf16.msra.mxu1 %v9103_v50  ;;  %v9184_v48 = vld [vmem:[%s13797_s1 + $0x4c0] ss:$16 sps:$4 sm:$0xff]   ;;  %v9187_v50 = vld [vmem:[%s13797_s1 + $0x4c8] ss:$16 sps:$4 sm:$0xff]  }
  0x64   :  { %6456 = vmatprep.subr.bf16.mxu0 %v9108_v51  ;;  %7112 = vmatprep.subr.bf16.mxu1 %v9111_v53  ;;  %v9192_v51 = vld [vmem:[%s13797_s1 + $0x4e4] ss:$16 sps:$4 sm:$0xff]   ;;  %v9195_v53 = vld [vmem:[%s13797_s1 + $0x4ec] ss:$16 sps:$4 sm:$0xff]  }
  0x67   :  { %6457 = vmatpush1.bf16.msra.mxu0 %v9106_v54  ;;  %7113 = vmatpush1.bf16.msra.mxu1 %v9109_v55  ;;  %v9190_v54 = vld [vmem:[%s13797_s1 + $0x4e0] ss:$16 sps:$4 sm:$0xff]   ;;  %v9193_v55 = vld [vmem:[%s13797_s1 + $0x4e8] ss:$16 sps:$4 sm:$0xff]  }
  0x68   :  { %6458 = vmatprep.subr.bf16.mxu0 %v9114_v56  ;;  %7114 = vmatprep.subr.bf16.mxu1 %v9117_v57  ;;  %v9198_v56 = vld [vmem:[%s13797_s1 + $0x504] ss:$16 sps:$4 sm:$0xff]   ;;  %v9201_v57 = vld [vmem:[%s13797_s1 + $0x50c] ss:$16 sps:$4 sm:$0xff]  }
  0x6b   :  { %6459 = vmatpush1.bf16.msra.mxu0 %v9112_v58  ;;  %7115 = vmatpush1.bf16.msra.mxu1 %v9115_v59  ;;  %v9196_v58 = vld [vmem:[%s13797_s1 + $0x500] ss:$16 sps:$4 sm:$0xff]   ;;  %v9199_v59 = vld [vmem:[%s13797_s1 + $0x508] ss:$16 sps:$4 sm:$0xff]  }
  0x6c   :  { %6460 = vmatprep.subr.bf16.mxu0 %v9120_v60  ;;  %7116 = vmatprep.subr.bf16.mxu1 %v9123_v61  ;;  %v9204_v60 = vld [vmem:[%s13797_s1 + $0x524] ss:$16 sps:$4 sm:$0xff]   ;;  %v9207_v61 = vld [vmem:[%s13797_s1 + $0x52c] ss:$16 sps:$4 sm:$0xff]  }
  0x6f   :  { %6461 = vmatpush1.bf16.msra.mxu0 %v9118_v62  ;;  %7117 = vmatpush1.bf16.msra.mxu1 %v9121_v63  ;;  %v9202_v62 = vld [vmem:[%s13797_s1 + $0x520] ss:$16 sps:$4 sm:$0xff]   ;;  %v9205_v63 = vld [vmem:[%s13797_s1 + $0x528] ss:$16 sps:$4 sm:$0xff]  }
  0x70   :  { %6462 = vmatprep.subr.bf16.mxu0 %v9126_v0  ;;  %7118 = vmatprep.subr.bf16.mxu1 %v9129_v1  ;;  %v9210_v0 = vld [vmem:[%s13797_s1 + $0x544] ss:$16 sps:$4 sm:$0xff]   ;;  %v9213_v1 = vld [vmem:[%s13797_s1 + $0x54c] ss:$16 sps:$4 sm:$0xff]  }
  0x73   :  { %6463 = vmatpush1.bf16.msra.mxu0 %v9124_v2  ;;  %7119 = vmatpush1.bf16.msra.mxu1 %v9127_v3  ;;  %v9208_v2 = vld [vmem:[%s13797_s1 + $0x540] ss:$16 sps:$4 sm:$0xff]   ;;  %v9211_v3 = vld [vmem:[%s13797_s1 + $0x548] ss:$16 sps:$4 sm:$0xff]  }
  0x74   :  { %6464 = vmatprep.subr.bf16.mxu0 %v9132_v4  ;;  %7120 = vmatprep.subr.bf16.mxu1 %v9135_v5  ;;  %v9216_v4 = vld [vmem:[%s13797_s1 + $0x564] ss:$16 sps:$4 sm:$0xff]   ;;  %v9219_v5 = vld [vmem:[%s13797_s1 + $0x56c] ss:$16 sps:$4 sm:$0xff]  }
  0x77   :  { %6465 = vmatpush1.bf16.msra.mxu0 %v9130_v6  ;;  %7121 = vmatpush1.bf16.msra.mxu1 %v9133_v7  ;;  %v9214_v6 = vld [vmem:[%s13797_s1 + $0x560] ss:$16 sps:$4 sm:$0xff]   ;;  %v9217_v7 = vld [vmem:[%s13797_s1 + $0x568] ss:$16 sps:$4 sm:$0xff]  }
  0x78   :  { %6466 = vmatprep.subr.bf16.mxu0 %v9138_v8  ;;  %7122 = vmatprep.subr.bf16.mxu1 %v9141_v9  ;;  %v9222_v8 = vld [vmem:[%s13797_s1 + $0x584] ss:$16 sps:$4 sm:$0xff]   ;;  %v9225_v9 = vld [vmem:[%s13797_s1 + $0x58c] ss:$16 sps:$4 sm:$0xff]  }
  0x7b   :  { %6467 = vmatpush1.bf16.msra.mxu0 %v9136_v11  ;;  %7123 = vmatpush1.bf16.msra.mxu1 %v9139_v12  ;;  %v9223_v11 = vld [vmem:[%s13797_s1 + $0x588] ss:$16 sps:$4 sm:$0xff]   ;;  %v9228_v12 = vld [vmem:[%s13797_s1 + $0x5a4] ss:$16 sps:$4 sm:$0xff]  }
  0x7c   :  { %6468 = vmatprep.subr.bf16.mxu0 %v9144_v14  ;;  %7124 = vmatprep.subr.bf16.mxu1 %v9147_v52  ;;  %v9231_v14 = vld [vmem:[%s13797_s1 + $0x5ac] ss:$16 sps:$4 sm:$0xff]   ;;  %v9226_v52 = vld [vmem:[%s13797_s1 + $0x5a0] ss:$16 sps:$4 sm:$0xff]  }
  0x7f   :  { %6469 = vmatpush1.bf16.msra.mxu0 %v9142_v16  ;;  %7125 = vmatpush1.bf16.msra.mxu1 %v9145_v17  ;;  %v9229_v16 = vld [vmem:[%s13797_s1 + $0x5a8] ss:$16 sps:$4 sm:$0xff]   ;;  %v9234_v17 = vld [vmem:[%s13797_s1 + $0x5c4] ss:$16 sps:$4 sm:$0xff]  }
  0x80   :  { %6479 = vmatprep.subr.bf16.mxu0 %v9150_v18  ;;  %7135 = vmatprep.subr.bf16.mxu1 %v9153_v19  ;;  %v9237_v18 = vld [vmem:[%s13797_s1 + $0x5cc] ss:$16 sps:$4 sm:$0xff]   ;;  %v9232_v19 = vld [vmem:[%s13797_s1 + $0x5c0] ss:$16 sps:$4 sm:$0xff]  }
  0x82   :  { %6471 = vmatmul.mubr.bf16.vlgmr.msra.gmra.mrb[0].mxu0 %v1094_v22  ;;  %7127 = vmatmul.mubr.bf16.vlgmr.msra.gmra.mrb[0].mxu1 %v1094_v22  ;;  %v9243_v22 = vld [vmem:[%s13797_s1 + $0x5ec] ss:$16 sps:$4 sm:$0xff]  }
  0x83   :  { %6480 = vmatpush1.bf16.msra.mxu0 %v9148_v21  ;;  %7136 = vmatpush1.bf16.msra.mxu1 %v9151_v23  ;;  %v9240_v21 = vld [vmem:[%s13797_s1 + $0x5e4] ss:$16 sps:$4 sm:$0xff]   ;;  %v9238_v23 = vld [vmem:[%s13797_s1 + $0x5e0] ss:$16 sps:$4 sm:$0xff]  }
  0x84   :  { %6481 = vmatprep.subr.bf16.mxu0 %v9156_v24  ;;  %7137 = vmatprep.subr.bf16.mxu1 %v9159_v25  ;;  %v9241_v24 = vld [vmem:[%s13797_s1 + $0x5e8] ss:$16 sps:$4 sm:$0xff]   ;;  %v9247_v25 = vld [vmem:[%s13797_s1 + $0x604] ss:$16 sps:$4 sm:$0xff]  }
  0x85   :  { %6511 = vmatprep.mubr.bf16.mxu0 %v10955_v26  ;;  %7167 = vmatprep.mubr.bf16.mxu1 %v10955_v26 }
  0x87   :  { %6482 = vmatpush1.bf16.msra.mxu0 %v9154_v13  ;;  %7138 = vmatpush1.bf16.msra.mxu1 %v9157_v27  ;;  %v9250_v13 = vld [vmem:[%s13797_s1 + $0x60c] ss:$16 sps:$4 sm:$0xff]   ;;  %v9245_v27 = vld [vmem:[%s13797_s1 + $0x600] ss:$16 sps:$4 sm:$0xff]  }
  0x88   :  { %6483 = vmatprep.subr.bf16.mxu0 %v9162_v28  ;;  %7139 = vmatprep.subr.bf16.mxu1 %v9165_v29  ;;  %v11144_v28 = vrot.slane %v10924_v15, %v10660_v49  ;;  %v9248_v29 = vld [vmem:[%s13797_s1 + $0x608] ss:$16 sps:$4 sm:$0xff]   ;;  %v1097_v15 = vcombine.high %v10955_v26, %v10955_v26  ;;  %v9259_v26 = vld [vmem:[%s13797_s1 + $0x644] ss:$16 sps:$4 sm:$0xff]  }
  0x8b   :  { %6484 = vmatpush1.bf16.msra.mxu0 %v9160_v30  ;;  %7140 = vmatpush1.bf16.msra.mxu1 %v9163_v31  ;;  %v9253_v30 = vld [vmem:[%s13797_s1 + $0x624] ss:$16 sps:$4 sm:$0xff]   ;;  %v9256_v31 = vld [vmem:[%s13797_s1 + $0x62c] ss:$16 sps:$4 sm:$0xff]  }
  0x8c   :  { %6485 = vmatprep.subr.bf16.mxu0 %v9168_v32  ;;  %7141 = vmatprep.subr.bf16.mxu1 %v9171_v33  ;;  %v9251_v32 = vld [vmem:[%s13797_s1 + $0x620] ss:$16 sps:$4 sm:$0xff]   ;;  %v9254_v33 = vld [vmem:[%s13797_s1 + $0x628] ss:$16 sps:$4 sm:$0xff]  }
  0x8f   :  { %6486 = vmatpush1.bf16.msra.mxu0 %v9166_v34  ;;  %7142 = vmatpush1.bf16.msra.mxu1 %v9169_v35  ;;  %v9262_v34 = vld [vmem:[%s13797_s1 + $0x64c] ss:$16 sps:$4 sm:$0xff]   ;;  %v9257_v35 = vld [vmem:[%s13797_s1 + $0x640] ss:$16 sps:$4 sm:$0xff]  }
  0x90   :  { %6487 = vmatprep.subr.bf16.mxu0 %v9174_v36  ;;  %7143 = vmatprep.subr.bf16.mxu1 %v9177_v37  ;;  %v9260_v36 = vld [vmem:[%s13797_s1 + $0x648] ss:$16 sps:$4 sm:$0xff]   ;;  %v9265_v37 = vld [vmem:[%s13797_s1 + $0x664] ss:$16 sps:$4 sm:$0xff]  }
  0x93   :  { %6488 = vmatpush1.bf16.msra.mxu0 %v9172_v39  ;;  %7144 = vmatpush1.bf16.msra.mxu1 %v9175_v40  ;;  %v9268_v39 = vld [vmem:[%s13797_s1 + $0x66c] ss:$16 sps:$4 sm:$0xff]   ;;  %v9263_v40 = vld [vmem:[%s13797_s1 + $0x660] ss:$16 sps:$4 sm:$0xff]  }
  0x94   :  { %6489 = vmatprep.subr.bf16.mxu0 %v9180_v41  ;;  %7145 = vmatprep.subr.bf16.mxu1 %v9183_v42  ;;  %v9266_v41 = vld [vmem:[%s13797_s1 + $0x668] ss:$16 sps:$4 sm:$0xff]   ;;  %v9271_v42 = vld [vmem:[%s13797_s1 + $0x684] ss:$16 sps:$4 sm:$0xff]  }
  0x97   :  { %6490 = vmatpush1.bf16.msra.mxu0 %v9178_v44  ;;  %7146 = vmatpush1.bf16.msra.mxu1 %v9181_v45  ;;  %v9274_v44 = vld [vmem:[%s13797_s1 + $0x68c] ss:$16 sps:$4 sm:$0xff]   ;;  %v9269_v45 = vld [vmem:[%s13797_s1 + $0x680] ss:$16 sps:$4 sm:$0xff]  }
  0x98   :  { %6491 = vmatprep.subr.bf16.mxu0 %v9186_v46  ;;  %7147 = vmatprep.subr.bf16.mxu1 %v9189_v47  ;;  %v9272_v46 = vld [vmem:[%s13797_s1 + $0x688] ss:$16 sps:$4 sm:$0xff]   ;;  %v9277_v47 = vld [vmem:[%s13797_s1 + $0x6a4] ss:$16 sps:$4 sm:$0xff]  }
  0x9b   :  { %6492 = vmatpush1.bf16.msra.mxu0 %v9184_v48  ;;  %7148 = vmatpush1.bf16.msra.mxu1 %v9187_v50  ;;  %v9280_v48 = vld [vmem:[%s13797_s1 + $0x6ac] ss:$16 sps:$4 sm:$0xff]   ;;  %v9275_v50 = vld [vmem:[%s13797_s1 + $0x6a0] ss:$16 sps:$4 sm:$0xff]  }
  0x9c   :  { %6493 = vmatprep.subr.bf16.mxu0 %v9192_v51  ;;  %7149 = vmatprep.subr.bf16.mxu1 %v9195_v53  ;;  %v9278_v51 = vld [vmem:[%s13797_s1 + $0x6a8] ss:$16 sps:$4 sm:$0xff]   ;;  %v9283_v53 = vld [vmem:[%s13797_s1 + $0x6c4] ss:$16 sps:$4 sm:$0xff]  }
  0x9f   :  { %6494 = vmatpush1.bf16.msra.mxu0 %v9190_v54  ;;  %7150 = vmatpush1.bf16.msra.mxu1 %v9193_v55  ;;  %v9286_v54 = vld [vmem:[%s13797_s1 + $0x6cc] ss:$16 sps:$4 sm:$0xff]   ;;  %v9281_v55 = vld [vmem:[%s13797_s1 + $0x6c0] ss:$16 sps:$4 sm:$0xff]  }
  0xa0   :  { %6495 = vmatprep.subr.bf16.mxu0 %v9198_v56  ;;  %7151 = vmatprep.subr.bf16.mxu1 %v9201_v57  ;;  %v9284_v56 = vld [vmem:[%s13797_s1 + $0x6c8] ss:$16 sps:$4 sm:$0xff]   ;;  %v9289_v57 = vld [vmem:[%s13797_s1 + $0x6e4] ss:$16 sps:$4 sm:$0xff]  }
  0xa3   :  { %6496 = vmatpush1.bf16.msra.mxu0 %v9196_v58  ;;  %7152 = vmatpush1.bf16.msra.mxu1 %v9199_v59  ;;  %v9292_v58 = vld [vmem:[%s13797_s1 + $0x6ec] ss:$16 sps:$4 sm:$0xff]   ;;  %v9287_v59 = vld [vmem:[%s13797_s1 + $0x6e0] ss:$16 sps:$4 sm:$0xff]  }
  0xa4   :  { %6497 = vmatprep.subr.bf16.mxu0 %v9204_v60  ;;  %7153 = vmatprep.subr.bf16.mxu1 %v9207_v61  ;;  %v9290_v60 = vld [vmem:[%s13797_s1 + $0x6e8] ss:$16 sps:$4 sm:$0xff]   ;;  %v9295_v61 = vld [vmem:[%s13797_s1 + $0x704] ss:$16 sps:$4 sm:$0xff]  }
  0xa7   :  { %6498 = vmatpush1.bf16.msra.mxu0 %v9202_v62  ;;  %7154 = vmatpush1.bf16.msra.mxu1 %v9205_v63  ;;  %v9298_v62 = vld [vmem:[%s13797_s1 + $0x70c] ss:$16 sps:$4 sm:$0xff]   ;;  %v9293_v63 = vld [vmem:[%s13797_s1 + $0x700] ss:$16 sps:$4 sm:$0xff]  }
  0xa8   :  { %6499 = vmatprep.subr.bf16.mxu0 %v9210_v0  ;;  %7155 = vmatprep.subr.bf16.mxu1 %v9213_v1  ;;  %v9296_v0 = vld [vmem:[%s13797_s1 + $0x708] ss:$16 sps:$4 sm:$0xff]   ;;  %v9301_v1 = vld [vmem:[%s13797_s1 + $0x724] ss:$16 sps:$4 sm:$0xff]  }
  0xab   :  { %6500 = vmatpush1.bf16.msra.mxu0 %v9208_v2  ;;  %7156 = vmatpush1.bf16.msra.mxu1 %v9211_v3  ;;  %v9304_v2 = vld [vmem:[%s13797_s1 + $0x72c] ss:$16 sps:$4 sm:$0xff]   ;;  %v9299_v3 = vld [vmem:[%s13797_s1 + $0x720] ss:$16 sps:$4 sm:$0xff]  }
  0xac   :  { %6501 = vmatprep.subr.bf16.mxu0 %v9216_v4  ;;  %7157 = vmatprep.subr.bf16.mxu1 %v9219_v5  ;;  %v9302_v4 = vld [vmem:[%s13797_s1 + $0x728] ss:$16 sps:$4 sm:$0xff]   ;;  %v9307_v5 = vld [vmem:[%s13797_s1 + $0x744] ss:$16 sps:$4 sm:$0xff]  }
  0xaf   :  { %6502 = vmatpush1.bf16.msra.mxu0 %v9214_v6  ;;  %7158 = vmatpush1.bf16.msra.mxu1 %v9217_v7  ;;  %v9310_v6 = vld [vmem:[%s13797_s1 + $0x74c] ss:$16 sps:$4 sm:$0xff]   ;;  %v9305_v7 = vld [vmem:[%s13797_s1 + $0x740] ss:$16 sps:$4 sm:$0xff]  }
  0xb0   :  { %6503 = vmatprep.subr.bf16.mxu0 %v9222_v8  ;;  %7159 = vmatprep.subr.bf16.mxu1 %v9225_v9  ;;  %v9308_v8 = vld [vmem:[%s13797_s1 + $0x748] ss:$16 sps:$4 sm:$0xff]   ;;  %v9313_v9 = vld [vmem:[%s13797_s1 + $0x764] ss:$16 sps:$4 sm:$0xff]  }
  0xb3   :  { %6504 = vmatpush1.bf16.msra.mxu0 %v9220_v10  ;;  %7160 = vmatpush1.bf16.msra.mxu1 %v9223_v11  ;;  %v9316_v10 = vld [vmem:[%s13797_s1 + $0x76c] ss:$16 sps:$4 sm:$0xff]   ;;  %v9311_v11 = vld [vmem:[%s13797_s1 + $0x760] ss:$16 sps:$4 sm:$0xff]  }
  0xb4   :  { %6505 = vmatprep.subr.bf16.mxu0 %v9228_v12  ;;  %7161 = vmatprep.subr.bf16.mxu1 %v9231_v14  ;;  %v9314_v12 = vld [vmem:[%s13797_s1 + $0x768] ss:$16 sps:$4 sm:$0xff]   ;;  %v9319_v14 = vld [vmem:[%s13797_s1 + $0x784] ss:$16 sps:$4 sm:$0xff]  }
  0xb7   :  { %6506 = vmatpush1.bf16.msra.mxu0 %v9226_v52  ;;  %7162 = vmatpush1.bf16.msra.mxu1 %v9229_v16  ;;  %v9322_v52 = vld [vmem:[%s13797_s1 + $0x78c] ss:$16 sps:$4 sm:$0xff]   ;;  %v9317_v16 = vld [vmem:[%s13797_s1 + $0x780] ss:$16 sps:$4 sm:$0xff]  }
  0xb8   :  { %6507 = vmatprep.subr.bf16.mxu0 %v9234_v17  ;;  %7163 = vmatprep.subr.bf16.mxu1 %v9237_v18  ;;  %v9320_v17 = vld [vmem:[%s13797_s1 + $0x788] ss:$16 sps:$4 sm:$0xff]   ;;  %v9325_v18 = vld [vmem:[%s13797_s1 + $0x7a4] ss:$16 sps:$4 sm:$0xff]  }
  0xbb   :  { %6508 = vmatpush1.bf16.msra.mxu0 %v9232_v19  ;;  %7164 = vmatpush1.bf16.msra.mxu1 %v9235_v20  ;;  %v9328_v19 = vld [vmem:[%s13797_s1 + $0x7ac] ss:$16 sps:$4 sm:$0xff]   ;;  %v9323_v20 = vld [vmem:[%s13797_s1 + $0x7a0] ss:$16 sps:$4 sm:$0xff]  }
  0xbc   :  { %6509 = vmatprep.subr.bf16.mxu0 %v9240_v21  ;;  %7165 = vmatprep.subr.bf16.mxu1 %v9243_v22  ;;  %v9326_v21 = vld [vmem:[%s13797_s1 + $0x7a8] ss:$16 sps:$4 sm:$0xff]   ;;  %v9331_v22 = vld [vmem:[%s13797_s1 + $0x7c4] ss:$16 sps:$4 sm:$0xff]  }
  0xbf   :  { %6510 = vmatpush1.bf16.msra.mxu0 %v9238_v23  ;;  %7166 = vmatpush1.bf16.msra.mxu1 %v9241_v24  ;;  %v9334_v23 = vld [vmem:[%s13797_s1 + $0x7cc] ss:$16 sps:$4 sm:$0xff]  }
  0xc0   :  { %6520 = vmatprep.subr.bf16.mxu0 %v9247_v25  ;;  %7176 = vmatprep.subr.bf16.mxu1 %v9250_v13  ;;  %v11318_v24 = vld.sshfl [vmem:[%s13798_s0 + $0x8] sm:$0xff pattern:$0x75316420]  ;;  %v9329_v25 = vld [vmem:[%s13797_s1 + $0x7c0] ss:$16 sps:$4 sm:$0xff]  }
  0xc1   :  { %v9332_v13 = vld [vmem:[%s13797_s1 + $0x7c8] ss:$16 sps:$4 sm:$0xff]  }
  0xc2   :  { %6512 = vmatmul.mubr.bf16.vlgmr.msra.gmra.mrb[0].mxu0 %v11144_v28  ;;  %7168 = vmatmul.mubr.bf16.vlgmr.msra.gmra.mrb[0].mxu1 %v11144_v28 }
  0xc3   :  { %6521 = vmatpush1.bf16.msra.mxu0 %v9245_v27  ;;  %7177 = vmatpush1.bf16.msra.mxu1 %v9248_v29  ;;  %v9337_v27 = vld [vmem:[%s13797_s1 + $0x7e4] ss:$16 sps:$4 sm:$0xff]   ;;  %v9340_v29 = vld [vmem:[%s13797_s1 + $0x7ec] ss:$16 sps:$4 sm:$0xff]  }
  0xc4   :  { %6522 = vmatprep.subr.bf16.mxu0 %v9253_v30  ;;  %7178 = vmatprep.subr.bf16.mxu1 %v9256_v31  ;;  %v9335_v30 = vld [vmem:[%s13797_s1 + $0x7e0] ss:$16 sps:$4 sm:$0xff]   ;;  %v9338_v31 = vld [vmem:[%s13797_s1 + $0x7e8] ss:$16 sps:$4 sm:$0xff]  }
  0xc5   :  { %6552 = vmatprep.mubr.bf16.mxu0 %v1097_v15  ;;  %7208 = vmatprep.mubr.bf16.mxu1 %v1097_v15  ;;  %v9343_v15 = vld [vmem:[%s13797_s1 + $0x804] ss:$16 sps:$4 sm:$0xff]  }
  0xc7   :  { %6523 = vmatpush1.bf16.msra.mxu0 %v9251_v32  ;;  %7179 = vmatpush1.bf16.msra.mxu1 %v9254_v33  ;;  %v9346_v32 = vld [vmem:[%s13797_s1 + $0x80c] ss:$16 sps:$4 sm:$0xff]   ;;  %v1113_v33 = vcombine.high %v11318_v24, %v11318_v24 }
  0xc8   :  { %6524 = vmatprep.subr.bf16.mxu0 %v9259_v26  ;;  %7180 = vmatprep.subr.bf16.mxu1 %v9262_v34  ;;  %v1095_v26 = vcombine.high %v11144_v28, %v11144_v28  ;;  %v9341_v34 = vld [vmem:[%s13797_s1 + $0x800] ss:$16 sps:$4 sm:$0xff]   ;;  %v9352_v28 = vld [vmem:[%s13797_s1 + $0x82c] ss:$16 sps:$4 sm:$0xff]  }
  0xcb   :  { %6525 = vmatpush1.bf16.msra.mxu0 %v9257_v35  ;;  %7181 = vmatpush1.bf16.msra.mxu1 %v9260_v36  ;;  %v9344_v35 = vld [vmem:[%s13797_s1 + $0x808] ss:$16 sps:$4 sm:$0xff]   ;;  %v9349_v36 = vld [vmem:[%s13797_s1 + $0x824] ss:$16 sps:$4 sm:$0xff]  }
  0xcc   :  { %6526 = vmatprep.subr.bf16.mxu0 %v9265_v37  ;;  %7182 = vmatprep.subr.bf16.mxu1 %v9268_v39  ;;  %v11361_v37 = vrot.slane %v1113_v33, %v10660_v49  ;;  %v9347_v39 = vld [vmem:[%s13797_s1 + $0x820] ss:$16 sps:$4 sm:$0xff]   ;;  %v9428_v33 = vld [vmem:[%s13797_s1 + $0x9c8] ss:$16 sps:$4 sm:$0xff]  }
  0xcf   :  { %6527 = vmatpush1.bf16.msra.mxu0 %v9263_v40  ;;  %7183 = vmatpush1.bf16.msra.mxu1 %v9266_v41  ;;  %v9350_v40 = vld [vmem:[%s13797_s1 + $0x828] ss:$16 sps:$4 sm:$0xff]   ;;  %v9355_v41 = vld [vmem:[%s13797_s1 + $0x844] ss:$16 sps:$4 sm:$0xff]  }
  0xd0   :  { %6528 = vmatprep.subr.bf16.mxu0 %v9271_v42  ;;  %7184 = vmatprep.subr.bf16.mxu1 %v9274_v44  ;;  %v9358_v42 = vld [vmem:[%s13797_s1 + $0x84c] ss:$16 sps:$4 sm:$0xff]   ;;  %v9353_v44 = vld [vmem:[%s13797_s1 + $0x840] ss:$16 sps:$4 sm:$0xff]  }
  0xd3   :  { %6529 = vmatpush1.bf16.msra.mxu0 %v9269_v45  ;;  %7185 = vmatpush1.bf16.msra.mxu1 %v9272_v46  ;;  %v9356_v45 = vld [vmem:[%s13797_s1 + $0x848] ss:$16 sps:$4 sm:$0xff]   ;;  %v9361_v46 = vld [vmem:[%s13797_s1 + $0x864] ss:$16 sps:$4 sm:$0xff]  }
  0xd4   :  { %6530 = vmatprep.subr.bf16.mxu0 %v9277_v47  ;;  %7186 = vmatprep.subr.bf16.mxu1 %v9280_v48  ;;  %v9364_v47 = vld [vmem:[%s13797_s1 + $0x86c] ss:$16 sps:$4 sm:$0xff]   ;;  %v9359_v48 = vld [vmem:[%s13797_s1 + $0x860] ss:$16 sps:$4 sm:$0xff]  }
  0xd7   :  { %6531 = vmatpush1.bf16.msra.mxu0 %v9275_v50  ;;  %7187 = vmatpush1.bf16.msra.mxu1 %v9278_v51  ;;  %v9362_v50 = vld [vmem:[%s13797_s1 + $0x868] ss:$16 sps:$4 sm:$0xff]   ;;  %v9367_v51 = vld [vmem:[%s13797_s1 + $0x884] ss:$16 sps:$4 sm:$0xff]  }
  0xd8   :  { %6532 = vmatprep.subr.bf16.mxu0 %v9283_v53  ;;  %7188 = vmatprep.subr.bf16.mxu1 %v9286_v54  ;;  %v9370_v53 = vld [vmem:[%s13797_s1 + $0x88c] ss:$16 sps:$4 sm:$0xff]   ;;  %v9365_v54 = vld [vmem:[%s13797_s1 + $0x880] ss:$16 sps:$4 sm:$0xff]  }
  0xdb   :  { %6533 = vmatpush1.bf16.msra.mxu0 %v9281_v55  ;;  %7189 = vmatpush1.bf16.msra.mxu1 %v9284_v56  ;;  %v9368_v55 = vld [vmem:[%s13797_s1 + $0x888] ss:$16 sps:$4 sm:$0xff]   ;;  %v9373_v56 = vld [vmem:[%s13797_s1 + $0x8a4] ss:$16 sps:$4 sm:$0xff]  }
  0xdc   :  { %6534 = vmatprep.subr.bf16.mxu0 %v9289_v57  ;;  %7190 = vmatprep.subr.bf16.mxu1 %v9292_v58  ;;  %v9376_v57 = vld [vmem:[%s13797_s1 + $0x8ac] ss:$16 sps:$4 sm:$0xff]   ;;  %v9371_v58 = vld [vmem:[%s13797_s1 + $0x8a0] ss:$16 sps:$4 sm:$0xff]  }
  0xdf   :  { %6535 = vmatpush1.bf16.msra.mxu0 %v9287_v59  ;;  %7191 = vmatpush1.bf16.msra.mxu1 %v9290_v60  ;;  %v9374_v59 = vld [vmem:[%s13797_s1 + $0x8a8] ss:$16 sps:$4 sm:$0xff]   ;;  %v9379_v60 = vld [vmem:[%s13797_s1 + $0x8c4] ss:$16 sps:$4 sm:$0xff]  }
  0xe0   :  { %6536 = vmatprep.subr.bf16.mxu0 %v9295_v61  ;;  %7192 = vmatprep.subr.bf16.mxu1 %v9298_v62  ;;  %v9382_v61 = vld [vmem:[%s13797_s1 + $0x8cc] ss:$16 sps:$4 sm:$0xff]   ;;  %v9377_v62 = vld [vmem:[%s13797_s1 + $0x8c0] ss:$16 sps:$4 sm:$0xff]  }
  0xe3   :  { %6537 = vmatpush1.bf16.msra.mxu0 %v9293_v63  ;;  %7193 = vmatpush1.bf16.msra.mxu1 %v9296_v0  ;;  %v9380_v63 = vld [vmem:[%s13797_s1 + $0x8c8] ss:$16 sps:$4 sm:$0xff]   ;;  %v9385_v0 = vld [vmem:[%s13797_s1 + $0x8e4] ss:$16 sps:$4 sm:$0xff]  }
  0xe4   :  { %6538 = vmatprep.subr.bf16.mxu0 %v9301_v1  ;;  %7194 = vmatprep.subr.bf16.mxu1 %v9304_v2  ;;  %v9388_v1 = vld [vmem:[%s13797_s1 + $0x8ec] ss:$16 sps:$4 sm:$0xff]   ;;  %v9383_v2 = vld [vmem:[%s13797_s1 + $0x8e0] ss:$16 sps:$4 sm:$0xff]  }
  0xe7   :  { %6539 = vmatpush1.bf16.msra.mxu0 %v9299_v3  ;;  %7195 = vmatpush1.bf16.msra.mxu1 %v9302_v4  ;;  %v9386_v3 = vld [vmem:[%s13797_s1 + $0x8e8] ss:$16 sps:$4 sm:$0xff]   ;;  %v9391_v4 = vld [vmem:[%s13797_s1 + $0x904] ss:$16 sps:$4 sm:$0xff]  }
  0xe8   :  { %6540 = vmatprep.subr.bf16.mxu0 %v9307_v5  ;;  %7196 = vmatprep.subr.bf16.mxu1 %v9310_v6  ;;  %v9394_v5 = vld [vmem:[%s13797_s1 + $0x90c] ss:$16 sps:$4 sm:$0xff]   ;;  %v9389_v6 = vld [vmem:[%s13797_s1 + $0x900] ss:$16 sps:$4 sm:$0xff]  }
  0xeb   :  { %6541 = vmatpush1.bf16.msra.mxu0 %v9305_v7  ;;  %7197 = vmatpush1.bf16.msra.mxu1 %v9308_v8  ;;  %v9392_v7 = vld [vmem:[%s13797_s1 + $0x908] ss:$16 sps:$4 sm:$0xff]   ;;  %v9397_v8 = vld [vmem:[%s13797_s1 + $0x924] ss:$16 sps:$4 sm:$0xff]  }
  0xec   :  { %6542 = vmatprep.subr.bf16.mxu0 %v9313_v9  ;;  %7198 = vmatprep.subr.bf16.mxu1 %v9316_v10  ;;  %v9400_v9 = vld [vmem:[%s13797_s1 + $0x92c] ss:$16 sps:$4 sm:$0xff]   ;;  %v9395_v10 = vld [vmem:[%s13797_s1 + $0x920] ss:$16 sps:$4 sm:$0xff]  }
  0xef   :  { %6543 = vmatpush1.bf16.msra.mxu0 %v9311_v11  ;;  %7199 = vmatpush1.bf16.msra.mxu1 %v9314_v12  ;;  %v9398_v11 = vld [vmem:[%s13797_s1 + $0x928] ss:$16 sps:$4 sm:$0xff]   ;;  %v9403_v12 = vld [vmem:[%s13797_s1 + $0x944] ss:$16 sps:$4 sm:$0xff]  }
  0xf0   :  { %6544 = vmatprep.subr.bf16.mxu0 %v9319_v14  ;;  %7200 = vmatprep.subr.bf16.mxu1 %v9322_v52  ;;  %v9406_v14 = vld [vmem:[%s13797_s1 + $0x94c] ss:$16 sps:$4 sm:$0xff]   ;;  %v9401_v52 = vld [vmem:[%s13797_s1 + $0x940] ss:$16 sps:$4 sm:$0xff]  }
  0xf3   :  { %6545 = vmatpush1.bf16.msra.mxu0 %v9317_v16  ;;  %7201 = vmatpush1.bf16.msra.mxu1 %v9320_v17  ;;  %v9404_v16 = vld [vmem:[%s13797_s1 + $0x948] ss:$16 sps:$4 sm:$0xff]   ;;  %v9409_v17 = vld [vmem:[%s13797_s1 + $0x964] ss:$16 sps:$4 sm:$0xff]  }
  0xf4   :  { %6546 = vmatprep.subr.bf16.mxu0 %v9325_v18  ;;  %7202 = vmatprep.subr.bf16.mxu1 %v9328_v19  ;;  %v9412_v18 = vld [vmem:[%s13797_s1 + $0x96c] ss:$16 sps:$4 sm:$0xff]   ;;  %v9407_v19 = vld [vmem:[%s13797_s1 + $0x960] ss:$16 sps:$4 sm:$0xff]  }
  0xf7   :  { %6547 = vmatpush1.bf16.msra.mxu0 %v9323_v20  ;;  %7203 = vmatpush1.bf16.msra.mxu1 %v9326_v21  ;;  %v9410_v20 = vld [vmem:[%s13797_s1 + $0x968] ss:$16 sps:$4 sm:$0xff]   ;;  %v9415_v21 = vld [vmem:[%s13797_s1 + $0x984] ss:$16 sps:$4 sm:$0xff]  }
  0xf8   :  { %6548 = vmatprep.subr.bf16.mxu0 %v9331_v22  ;;  %7204 = vmatprep.subr.bf16.mxu1 %v9334_v23  ;;  %v9418_v22 = vld [vmem:[%s13797_s1 + $0x98c] ss:$16 sps:$4 sm:$0xff]   ;;  %v9413_v23 = vld [vmem:[%s13797_s1 + $0x980] ss:$16 sps:$4 sm:$0xff]  }
  0xfb   :  { %6549 = vmatpush1.bf16.msra.mxu0 %v9329_v25  ;;  %7205 = vmatpush1.bf16.msra.mxu1 %v9332_v13  ;;  %v9416_v25 = vld [vmem:[%s13797_s1 + $0x988] ss:$16 sps:$4 sm:$0xff]   ;;  %v9421_v13 = vld [vmem:[%s13797_s1 + $0x9a4] ss:$16 sps:$4 sm:$0xff]  }
  0xfc   :  { %6550 = vmatprep.subr.bf16.mxu0 %v9337_v27  ;;  %7206 = vmatprep.subr.bf16.mxu1 %v9340_v29  ;;  %v9424_v27 = vld [vmem:[%s13797_s1 + $0x9ac] ss:$16 sps:$4 sm:$0xff]   ;;  %v9419_v29 = vld [vmem:[%s13797_s1 + $0x9a0] ss:$16 sps:$4 sm:$0xff]  }
  0xff   :  { %6551 = vmatpush1.bf16.msra.mxu0 %v9335_v30  ;;  %7207 = vmatpush1.bf16.msra.mxu1 %v9338_v31  ;;  %v9422_v30 = vld [vmem:[%s13797_s1 + $0x9a8] ss:$16 sps:$4 sm:$0xff]   ;;  %v9427_v31 = vld [vmem:[%s13797_s1 + $0x9c4] ss:$16 sps:$4 sm:$0xff]  }
 0x100   :  { %6561 = vmatprep.subr.bf16.mxu0 %v9343_v15  ;;  %7217 = vmatprep.subr.bf16.mxu1 %v9346_v32  ;;  %v9430_v15 = vld [vmem:[%s13797_s1 + $0x9cc] ss:$16 sps:$4 sm:$0xff]   ;;  %v9425_v32 = vld [vmem:[%s13797_s1 + $0x9c0] ss:$16 sps:$4 sm:$0xff]  }
 0x102   :  { %6553 = vmatmul.mubr.bf16.vlgmr.msra.gmra.mrb[0].mxu0 %v1095_v26  ;;  %7209 = vmatmul.mubr.bf16.vlgmr.msra.gmra.mrb[0].mxu1 %v1095_v26  ;;  %v9433_v26 = vld [vmem:[%s13797_s1 + $0x9e4] ss:$16 sps:$4 sm:$0xff]  }
 0x103   :  { %6562 = vmatpush1.bf16.msra.mxu0 %v9341_v34  ;;  %7218 = vmatpush1.bf16.msra.mxu1 %v9344_v35  ;;  %v9436_v34 = vld [vmem:[%s13797_s1 + $0x9ec] ss:$16 sps:$4 sm:$0xff]   ;;  %v9431_v35 = vld [vmem:[%s13797_s1 + $0x9e0] ss:$16 sps:$4 sm:$0xff]  }
 0x104   :  { %6563 = vmatprep.subr.bf16.mxu0 %v9349_v36  ;;  %7219 = vmatprep.subr.bf16.mxu1 %v9352_v28  ;;  %v9434_v36 = vld [vmem:[%s13797_s1 + $0x9e8] ss:$16 sps:$4 sm:$0xff]   ;;  %v9439_v28 = vld [vmem:[%s13797_s1 + $0xa04] ss:$16 sps:$4 sm:$0xff]  }
 0x105   :  { %6593 = vmatprep.mubr.bf16.mxu0 %v11361_v37  ;;  %7249 = vmatprep.mubr.bf16.mxu1 %v11361_v37 }
 0x107   :  { %6564 = vmatpush1.bf16.msra.mxu0 %v9347_v39  ;;  %7220 = vmatpush1.bf16.msra.mxu1 %v9350_v40  ;;  %v9442_v39 = vld [vmem:[%s13797_s1 + $0xa0c] ss:$16 sps:$4 sm:$0xff]   ;;  %v11547_v40 = vrot.slane %v11318_v24, %v10660_v49 }
 0x108   :  { %6565 = vmatprep.subr.bf16.mxu0 %v9355_v41  ;;  %7221 = vmatprep.subr.bf16.mxu1 %v9358_v42  ;;  %v9437_v41 = vld [vmem:[%s13797_s1 + $0xa00] ss:$16 sps:$4 sm:$0xff]   ;;  %v9440_v42 = vld [vmem:[%s13797_s1 + $0xa08] ss:$16 sps:$4 sm:$0xff]   ;;  %v9448_v24 = vld [vmem:[%s13797_s1 + $0xa2c] ss:$16 sps:$4 sm:$0xff]  }
 0x10b   :  { %6566 = vmatpush1.bf16.msra.mxu0 %v9353_v44  ;;  %7222 = vmatpush1.bf16.msra.mxu1 %v9356_v45  ;;  %v9445_v44 = vld [vmem:[%s13797_s1 + $0xa24] ss:$16 sps:$4 sm:$0xff]   ;;  %v1145_v45 = vcombine.high %v11361_v37, %v11361_v37 }
 0x10c   :  { %6567 = vmatprep.subr.bf16.mxu0 %v9361_v46  ;;  %7223 = vmatprep.subr.bf16.mxu1 %v9364_v47  ;;  %v9443_v46 = vld [vmem:[%s13797_s1 + $0xa20] ss:$16 sps:$4 sm:$0xff]   ;;  %v9446_v47 = vld [vmem:[%s13797_s1 + $0xa28] ss:$16 sps:$4 sm:$0xff]   ;;  %v9451_v37 = vld [vmem:[%s13797_s1 + $0xa44] ss:$16 sps:$4 sm:$0xff]  }
 0x10f   :  { %6568 = vmatpush1.bf16.msra.mxu0 %v9359_v48  ;;  %7224 = vmatpush1.bf16.msra.mxu1 %v9362_v50  ;;  %v9454_v48 = vld [vmem:[%s13797_s1 + $0xa4c] ss:$16 sps:$4 sm:$0xff]   ;;  %v9449_v50 = vld [vmem:[%s13797_s1 + $0xa40] ss:$16 sps:$4 sm:$0xff]  }
 0x110   :  { %6569 = vmatprep.subr.bf16.mxu0 %v9367_v51  ;;  %7225 = vmatprep.subr.bf16.mxu1 %v9370_v53  ;;  %v9452_v51 = vld [vmem:[%s13797_s1 + $0xa48] ss:$16 sps:$4 sm:$0xff]   ;;  %v9457_v53 = vld [vmem:[%s13797_s1 + $0xa64] ss:$16 sps:$4 sm:$0xff]  }
 0x113   :  { %6570 = vmatpush1.bf16.msra.mxu0 %v9365_v54  ;;  %7226 = vmatpush1.bf16.msra.mxu1 %v9368_v55  ;;  %v9460_v54 = vld [vmem:[%s13797_s1 + $0xa6c] ss:$16 sps:$4 sm:$0xff]   ;;  %v9455_v55 = vld [vmem:[%s13797_s1 + $0xa60] ss:$16 sps:$4 sm:$0xff]  }
 0x114   :  { %6571 = vmatprep.subr.bf16.mxu0 %v9373_v56  ;;  %7227 = vmatprep.subr.bf16.mxu1 %v9376_v57  ;;  %v9458_v56 = vld [vmem:[%s13797_s1 + $0xa68] ss:$16 sps:$4 sm:$0xff]   ;;  %v9463_v57 = vld [vmem:[%s13797_s1 + $0xa84] ss:$16 sps:$4 sm:$0xff]  }
 0x117   :  { %6572 = vmatpush1.bf16.msra.mxu0 %v9371_v58  ;;  %7228 = vmatpush1.bf16.msra.mxu1 %v9374_v59  ;;  %v9466_v58 = vld [vmem:[%s13797_s1 + $0xa8c] ss:$16 sps:$4 sm:$0xff]   ;;  %v9461_v59 = vld [vmem:[%s13797_s1 + $0xa80] ss:$16 sps:$4 sm:$0xff]  }
 0x118   :  { %6573 = vmatprep.subr.bf16.mxu0 %v9379_v60  ;;  %7229 = vmatprep.subr.bf16.mxu1 %v9382_v61  ;;  %v9464_v60 = vld [vmem:[%s13797_s1 + $0xa88] ss:$16 sps:$4 sm:$0xff]   ;;  %v9469_v61 = vld [vmem:[%s13797_s1 + $0xaa4] ss:$16 sps:$4 sm:$0xff]  }
 0x11b   :  { %6574 = vmatpush1.bf16.msra.mxu0 %v9377_v62  ;;  %7230 = vmatpush1.bf16.msra.mxu1 %v9380_v63  ;;  %v9472_v62 = vld [vmem:[%s13797_s1 + $0xaac] ss:$16 sps:$4 sm:$0xff]   ;;  %v9467_v63 = vld [vmem:[%s13797_s1 + $0xaa0] ss:$16 sps:$4 sm:$0xff]  }
 0x11c   :  { %6575 = vmatprep.subr.bf16.mxu0 %v9385_v0  ;;  %7231 = vmatprep.subr.bf16.mxu1 %v9388_v1  ;;  %v9470_v0 = vld [vmem:[%s13797_s1 + $0xaa8] ss:$16 sps:$4 sm:$0xff]   ;;  %v9475_v1 = vld [vmem:[%s13797_s1 + $0xac4] ss:$16 sps:$4 sm:$0xff]  }
 0x11f   :  { %6576 = vmatpush1.bf16.msra.mxu0 %v9383_v2  ;;  %7232 = vmatpush1.bf16.msra.mxu1 %v9386_v3  ;;  %v9478_v2 = vld [vmem:[%s13797_s1 + $0xacc] ss:$16 sps:$4 sm:$0xff]   ;;  %v9473_v3 = vld [vmem:[%s13797_s1 + $0xac0] ss:$16 sps:$4 sm:$0xff]  }
 0x120   :  { %6577 = vmatprep.subr.bf16.mxu0 %v9391_v4  ;;  %7233 = vmatprep.subr.bf16.mxu1 %v9394_v5  ;;  %v9476_v4 = vld [vmem:[%s13797_s1 + $0xac8] ss:$16 sps:$4 sm:$0xff]   ;;  %v9481_v5 = vld [vmem:[%s13797_s1 + $0xae4] ss:$16 sps:$4 sm:$0xff]  }
 0x123   :  { %6578 = vmatpush1.bf16.msra.mxu0 %v9389_v6  ;;  %7234 = vmatpush1.bf16.msra.mxu1 %v9392_v7  ;;  %v9484_v6 = vld [vmem:[%s13797_s1 + $0xaec] ss:$16 sps:$4 sm:$0xff]   ;;  %v9479_v7 = vld [vmem:[%s13797_s1 + $0xae0] ss:$16 sps:$4 sm:$0xff]  }
 0x124   :  { %6579 = vmatprep.subr.bf16.mxu0 %v9397_v8  ;;  %7235 = vmatprep.subr.bf16.mxu1 %v9400_v9  ;;  %v9482_v8 = vld [vmem:[%s13797_s1 + $0xae8] ss:$16 sps:$4 sm:$0xff]   ;;  %v9487_v9 = vld [vmem:[%s13797_s1 + $0xb04] ss:$16 sps:$4 sm:$0xff]  }
 0x127   :  { %6580 = vmatpush1.bf16.msra.mxu0 %v9395_v10  ;;  %7236 = vmatpush1.bf16.msra.mxu1 %v9398_v11  ;;  %v9490_v10 = vld [vmem:[%s13797_s1 + $0xb0c] ss:$16 sps:$4 sm:$0xff]   ;;  %v9485_v11 = vld [vmem:[%s13797_s1 + $0xb00] ss:$16 sps:$4 sm:$0xff]  }
 0x128   :  { %6581 = vmatprep.subr.bf16.mxu0 %v9403_v12  ;;  %7237 = vmatprep.subr.bf16.mxu1 %v9406_v14  ;;  %v9488_v12 = vld [vmem:[%s13797_s1 + $0xb08] ss:$16 sps:$4 sm:$0xff]   ;;  %v9493_v14 = vld [vmem:[%s13797_s1 + $0xb24] ss:$16 sps:$4 sm:$0xff]  }
 0x12b   :  { %6582 = vmatpush1.bf16.msra.mxu0 %v9401_v52  ;;  %7238 = vmatpush1.bf16.msra.mxu1 %v9404_v16  ;;  %v9496_v52 = vld [vmem:[%s13797_s1 + $0xb2c] ss:$16 sps:$4 sm:$0xff]   ;;  %v9491_v16 = vld [vmem:[%s13797_s1 + $0xb20] ss:$16 sps:$4 sm:$0xff]  }
 0x12c   :  { %6583 = vmatprep.subr.bf16.mxu0 %v9409_v17  ;;  %7239 = vmatprep.subr.bf16.mxu1 %v9412_v18  ;;  %v9494_v17 = vld [vmem:[%s13797_s1 + $0xb28] ss:$16 sps:$4 sm:$0xff]   ;;  %v9499_v18 = vld [vmem:[%s13797_s1 + $0xb44] ss:$16 sps:$4 sm:$0xff]  }
 0x12f   :  { %6584 = vmatpush1.bf16.msra.mxu0 %v9407_v19  ;;  %7240 = vmatpush1.bf16.msra.mxu1 %v9410_v20  ;;  %v9502_v19 = vld [vmem:[%s13797_s1 + $0xb4c] ss:$16 sps:$4 sm:$0xff]   ;;  %v9497_v20 = vld [vmem:[%s13797_s1 + $0xb40] ss:$16 sps:$4 sm:$0xff]  }
 0x130   :  { %6585 = vmatprep.subr.bf16.mxu0 %v9415_v21  ;;  %7241 = vmatprep.subr.bf16.mxu1 %v9418_v22  ;;  %v9500_v21 = vld [vmem:[%s13797_s1 + $0xb48] ss:$16 sps:$4 sm:$0xff]   ;;  %v9505_v22 = vld [vmem:[%s13797_s1 + $0xb64] ss:$16 sps:$4 sm:$0xff]  }
 0x133   :  { %6586 = vmatpush1.bf16.msra.mxu0 %v9413_v23  ;;  %7242 = vmatpush1.bf16.msra.mxu1 %v9416_v25  ;;  %v9508_v23 = vld [vmem:[%s13797_s1 + $0xb6c] ss:$16 sps:$4 sm:$0xff]   ;;  %v9503_v25 = vld [vmem:[%s13797_s1 + $0xb60] ss:$16 sps:$4 sm:$0xff]  }
 0x134   :  { %6587 = vmatprep.subr.bf16.mxu0 %v9421_v13  ;;  %7243 = vmatprep.subr.bf16.mxu1 %v9424_v27  ;;  %v9506_v13 = vld [vmem:[%s13797_s1 + $0xb68] ss:$16 sps:$4 sm:$0xff]   ;;  %v9511_v27 = vld [vmem:[%s13797_s1 + $0xb84] ss:$16 sps:$4 sm:$0xff]  }
 0x137   :  { %6588 = vmatpush1.bf16.msra.mxu0 %v9419_v29  ;;  %7244 = vmatpush1.bf16.msra.mxu1 %v9422_v30  ;;  %v9514_v29 = vld [vmem:[%s13797_s1 + $0xb8c] ss:$16 sps:$4 sm:$0xff]   ;;  %v9509_v30 = vld [vmem:[%s13797_s1 + $0xb80] ss:$16 sps:$4 sm:$0xff]  }
 0x138   :  { %6589 = vmatprep.subr.bf16.mxu0 %v9427_v31  ;;  %7245 = vmatprep.subr.bf16.mxu1 %v9430_v15  ;;  %v9512_v31 = vld [vmem:[%s13797_s1 + $0xb88] ss:$16 sps:$4 sm:$0xff]   ;;  %v9517_v15 = vld [vmem:[%s13797_s1 + $0xba4] ss:$16 sps:$4 sm:$0xff]  }
 0x13b   :  { %6590 = vmatpush1.bf16.msra.mxu0 %v9425_v32  ;;  %7246 = vmatpush1.bf16.msra.mxu1 %v9428_v33  ;;  %v9520_v32 = vld [vmem:[%s13797_s1 + $0xbac] ss:$16 sps:$4 sm:$0xff]   ;;  %v9515_v33 = vld [vmem:[%s13797_s1 + $0xba0] ss:$16 sps:$4 sm:$0xff]  }
 0x13c   :  { %6591 = vmatprep.subr.bf16.mxu0 %v9433_v26  ;;  %7247 = vmatprep.subr.bf16.mxu1 %v9436_v34  ;;  %v9518_v26 = vld [vmem:[%s13797_s1 + $0xba8] ss:$16 sps:$4 sm:$0xff]   ;;  %v9523_v34 = vld [vmem:[%s13797_s1 + $0xbc4] ss:$16 sps:$4 sm:$0xff]  }
 0x13f   :  { %6592 = vmatpush1.bf16.msra.mxu0 %v9431_v35  ;;  %7248 = vmatpush1.bf16.msra.mxu1 %v9434_v36  ;;  %v9526_v35 = vld [vmem:[%s13797_s1 + $0xbcc] ss:$16 sps:$4 sm:$0xff]  }
 0x140   :  { %6602 = vmatprep.subr.bf16.mxu0 %v9439_v28  ;;  %7258 = vmatprep.subr.bf16.mxu1 %v9442_v39  ;;  %v10496_v36 = vld [vmem:[%s13798_s0 + $0x8] sm:$0xff]  ;;  %v9521_v39 = vld [vmem:[%s13797_s1 + $0xbc0] ss:$16 sps:$4 sm:$0xff]  }
 0x141   :  { %v1098_v28 = vcombine.high %v10496_v36, %v10496_v36  ;;  %v9610_v36 = vld [vmem:[%s13797_s1 + $0xd8c] ss:$16 sps:$4 sm:$0xff]  }
 0x142   :  { %6594 = vmatmul.mubr.bf16.vlgmr.msra.gmra.mrb[0].mxu0 %v11547_v40  ;;  %7250 = vmatmul.mubr.bf16.vlgmr.msra.gmra.mrb[0].mxu1 %v11547_v40 }
 0x143   :  { %6603 = vmatpush1.bf16.msra.mxu0 %v9437_v41  ;;  %7259 = vmatpush1.bf16.msra.mxu1 %v9440_v42  ;;  %v9524_v41 = vld [vmem:[%s13797_s1 + $0xbc8] ss:$16 sps:$4 sm:$0xff]   ;;  %v9529_v42 = vld [vmem:[%s13797_s1 + $0xbe4] ss:$16 sps:$4 sm:$0xff]  }
 0x144   :  { %6604 = vmatprep.subr.bf16.mxu0 %v9445_v44  ;;  %7260 = vmatprep.subr.bf16.mxu1 %v9448_v24  ;;  %v9532_v44 = vld [vmem:[%s13797_s1 + $0xbec] ss:$16 sps:$4 sm:$0xff]   ;;  %v11737_v24 = vrot.slane %v1098_v28, %v10660_v49  ;;  %v9605_v28 = vld [vmem:[%s13797_s1 + $0xd80] ss:$16 sps:$4 sm:$0xff]  }
 0x145   :  { %6634 = vmatprep.mubr.bf16.mxu0 %v1145_v45  ;;  %7290 = vmatprep.mubr.bf16.mxu1 %v1145_v45  ;;  %v9527_v45 = vld [vmem:[%s13797_s1 + $0xbe0] ss:$16 sps:$4 sm:$0xff]  }
 0x147   :  { %6605 = vmatpush1.bf16.msra.mxu0 %v9443_v46  ;;  %7261 = vmatpush1.bf16.msra.mxu1 %v9446_v47  ;;  %v9530_v46 = vld [vmem:[%s13797_s1 + $0xbe8] ss:$16 sps:$4 sm:$0xff]   ;;  %v9535_v47 = vld [vmem:[%s13797_s1 + $0xc04] ss:$16 sps:$4 sm:$0xff]  }
 0x148   :  { %6606 = vmatprep.subr.bf16.mxu0 %v9451_v37  ;;  %7262 = vmatprep.subr.bf16.mxu1 %v9454_v48  ;;  %v9538_v37 = vld [vmem:[%s13797_s1 + $0xc0c] ss:$16 sps:$4 sm:$0xff]   ;;  %v1114_v48 = vcombine.high %v11737_v24, %v11737_v24 }
 0x14b   :  { %6607 = vmatpush1.bf16.msra.mxu0 %v9449_v50  ;;  %7263 = vmatpush1.bf16.msra.mxu1 %v9452_v51  ;;  %v1143_v50 = vcombine.high %v11547_v40, %v11547_v40  ;;  %v9533_v51 = vld [vmem:[%s13797_s1 + $0xc00] ss:$16 sps:$4 sm:$0xff]   ;;  %v9544_v40 = vld [vmem:[%s13797_s1 + $0xc2c] ss:$16 sps:$4 sm:$0xff]  }
 0x14c   :  { %6608 = vmatprep.subr.bf16.mxu0 %v9457_v53  ;;  %7264 = vmatprep.subr.bf16.mxu1 %v9460_v54  ;;  %v9536_v53 = vld [vmem:[%s13797_s1 + $0xc08] ss:$16 sps:$4 sm:$0xff]   ;;  %v9541_v54 = vld [vmem:[%s13797_s1 + $0xc24] ss:$16 sps:$4 sm:$0xff]  }
 0x14f   :  { %6609 = vmatpush1.bf16.msra.mxu0 %v9455_v55  ;;  %7265 = vmatpush1.bf16.msra.mxu1 %v9458_v56  ;;  %v11768_v55 = vrot.slane %v1114_v48, %v10660_v49  ;;  %v9539_v56 = vld [vmem:[%s13797_s1 + $0xc20] ss:$16 sps:$4 sm:$0xff]   ;;  %v9620_v48 = vld [vmem:[%s13797_s1 + $0xdc8] ss:$16 sps:$4 sm:$0xff]  }
 0x150   :  { %6610 = vmatprep.subr.bf16.mxu0 %v9463_v57  ;;  %7266 = vmatprep.subr.bf16.mxu1 %v9466_v58  ;;  %v9542_v57 = vld [vmem:[%s13797_s1 + $0xc28] ss:$16 sps:$4 sm:$0xff]   ;;  %v9547_v58 = vld [vmem:[%s13797_s1 + $0xc44] ss:$16 sps:$4 sm:$0xff]  }
 0x153   :  { %6611 = vmatpush1.bf16.msra.mxu0 %v9461_v59  ;;  %7267 = vmatpush1.bf16.msra.mxu1 %v9464_v60  ;;  %v9550_v59 = vld [vmem:[%s13797_s1 + $0xc4c] ss:$16 sps:$4 sm:$0xff]   ;;  %v9545_v60 = vld [vmem:[%s13797_s1 + $0xc40] ss:$16 sps:$4 sm:$0xff]  }
 0x154   :  { %6612 = vmatprep.subr.bf16.mxu0 %v9469_v61  ;;  %7268 = vmatprep.subr.bf16.mxu1 %v9472_v62  ;;  %v9548_v61 = vld [vmem:[%s13797_s1 + $0xc48] ss:$16 sps:$4 sm:$0xff]   ;;  %v9553_v62 = vld [vmem:[%s13797_s1 + $0xc64] ss:$16 sps:$4 sm:$0xff]  }
 0x157   :  { %6613 = vmatpush1.bf16.msra.mxu0 %v9467_v63  ;;  %7269 = vmatpush1.bf16.msra.mxu1 %v9470_v0  ;;  %v9556_v63 = vld [vmem:[%s13797_s1 + $0xc6c] ss:$16 sps:$4 sm:$0xff]   ;;  %v9551_v0 = vld [vmem:[%s13797_s1 + $0xc60] ss:$16 sps:$4 sm:$0xff]  }
 0x158   :  { %6614 = vmatprep.subr.bf16.mxu0 %v9475_v1  ;;  %7270 = vmatprep.subr.bf16.mxu1 %v9478_v2  ;;  %v9554_v1 = vld [vmem:[%s13797_s1 + $0xc68] ss:$16 sps:$4 sm:$0xff]   ;;  %v9559_v2 = vld [vmem:[%s13797_s1 + $0xc84] ss:$16 sps:$4 sm:$0xff]  }
 0x15b   :  { %6615 = vmatpush1.bf16.msra.mxu0 %v9473_v3  ;;  %7271 = vmatpush1.bf16.msra.mxu1 %v9476_v4  ;;  %v9562_v3 = vld [vmem:[%s13797_s1 + $0xc8c] ss:$16 sps:$4 sm:$0xff]   ;;  %v9557_v4 = vld [vmem:[%s13797_s1 + $0xc80] ss:$16 sps:$4 sm:$0xff]  }
 0x15c   :  { %6616 = vmatprep.subr.bf16.mxu0 %v9481_v5  ;;  %7272 = vmatprep.subr.bf16.mxu1 %v9484_v6  ;;  %v9560_v5 = vld [vmem:[%s13797_s1 + $0xc88] ss:$16 sps:$4 sm:$0xff]   ;;  %v9565_v6 = vld [vmem:[%s13797_s1 + $0xca4] ss:$16 sps:$4 sm:$0xff]  }
 0x15f   :  { %6617 = vmatpush1.bf16.msra.mxu0 %v9479_v7  ;;  %7273 = vmatpush1.bf16.msra.mxu1 %v9482_v8  ;;  %v9568_v7 = vld [vmem:[%s13797_s1 + $0xcac] ss:$16 sps:$4 sm:$0xff]   ;;  %v9563_v8 = vld [vmem:[%s13797_s1 + $0xca0] ss:$16 sps:$4 sm:$0xff]  }
 0x160   :  { %6618 = vmatprep.subr.bf16.mxu0 %v9487_v9  ;;  %7274 = vmatprep.subr.bf16.mxu1 %v9490_v10  ;;  %v9566_v9 = vld [vmem:[%s13797_s1 + $0xca8] ss:$16 sps:$4 sm:$0xff]   ;;  %v9571_v10 = vld [vmem:[%s13797_s1 + $0xcc4] ss:$16 sps:$4 sm:$0xff]  }
 0x163   :  { %6619 = vmatpush1.bf16.msra.mxu0 %v9485_v11  ;;  %7275 = vmatpush1.bf16.msra.mxu1 %v9488_v12  ;;  %v9574_v11 = vld [vmem:[%s13797_s1 + $0xccc] ss:$16 sps:$4 sm:$0xff]   ;;  %v9569_v12 = vld [vmem:[%s13797_s1 + $0xcc0] ss:$16 sps:$4 sm:$0xff]  }
 0x164   :  { %6620 = vmatprep.subr.bf16.mxu0 %v9493_v14  ;;  %7276 = vmatprep.subr.bf16.mxu1 %v9496_v52  ;;  %v9572_v14 = vld [vmem:[%s13797_s1 + $0xcc8] ss:$16 sps:$4 sm:$0xff]   ;;  %v9577_v52 = vld [vmem:[%s13797_s1 + $0xce4] ss:$16 sps:$4 sm:$0xff]  }
 0x167   :  { %6621 = vmatpush1.bf16.msra.mxu0 %v9491_v16  ;;  %7277 = vmatpush1.bf16.msra.mxu1 %v9494_v17  ;;  %v9580_v16 = vld [vmem:[%s13797_s1 + $0xcec] ss:$16 sps:$4 sm:$0xff]   ;;  %v9575_v17 = vld [vmem:[%s13797_s1 + $0xce0] ss:$16 sps:$4 sm:$0xff]  }
 0x168   :  { %6622 = vmatprep.subr.bf16.mxu0 %v9499_v18  ;;  %7278 = vmatprep.subr.bf16.mxu1 %v9502_v19  ;;  %v9578_v18 = vld [vmem:[%s13797_s1 + $0xce8] ss:$16 sps:$4 sm:$0xff]   ;;  %v9583_v19 = vld [vmem:[%s13797_s1 + $0xd04] ss:$16 sps:$4 sm:$0xff]  }
 0x16b   :  { %6623 = vmatpush1.bf16.msra.mxu0 %v9497_v20  ;;  %7279 = vmatpush1.bf16.msra.mxu1 %v9500_v21  ;;  %v9586_v20 = vld [vmem:[%s13797_s1 + $0xd0c] ss:$16 sps:$4 sm:$0xff]   ;;  %v9581_v21 = vld [vmem:[%s13797_s1 + $0xd00] ss:$16 sps:$4 sm:$0xff]  }
 0x16c   :  { %6624 = vmatprep.subr.bf16.mxu0 %v9505_v22  ;;  %7280 = vmatprep.subr.bf16.mxu1 %v9508_v23  ;;  %v9584_v22 = vld [vmem:[%s13797_s1 + $0xd08] ss:$16 sps:$4 sm:$0xff]   ;;  %v9589_v23 = vld [vmem:[%s13797_s1 + $0xd24] ss:$16 sps:$4 sm:$0xff]  }
 0x16f   :  { %6625 = vmatpush1.bf16.msra.mxu0 %v9503_v25  ;;  %7281 = vmatpush1.bf16.msra.mxu1 %v9506_v13  ;;  %v9592_v25 = vld [vmem:[%s13797_s1 + $0xd2c] ss:$16 sps:$4 sm:$0xff]   ;;  %v9587_v13 = vld [vmem:[%s13797_s1 + $0xd20] ss:$16 sps:$4 sm:$0xff]  }
 0x170   :  { %6626 = vmatprep.subr.bf16.mxu0 %v9511_v27  ;;  %7282 = vmatprep.subr.bf16.mxu1 %v9514_v29  ;;  %v9590_v27 = vld [vmem:[%s13797_s1 + $0xd28] ss:$16 sps:$4 sm:$0xff]   ;;  %v9595_v29 = vld [vmem:[%s13797_s1 + $0xd44] ss:$16 sps:$4 sm:$0xff]  }
 0x173   :  { %6627 = vmatpush1.bf16.msra.mxu0 %v9509_v30  ;;  %7283 = vmatpush1.bf16.msra.mxu1 %v9512_v31  ;;  %v9598_v30 = vld [vmem:[%s13797_s1 + $0xd4c] ss:$16 sps:$4 sm:$0xff]   ;;  %v9593_v31 = vld [vmem:[%s13797_s1 + $0xd40] ss:$16 sps:$4 sm:$0xff]  }
 0x174   :  { %6628 = vmatprep.subr.bf16.mxu0 %v9517_v15  ;;  %7284 = vmatprep.subr.bf16.mxu1 %v9520_v32  ;;  %v9596_v15 = vld [vmem:[%s13797_s1 + $0xd48] ss:$16 sps:$4 sm:$0xff]   ;;  %v9601_v32 = vld [vmem:[%s13797_s1 + $0xd64] ss:$16 sps:$4 sm:$0xff]  }
 0x177   :  { %6629 = vmatpush1.bf16.msra.mxu0 %v9515_v33  ;;  %7285 = vmatpush1.bf16.msra.mxu1 %v9518_v26  ;;  %v9604_v33 = vld [vmem:[%s13797_s1 + $0xd6c] ss:$16 sps:$4 sm:$0xff]   ;;  %v9599_v26 = vld [vmem:[%s13797_s1 + $0xd60] ss:$16 sps:$4 sm:$0xff]  }
 0x178   :  { %6630 = vmatprep.subr.bf16.mxu0 %v9523_v34  ;;  %7286 = vmatprep.subr.bf16.mxu1 %v9526_v35  ;;  %v9602_v34 = vld [vmem:[%s13797_s1 + $0xd68] ss:$16 sps:$4 sm:$0xff]   ;;  %v9607_v35 = vld [vmem:[%s13797_s1 + $0xd84] ss:$16 sps:$4 sm:$0xff]  }
 0x17b   :  { %6631 = vmatpush1.bf16.msra.mxu0 %v9521_v39  ;;  %7287 = vmatpush1.bf16.msra.mxu1 %v9524_v41  ;;  %v9608_v39 = vld [vmem:[%s13797_s1 + $0xd88] ss:$16 sps:$4 sm:$0xff]   ;;  %v9613_v41 = vld [vmem:[%s13797_s1 + $0xda4] ss:$16 sps:$4 sm:$0xff]  }
 0x17c   :  { %6632 = vmatprep.subr.bf16.mxu0 %v9529_v42  ;;  %7288 = vmatprep.subr.bf16.mxu1 %v9532_v44  ;;  %v9616_v42 = vld [vmem:[%s13797_s1 + $0xdac] ss:$16 sps:$4 sm:$0xff]   ;;  %v9611_v44 = vld [vmem:[%s13797_s1 + $0xda0] ss:$16 sps:$4 sm:$0xff]  }
 0x17f   :  { %6633 = vmatpush1.bf16.msra.mxu0 %v9527_v45  ;;  %7289 = vmatpush1.bf16.msra.mxu1 %v9530_v46  ;;  %v9614_v45 = vld [vmem:[%s13797_s1 + $0xda8] ss:$16 sps:$4 sm:$0xff]   ;;  %v9619_v46 = vld [vmem:[%s13797_s1 + $0xdc4] ss:$16 sps:$4 sm:$0xff]  }
 0x180   :  { %6643 = vmatprep.subr.bf16.mxu0 %v9535_v47  ;;  %7299 = vmatprep.subr.bf16.mxu1 %v9538_v37  ;;  %v9622_v47 = vld [vmem:[%s13797_s1 + $0xdcc] ss:$16 sps:$4 sm:$0xff]   ;;  %v9617_v37 = vld [vmem:[%s13797_s1 + $0xdc0] ss:$16 sps:$4 sm:$0xff]  }
 0x182   :  { %6635 = vmatmul.mubr.bf16.vlgmr.msra.gmra.mrb[0].mxu0 %v1143_v50  ;;  %7291 = vmatmul.mubr.bf16.vlgmr.msra.gmra.mrb[0].mxu1 %v1143_v50  ;;  %v9625_v50 = vld [vmem:[%s13797_s1 + $0xde4] ss:$16 sps:$4 sm:$0xff]  }
 0x183   :  { %6644 = vmatpush1.bf16.msra.mxu0 %v9533_v51  ;;  %7300 = vmatpush1.bf16.msra.mxu1 %v9536_v53  ;;  %v9628_v51 = vld [vmem:[%s13797_s1 + $0xdec] ss:$16 sps:$4 sm:$0xff]   ;;  %v9623_v53 = vld [vmem:[%s13797_s1 + $0xde0] ss:$16 sps:$4 sm:$0xff]  }
 0x184   :  { %6645 = vmatprep.subr.bf16.mxu0 %v9541_v54  ;;  %7301 = vmatprep.subr.bf16.mxu1 %v9544_v40  ;;  %v9626_v54 = vld [vmem:[%s13797_s1 + $0xde8] ss:$16 sps:$4 sm:$0xff]   ;;  %v9632_v40 = vld [vmem:[%s13797_s1 + $0xe04] ss:$16 sps:$4 sm:$0xff]  }
 0x185   :  { %6675 = vmatprep.mubr.bf16.mxu0 %v11768_v55  ;;  %7331 = vmatprep.mubr.bf16.mxu1 %v11768_v55 }
 0x187   :  { %6646 = vmatpush1.bf16.msra.mxu0 %v9539_v56  ;;  %7302 = vmatpush1.bf16.msra.mxu1 %v9542_v57  ;;  %v9635_v56 = vld [vmem:[%s13797_s1 + $0xe0c] ss:$16 sps:$4 sm:$0xff]   ;;  %v11954_v57 = vrot.slane %v11737_v24, %v10660_v49 }
 0x188   :  { %6647 = vmatprep.subr.bf16.mxu0 %v9547_v58  ;;  %7303 = vmatprep.subr.bf16.mxu1 %v9550_v59  ;;  %v9630_v58 = vld [vmem:[%s13797_s1 + $0xe00] ss:$16 sps:$4 sm:$0xff]   ;;  %v9633_v59 = vld [vmem:[%s13797_s1 + $0xe08] ss:$16 sps:$4 sm:$0xff]   ;;  %v9641_v24 = vld [vmem:[%s13797_s1 + $0xe2c] ss:$16 sps:$4 sm:$0xff]  }
 0x18b   :  { %6648 = vmatpush1.bf16.msra.mxu0 %v9545_v60  ;;  %7304 = vmatpush1.bf16.msra.mxu1 %v9548_v61  ;;  %v9638_v60 = vld [vmem:[%s13797_s1 + $0xe24] ss:$16 sps:$4 sm:$0xff]   ;;  %v1146_v61 = vcombine.high %v11768_v55, %v11768_v55 }
 0x18c   :  { %6649 = vmatprep.subr.bf16.mxu0 %v9553_v62  ;;  %7305 = vmatprep.subr.bf16.mxu1 %v9556_v63  ;;  %v9636_v62 = vld [vmem:[%s13797_s1 + $0xe20] ss:$16 sps:$4 sm:$0xff]   ;;  %v9639_v63 = vld [vmem:[%s13797_s1 + $0xe28] ss:$16 sps:$4 sm:$0xff]   ;;  %v9644_v55 = vld [vmem:[%s13797_s1 + $0xe44] ss:$16 sps:$4 sm:$0xff]  }
 0x18f   :  { %6650 = vmatpush1.bf16.msra.mxu0 %v9551_v0  ;;  %7306 = vmatpush1.bf16.msra.mxu1 %v9554_v1  ;;  %v9647_v0 = vld [vmem:[%s13797_s1 + $0xe4c] ss:$16 sps:$4 sm:$0xff]   ;;  %v9642_v1 = vld [vmem:[%s13797_s1 + $0xe40] ss:$16 sps:$4 sm:$0xff]  }
 0x190   :  { %6651 = vmatprep.subr.bf16.mxu0 %v9559_v2  ;;  %7307 = vmatprep.subr.bf16.mxu1 %v9562_v3  ;;  %v9645_v2 = vld [vmem:[%s13797_s1 + $0xe48] ss:$16 sps:$4 sm:$0xff]   ;;  %v9650_v3 = vld [vmem:[%s13797_s1 + $0xe64] ss:$16 sps:$4 sm:$0xff]  }
 0x193   :  { %6652 = vmatpush1.bf16.msra.mxu0 %v9557_v4  ;;  %7308 = vmatpush1.bf16.msra.mxu1 %v9560_v5  ;;  %v9653_v4 = vld [vmem:[%s13797_s1 + $0xe6c] ss:$16 sps:$4 sm:$0xff]   ;;  %v9648_v5 = vld [vmem:[%s13797_s1 + $0xe60] ss:$16 sps:$4 sm:$0xff]  }
 0x194   :  { %6653 = vmatprep.subr.bf16.mxu0 %v9565_v6  ;;  %7309 = vmatprep.subr.bf16.mxu1 %v9568_v7  ;;  %v9651_v6 = vld [vmem:[%s13797_s1 + $0xe68] ss:$16 sps:$4 sm:$0xff]   ;;  %v9656_v7 = vld [vmem:[%s13797_s1 + $0xe84] ss:$16 sps:$4 sm:$0xff]  }
 0x197   :  { %6654 = vmatpush1.bf16.msra.mxu0 %v9563_v8  ;;  %7310 = vmatpush1.bf16.msra.mxu1 %v9566_v9  ;;  %v9659_v8 = vld [vmem:[%s13797_s1 + $0xe8c] ss:$16 sps:$4 sm:$0xff]   ;;  %v9654_v9 = vld [vmem:[%s13797_s1 + $0xe80] ss:$16 sps:$4 sm:$0xff]  }
 0x198   :  { %6655 = vmatprep.subr.bf16.mxu0 %v9571_v10  ;;  %7311 = vmatprep.subr.bf16.mxu1 %v9574_v11  ;;  %v9657_v10 = vld [vmem:[%s13797_s1 + $0xe88] ss:$16 sps:$4 sm:$0xff]   ;;  %v9662_v11 = vld [vmem:[%s13797_s1 + $0xea4] ss:$16 sps:$4 sm:$0xff]  }
 0x19b   :  { %6656 = vmatpush1.bf16.msra.mxu0 %v9569_v12  ;;  %7312 = vmatpush1.bf16.msra.mxu1 %v9572_v14  ;;  %v9665_v12 = vld [vmem:[%s13797_s1 + $0xeac] ss:$16 sps:$4 sm:$0xff]   ;;  %v9660_v14 = vld [vmem:[%s13797_s1 + $0xea0] ss:$16 sps:$4 sm:$0xff]  }
 0x19c   :  { %6657 = vmatprep.subr.bf16.mxu0 %v9577_v52  ;;  %7313 = vmatprep.subr.bf16.mxu1 %v9580_v16  ;;  %v9663_v52 = vld [vmem:[%s13797_s1 + $0xea8] ss:$16 sps:$4 sm:$0xff]   ;;  %v9668_v16 = vld [vmem:[%s13797_s1 + $0xec4] ss:$16 sps:$4 sm:$0xff]  }
 0x19f   :  { %6658 = vmatpush1.bf16.msra.mxu0 %v9575_v17  ;;  %7314 = vmatpush1.bf16.msra.mxu1 %v9578_v18  ;;  %v9671_v17 = vld [vmem:[%s13797_s1 + $0xecc] ss:$16 sps:$4 sm:$0xff]   ;;  %v9666_v18 = vld [vmem:[%s13797_s1 + $0xec0] ss:$16 sps:$4 sm:$0xff]  }
 0x1a0   :  { %6659 = vmatprep.subr.bf16.mxu0 %v9583_v19  ;;  %7315 = vmatprep.subr.bf16.mxu1 %v9586_v20  ;;  %v9669_v19 = vld [vmem:[%s13797_s1 + $0xec8] ss:$16 sps:$4 sm:$0xff]   ;;  %v9674_v20 = vld [vmem:[%s13797_s1 + $0xee4] ss:$16 sps:$4 sm:$0xff]  }
 0x1a3   :  { %6660 = vmatpush1.bf16.msra.mxu0 %v9581_v21  ;;  %7316 = vmatpush1.bf16.msra.mxu1 %v9584_v22  ;;  %v9677_v21 = vld [vmem:[%s13797_s1 + $0xeec] ss:$16 sps:$4 sm:$0xff]   ;;  %v9672_v22 = vld [vmem:[%s13797_s1 + $0xee0] ss:$16 sps:$4 sm:$0xff]  }
 0x1a4   :  { %6661 = vmatprep.subr.bf16.mxu0 %v9589_v23  ;;  %7317 = vmatprep.subr.bf16.mxu1 %v9592_v25  ;;  %v9675_v23 = vld [vmem:[%s13797_s1 + $0xee8] ss:$16 sps:$4 sm:$0xff]   ;;  %v9680_v25 = vld [vmem:[%s13797_s1 + $0xf04] ss:$16 sps:$4 sm:$0xff]  }
 0x1a7   :  { %6662 = vmatpush1.bf16.msra.mxu0 %v9587_v13  ;;  %7318 = vmatpush1.bf16.msra.mxu1 %v9590_v27  ;;  %v9683_v13 = vld [vmem:[%s13797_s1 + $0xf0c] ss:$16 sps:$4 sm:$0xff]   ;;  %v9678_v27 = vld [vmem:[%s13797_s1 + $0xf00] ss:$16 sps:$4 sm:$0xff]  }
 0x1a8   :  { %6663 = vmatprep.subr.bf16.mxu0 %v9595_v29  ;;  %7319 = vmatprep.subr.bf16.mxu1 %v9598_v30  ;;  %v9681_v29 = vld [vmem:[%s13797_s1 + $0xf08] ss:$16 sps:$4 sm:$0xff]   ;;  %v9686_v30 = vld [vmem:[%s13797_s1 + $0xf24] ss:$16 sps:$4 sm:$0xff]  }
 0x1ab   :  { %6664 = vmatpush1.bf16.msra.mxu0 %v9593_v31  ;;  %7320 = vmatpush1.bf16.msra.mxu1 %v9596_v15  ;;  %v9689_v31 = vld [vmem:[%s13797_s1 + $0xf2c] ss:$16 sps:$4 sm:$0xff]   ;;  %v9684_v15 = vld [vmem:[%s13797_s1 + $0xf20] ss:$16 sps:$4 sm:$0xff]  }
 0x1ac   :  { %6665 = vmatprep.subr.bf16.mxu0 %v9601_v32  ;;  %7321 = vmatprep.subr.bf16.mxu1 %v9604_v33  ;;  %v9687_v32 = vld [vmem:[%s13797_s1 + $0xf28] ss:$16 sps:$4 sm:$0xff]   ;;  %v9692_v33 = vld [vmem:[%s13797_s1 + $0xf44] ss:$16 sps:$4 sm:$0xff]  }
 0x1af   :  { %6666 = vmatpush1.bf16.msra.mxu0 %v9599_v26  ;;  %7322 = vmatpush1.bf16.msra.mxu1 %v9602_v34  ;;  %v9695_v26 = vld [vmem:[%s13797_s1 + $0xf4c] ss:$16 sps:$4 sm:$0xff]   ;;  %v9690_v34 = vld [vmem:[%s13797_s1 + $0xf40] ss:$16 sps:$4 sm:$0xff]  }
 0x1b0   :  { %6667 = vmatprep.subr.bf16.mxu0 %v9607_v35  ;;  %7323 = vmatprep.subr.bf16.mxu1 %v9610_v36  ;;  %v9693_v35 = vld [vmem:[%s13797_s1 + $0xf48] ss:$16 sps:$4 sm:$0xff]   ;;  %v9698_v36 = vld [vmem:[%s13797_s1 + $0xf64] ss:$16 sps:$4 sm:$0xff]  }
 0x1b3   :  { %6668 = vmatpush1.bf16.msra.mxu0 %v9605_v28  ;;  %7324 = vmatpush1.bf16.msra.mxu1 %v9608_v39  ;;  %v9701_v28 = vld [vmem:[%s13797_s1 + $0xf6c] ss:$16 sps:$4 sm:$0xff]   ;;  %v9696_v39 = vld [vmem:[%s13797_s1 + $0xf60] ss:$16 sps:$4 sm:$0xff]  }
 0x1b4   :  { %6669 = vmatprep.subr.bf16.mxu0 %v9613_v41  ;;  %7325 = vmatprep.subr.bf16.mxu1 %v9616_v42  ;;  %v9699_v41 = vld [vmem:[%s13797_s1 + $0xf68] ss:$16 sps:$4 sm:$0xff]   ;;  %v9704_v42 = vld [vmem:[%s13797_s1 + $0xf84] ss:$16 sps:$4 sm:$0xff]  }
 0x1b7   :  { %6670 = vmatpush1.bf16.msra.mxu0 %v9611_v44  ;;  %7326 = vmatpush1.bf16.msra.mxu1 %v9614_v45  ;;  %v9707_v44 = vld [vmem:[%s13797_s1 + $0xf8c] ss:$16 sps:$4 sm:$0xff]   ;;  %v9702_v45 = vld [vmem:[%s13797_s1 + $0xf80] ss:$16 sps:$4 sm:$0xff]  }
 0x1b8   :  { %6671 = vmatprep.subr.bf16.mxu0 %v9619_v46  ;;  %7327 = vmatprep.subr.bf16.mxu1 %v9622_v47  ;;  %v9705_v46 = vld [vmem:[%s13797_s1 + $0xf88] ss:$16 sps:$4 sm:$0xff]   ;;  %v9710_v47 = vld [vmem:[%s13797_s1 + $0xfa4] ss:$16 sps:$4 sm:$0xff]  }
 0x1bb   :  { %6672 = vmatpush1.bf16.msra.mxu0 %v9617_v37  ;;  %7328 = vmatpush1.bf16.msra.mxu1 %v9620_v48  ;;  %v9713_v37 = vld [vmem:[%s13797_s1 + $0xfac] ss:$16 sps:$4 sm:$0xff]   ;;  %v9708_v48 = vld [vmem:[%s13797_s1 + $0xfa0] ss:$16 sps:$4 sm:$0xff]  }
 0x1bc   :  { %6673 = vmatprep.subr.bf16.mxu0 %v9625_v50  ;;  %7329 = vmatprep.subr.bf16.mxu1 %v9628_v51  ;;  %v9711_v50 = vld [vmem:[%s13797_s1 + $0xfa8] ss:$16 sps:$4 sm:$0xff]   ;;  %v9716_v51 = vld [vmem:[%s13797_s1 + $0xfc4] ss:$16 sps:$4 sm:$0xff]  }
 0x1bf   :  { %6674 = vmatpush1.bf16.msra.mxu0 %v9623_v53  ;;  %7330 = vmatpush1.bf16.msra.mxu1 %v9626_v54  ;;  %v9719_v53 = vld [vmem:[%s13797_s1 + $0xfcc] ss:$16 sps:$4 sm:$0xff]   ;;  %v12131_v54 = vld [vmem:[%s13798_s0 + $0x10] sm:$0xff] }
 0x1c0   :  { %6684 = vmatprep.subr.bf16.mxu0 %v9632_v40  ;;  %7340 = vmatprep.subr.bf16.mxu1 %v9635_v56  ;;  %v9714_v40 = vld [vmem:[%s13797_s1 + $0xfc0] ss:$16 sps:$4 sm:$0xff]   ;;  %v9717_v56 = vld [vmem:[%s13797_s1 + $0xfc8] ss:$16 sps:$4 sm:$0xff]  }
 0x1c2   :  { %6676 = vmatmul.mubr.bf16.vlgmr.msra.gmra.mrb[0].mxu0 %v11954_v57  ;;  %7332 = vmatmul.mubr.bf16.vlgmr.msra.gmra.mrb[0].mxu1 %v11954_v57 }
 0x1c3   :  { %6685 = vmatpush1.bf16.msra.mxu0 %v9630_v58  ;;  %7341 = vmatpush1.bf16.msra.mxu1 %v9633_v59  ;;  %v9722_v58 = vld [vmem:[%s13797_s1 + $0xfe4] ss:$16 sps:$4 sm:$0xff]   ;;  %v9725_v59 = vld [vmem:[%s13797_s1 + $0xfec] ss:$16 sps:$4 sm:$0xff]  }
 0x1c4   :  { %6686 = vmatprep.subr.bf16.mxu0 %v9638_v60  ;;  %7342 = vmatprep.subr.bf16.mxu1 %v9641_v24  ;;  %v12147_v60 = vrot.slane %v12131_v54, %v10660_v49  ;;  %v9720_v24 = vld [vmem:[%s13797_s1 + $0xfe0] ss:$16 sps:$4 sm:$0xff]  }
 0x1c5   :  { %6716 = vmatprep.mubr.bf16.mxu0 %v1146_v61  ;;  %7372 = vmatprep.mubr.bf16.mxu1 %v1146_v61  ;;  %v9723_v61 = vld [vmem:[%s13797_s1 + $0xfe8] ss:$16 sps:$4 sm:$0xff]  }
 0x1c7   :  { %6687 = vmatpush1.bf16.msra.mxu0 %v9636_v62  ;;  %7343 = vmatpush1.bf16.msra.mxu1 %v9639_v63  ;;  %v9728_v62 = vld [vmem:[%s13797_s1 + $0x1004] ss:$16 sps:$4 sm:$0xff]   ;;  %v9731_v63 = vld [vmem:[%s13797_s1 + $0x100c] ss:$16 sps:$4 sm:$0xff]  }
 0x1c8   :  { %6688 = vmatprep.subr.bf16.mxu0 %v9644_v55  ;;  %7344 = vmatprep.subr.bf16.mxu1 %v9647_v0  ;;  %v1162_v55 = vcombine.high %v12147_v60, %v12147_v60  ;;  %v1144_v0 = vcombine.high %v11954_v57, %v11954_v57  ;;  %v9737_v57 = vld [vmem:[%s13797_s1 + $0x102c] ss:$16 sps:$4 sm:$0xff]  }
 0x1cb   :  { %6689 = vmatpush1.bf16.msra.mxu0 %v9642_v1  ;;  %7345 = vmatpush1.bf16.msra.mxu1 %v9645_v2  ;;  %v9726_v1 = vld [vmem:[%s13797_s1 + $0x1000] ss:$16 sps:$4 sm:$0xff]   ;;  %v9729_v2 = vld [vmem:[%s13797_s1 + $0x1008] ss:$16 sps:$4 sm:$0xff]  }
 0x1cc   :  { %6690 = vmatprep.subr.bf16.mxu0 %v9650_v3  ;;  %7346 = vmatprep.subr.bf16.mxu1 %v9653_v4  ;;  %v9734_v3 = vld [vmem:[%s13797_s1 + $0x1024] ss:$16 sps:$4 sm:$0xff]   ;;  %v12178_v4 = vrot.slane %v1162_v55, %v10660_v49  ;;  %v9810_v55 = vld [vmem:[%s13797_s1 + $0x11c0] ss:$16 sps:$4 sm:$0xff]  }
 0x1cf   :  { %6691 = vmatpush1.bf16.msra.mxu0 %v9648_v5  ;;  %7347 = vmatpush1.bf16.msra.mxu1 %v9651_v6  ;;  %v9732_v5 = vld [vmem:[%s13797_s1 + $0x1020] ss:$16 sps:$4 sm:$0xff]   ;;  %v9735_v6 = vld [vmem:[%s13797_s1 + $0x1028] ss:$16 sps:$4 sm:$0xff]  }
 0x1d0   :  { %6692 = vmatprep.subr.bf16.mxu0 %v9656_v7  ;;  %7348 = vmatprep.subr.bf16.mxu1 %v9659_v8  ;;  %v9740_v7 = vld [vmem:[%s13797_s1 + $0x1044] ss:$16 sps:$4 sm:$0xff]   ;;  %v9743_v8 = vld [vmem:[%s13797_s1 + $0x104c] ss:$16 sps:$4 sm:$0xff]  }
 0x1d3   :  { %6693 = vmatpush1.bf16.msra.mxu0 %v9654_v9  ;;  %7349 = vmatpush1.bf16.msra.mxu1 %v9657_v10  ;;  %v9738_v9 = vld [vmem:[%s13797_s1 + $0x1040] ss:$16 sps:$4 sm:$0xff]   ;;  %v9741_v10 = vld [vmem:[%s13797_s1 + $0x1048] ss:$16 sps:$4 sm:$0xff]  }
 0x1d4   :  { %6694 = vmatprep.subr.bf16.mxu0 %v9662_v11  ;;  %7350 = vmatprep.subr.bf16.mxu1 %v9665_v12  ;;  %v9746_v11 = vld [vmem:[%s13797_s1 + $0x1064] ss:$16 sps:$4 sm:$0xff]   ;;  %v9749_v12 = vld [vmem:[%s13797_s1 + $0x106c] ss:$16 sps:$4 sm:$0xff]  }
 0x1d7   :  { %6695 = vmatpush1.bf16.msra.mxu0 %v9660_v14  ;;  %7351 = vmatpush1.bf16.msra.mxu1 %v9663_v52  ;;  %v9744_v14 = vld [vmem:[%s13797_s1 + $0x1060] ss:$16 sps:$4 sm:$0xff]   ;;  %v9747_v52 = vld [vmem:[%s13797_s1 + $0x1068] ss:$16 sps:$4 sm:$0xff]  }
 0x1d8   :  { %6696 = vmatprep.subr.bf16.mxu0 %v9668_v16  ;;  %7352 = vmatprep.subr.bf16.mxu1 %v9671_v17  ;;  %v9752_v16 = vld [vmem:[%s13797_s1 + $0x1084] ss:$16 sps:$4 sm:$0xff]   ;;  %v9755_v17 = vld [vmem:[%s13797_s1 + $0x108c] ss:$16 sps:$4 sm:$0xff]  }
 0x1db   :  { %6697 = vmatpush1.bf16.msra.mxu0 %v9666_v18  ;;  %7353 = vmatpush1.bf16.msra.mxu1 %v9669_v19  ;;  %v9750_v18 = vld [vmem:[%s13797_s1 + $0x1080] ss:$16 sps:$4 sm:$0xff]   ;;  %v9753_v19 = vld [vmem:[%s13797_s1 + $0x1088] ss:$16 sps:$4 sm:$0xff]  }
 0x1dc   :  { %6698 = vmatprep.subr.bf16.mxu0 %v9674_v20  ;;  %7354 = vmatprep.subr.bf16.mxu1 %v9677_v21  ;;  %v9758_v20 = vld [vmem:[%s13797_s1 + $0x10a4] ss:$16 sps:$4 sm:$0xff]   ;;  %v9761_v21 = vld [vmem:[%s13797_s1 + $0x10ac] ss:$16 sps:$4 sm:$0xff]  }
 0x1df   :  { %6699 = vmatpush1.bf16.msra.mxu0 %v9672_v22  ;;  %7355 = vmatpush1.bf16.msra.mxu1 %v9675_v23  ;;  %v9756_v22 = vld [vmem:[%s13797_s1 + $0x10a0] ss:$16 sps:$4 sm:$0xff]   ;;  %v9759_v23 = vld [vmem:[%s13797_s1 + $0x10a8] ss:$16 sps:$4 sm:$0xff]  }
 0x1e0   :  { %6700 = vmatprep.subr.bf16.mxu0 %v9680_v25  ;;  %7356 = vmatprep.subr.bf16.mxu1 %v9683_v13  ;;  %v9764_v25 = vld [vmem:[%s13797_s1 + $0x10c4] ss:$16 sps:$4 sm:$0xff]   ;;  %v9767_v13 = vld [vmem:[%s13797_s1 + $0x10cc] ss:$16 sps:$4 sm:$0xff]  }
 0x1e3   :  { %6701 = vmatpush1.bf16.msra.mxu0 %v9678_v27  ;;  %7357 = vmatpush1.bf16.msra.mxu1 %v9681_v29  ;;  %v9762_v27 = vld [vmem:[%s13797_s1 + $0x10c0] ss:$16 sps:$4 sm:$0xff]   ;;  %v9765_v29 = vld [vmem:[%s13797_s1 + $0x10c8] ss:$16 sps:$4 sm:$0xff]  }
 0x1e4   :  { %6702 = vmatprep.subr.bf16.mxu0 %v9686_v30  ;;  %7358 = vmatprep.subr.bf16.mxu1 %v9689_v31  ;;  %v9770_v30 = vld [vmem:[%s13797_s1 + $0x10e4] ss:$16 sps:$4 sm:$0xff]   ;;  %v9773_v31 = vld [vmem:[%s13797_s1 + $0x10ec] ss:$16 sps:$4 sm:$0xff]  }
 0x1e7   :  { %6703 = vmatpush1.bf16.msra.mxu0 %v9684_v15  ;;  %7359 = vmatpush1.bf16.msra.mxu1 %v9687_v32  ;;  %v9768_v15 = vld [vmem:[%s13797_s1 + $0x10e0] ss:$16 sps:$4 sm:$0xff]   ;;  %v9771_v32 = vld [vmem:[%s13797_s1 + $0x10e8] ss:$16 sps:$4 sm:$0xff]  }
 0x1e8   :  { %6704 = vmatprep.subr.bf16.mxu0 %v9692_v33  ;;  %7360 = vmatprep.subr.bf16.mxu1 %v9695_v26  ;;  %v9776_v33 = vld [vmem:[%s13797_s1 + $0x1104] ss:$16 sps:$4 sm:$0xff]   ;;  %v9779_v26 = vld [vmem:[%s13797_s1 + $0x110c] ss:$16 sps:$4 sm:$0xff]  }
 0x1eb   :  { %6705 = vmatpush1.bf16.msra.mxu0 %v9690_v34  ;;  %7361 = vmatpush1.bf16.msra.mxu1 %v9693_v35  ;;  %v9774_v34 = vld [vmem:[%s13797_s1 + $0x1100] ss:$16 sps:$4 sm:$0xff]   ;;  %v9777_v35 = vld [vmem:[%s13797_s1 + $0x1108] ss:$16 sps:$4 sm:$0xff]  }
 0x1ec   :  { %6706 = vmatprep.subr.bf16.mxu0 %v9698_v36  ;;  %7362 = vmatprep.subr.bf16.mxu1 %v9701_v28  ;;  %v9782_v36 = vld [vmem:[%s13797_s1 + $0x1124] ss:$16 sps:$4 sm:$0xff]   ;;  %v9785_v28 = vld [vmem:[%s13797_s1 + $0x112c] ss:$16 sps:$4 sm:$0xff]  }
 0x1ef   :  { %6707 = vmatpush1.bf16.msra.mxu0 %v9696_v39  ;;  %7363 = vmatpush1.bf16.msra.mxu1 %v9699_v41  ;;  %v9780_v39 = vld [vmem:[%s13797_s1 + $0x1120] ss:$16 sps:$4 sm:$0xff]   ;;  %v9783_v41 = vld [vmem:[%s13797_s1 + $0x1128] ss:$16 sps:$4 sm:$0xff]  }
 0x1f0   :  { %6708 = vmatprep.subr.bf16.mxu0 %v9704_v42  ;;  %7364 = vmatprep.subr.bf16.mxu1 %v9707_v44  ;;  %v9788_v42 = vld [vmem:[%s13797_s1 + $0x1144] ss:$16 sps:$4 sm:$0xff]   ;;  %v9791_v44 = vld [vmem:[%s13797_s1 + $0x114c] ss:$16 sps:$4 sm:$0xff]  }
 0x1f3   :  { %6709 = vmatpush1.bf16.msra.mxu0 %v9702_v45  ;;  %7365 = vmatpush1.bf16.msra.mxu1 %v9705_v46  ;;  %v9786_v45 = vld [vmem:[%s13797_s1 + $0x1140] ss:$16 sps:$4 sm:$0xff]   ;;  %v9789_v46 = vld [vmem:[%s13797_s1 + $0x1148] ss:$16 sps:$4 sm:$0xff]  }
 0x1f4   :  { %6710 = vmatprep.subr.bf16.mxu0 %v9710_v47  ;;  %7366 = vmatprep.subr.bf16.mxu1 %v9713_v37  ;;  %v9794_v47 = vld [vmem:[%s13797_s1 + $0x1164] ss:$16 sps:$4 sm:$0xff]   ;;  %v9797_v37 = vld [vmem:[%s13797_s1 + $0x116c] ss:$16 sps:$4 sm:$0xff]  }
 0x1f7   :  { %6711 = vmatpush1.bf16.msra.mxu0 %v9708_v48  ;;  %7367 = vmatpush1.bf16.msra.mxu1 %v9711_v50  ;;  %v9792_v48 = vld [vmem:[%s13797_s1 + $0x1160] ss:$16 sps:$4 sm:$0xff]   ;;  %v9795_v50 = vld [vmem:[%s13797_s1 + $0x1168] ss:$16 sps:$4 sm:$0xff]  }
 0x1f8   :  { %6712 = vmatprep.subr.bf16.mxu0 %v9716_v51  ;;  %7368 = vmatprep.subr.bf16.mxu1 %v9719_v53  ;;  %v9800_v51 = vld [vmem:[%s13797_s1 + $0x1184] ss:$16 sps:$4 sm:$0xff]   ;;  %v9803_v53 = vld [vmem:[%s13797_s1 + $0x118c] ss:$16 sps:$4 sm:$0xff]  }
 0x1fb   :  { %6713 = vmatpush1.bf16.msra.mxu0 %v9714_v40  ;;  %7369 = vmatpush1.bf16.msra.mxu1 %v9717_v56  ;;  %v9798_v40 = vld [vmem:[%s13797_s1 + $0x1180] ss:$16 sps:$4 sm:$0xff]   ;;  %v9801_v56 = vld [vmem:[%s13797_s1 + $0x1188] ss:$16 sps:$4 sm:$0xff]  }
 0x1fc   :  { %6714 = vmatprep.subr.bf16.mxu0 %v9722_v58  ;;  %7370 = vmatprep.subr.bf16.mxu1 %v9725_v59  ;;  %v9806_v58 = vld [vmem:[%s13797_s1 + $0x11a4] ss:$16 sps:$4 sm:$0xff]   ;;  %v9809_v59 = vld [vmem:[%s13797_s1 + $0x11ac] ss:$16 sps:$4 sm:$0xff]  }
 0x1ff   :  { %6715 = vmatpush1.bf16.msra.mxu0 %v9720_v24  ;;  %7371 = vmatpush1.bf16.msra.mxu1 %v9723_v61  ;;  %v9804_v24 = vld [vmem:[%s13797_s1 + $0x11a0] ss:$16 sps:$4 sm:$0xff]   ;;  %v9807_v61 = vld [vmem:[%s13797_s1 + $0x11a8] ss:$16 sps:$4 sm:$0xff]  }
 0x200   :  { %6725 = vmatprep.subr.bf16.mxu0 %v9728_v62  ;;  %7381 = vmatprep.subr.bf16.mxu1 %v9731_v63  ;;  %v9812_v62 = vld [vmem:[%s13797_s1 + $0x11c4] ss:$16 sps:$4 sm:$0xff]   ;;  %v9815_v63 = vld [vmem:[%s13797_s1 + $0x11cc] ss:$16 sps:$4 sm:$0xff]  }
 0x202   :  { %6717 = vmatmul.mubr.bf16.vlgmr.msra.gmra.mrb[0].mxu0 %v1144_v0  ;;  %7373 = vmatmul.mubr.bf16.vlgmr.msra.gmra.mrb[0].mxu1 %v1144_v0  ;;  %v9813_v0 = vld [vmem:[%s13797_s1 + $0x11c8] ss:$16 sps:$4 sm:$0xff]  }
 0x203   :  { %6726 = vmatpush1.bf16.msra.mxu0 %v9726_v1  ;;  %7382 = vmatpush1.bf16.msra.mxu1 %v9729_v2  ;;  %v9818_v1 = vld [vmem:[%s13797_s1 + $0x11e4] ss:$16 sps:$4 sm:$0xff]   ;;  %v9821_v2 = vld [vmem:[%s13797_s1 + $0x11ec] ss:$16 sps:$4 sm:$0xff]  }
 0x204   :  { %6727 = vmatprep.subr.bf16.mxu0 %v9734_v3  ;;  %7383 = vmatprep.subr.bf16.mxu1 %v9737_v57  ;;  %v9816_v3 = vld [vmem:[%s13797_s1 + $0x11e0] ss:$16 sps:$4 sm:$0xff]   ;;  %v9819_v57 = vld [vmem:[%s13797_s1 + $0x11e8] ss:$16 sps:$4 sm:$0xff]  }
 0x205   :  { %6757 = vmatprep.mubr.bf16.mxu0 %v12178_v4  ;;  %7413 = vmatprep.mubr.bf16.mxu1 %v12178_v4 }
 0x207   :  { %6728 = vmatpush1.bf16.msra.mxu0 %v9732_v5  ;;  %7384 = vmatpush1.bf16.msra.mxu1 %v9735_v6  ;;  %v9824_v5 = vld [vmem:[%s13797_s1 + $0x1204] ss:$16 sps:$4 sm:$0xff]   ;;  %v9827_v6 = vld [vmem:[%s13797_s1 + $0x120c] ss:$16 sps:$4 sm:$0xff]  }
 0x208   :  { %6729 = vmatprep.subr.bf16.mxu0 %v9740_v7  ;;  %7385 = vmatprep.subr.bf16.mxu1 %v9743_v8  ;;  %v12364_v7 = vrot.slane %v12147_v60, %v10660_v49  ;;  %v9822_v8 = vld [vmem:[%s13797_s1 + $0x1200] ss:$16 sps:$4 sm:$0xff]   ;;  %v9833_v60 = vld [vmem:[%s13797_s1 + $0x122c] ss:$16 sps:$4 sm:$0xff]  }
 0x20b   :  { %6730 = vmatpush1.bf16.msra.mxu0 %v9738_v9  ;;  %7386 = vmatpush1.bf16.msra.mxu1 %v9741_v10  ;;  %v9825_v9 = vld [vmem:[%s13797_s1 + $0x1208] ss:$16 sps:$4 sm:$0xff]   ;;  %v9830_v10 = vld [vmem:[%s13797_s1 + $0x1224] ss:$16 sps:$4 sm:$0xff]  }
 0x20c   :  { %6731 = vmatprep.subr.bf16.mxu0 %v9746_v11  ;;  %7387 = vmatprep.subr.bf16.mxu1 %v9749_v12  ;;  %v1194_v11 = vcombine.high %v12178_v4, %v12178_v4  ;;  %v9828_v12 = vld [vmem:[%s13797_s1 + $0x1220] ss:$16 sps:$4 sm:$0xff]   ;;  %v9836_v4 = vld [vmem:[%s13797_s1 + $0x1244] ss:$16 sps:$4 sm:$0xff]  }
 0x20f   :  { %6732 = vmatpush1.bf16.msra.mxu0 %v9744_v14  ;;  %7388 = vmatpush1.bf16.msra.mxu1 %v9747_v52  ;;  %v9831_v14 = vld [vmem:[%s13797_s1 + $0x1228] ss:$16 sps:$4 sm:$0xff]   ;;  %v9839_v52 = vld [vmem:[%s13797_s1 + $0x124c] ss:$16 sps:$4 sm:$0xff]  }
 0x210   :  { %6733 = vmatprep.subr.bf16.mxu0 %v9752_v16  ;;  %7389 = vmatprep.subr.bf16.mxu1 %v9755_v17  ;;  %v9834_v16 = vld [vmem:[%s13797_s1 + $0x1240] ss:$16 sps:$4 sm:$0xff]   ;;  %v9837_v17 = vld [vmem:[%s13797_s1 + $0x1248] ss:$16 sps:$4 sm:$0xff]  }
 0x213   :  { %6734 = vmatpush1.bf16.msra.mxu0 %v9750_v18  ;;  %7390 = vmatpush1.bf16.msra.mxu1 %v9753_v19  ;;  %v9842_v18 = vld [vmem:[%s13797_s1 + $0x1264] ss:$16 sps:$4 sm:$0xff]   ;;  %v9845_v19 = vld [vmem:[%s13797_s1 + $0x126c] ss:$16 sps:$4 sm:$0xff]  }
 0x214   :  { %6735 = vmatprep.subr.bf16.mxu0 %v9758_v20  ;;  %7391 = vmatprep.subr.bf16.mxu1 %v9761_v21  ;;  %v9840_v20 = vld [vmem:[%s13797_s1 + $0x1260] ss:$16 sps:$4 sm:$0xff]   ;;  %v9843_v21 = vld [vmem:[%s13797_s1 + $0x1268] ss:$16 sps:$4 sm:$0xff]  }
 0x217   :  { %6736 = vmatpush1.bf16.msra.mxu0 %v9756_v22  ;;  %7392 = vmatpush1.bf16.msra.mxu1 %v9759_v23  ;;  %v9848_v22 = vld [vmem:[%s13797_s1 + $0x1284] ss:$16 sps:$4 sm:$0xff]   ;;  %v9851_v23 = vld [vmem:[%s13797_s1 + $0x128c] ss:$16 sps:$4 sm:$0xff]  }
 0x218   :  { %6737 = vmatprep.subr.bf16.mxu0 %v9764_v25  ;;  %7393 = vmatprep.subr.bf16.mxu1 %v9767_v13  ;;  %v9846_v25 = vld [vmem:[%s13797_s1 + $0x1280] ss:$16 sps:$4 sm:$0xff]   ;;  %v9849_v13 = vld [vmem:[%s13797_s1 + $0x1288] ss:$16 sps:$4 sm:$0xff]  }
 0x21b   :  { %6738 = vmatpush1.bf16.msra.mxu0 %v9762_v27  ;;  %7394 = vmatpush1.bf16.msra.mxu1 %v9765_v29  ;;  %v9854_v27 = vld [vmem:[%s13797_s1 + $0x12a4] ss:$16 sps:$4 sm:$0xff]   ;;  %v9857_v29 = vld [vmem:[%s13797_s1 + $0x12ac] ss:$16 sps:$4 sm:$0xff]  }
 0x21c   :  { %6739 = vmatprep.subr.bf16.mxu0 %v9770_v30  ;;  %7395 = vmatprep.subr.bf16.mxu1 %v9773_v31  ;;  %v9852_v30 = vld [vmem:[%s13797_s1 + $0x12a0] ss:$16 sps:$4 sm:$0xff]   ;;  %v9855_v31 = vld [vmem:[%s13797_s1 + $0x12a8] ss:$16 sps:$4 sm:$0xff]  }
 0x21f   :  { %6740 = vmatpush1.bf16.msra.mxu0 %v9768_v15  ;;  %7396 = vmatpush1.bf16.msra.mxu1 %v9771_v32  ;;  %v9860_v15 = vld [vmem:[%s13797_s1 + $0x12c4] ss:$16 sps:$4 sm:$0xff]   ;;  %v9863_v32 = vld [vmem:[%s13797_s1 + $0x12cc] ss:$16 sps:$4 sm:$0xff]  }
 0x220   :  { %6741 = vmatprep.subr.bf16.mxu0 %v9776_v33  ;;  %7397 = vmatprep.subr.bf16.mxu1 %v9779_v26  ;;  %v9858_v33 = vld [vmem:[%s13797_s1 + $0x12c0] ss:$16 sps:$4 sm:$0xff]   ;;  %v9861_v26 = vld [vmem:[%s13797_s1 + $0x12c8] ss:$16 sps:$4 sm:$0xff]  }
 0x223   :  { %6742 = vmatpush1.bf16.msra.mxu0 %v9774_v34  ;;  %7398 = vmatpush1.bf16.msra.mxu1 %v9777_v35  ;;  %v9866_v34 = vld [vmem:[%s13797_s1 + $0x12e4] ss:$16 sps:$4 sm:$0xff]   ;;  %v9869_v35 = vld [vmem:[%s13797_s1 + $0x12ec] ss:$16 sps:$4 sm:$0xff]  }
 0x224   :  { %6743 = vmatprep.subr.bf16.mxu0 %v9782_v36  ;;  %7399 = vmatprep.subr.bf16.mxu1 %v9785_v28  ;;  %v9864_v36 = vld [vmem:[%s13797_s1 + $0x12e0] ss:$16 sps:$4 sm:$0xff]   ;;  %v9867_v28 = vld [vmem:[%s13797_s1 + $0x12e8] ss:$16 sps:$4 sm:$0xff]  }
 0x227   :  { %6744 = vmatpush1.bf16.msra.mxu0 %v9780_v39  ;;  %7400 = vmatpush1.bf16.msra.mxu1 %v9783_v41  ;;  %v9872_v39 = vld [vmem:[%s13797_s1 + $0x1304] ss:$16 sps:$4 sm:$0xff]   ;;  %v9875_v41 = vld [vmem:[%s13797_s1 + $0x130c] ss:$16 sps:$4 sm:$0xff]  }
 0x228   :  { %6745 = vmatprep.subr.bf16.mxu0 %v9788_v42  ;;  %7401 = vmatprep.subr.bf16.mxu1 %v9791_v44  ;;  %v9870_v42 = vld [vmem:[%s13797_s1 + $0x1300] ss:$16 sps:$4 sm:$0xff]   ;;  %v9873_v44 = vld [vmem:[%s13797_s1 + $0x1308] ss:$16 sps:$4 sm:$0xff]  }
 0x22b   :  { %6746 = vmatpush1.bf16.msra.mxu0 %v9786_v45  ;;  %7402 = vmatpush1.bf16.msra.mxu1 %v9789_v46  ;;  %v9878_v45 = vld [vmem:[%s13797_s1 + $0x1324] ss:$16 sps:$4 sm:$0xff]   ;;  %v9881_v46 = vld [vmem:[%s13797_s1 + $0x132c] ss:$16 sps:$4 sm:$0xff]  }
 0x22c   :  { %6747 = vmatprep.subr.bf16.mxu0 %v9794_v47  ;;  %7403 = vmatprep.subr.bf16.mxu1 %v9797_v37  ;;  %v9876_v47 = vld [vmem:[%s13797_s1 + $0x1320] ss:$16 sps:$4 sm:$0xff]   ;;  %v9879_v37 = vld [vmem:[%s13797_s1 + $0x1328] ss:$16 sps:$4 sm:$0xff]  }
 0x22f   :  { %6748 = vmatpush1.bf16.msra.mxu0 %v9792_v48  ;;  %7404 = vmatpush1.bf16.msra.mxu1 %v9795_v50  ;;  %v9884_v48 = vld [vmem:[%s13797_s1 + $0x1344] ss:$16 sps:$4 sm:$0xff]   ;;  %v9887_v50 = vld [vmem:[%s13797_s1 + $0x134c] ss:$16 sps:$4 sm:$0xff]  }
 0x230   :  { %6749 = vmatprep.subr.bf16.mxu0 %v9800_v51  ;;  %7405 = vmatprep.subr.bf16.mxu1 %v9803_v53  ;;  %v9882_v51 = vld [vmem:[%s13797_s1 + $0x1340] ss:$16 sps:$4 sm:$0xff]   ;;  %v9885_v53 = vld [vmem:[%s13797_s1 + $0x1348] ss:$16 sps:$4 sm:$0xff]  }
 0x233   :  { %6750 = vmatpush1.bf16.msra.mxu0 %v9798_v40  ;;  %7406 = vmatpush1.bf16.msra.mxu1 %v9801_v56  ;;  %v9890_v40 = vld [vmem:[%s13797_s1 + $0x1364] ss:$16 sps:$4 sm:$0xff]   ;;  %v9893_v56 = vld [vmem:[%s13797_s1 + $0x136c] ss:$16 sps:$4 sm:$0xff]  }
 0x234   :  { %6751 = vmatprep.subr.bf16.mxu0 %v9806_v58  ;;  %7407 = vmatprep.subr.bf16.mxu1 %v9809_v59  ;;  %v9888_v58 = vld [vmem:[%s13797_s1 + $0x1360] ss:$16 sps:$4 sm:$0xff]   ;;  %v9891_v59 = vld [vmem:[%s13797_s1 + $0x1368] ss:$16 sps:$4 sm:$0xff]  }
 0x237   :  { %6752 = vmatpush1.bf16.msra.mxu0 %v9804_v24  ;;  %7408 = vmatpush1.bf16.msra.mxu1 %v9807_v61  ;;  %v9896_v24 = vld [vmem:[%s13797_s1 + $0x1384] ss:$16 sps:$4 sm:$0xff]   ;;  %v9899_v61 = vld [vmem:[%s13797_s1 + $0x138c] ss:$16 sps:$4 sm:$0xff]  }
 0x238   :  { %6753 = vmatprep.subr.bf16.mxu0 %v9812_v62  ;;  %7409 = vmatprep.subr.bf16.mxu1 %v9815_v63  ;;  %v9894_v62 = vld [vmem:[%s13797_s1 + $0x1380] ss:$16 sps:$4 sm:$0xff]   ;;  %v9897_v63 = vld [vmem:[%s13797_s1 + $0x1388] ss:$16 sps:$4 sm:$0xff]  }
 0x23b   :  { %6754 = vmatpush1.bf16.msra.mxu0 %v9810_v55  ;;  %7410 = vmatpush1.bf16.msra.mxu1 %v9813_v0  ;;  %v9902_v55 = vld [vmem:[%s13797_s1 + $0x13a4] ss:$16 sps:$4 sm:$0xff]   ;;  %v9905_v0 = vld [vmem:[%s13797_s1 + $0x13ac] ss:$16 sps:$4 sm:$0xff]  }
 0x23c   :  { %6755 = vmatprep.subr.bf16.mxu0 %v9818_v1  ;;  %7411 = vmatprep.subr.bf16.mxu1 %v9821_v2  ;;  %v9900_v1 = vld [vmem:[%s13797_s1 + $0x13a0] ss:$16 sps:$4 sm:$0xff]   ;;  %v9903_v2 = vld [vmem:[%s13797_s1 + $0x13a8] ss:$16 sps:$4 sm:$0xff]  }
 0x23f   :  { %6756 = vmatpush1.bf16.msra.mxu0 %v9816_v3  ;;  %7412 = vmatpush1.bf16.msra.mxu1 %v9819_v57  ;;  %v9908_v3 = vld [vmem:[%s13797_s1 + $0x13c4] ss:$16 sps:$4 sm:$0xff]   ;;  %v9911_v57 = vld [vmem:[%s13797_s1 + $0x13cc] ss:$16 sps:$4 sm:$0xff]  }
 0x240   :  { %6766 = vmatprep.subr.bf16.mxu0 %v9824_v5  ;;  %7422 = vmatprep.subr.bf16.mxu1 %v9827_v6  ;;  %v1147_v5 = vcombine.high %v12131_v54, %v12131_v54  ;;  %v9906_v6 = vld [vmem:[%s13797_s1 + $0x13c0] ss:$16 sps:$4 sm:$0xff]   ;;  %v9917_v54 = vld [vmem:[%s13797_s1 + $0x13ec] ss:$16 sps:$4 sm:$0xff]  }
 0x242   :  { %6758 = vmatmul.mubr.bf16.vlgmr.msra.gmra.mrb[0].mxu0 %v12364_v7  ;;  %7414 = vmatmul.mubr.bf16.vlgmr.msra.gmra.mrb[0].mxu1 %v12364_v7 }
 0x243   :  { %6767 = vmatpush1.bf16.msra.mxu0 %v9822_v8  ;;  %7423 = vmatpush1.bf16.msra.mxu1 %v9825_v9  ;;  %v9909_v8 = vld [vmem:[%s13797_s1 + $0x13c8] ss:$16 sps:$4 sm:$0xff]   ;;  %v9914_v9 = vld [vmem:[%s13797_s1 + $0x13e4] ss:$16 sps:$4 sm:$0xff]  }
 0x244   :  { %6768 = vmatprep.subr.bf16.mxu0 %v9830_v10  ;;  %7424 = vmatprep.subr.bf16.mxu1 %v9833_v60  ;;  %v12553_v10 = vrot.slane %v1147_v5, %v10660_v49  ;;  %v9912_v60 = vld [vmem:[%s13797_s1 + $0x13e0] ss:$16 sps:$4 sm:$0xff]  }
 0x245   :  { %6798 = vmatprep.mubr.bf16.mxu0 %v1194_v11  ;;  %7454 = vmatprep.mubr.bf16.mxu1 %v1194_v11  ;;  %v9915_v11 = vld [vmem:[%s13797_s1 + $0x13e8] ss:$16 sps:$4 sm:$0xff]   ;;  %v9990_v5 = vld [vmem:[%s13797_s1 + $0x1580] ss:$16 sps:$4 sm:$0xff]  }
 0x247   :  { %6769 = vmatpush1.bf16.msra.mxu0 %v9828_v12  ;;  %7425 = vmatpush1.bf16.msra.mxu1 %v9831_v14  ;;  %v9920_v12 = vld [vmem:[%s13797_s1 + $0x1404] ss:$16 sps:$4 sm:$0xff]   ;;  %v9923_v14 = vld [vmem:[%s13797_s1 + $0x140c] ss:$16 sps:$4 sm:$0xff]  }
 0x248   :  { %6770 = vmatprep.subr.bf16.mxu0 %v9836_v4  ;;  %7426 = vmatprep.subr.bf16.mxu1 %v9839_v52  ;;  %v1163_v4 = vcombine.high %v12553_v10, %v12553_v10  ;;  %v1192_v52 = vcombine.high %v12364_v7, %v12364_v7  ;;  %v9929_v7 = vld [vmem:[%s13797_s1 + $0x142c] ss:$16 sps:$4 sm:$0xff]  }
 0x24b   :  { %6771 = vmatpush1.bf16.msra.mxu0 %v9834_v16  ;;  %7427 = vmatpush1.bf16.msra.mxu1 %v9837_v17  ;;  %v9918_v16 = vld [vmem:[%s13797_s1 + $0x1400] ss:$16 sps:$4 sm:$0xff]   ;;  %v9921_v17 = vld [vmem:[%s13797_s1 + $0x1408] ss:$16 sps:$4 sm:$0xff]  }
 0x24c   :  { %6772 = vmatprep.subr.bf16.mxu0 %v9842_v18  ;;  %7428 = vmatprep.subr.bf16.mxu1 %v9845_v19  ;;  %v9926_v18 = vld [vmem:[%s13797_s1 + $0x1424] ss:$16 sps:$4 sm:$0xff]   ;;  %v12584_v19 = vrot.slane %v1163_v4, %v10660_v49  ;;  %v10005_v4 = vld [vmem:[%s13797_s1 + $0x15c8] ss:$16 sps:$4 sm:$0xff]  }
 0x24f   :  { %6773 = vmatpush1.bf16.msra.mxu0 %v9840_v20  ;;  %7429 = vmatpush1.bf16.msra.mxu1 %v9843_v21  ;;  %v9924_v20 = vld [vmem:[%s13797_s1 + $0x1420] ss:$16 sps:$4 sm:$0xff]   ;;  %v9927_v21 = vld [vmem:[%s13797_s1 + $0x1428] ss:$16 sps:$4 sm:$0xff]  }
 0x250   :  { %6774 = vmatprep.subr.bf16.mxu0 %v9848_v22  ;;  %7430 = vmatprep.subr.bf16.mxu1 %v9851_v23  ;;  %v9932_v22 = vld [vmem:[%s13797_s1 + $0x1444] ss:$16 sps:$4 sm:$0xff]   ;;  %v9935_v23 = vld [vmem:[%s13797_s1 + $0x144c] ss:$16 sps:$4 sm:$0xff]  }
 0x253   :  { %6775 = vmatpush1.bf16.msra.mxu0 %v9846_v25  ;;  %7431 = vmatpush1.bf16.msra.mxu1 %v9849_v13  ;;  %v9930_v25 = vld [vmem:[%s13797_s1 + $0x1440] ss:$16 sps:$4 sm:$0xff]   ;;  %v9933_v13 = vld [vmem:[%s13797_s1 + $0x1448] ss:$16 sps:$4 sm:$0xff]  }
 0x254   :  { %6776 = vmatprep.subr.bf16.mxu0 %v9854_v27  ;;  %7432 = vmatprep.subr.bf16.mxu1 %v9857_v29  ;;  %v9938_v27 = vld [vmem:[%s13797_s1 + $0x1464] ss:$16 sps:$4 sm:$0xff]   ;;  %v9941_v29 = vld [vmem:[%s13797_s1 + $0x146c] ss:$16 sps:$4 sm:$0xff]  }
 0x257   :  { %6777 = vmatpush1.bf16.msra.mxu0 %v9852_v30  ;;  %7433 = vmatpush1.bf16.msra.mxu1 %v9855_v31  ;;  %v9936_v30 = vld [vmem:[%s13797_s1 + $0x1460] ss:$16 sps:$4 sm:$0xff]   ;;  %v9939_v31 = vld [vmem:[%s13797_s1 + $0x1468] ss:$16 sps:$4 sm:$0xff]  }
 0x258   :  { %6778 = vmatprep.subr.bf16.mxu0 %v9860_v15  ;;  %7434 = vmatprep.subr.bf16.mxu1 %v9863_v32  ;;  %v9944_v15 = vld [vmem:[%s13797_s1 + $0x1484] ss:$16 sps:$4 sm:$0xff]   ;;  %v9947_v32 = vld [vmem:[%s13797_s1 + $0x148c] ss:$16 sps:$4 sm:$0xff]  }
 0x25b   :  { %6779 = vmatpush1.bf16.msra.mxu0 %v9858_v33  ;;  %7435 = vmatpush1.bf16.msra.mxu1 %v9861_v26  ;;  %v9942_v33 = vld [vmem:[%s13797_s1 + $0x1480] ss:$16 sps:$4 sm:$0xff]   ;;  %v9945_v26 = vld [vmem:[%s13797_s1 + $0x1488] ss:$16 sps:$4 sm:$0xff]  }
 0x25c   :  { %6780 = vmatprep.subr.bf16.mxu0 %v9866_v34  ;;  %7436 = vmatprep.subr.bf16.mxu1 %v9869_v35  ;;  %v9950_v34 = vld [vmem:[%s13797_s1 + $0x14a4] ss:$16 sps:$4 sm:$0xff]   ;;  %v9953_v35 = vld [vmem:[%s13797_s1 + $0x14ac] ss:$16 sps:$4 sm:$0xff]  }
 0x25f   :  { %6781 = vmatpush1.bf16.msra.mxu0 %v9864_v36  ;;  %7437 = vmatpush1.bf16.msra.mxu1 %v9867_v28  ;;  %v9948_v36 = vld [vmem:[%s13797_s1 + $0x14a0] ss:$16 sps:$4 sm:$0xff]   ;;  %v9951_v28 = vld [vmem:[%s13797_s1 + $0x14a8] ss:$16 sps:$4 sm:$0xff]  }
 0x260   :  { %6782 = vmatprep.subr.bf16.mxu0 %v9872_v39  ;;  %7438 = vmatprep.subr.bf16.mxu1 %v9875_v41  ;;  %v9956_v39 = vld [vmem:[%s13797_s1 + $0x14c4] ss:$16 sps:$4 sm:$0xff]   ;;  %v9959_v41 = vld [vmem:[%s13797_s1 + $0x14cc] ss:$16 sps:$4 sm:$0xff]  }
 0x263   :  { %6783 = vmatpush1.bf16.msra.mxu0 %v9870_v42  ;;  %7439 = vmatpush1.bf16.msra.mxu1 %v9873_v44  ;;  %v9954_v42 = vld [vmem:[%s13797_s1 + $0x14c0] ss:$16 sps:$4 sm:$0xff]   ;;  %v9957_v44 = vld [vmem:[%s13797_s1 + $0x14c8] ss:$16 sps:$4 sm:$0xff]  }
 0x264   :  { %6784 = vmatprep.subr.bf16.mxu0 %v9878_v45  ;;  %7440 = vmatprep.subr.bf16.mxu1 %v9881_v46  ;;  %v9962_v45 = vld [vmem:[%s13797_s1 + $0x14e4] ss:$16 sps:$4 sm:$0xff]   ;;  %v9965_v46 = vld [vmem:[%s13797_s1 + $0x14ec] ss:$16 sps:$4 sm:$0xff]  }
 0x267   :  { %6785 = vmatpush1.bf16.msra.mxu0 %v9876_v47  ;;  %7441 = vmatpush1.bf16.msra.mxu1 %v9879_v37  ;;  %v9960_v47 = vld [vmem:[%s13797_s1 + $0x14e0] ss:$16 sps:$4 sm:$0xff]   ;;  %v9963_v37 = vld [vmem:[%s13797_s1 + $0x14e8] ss:$16 sps:$4 sm:$0xff]  }
 0x268   :  { %6786 = vmatprep.subr.bf16.mxu0 %v9884_v48  ;;  %7442 = vmatprep.subr.bf16.mxu1 %v9887_v50  ;;  %v9968_v48 = vld [vmem:[%s13797_s1 + $0x1504] ss:$16 sps:$4 sm:$0xff]   ;;  %v9971_v50 = vld [vmem:[%s13797_s1 + $0x150c] ss:$16 sps:$4 sm:$0xff]  }
 0x26b   :  { %6787 = vmatpush1.bf16.msra.mxu0 %v9882_v51  ;;  %7443 = vmatpush1.bf16.msra.mxu1 %v9885_v53  ;;  %v9966_v51 = vld [vmem:[%s13797_s1 + $0x1500] ss:$16 sps:$4 sm:$0xff]   ;;  %v9969_v53 = vld [vmem:[%s13797_s1 + $0x1508] ss:$16 sps:$4 sm:$0xff]  }
 0x26c   :  { %6788 = vmatprep.subr.bf16.mxu0 %v9890_v40  ;;  %7444 = vmatprep.subr.bf16.mxu1 %v9893_v56  ;;  %v9974_v40 = vld [vmem:[%s13797_s1 + $0x1524] ss:$16 sps:$4 sm:$0xff]   ;;  %v9977_v56 = vld [vmem:[%s13797_s1 + $0x152c] ss:$16 sps:$4 sm:$0xff]  }
 0x26f   :  { %6789 = vmatpush1.bf16.msra.mxu0 %v9888_v58  ;;  %7445 = vmatpush1.bf16.msra.mxu1 %v9891_v59  ;;  %v9972_v58 = vld [vmem:[%s13797_s1 + $0x1520] ss:$16 sps:$4 sm:$0xff]   ;;  %v9975_v59 = vld [vmem:[%s13797_s1 + $0x1528] ss:$16 sps:$4 sm:$0xff]  }
 0x270   :  { %6790 = vmatprep.subr.bf16.mxu0 %v9896_v24  ;;  %7446 = vmatprep.subr.bf16.mxu1 %v9899_v61  ;;  %v9980_v24 = vld [vmem:[%s13797_s1 + $0x1544] ss:$16 sps:$4 sm:$0xff]   ;;  %v9983_v61 = vld [vmem:[%s13797_s1 + $0x154c] ss:$16 sps:$4 sm:$0xff]  }
 0x273   :  { %6791 = vmatpush1.bf16.msra.mxu0 %v9894_v62  ;;  %7447 = vmatpush1.bf16.msra.mxu1 %v9897_v63  ;;  %v9978_v62 = vld [vmem:[%s13797_s1 + $0x1540] ss:$16 sps:$4 sm:$0xff]   ;;  %v9981_v63 = vld [vmem:[%s13797_s1 + $0x1548] ss:$16 sps:$4 sm:$0xff]  }
 0x274   :  { %6792 = vmatprep.subr.bf16.mxu0 %v9902_v55  ;;  %7448 = vmatprep.subr.bf16.mxu1 %v9905_v0  ;;  %v9986_v55 = vld [vmem:[%s13797_s1 + $0x1564] ss:$16 sps:$4 sm:$0xff]   ;;  %v9989_v0 = vld [vmem:[%s13797_s1 + $0x156c] ss:$16 sps:$4 sm:$0xff]  }
 0x277   :  { %6793 = vmatpush1.bf16.msra.mxu0 %v9900_v1  ;;  %7449 = vmatpush1.bf16.msra.mxu1 %v9903_v2  ;;  %v9984_v1 = vld [vmem:[%s13797_s1 + $0x1560] ss:$16 sps:$4 sm:$0xff]   ;;  %v9987_v2 = vld [vmem:[%s13797_s1 + $0x1568] ss:$16 sps:$4 sm:$0xff]  }
 0x278   :  { %6794 = vmatprep.subr.bf16.mxu0 %v9908_v3  ;;  %7450 = vmatprep.subr.bf16.mxu1 %v9911_v57  ;;  %v9992_v3 = vld [vmem:[%s13797_s1 + $0x1584] ss:$16 sps:$4 sm:$0xff]   ;;  %v9995_v57 = vld [vmem:[%s13797_s1 + $0x158c] ss:$16 sps:$4 sm:$0xff]  }
 0x27b   :  { %6795 = vmatpush1.bf16.msra.mxu0 %v9906_v6  ;;  %7451 = vmatpush1.bf16.msra.mxu1 %v9909_v8  ;;  %v9993_v6 = vld [vmem:[%s13797_s1 + $0x1588] ss:$16 sps:$4 sm:$0xff]   ;;  %v9998_v8 = vld [vmem:[%s13797_s1 + $0x15a4] ss:$16 sps:$4 sm:$0xff]  }
 0x27c   :  { %6796 = vmatprep.subr.bf16.mxu0 %v9914_v9  ;;  %7452 = vmatprep.subr.bf16.mxu1 %v9917_v54  ;;  %v10001_v9 = vld [vmem:[%s13797_s1 + $0x15ac] ss:$16 sps:$4 sm:$0xff]   ;;  %v9996_v54 = vld [vmem:[%s13797_s1 + $0x15a0] ss:$16 sps:$4 sm:$0xff]  }
 0x27f   :  { %6797 = vmatpush1.bf16.msra.mxu0 %v9912_v60  ;;  %7453 = vmatpush1.bf16.msra.mxu1 %v9915_v11  ;;  %v9999_v60 = vld [vmem:[%s13797_s1 + $0x15a8] ss:$16 sps:$4 sm:$0xff]   ;;  %v10004_v11 = vld [vmem:[%s13797_s1 + $0x15c4] ss:$16 sps:$4 sm:$0xff]  }
 0x280   :  { %6807 = vmatprep.subr.bf16.mxu0 %v9920_v12  ;;  %7463 = vmatprep.subr.bf16.mxu1 %v9923_v14  ;;  %v10007_v12 = vld [vmem:[%s13797_s1 + $0x15cc] ss:$16 sps:$4 sm:$0xff]   ;;  %v10002_v14 = vld [vmem:[%s13797_s1 + $0x15c0] ss:$16 sps:$4 sm:$0xff]  }
 0x282   :  { %6799 = vmatmul.mubr.bf16.vlgmr.msra.gmra.mrb[0].mxu0 %v1192_v52  ;;  %7455 = vmatmul.mubr.bf16.vlgmr.msra.gmra.mrb[0].mxu1 %v1192_v52  ;;  %v10010_v52 = vld [vmem:[%s13797_s1 + $0x15e4] ss:$16 sps:$4 sm:$0xff]  }
 0x283   :  { %6808 = vmatpush1.bf16.msra.mxu0 %v9918_v16  ;;  %7464 = vmatpush1.bf16.msra.mxu1 %v9921_v17  ;;  %v10013_v16 = vld [vmem:[%s13797_s1 + $0x15ec] ss:$16 sps:$4 sm:$0xff]   ;;  %v10008_v17 = vld [vmem:[%s13797_s1 + $0x15e0] ss:$16 sps:$4 sm:$0xff]  }
 0x284   :  { %6809 = vmatprep.subr.bf16.mxu0 %v9926_v18  ;;  %7465 = vmatprep.subr.bf16.mxu1 %v9929_v7  ;;  %v10011_v18 = vld [vmem:[%s13797_s1 + $0x15e8] ss:$16 sps:$4 sm:$0xff]   ;;  %v10017_v7 = vld [vmem:[%s13797_s1 + $0x1604] ss:$16 sps:$4 sm:$0xff]  }
 0x285   :  { %6839 = vmatprep.mubr.bf16.mxu0 %v12584_v19  ;;  %7495 = vmatprep.mubr.bf16.mxu1 %v12584_v19 }
 0x287   :  { %6810 = vmatpush1.bf16.msra.mxu0 %v9924_v20  ;;  %7466 = vmatpush1.bf16.msra.mxu1 %v9927_v21  ;;  %v10020_v20 = vld [vmem:[%s13797_s1 + $0x160c] ss:$16 sps:$4 sm:$0xff]   ;;  %v12770_v21 = vrot.slane %v12553_v10, %v10660_v49 }
 0x288   :  { %6811 = vmatprep.subr.bf16.mxu0 %v9932_v22  ;;  %7467 = vmatprep.subr.bf16.mxu1 %v9935_v23  ;;  %v10015_v22 = vld [vmem:[%s13797_s1 + $0x1600] ss:$16 sps:$4 sm:$0xff]   ;;  %v10018_v23 = vld [vmem:[%s13797_s1 + $0x1608] ss:$16 sps:$4 sm:$0xff]   ;;  %v10026_v10 = vld [vmem:[%s13797_s1 + $0x162c] ss:$16 sps:$4 sm:$0xff]  }
 0x28b   :  { %6812 = vmatpush1.bf16.msra.mxu0 %v9930_v25  ;;  %7468 = vmatpush1.bf16.msra.mxu1 %v9933_v13  ;;  %v10023_v25 = vld [vmem:[%s13797_s1 + $0x1624] ss:$16 sps:$4 sm:$0xff]   ;;  %v1195_v13 = vcombine.high %v12584_v19, %v12584_v19 }
 0x28c   :  { %6813 = vmatprep.subr.bf16.mxu0 %v9938_v27  ;;  %7469 = vmatprep.subr.bf16.mxu1 %v9941_v29  ;;  %v10021_v27 = vld [vmem:[%s13797_s1 + $0x1620] ss:$16 sps:$4 sm:$0xff]   ;;  %v10024_v29 = vld [vmem:[%s13797_s1 + $0x1628] ss:$16 sps:$4 sm:$0xff]   ;;  %v10029_v19 = vld [vmem:[%s13797_s1 + $0x1644] ss:$16 sps:$4 sm:$0xff]  }
 0x28f   :  { %6814 = vmatpush1.bf16.msra.mxu0 %v9936_v30  ;;  %7470 = vmatpush1.bf16.msra.mxu1 %v9939_v31  ;;  %v10032_v30 = vld [vmem:[%s13797_s1 + $0x164c] ss:$16 sps:$4 sm:$0xff]   ;;  %v10027_v31 = vld [vmem:[%s13797_s1 + $0x1640] ss:$16 sps:$4 sm:$0xff]  }
 0x290   :  { %6815 = vmatprep.subr.bf16.mxu0 %v9944_v15  ;;  %7471 = vmatprep.subr.bf16.mxu1 %v9947_v32  ;;  %v10030_v15 = vld [vmem:[%s13797_s1 + $0x1648] ss:$16 sps:$4 sm:$0xff]   ;;  %v10035_v32 = vld [vmem:[%s13797_s1 + $0x1664] ss:$16 sps:$4 sm:$0xff]  }
 0x293   :  { %6816 = vmatpush1.bf16.msra.mxu0 %v9942_v33  ;;  %7472 = vmatpush1.bf16.msra.mxu1 %v9945_v26  ;;  %v10038_v33 = vld [vmem:[%s13797_s1 + $0x166c] ss:$16 sps:$4 sm:$0xff]   ;;  %v10033_v26 = vld [vmem:[%s13797_s1 + $0x1660] ss:$16 sps:$4 sm:$0xff]  }
 0x294   :  { %6817 = vmatprep.subr.bf16.mxu0 %v9950_v34  ;;  %7473 = vmatprep.subr.bf16.mxu1 %v9953_v35  ;;  %v10036_v34 = vld [vmem:[%s13797_s1 + $0x1668] ss:$16 sps:$4 sm:$0xff]   ;;  %v10041_v35 = vld [vmem:[%s13797_s1 + $0x1684] ss:$16 sps:$4 sm:$0xff]  }
 0x297   :  { %6818 = vmatpush1.bf16.msra.mxu0 %v9948_v36  ;;  %7474 = vmatpush1.bf16.msra.mxu1 %v9951_v28  ;;  %v10044_v36 = vld [vmem:[%s13797_s1 + $0x168c] ss:$16 sps:$4 sm:$0xff]   ;;  %v10039_v28 = vld [vmem:[%s13797_s1 + $0x1680] ss:$16 sps:$4 sm:$0xff]  }
 0x298   :  { %6819 = vmatprep.subr.bf16.mxu0 %v9956_v39  ;;  %7475 = vmatprep.subr.bf16.mxu1 %v9959_v41  ;;  %v10042_v39 = vld [vmem:[%s13797_s1 + $0x1688] ss:$16 sps:$4 sm:$0xff]   ;;  %v10047_v41 = vld [vmem:[%s13797_s1 + $0x16a4] ss:$16 sps:$4 sm:$0xff]  }
 0x29b   :  { %6820 = vmatpush1.bf16.msra.mxu0 %v9954_v42  ;;  %7476 = vmatpush1.bf16.msra.mxu1 %v9957_v44  ;;  %v10050_v42 = vld [vmem:[%s13797_s1 + $0x16ac] ss:$16 sps:$4 sm:$0xff]   ;;  %v10045_v44 = vld [vmem:[%s13797_s1 + $0x16a0] ss:$16 sps:$4 sm:$0xff]  }
 0x29c   :  { %6821 = vmatprep.subr.bf16.mxu0 %v9962_v45  ;;  %7477 = vmatprep.subr.bf16.mxu1 %v9965_v46  ;;  %v10048_v45 = vld [vmem:[%s13797_s1 + $0x16a8] ss:$16 sps:$4 sm:$0xff]   ;;  %v10053_v46 = vld [vmem:[%s13797_s1 + $0x16c4] ss:$16 sps:$4 sm:$0xff]  }
 0x29f   :  { %6822 = vmatpush1.bf16.msra.mxu0 %v9960_v47  ;;  %7478 = vmatpush1.bf16.msra.mxu1 %v9963_v37  ;;  %v10056_v47 = vld [vmem:[%s13797_s1 + $0x16cc] ss:$16 sps:$4 sm:$0xff]   ;;  %v10051_v37 = vld [vmem:[%s13797_s1 + $0x16c0] ss:$16 sps:$4 sm:$0xff]  }
 0x2a0   :  { %6823 = vmatprep.subr.bf16.mxu0 %v9968_v48  ;;  %7479 = vmatprep.subr.bf16.mxu1 %v9971_v50  ;;  %v10054_v48 = vld [vmem:[%s13797_s1 + $0x16c8] ss:$16 sps:$4 sm:$0xff]   ;;  %v10059_v50 = vld [vmem:[%s13797_s1 + $0x16e4] ss:$16 sps:$4 sm:$0xff]  }
 0x2a3   :  { %6824 = vmatpush1.bf16.msra.mxu0 %v9966_v51  ;;  %7480 = vmatpush1.bf16.msra.mxu1 %v9969_v53  ;;  %v10062_v51 = vld [vmem:[%s13797_s1 + $0x16ec] ss:$16 sps:$4 sm:$0xff]   ;;  %v10057_v53 = vld [vmem:[%s13797_s1 + $0x16e0] ss:$16 sps:$4 sm:$0xff]  }
 0x2a4   :  { %6825 = vmatprep.subr.bf16.mxu0 %v9974_v40  ;;  %7481 = vmatprep.subr.bf16.mxu1 %v9977_v56  ;;  %v10060_v40 = vld [vmem:[%s13797_s1 + $0x16e8] ss:$16 sps:$4 sm:$0xff]   ;;  %v10065_v56 = vld [vmem:[%s13797_s1 + $0x1704] ss:$16 sps:$4 sm:$0xff]  }
 0x2a7   :  { %6826 = vmatpush1.bf16.msra.mxu0 %v9972_v58  ;;  %7482 = vmatpush1.bf16.msra.mxu1 %v9975_v59  ;;  %v10068_v58 = vld [vmem:[%s13797_s1 + $0x170c] ss:$16 sps:$4 sm:$0xff]   ;;  %v10063_v59 = vld [vmem:[%s13797_s1 + $0x1700] ss:$16 sps:$4 sm:$0xff]  }
 0x2a8   :  { %6827 = vmatprep.subr.bf16.mxu0 %v9980_v24  ;;  %7483 = vmatprep.subr.bf16.mxu1 %v9983_v61  ;;  %v10066_v24 = vld [vmem:[%s13797_s1 + $0x1708] ss:$16 sps:$4 sm:$0xff]   ;;  %v10071_v61 = vld [vmem:[%s13797_s1 + $0x1724] ss:$16 sps:$4 sm:$0xff]  }
 0x2ab   :  { %6828 = vmatpush1.bf16.msra.mxu0 %v9978_v62  ;;  %7484 = vmatpush1.bf16.msra.mxu1 %v9981_v63  ;;  %v10074_v62 = vld [vmem:[%s13797_s1 + $0x172c] ss:$16 sps:$4 sm:$0xff]   ;;  %v10069_v63 = vld [vmem:[%s13797_s1 + $0x1720] ss:$16 sps:$4 sm:$0xff]  }
 0x2ac   :  { %6829 = vmatprep.subr.bf16.mxu0 %v9986_v55  ;;  %7485 = vmatprep.subr.bf16.mxu1 %v9989_v0  ;;  %v10072_v55 = vld [vmem:[%s13797_s1 + $0x1728] ss:$16 sps:$4 sm:$0xff]   ;;  %v10077_v0 = vld [vmem:[%s13797_s1 + $0x1744] ss:$16 sps:$4 sm:$0xff]  }
 0x2af   :  { %6830 = vmatpush1.bf16.msra.mxu0 %v9984_v1  ;;  %7486 = vmatpush1.bf16.msra.mxu1 %v9987_v2  ;;  %v10080_v1 = vld [vmem:[%s13797_s1 + $0x174c] ss:$16 sps:$4 sm:$0xff]   ;;  %v10075_v2 = vld [vmem:[%s13797_s1 + $0x1740] ss:$16 sps:$4 sm:$0xff]  }
 0x2b0   :  { %6831 = vmatprep.subr.bf16.mxu0 %v9992_v3  ;;  %7487 = vmatprep.subr.bf16.mxu1 %v9995_v57  ;;  %v10078_v3 = vld [vmem:[%s13797_s1 + $0x1748] ss:$16 sps:$4 sm:$0xff]   ;;  %v10083_v57 = vld [vmem:[%s13797_s1 + $0x1764] ss:$16 sps:$4 sm:$0xff]  }
 0x2b3   :  { %6832 = vmatpush1.bf16.msra.mxu0 %v9990_v5  ;;  %7488 = vmatpush1.bf16.msra.mxu1 %v9993_v6  ;;  %v10086_v5 = vld [vmem:[%s13797_s1 + $0x176c] ss:$16 sps:$4 sm:$0xff]   ;;  %v10081_v6 = vld [vmem:[%s13797_s1 + $0x1760] ss:$16 sps:$4 sm:$0xff]  }
 0x2b4   :  { %6833 = vmatprep.subr.bf16.mxu0 %v9998_v8  ;;  %7489 = vmatprep.subr.bf16.mxu1 %v10001_v9  ;;  %v10084_v8 = vld [vmem:[%s13797_s1 + $0x1768] ss:$16 sps:$4 sm:$0xff]   ;;  %v10089_v9 = vld [vmem:[%s13797_s1 + $0x1784] ss:$16 sps:$4 sm:$0xff]  }
 0x2b7   :  { %6834 = vmatpush1.bf16.msra.mxu0 %v9996_v54  ;;  %7490 = vmatpush1.bf16.msra.mxu1 %v9999_v60  ;;  %v10092_v54 = vld [vmem:[%s13797_s1 + $0x178c] ss:$16 sps:$4 sm:$0xff]   ;;  %v10087_v60 = vld [vmem:[%s13797_s1 + $0x1780] ss:$16 sps:$4 sm:$0xff]  }
 0x2b8   :  { %6835 = vmatprep.subr.bf16.mxu0 %v10004_v11  ;;  %7491 = vmatprep.subr.bf16.mxu1 %v10007_v12  ;;  %v10090_v11 = vld [vmem:[%s13797_s1 + $0x1788] ss:$16 sps:$4 sm:$0xff]   ;;  %v10095_v12 = vld [vmem:[%s13797_s1 + $0x17a4] ss:$16 sps:$4 sm:$0xff]  }
 0x2bb   :  { %6836 = vmatpush1.bf16.msra.mxu0 %v10002_v14  ;;  %7492 = vmatpush1.bf16.msra.mxu1 %v10005_v4  ;;  %v10098_v14 = vld [vmem:[%s13797_s1 + $0x17ac] ss:$16 sps:$4 sm:$0xff]   ;;  %v10093_v4 = vld [vmem:[%s13797_s1 + $0x17a0] ss:$16 sps:$4 sm:$0xff]  }
 0x2bc   :  { %6837 = vmatprep.subr.bf16.mxu0 %v10010_v52  ;;  %7493 = vmatprep.subr.bf16.mxu1 %v10013_v16  ;;  %v10096_v52 = vld [vmem:[%s13797_s1 + $0x17a8] ss:$16 sps:$4 sm:$0xff]   ;;  %v10101_v16 = vld [vmem:[%s13797_s1 + $0x17c4] ss:$16 sps:$4 sm:$0xff]  }
 0x2bf   :  { %6838 = vmatpush1.bf16.msra.mxu0 %v10008_v17  ;;  %7494 = vmatpush1.bf16.msra.mxu1 %v10011_v18  ;;  %v10104_v17 = vld [vmem:[%s13797_s1 + $0x17cc] ss:$16 sps:$4 sm:$0xff]  }
 0x2c0   :  { %6848 = vmatprep.subr.bf16.mxu0 %v10017_v7  ;;  %7504 = vmatprep.subr.bf16.mxu1 %v10020_v20  ;;  %v12947_v18 = vld [vmem:[%s13798_s0 + $0x18] sm:$0xff]  ;;  %v10099_v7 = vld [vmem:[%s13797_s1 + $0x17c0] ss:$16 sps:$4 sm:$0xff]  }
 0x2c1   :  { %v10102_v20 = vld [vmem:[%s13797_s1 + $0x17c8] ss:$16 sps:$4 sm:$0xff]  }
 0x2c2   :  { %6840 = vmatmul.mubr.bf16.vlgmr.msra.gmra.mrb[0].mxu0 %v12770_v21  ;;  %7496 = vmatmul.mubr.bf16.vlgmr.msra.gmra.mrb[0].mxu1 %v12770_v21 }
 0x2c3   :  { %6849 = vmatpush1.bf16.msra.mxu0 %v10015_v22  ;;  %7505 = vmatpush1.bf16.msra.mxu1 %v10018_v23  ;;  %v10107_v22 = vld [vmem:[%s13797_s1 + $0x17e4] ss:$16 sps:$4 sm:$0xff]   ;;  %v10110_v23 = vld [vmem:[%s13797_s1 + $0x17ec] ss:$16 sps:$4 sm:$0xff]  }
 0x2c4   :  { %6850 = vmatprep.subr.bf16.mxu0 %v10023_v25  ;;  %7506 = vmatprep.subr.bf16.mxu1 %v10026_v10  ;;  %v12963_v25 = vrot.slane %v12947_v18, %v10660_v49  ;;  %v10105_v10 = vld [vmem:[%s13797_s1 + $0x17e0] ss:$16 sps:$4 sm:$0xff]  }
 0x2c5   :  { %6880 = vmatprep.mubr.bf16.mxu0 %v1195_v13  ;;  %7536 = vmatprep.mubr.bf16.mxu1 %v1195_v13  ;;  %v10108_v13 = vld [vmem:[%s13797_s1 + $0x17e8] ss:$16 sps:$4 sm:$0xff]  }
 0x2c7   :  { %6851 = vmatpush1.bf16.msra.mxu0 %v10021_v27  ;;  %7507 = vmatpush1.bf16.msra.mxu1 %v10024_v29  ;;  %v10113_v27 = vld [vmem:[%s13797_s1 + $0x1804] ss:$16 sps:$4 sm:$0xff]   ;;  %v10116_v29 = vld [vmem:[%s13797_s1 + $0x180c] ss:$16 sps:$4 sm:$0xff]  }
 0x2c8   :  { %6852 = vmatprep.subr.bf16.mxu0 %v10029_v19  ;;  %7508 = vmatprep.subr.bf16.mxu1 %v10032_v30  ;;  %v1211_v19 = vcombine.high %v12963_v25, %v12963_v25  ;;  %v1193_v30 = vcombine.high %v12770_v21, %v12770_v21  ;;  %v10122_v21 = vld [vmem:[%s13797_s1 + $0x182c] ss:$16 sps:$4 sm:$0xff]  }
 0x2cb   :  { %6853 = vmatpush1.bf16.msra.mxu0 %v10027_v31  ;;  %7509 = vmatpush1.bf16.msra.mxu1 %v10030_v15  ;;  %v10111_v31 = vld [vmem:[%s13797_s1 + $0x1800] ss:$16 sps:$4 sm:$0xff]   ;;  %v10114_v15 = vld [vmem:[%s13797_s1 + $0x1808] ss:$16 sps:$4 sm:$0xff]  }
 0x2cc   :  { %6854 = vmatprep.subr.bf16.mxu0 %v10035_v32  ;;  %7510 = vmatprep.subr.bf16.mxu1 %v10038_v33  ;;  %v10119_v32 = vld [vmem:[%s13797_s1 + $0x1824] ss:$16 sps:$4 sm:$0xff]   ;;  %v12994_v33 = vrot.slane %v1211_v19, %v10660_v49  ;;  %v10195_v19 = vld [vmem:[%s13797_s1 + $0x19c0] ss:$16 sps:$4 sm:$0xff]  }
 0x2cf   :  { %6855 = vmatpush1.bf16.msra.mxu0 %v10033_v26  ;;  %7511 = vmatpush1.bf16.msra.mxu1 %v10036_v34  ;;  %v10117_v26 = vld [vmem:[%s13797_s1 + $0x1820] ss:$16 sps:$4 sm:$0xff]   ;;  %v10120_v34 = vld [vmem:[%s13797_s1 + $0x1828] ss:$16 sps:$4 sm:$0xff]  }
 0x2d0   :  { %6856 = vmatprep.subr.bf16.mxu0 %v10041_v35  ;;  %7512 = vmatprep.subr.bf16.mxu1 %v10044_v36  ;;  %v10125_v35 = vld [vmem:[%s13797_s1 + $0x1844] ss:$16 sps:$4 sm:$0xff]   ;;  %v10128_v36 = vld [vmem:[%s13797_s1 + $0x184c] ss:$16 sps:$4 sm:$0xff]  }
 0x2d3   :  { %6857 = vmatpush1.bf16.msra.mxu0 %v10039_v28  ;;  %7513 = vmatpush1.bf16.msra.mxu1 %v10042_v39  ;;  %v10123_v28 = vld [vmem:[%s13797_s1 + $0x1840] ss:$16 sps:$4 sm:$0xff]   ;;  %v10126_v39 = vld [vmem:[%s13797_s1 + $0x1848] ss:$16 sps:$4 sm:$0xff]  }
 0x2d4   :  { %6858 = vmatprep.subr.bf16.mxu0 %v10047_v41  ;;  %7514 = vmatprep.subr.bf16.mxu1 %v10050_v42  ;;  %v10131_v41 = vld [vmem:[%s13797_s1 + $0x1864] ss:$16 sps:$4 sm:$0xff]   ;;  %v10134_v42 = vld [vmem:[%s13797_s1 + $0x186c] ss:$16 sps:$4 sm:$0xff]  }
 0x2d7   :  { %6859 = vmatpush1.bf16.msra.mxu0 %v10045_v44  ;;  %7515 = vmatpush1.bf16.msra.mxu1 %v10048_v45  ;;  %v10129_v44 = vld [vmem:[%s13797_s1 + $0x1860] ss:$16 sps:$4 sm:$0xff]   ;;  %v10132_v45 = vld [vmem:[%s13797_s1 + $0x1868] ss:$16 sps:$4 sm:$0xff]  }
 0x2d8   :  { %6860 = vmatprep.subr.bf16.mxu0 %v10053_v46  ;;  %7516 = vmatprep.subr.bf16.mxu1 %v10056_v47  ;;  %v10137_v46 = vld [vmem:[%s13797_s1 + $0x1884] ss:$16 sps:$4 sm:$0xff]   ;;  %v10140_v47 = vld [vmem:[%s13797_s1 + $0x188c] ss:$16 sps:$4 sm:$0xff]  }
 0x2db   :  { %6861 = vmatpush1.bf16.msra.mxu0 %v10051_v37  ;;  %7517 = vmatpush1.bf16.msra.mxu1 %v10054_v48  ;;  %v10135_v37 = vld [vmem:[%s13797_s1 + $0x1880] ss:$16 sps:$4 sm:$0xff]   ;;  %v10138_v48 = vld [vmem:[%s13797_s1 + $0x1888] ss:$16 sps:$4 sm:$0xff]  }
 0x2dc   :  { %6862 = vmatprep.subr.bf16.mxu0 %v10059_v50  ;;  %7518 = vmatprep.subr.bf16.mxu1 %v10062_v51  ;;  %v10143_v50 = vld [vmem:[%s13797_s1 + $0x18a4] ss:$16 sps:$4 sm:$0xff]   ;;  %v10146_v51 = vld [vmem:[%s13797_s1 + $0x18ac] ss:$16 sps:$4 sm:$0xff]  }
 0x2df   :  { %6863 = vmatpush1.bf16.msra.mxu0 %v10057_v53  ;;  %7519 = vmatpush1.bf16.msra.mxu1 %v10060_v40  ;;  %v10141_v53 = vld [vmem:[%s13797_s1 + $0x18a0] ss:$16 sps:$4 sm:$0xff]   ;;  %v10144_v40 = vld [vmem:[%s13797_s1 + $0x18a8] ss:$16 sps:$4 sm:$0xff]  }
 0x2e0   :  { %6864 = vmatprep.subr.bf16.mxu0 %v10065_v56  ;;  %7520 = vmatprep.subr.bf16.mxu1 %v10068_v58  ;;  %v10149_v56 = vld [vmem:[%s13797_s1 + $0x18c4] ss:$16 sps:$4 sm:$0xff]   ;;  %v10152_v58 = vld [vmem:[%s13797_s1 + $0x18cc] ss:$16 sps:$4 sm:$0xff]  }
 0x2e3   :  { %6865 = vmatpush1.bf16.msra.mxu0 %v10063_v59  ;;  %7521 = vmatpush1.bf16.msra.mxu1 %v10066_v24  ;;  %v10147_v59 = vld [vmem:[%s13797_s1 + $0x18c0] ss:$16 sps:$4 sm:$0xff]   ;;  %v10150_v24 = vld [vmem:[%s13797_s1 + $0x18c8] ss:$16 sps:$4 sm:$0xff]  }
 0x2e4   :  { %6866 = vmatprep.subr.bf16.mxu0 %v10071_v61  ;;  %7522 = vmatprep.subr.bf16.mxu1 %v10074_v62  ;;  %v10155_v61 = vld [vmem:[%s13797_s1 + $0x18e4] ss:$16 sps:$4 sm:$0xff]   ;;  %v10158_v62 = vld [vmem:[%s13797_s1 + $0x18ec] ss:$16 sps:$4 sm:$0xff]  }
 0x2e7   :  { %6867 = vmatpush1.bf16.msra.mxu0 %v10069_v63  ;;  %7523 = vmatpush1.bf16.msra.mxu1 %v10072_v55  ;;  %v10153_v63 = vld [vmem:[%s13797_s1 + $0x18e0] ss:$16 sps:$4 sm:$0xff]   ;;  %v10156_v55 = vld [vmem:[%s13797_s1 + $0x18e8] ss:$16 sps:$4 sm:$0xff]  }
 0x2e8   :  { %6868 = vmatprep.subr.bf16.mxu0 %v10077_v0  ;;  %7524 = vmatprep.subr.bf16.mxu1 %v10080_v1  ;;  %v10161_v0 = vld [vmem:[%s13797_s1 + $0x1904] ss:$16 sps:$4 sm:$0xff]   ;;  %v10164_v1 = vld [vmem:[%s13797_s1 + $0x190c] ss:$16 sps:$4 sm:$0xff]  }
 0x2eb   :  { %6869 = vmatpush1.bf16.msra.mxu0 %v10075_v2  ;;  %7525 = vmatpush1.bf16.msra.mxu1 %v10078_v3  ;;  %v10159_v2 = vld [vmem:[%s13797_s1 + $0x1900] ss:$16 sps:$4 sm:$0xff]   ;;  %v10162_v3 = vld [vmem:[%s13797_s1 + $0x1908] ss:$16 sps:$4 sm:$0xff]  }
 0x2ec   :  { %6870 = vmatprep.subr.bf16.mxu0 %v10083_v57  ;;  %7526 = vmatprep.subr.bf16.mxu1 %v10086_v5  ;;  %v10167_v57 = vld [vmem:[%s13797_s1 + $0x1924] ss:$16 sps:$4 sm:$0xff]   ;;  %v10170_v5 = vld [vmem:[%s13797_s1 + $0x192c] ss:$16 sps:$4 sm:$0xff]  }
 0x2ef   :  { %6871 = vmatpush1.bf16.msra.mxu0 %v10081_v6  ;;  %7527 = vmatpush1.bf16.msra.mxu1 %v10084_v8  ;;  %v10165_v6 = vld [vmem:[%s13797_s1 + $0x1920] ss:$16 sps:$4 sm:$0xff]   ;;  %v10168_v8 = vld [vmem:[%s13797_s1 + $0x1928] ss:$16 sps:$4 sm:$0xff]  }
 0x2f0   :  { %6872 = vmatprep.subr.bf16.mxu0 %v10089_v9  ;;  %7528 = vmatprep.subr.bf16.mxu1 %v10092_v54  ;;  %v10173_v9 = vld [vmem:[%s13797_s1 + $0x1944] ss:$16 sps:$4 sm:$0xff]   ;;  %v10176_v54 = vld [vmem:[%s13797_s1 + $0x194c] ss:$16 sps:$4 sm:$0xff]  }
 0x2f3   :  { %6873 = vmatpush1.bf16.msra.mxu0 %v10087_v60  ;;  %7529 = vmatpush1.bf16.msra.mxu1 %v10090_v11  ;;  %v10171_v60 = vld [vmem:[%s13797_s1 + $0x1940] ss:$16 sps:$4 sm:$0xff]   ;;  %v10174_v11 = vld [vmem:[%s13797_s1 + $0x1948] ss:$16 sps:$4 sm:$0xff]  }
 0x2f4   :  { %6874 = vmatprep.subr.bf16.mxu0 %v10095_v12  ;;  %7530 = vmatprep.subr.bf16.mxu1 %v10098_v14  ;;  %v10179_v12 = vld [vmem:[%s13797_s1 + $0x1964] ss:$16 sps:$4 sm:$0xff]   ;;  %v10182_v14 = vld [vmem:[%s13797_s1 + $0x196c] ss:$16 sps:$4 sm:$0xff]  }
 0x2f7   :  { %6875 = vmatpush1.bf16.msra.mxu0 %v10093_v4  ;;  %7531 = vmatpush1.bf16.msra.mxu1 %v10096_v52  ;;  %v10177_v4 = vld [vmem:[%s13797_s1 + $0x1960] ss:$16 sps:$4 sm:$0xff]   ;;  %v10180_v52 = vld [vmem:[%s13797_s1 + $0x1968] ss:$16 sps:$4 sm:$0xff]  }
 0x2f8   :  { %6876 = vmatprep.subr.bf16.mxu0 %v10101_v16  ;;  %7532 = vmatprep.subr.bf16.mxu1 %v10104_v17  ;;  %v10185_v16 = vld [vmem:[%s13797_s1 + $0x1984] ss:$16 sps:$4 sm:$0xff]   ;;  %v10188_v17 = vld [vmem:[%s13797_s1 + $0x198c] ss:$16 sps:$4 sm:$0xff]  }
 0x2fb   :  { %6877 = vmatpush1.bf16.msra.mxu0 %v10099_v7  ;;  %7533 = vmatpush1.bf16.msra.mxu1 %v10102_v20  ;;  %v10183_v7 = vld [vmem:[%s13797_s1 + $0x1980] ss:$16 sps:$4 sm:$0xff]   ;;  %v10186_v20 = vld [vmem:[%s13797_s1 + $0x1988] ss:$16 sps:$4 sm:$0xff]  }
 0x2fc   :  { %6878 = vmatprep.subr.bf16.mxu0 %v10107_v22  ;;  %7534 = vmatprep.subr.bf16.mxu1 %v10110_v23  ;;  %v10191_v22 = vld [vmem:[%s13797_s1 + $0x19a4] ss:$16 sps:$4 sm:$0xff]   ;;  %v10194_v23 = vld [vmem:[%s13797_s1 + $0x19ac] ss:$16 sps:$4 sm:$0xff]  }
 0x2ff   :  { %6879 = vmatpush1.bf16.msra.mxu0 %v10105_v10  ;;  %7535 = vmatpush1.bf16.msra.mxu1 %v10108_v13  ;;  %v10189_v10 = vld [vmem:[%s13797_s1 + $0x19a0] ss:$16 sps:$4 sm:$0xff]   ;;  %v10192_v13 = vld [vmem:[%s13797_s1 + $0x19a8] ss:$16 sps:$4 sm:$0xff]  }
 0x300   :  { %6889 = vmatprep.subr.bf16.mxu0 %v10113_v27  ;;  %7545 = vmatprep.subr.bf16.mxu1 %v10116_v29  ;;  %v10197_v27 = vld [vmem:[%s13797_s1 + $0x19c4] ss:$16 sps:$4 sm:$0xff]   ;;  %v10200_v29 = vld [vmem:[%s13797_s1 + $0x19cc] ss:$16 sps:$4 sm:$0xff]  }
 0x302   :  { %6881 = vmatmul.mubr.bf16.vlgmr.msra.gmra.mrb[0].mxu0 %v1193_v30  ;;  %7537 = vmatmul.mubr.bf16.vlgmr.msra.gmra.mrb[0].mxu1 %v1193_v30  ;;  %v10198_v30 = vld [vmem:[%s13797_s1 + $0x19c8] ss:$16 sps:$4 sm:$0xff]  }
 0x303   :  { %6890 = vmatpush1.bf16.msra.mxu0 %v10111_v31  ;;  %7546 = vmatpush1.bf16.msra.mxu1 %v10114_v15  ;;  %v10203_v31 = vld [vmem:[%s13797_s1 + $0x19e4] ss:$16 sps:$4 sm:$0xff]   ;;  %v10206_v15 = vld [vmem:[%s13797_s1 + $0x19ec] ss:$16 sps:$4 sm:$0xff]  }
 0x304   :  { %6891 = vmatprep.subr.bf16.mxu0 %v10119_v32  ;;  %7547 = vmatprep.subr.bf16.mxu1 %v10122_v21  ;;  %v10201_v32 = vld [vmem:[%s13797_s1 + $0x19e0] ss:$16 sps:$4 sm:$0xff]   ;;  %v10204_v21 = vld [vmem:[%s13797_s1 + $0x19e8] ss:$16 sps:$4 sm:$0xff]  }
 0x305   :  { %6921 = vmatprep.mubr.bf16.mxu0 %v12994_v33  ;;  %7577 = vmatprep.mubr.bf16.mxu1 %v12994_v33 }
 0x307   :  { %6892 = vmatpush1.bf16.msra.mxu0 %v10117_v26  ;;  %7548 = vmatpush1.bf16.msra.mxu1 %v10120_v34  ;;  %v10209_v26 = vld [vmem:[%s13797_s1 + $0x1a04] ss:$16 sps:$4 sm:$0xff]   ;;  %v10212_v34 = vld [vmem:[%s13797_s1 + $0x1a0c] ss:$16 sps:$4 sm:$0xff]  }
 0x308   :  { %6893 = vmatprep.subr.bf16.mxu0 %v10125_v35  ;;  %7549 = vmatprep.subr.bf16.mxu1 %v10128_v36  ;;  %v13180_v35 = vrot.slane %v12963_v25, %v10660_v49  ;;  %v10207_v36 = vld [vmem:[%s13797_s1 + $0x1a00] ss:$16 sps:$4 sm:$0xff]   ;;  %v10218_v25 = vld [vmem:[%s13797_s1 + $0x1a2c] ss:$16 sps:$4 sm:$0xff]  }
 0x30b   :  { %6894 = vmatpush1.bf16.msra.mxu0 %v10123_v28  ;;  %7550 = vmatpush1.bf16.msra.mxu1 %v10126_v39  ;;  %v10210_v28 = vld [vmem:[%s13797_s1 + $0x1a08] ss:$16 sps:$4 sm:$0xff]   ;;  %v10215_v39 = vld [vmem:[%s13797_s1 + $0x1a24] ss:$16 sps:$4 sm:$0xff]  }
 0x30c   :  { %6895 = vmatprep.subr.bf16.mxu0 %v10131_v41  ;;  %7551 = vmatprep.subr.bf16.mxu1 %v10134_v42  ;;  %v1243_v41 = vcombine.high %v12994_v33, %v12994_v33  ;;  %v10213_v42 = vld [vmem:[%s13797_s1 + $0x1a20] ss:$16 sps:$4 sm:$0xff]   ;;  %v10221_v33 = vld [vmem:[%s13797_s1 + $0x1a44] ss:$16 sps:$4 sm:$0xff]  }
 0x30f   :  { %6896 = vmatpush1.bf16.msra.mxu0 %v10129_v44  ;;  %7552 = vmatpush1.bf16.msra.mxu1 %v10132_v45  ;;  %v10216_v44 = vld [vmem:[%s13797_s1 + $0x1a28] ss:$16 sps:$4 sm:$0xff]   ;;  %v10224_v45 = vld [vmem:[%s13797_s1 + $0x1a4c] ss:$16 sps:$4 sm:$0xff]  }
 0x310   :  { %6897 = vmatprep.subr.bf16.mxu0 %v10137_v46  ;;  %7553 = vmatprep.subr.bf16.mxu1 %v10140_v47  ;;  %v10219_v46 = vld [vmem:[%s13797_s1 + $0x1a40] ss:$16 sps:$4 sm:$0xff]   ;;  %v10222_v47 = vld [vmem:[%s13797_s1 + $0x1a48] ss:$16 sps:$4 sm:$0xff]  }
 0x313   :  { %6898 = vmatpush1.bf16.msra.mxu0 %v10135_v37  ;;  %7554 = vmatpush1.bf16.msra.mxu1 %v10138_v48  ;;  %v10227_v37 = vld [vmem:[%s13797_s1 + $0x1a64] ss:$16 sps:$4 sm:$0xff]   ;;  %v10230_v48 = vld [vmem:[%s13797_s1 + $0x1a6c] ss:$16 sps:$4 sm:$0xff]  }
 0x314   :  { %6899 = vmatprep.subr.bf16.mxu0 %v10143_v50  ;;  %7555 = vmatprep.subr.bf16.mxu1 %v10146_v51  ;;  %v10225_v50 = vld [vmem:[%s13797_s1 + $0x1a60] ss:$16 sps:$4 sm:$0xff]   ;;  %v10228_v51 = vld [vmem:[%s13797_s1 + $0x1a68] ss:$16 sps:$4 sm:$0xff]  }
 0x317   :  { %6900 = vmatpush1.bf16.msra.mxu0 %v10141_v53  ;;  %7556 = vmatpush1.bf16.msra.mxu1 %v10144_v40  ;;  %v10233_v53 = vld [vmem:[%s13797_s1 + $0x1a84] ss:$16 sps:$4 sm:$0xff]   ;;  %v10236_v40 = vld [vmem:[%s13797_s1 + $0x1a8c] ss:$16 sps:$4 sm:$0xff]  }
 0x318   :  { %6901 = vmatprep.subr.bf16.mxu0 %v10149_v56  ;;  %7557 = vmatprep.subr.bf16.mxu1 %v10152_v58  ;;  %v10231_v56 = vld [vmem:[%s13797_s1 + $0x1a80] ss:$16 sps:$4 sm:$0xff]   ;;  %v10234_v58 = vld [vmem:[%s13797_s1 + $0x1a88] ss:$16 sps:$4 sm:$0xff]  }
 0x31b   :  { %6902 = vmatpush1.bf16.msra.mxu0 %v10147_v59  ;;  %7558 = vmatpush1.bf16.msra.mxu1 %v10150_v24  ;;  %v10239_v59 = vld [vmem:[%s13797_s1 + $0x1aa4] ss:$16 sps:$4 sm:$0xff]   ;;  %v10242_v24 = vld [vmem:[%s13797_s1 + $0x1aac] ss:$16 sps:$4 sm:$0xff]  }
 0x31c   :  { %6903 = vmatprep.subr.bf16.mxu0 %v10155_v61  ;;  %7559 = vmatprep.subr.bf16.mxu1 %v10158_v62  ;;  %v10237_v61 = vld [vmem:[%s13797_s1 + $0x1aa0] ss:$16 sps:$4 sm:$0xff]   ;;  %v10240_v62 = vld [vmem:[%s13797_s1 + $0x1aa8] ss:$16 sps:$4 sm:$0xff]  }
 0x31f   :  { %6904 = vmatpush1.bf16.msra.mxu0 %v10153_v63  ;;  %7560 = vmatpush1.bf16.msra.mxu1 %v10156_v55  ;;  %v10245_v63 = vld [vmem:[%s13797_s1 + $0x1ac4] ss:$16 sps:$4 sm:$0xff]   ;;  %v10248_v55 = vld [vmem:[%s13797_s1 + $0x1acc] ss:$16 sps:$4 sm:$0xff]  }
 0x320   :  { %6905 = vmatprep.subr.bf16.mxu0 %v10161_v0  ;;  %7561 = vmatprep.subr.bf16.mxu1 %v10164_v1  ;;  %v10243_v0 = vld [vmem:[%s13797_s1 + $0x1ac0] ss:$16 sps:$4 sm:$0xff]   ;;  %v10246_v1 = vld [vmem:[%s13797_s1 + $0x1ac8] ss:$16 sps:$4 sm:$0xff]  }
 0x323   :  { %6906 = vmatpush1.bf16.msra.mxu0 %v10159_v2  ;;  %7562 = vmatpush1.bf16.msra.mxu1 %v10162_v3  ;;  %v10251_v2 = vld [vmem:[%s13797_s1 + $0x1ae4] ss:$16 sps:$4 sm:$0xff]   ;;  %v10254_v3 = vld [vmem:[%s13797_s1 + $0x1aec] ss:$16 sps:$4 sm:$0xff]  }
 0x324   :  { %6907 = vmatprep.subr.bf16.mxu0 %v10167_v57  ;;  %7563 = vmatprep.subr.bf16.mxu1 %v10170_v5  ;;  %v10249_v57 = vld [vmem:[%s13797_s1 + $0x1ae0] ss:$16 sps:$4 sm:$0xff]   ;;  %v10252_v5 = vld [vmem:[%s13797_s1 + $0x1ae8] ss:$16 sps:$4 sm:$0xff]  }
 0x327   :  { %6908 = vmatpush1.bf16.msra.mxu0 %v10165_v6  ;;  %7564 = vmatpush1.bf16.msra.mxu1 %v10168_v8  ;;  %v10257_v6 = vld [vmem:[%s13797_s1 + $0x1b04] ss:$16 sps:$4 sm:$0xff]   ;;  %v10260_v8 = vld [vmem:[%s13797_s1 + $0x1b0c] ss:$16 sps:$4 sm:$0xff]  }
 0x328   :  { %6909 = vmatprep.subr.bf16.mxu0 %v10173_v9  ;;  %7565 = vmatprep.subr.bf16.mxu1 %v10176_v54  ;;  %v10255_v9 = vld [vmem:[%s13797_s1 + $0x1b00] ss:$16 sps:$4 sm:$0xff]   ;;  %v10258_v54 = vld [vmem:[%s13797_s1 + $0x1b08] ss:$16 sps:$4 sm:$0xff]  }
 0x32b   :  { %6910 = vmatpush1.bf16.msra.mxu0 %v10171_v60  ;;  %7566 = vmatpush1.bf16.msra.mxu1 %v10174_v11  ;;  %v10263_v60 = vld [vmem:[%s13797_s1 + $0x1b24] ss:$16 sps:$4 sm:$0xff]   ;;  %v10266_v11 = vld [vmem:[%s13797_s1 + $0x1b2c] ss:$16 sps:$4 sm:$0xff]  }
 0x32c   :  { %6911 = vmatprep.subr.bf16.mxu0 %v10179_v12  ;;  %7567 = vmatprep.subr.bf16.mxu1 %v10182_v14  ;;  %v10261_v12 = vld [vmem:[%s13797_s1 + $0x1b20] ss:$16 sps:$4 sm:$0xff]   ;;  %v10264_v14 = vld [vmem:[%s13797_s1 + $0x1b28] ss:$16 sps:$4 sm:$0xff]  }
 0x32f   :  { %6912 = vmatpush1.bf16.msra.mxu0 %v10177_v4  ;;  %7568 = vmatpush1.bf16.msra.mxu1 %v10180_v52  ;;  %v10269_v4 = vld [vmem:[%s13797_s1 + $0x1b44] ss:$16 sps:$4 sm:$0xff]   ;;  %v10272_v52 = vld [vmem:[%s13797_s1 + $0x1b4c] ss:$16 sps:$4 sm:$0xff]  }
 0x330   :  { %6913 = vmatprep.subr.bf16.mxu0 %v10185_v16  ;;  %7569 = vmatprep.subr.bf16.mxu1 %v10188_v17  ;;  %v10267_v16 = vld [vmem:[%s13797_s1 + $0x1b40] ss:$16 sps:$4 sm:$0xff]   ;;  %v10270_v17 = vld [vmem:[%s13797_s1 + $0x1b48] ss:$16 sps:$4 sm:$0xff]  }
 0x333   :  { %6914 = vmatpush1.bf16.msra.mxu0 %v10183_v7  ;;  %7570 = vmatpush1.bf16.msra.mxu1 %v10186_v20  ;;  %v10275_v7 = vld [vmem:[%s13797_s1 + $0x1b64] ss:$16 sps:$4 sm:$0xff]   ;;  %v10278_v20 = vld [vmem:[%s13797_s1 + $0x1b6c] ss:$16 sps:$4 sm:$0xff]  }
 0x334   :  { %6915 = vmatprep.subr.bf16.mxu0 %v10191_v22  ;;  %7571 = vmatprep.subr.bf16.mxu1 %v10194_v23  ;;  %v10273_v22 = vld [vmem:[%s13797_s1 + $0x1b60] ss:$16 sps:$4 sm:$0xff]   ;;  %v10276_v23 = vld [vmem:[%s13797_s1 + $0x1b68] ss:$16 sps:$4 sm:$0xff]  }
 0x337   :  { %6916 = vmatpush1.bf16.msra.mxu0 %v10189_v10  ;;  %7572 = vmatpush1.bf16.msra.mxu1 %v10192_v13  ;;  %v10281_v10 = vld [vmem:[%s13797_s1 + $0x1b84] ss:$16 sps:$4 sm:$0xff]   ;;  %v10284_v13 = vld [vmem:[%s13797_s1 + $0x1b8c] ss:$16 sps:$4 sm:$0xff]  }
 0x338   :  { %6917 = vmatprep.subr.bf16.mxu0 %v10197_v27  ;;  %7573 = vmatprep.subr.bf16.mxu1 %v10200_v29  ;;  %v10279_v27 = vld [vmem:[%s13797_s1 + $0x1b80] ss:$16 sps:$4 sm:$0xff]   ;;  %v10282_v29 = vld [vmem:[%s13797_s1 + $0x1b88] ss:$16 sps:$4 sm:$0xff]  }
 0x33b   :  { %6918 = vmatpush1.bf16.msra.mxu0 %v10195_v19  ;;  %7574 = vmatpush1.bf16.msra.mxu1 %v10198_v30  ;;  %v10287_v19 = vld [vmem:[%s13797_s1 + $0x1ba4] ss:$16 sps:$4 sm:$0xff]   ;;  %v10290_v30 = vld [vmem:[%s13797_s1 + $0x1bac] ss:$16 sps:$4 sm:$0xff]  }
 0x33c   :  { %6919 = vmatprep.subr.bf16.mxu0 %v10203_v31  ;;  %7575 = vmatprep.subr.bf16.mxu1 %v10206_v15  ;;  %v10285_v31 = vld [vmem:[%s13797_s1 + $0x1ba0] ss:$16 sps:$4 sm:$0xff]   ;;  %v10288_v15 = vld [vmem:[%s13797_s1 + $0x1ba8] ss:$16 sps:$4 sm:$0xff]  }
 0x33f   :  { %6920 = vmatpush1.bf16.msra.mxu0 %v10201_v32  ;;  %7576 = vmatpush1.bf16.msra.mxu1 %v10204_v21  ;;  %v10293_v32 = vld [vmem:[%s13797_s1 + $0x1bc4] ss:$16 sps:$4 sm:$0xff]   ;;  %v10296_v21 = vld [vmem:[%s13797_s1 + $0x1bcc] ss:$16 sps:$4 sm:$0xff]  }
 0x340   :  { %6930 = vmatprep.subr.bf16.mxu0 %v10209_v26  ;;  %7586 = vmatprep.subr.bf16.mxu1 %v10212_v34  ;;  %v1196_v26 = vcombine.high %v12947_v18, %v12947_v18  ;;  %v10291_v34 = vld [vmem:[%s13797_s1 + $0x1bc0] ss:$16 sps:$4 sm:$0xff]   ;;  %v10302_v18 = vld [vmem:[%s13797_s1 + $0x1bec] ss:$16 sps:$4 sm:$0xff]  }
 0x342   :  { %6922 = vmatmul.mubr.bf16.vlgmr.msra.gmra.mrb[0].mxu0 %v13180_v35  ;;  %7578 = vmatmul.mubr.bf16.vlgmr.msra.gmra.mrb[0].mxu1 %v13180_v35 }
 0x343   :  { %6931 = vmatpush1.bf16.msra.mxu0 %v10207_v36  ;;  %7587 = vmatpush1.bf16.msra.mxu1 %v10210_v28  ;;  %v10294_v36 = vld [vmem:[%s13797_s1 + $0x1bc8] ss:$16 sps:$4 sm:$0xff]   ;;  %v10299_v28 = vld [vmem:[%s13797_s1 + $0x1be4] ss:$16 sps:$4 sm:$0xff]  }
 0x344   :  { %6932 = vmatprep.subr.bf16.mxu0 %v10215_v39  ;;  %7588 = vmatprep.subr.bf16.mxu1 %v10218_v25  ;;  %v13369_v39 = vrot.slane %v1196_v26, %v10660_v49  ;;  %v10297_v25 = vld [vmem:[%s13797_s1 + $0x1be0] ss:$16 sps:$4 sm:$0xff]  }
 0x345   :  { %6962 = vmatprep.mubr.bf16.mxu0 %v1243_v41  ;;  %7618 = vmatprep.mubr.bf16.mxu1 %v1243_v41  ;;  %v10300_v41 = vld [vmem:[%s13797_s1 + $0x1be8] ss:$16 sps:$4 sm:$0xff]   ;;  %v10375_v26 = vld [vmem:[%s13797_s1 + $0x1d80] ss:$16 sps:$4 sm:$0xff]  }
 0x347   :  { %6933 = vmatpush1.bf16.msra.mxu0 %v10213_v42  ;;  %7589 = vmatpush1.bf16.msra.mxu1 %v10216_v44  ;;  %v10305_v42 = vld [vmem:[%s13797_s1 + $0x1c04] ss:$16 sps:$4 sm:$0xff]   ;;  %v10308_v44 = vld [vmem:[%s13797_s1 + $0x1c0c] ss:$16 sps:$4 sm:$0xff]  }
 0x348   :  { %6934 = vmatprep.subr.bf16.mxu0 %v10221_v33  ;;  %7590 = vmatprep.subr.bf16.mxu1 %v10224_v45  ;;  %v1212_v33 = vcombine.high %v13369_v39, %v13369_v39  ;;  %v1241_v45 = vcombine.high %v13180_v35, %v13180_v35  ;;  %v10314_v35 = vld [vmem:[%s13797_s1 + $0x1c2c] ss:$16 sps:$4 sm:$0xff]  }
 0x34b   :  { %6935 = vmatpush1.bf16.msra.mxu0 %v10219_v46  ;;  %7591 = vmatpush1.bf16.msra.mxu1 %v10222_v47  ;;  %v10303_v46 = vld [vmem:[%s13797_s1 + $0x1c00] ss:$16 sps:$4 sm:$0xff]   ;;  %v10306_v47 = vld [vmem:[%s13797_s1 + $0x1c08] ss:$16 sps:$4 sm:$0xff]  }
 0x34c   :  { %6936 = vmatprep.subr.bf16.mxu0 %v10227_v37  ;;  %7592 = vmatprep.subr.bf16.mxu1 %v10230_v48  ;;  %v10311_v37 = vld [vmem:[%s13797_s1 + $0x1c24] ss:$16 sps:$4 sm:$0xff]   ;;  %v13400_v48 = vrot.slane %v1212_v33, %v10660_v49  ;;  %v10390_v33 = vld [vmem:[%s13797_s1 + $0x1dc8] ss:$16 sps:$4 sm:$0xff]  }
 0x34f   :  { %6937 = vmatpush1.bf16.msra.mxu0 %v10225_v50  ;;  %7593 = vmatpush1.bf16.msra.mxu1 %v10228_v51  ;;  %v10309_v50 = vld [vmem:[%s13797_s1 + $0x1c20] ss:$16 sps:$4 sm:$0xff]   ;;  %v10312_v51 = vld [vmem:[%s13797_s1 + $0x1c28] ss:$16 sps:$4 sm:$0xff]  }
 0x350   :  { %6938 = vmatprep.subr.bf16.mxu0 %v10233_v53  ;;  %7594 = vmatprep.subr.bf16.mxu1 %v10236_v40  ;;  %v10317_v53 = vld [vmem:[%s13797_s1 + $0x1c44] ss:$16 sps:$4 sm:$0xff]   ;;  %v10320_v40 = vld [vmem:[%s13797_s1 + $0x1c4c] ss:$16 sps:$4 sm:$0xff]  }
 0x353   :  { %6939 = vmatpush1.bf16.msra.mxu0 %v10231_v56  ;;  %7595 = vmatpush1.bf16.msra.mxu1 %v10234_v58  ;;  %v10315_v56 = vld [vmem:[%s13797_s1 + $0x1c40] ss:$16 sps:$4 sm:$0xff]   ;;  %v10318_v58 = vld [vmem:[%s13797_s1 + $0x1c48] ss:$16 sps:$4 sm:$0xff]  }
 0x354   :  { %6940 = vmatprep.subr.bf16.mxu0 %v10239_v59  ;;  %7596 = vmatprep.subr.bf16.mxu1 %v10242_v24  ;;  %v10323_v59 = vld [vmem:[%s13797_s1 + $0x1c64] ss:$16 sps:$4 sm:$0xff]   ;;  %v10326_v24 = vld [vmem:[%s13797_s1 + $0x1c6c] ss:$16 sps:$4 sm:$0xff]  }
 0x357   :  { %6941 = vmatpush1.bf16.msra.mxu0 %v10237_v61  ;;  %7597 = vmatpush1.bf16.msra.mxu1 %v10240_v62  ;;  %v10321_v61 = vld [vmem:[%s13797_s1 + $0x1c60] ss:$16 sps:$4 sm:$0xff]   ;;  %v10324_v62 = vld [vmem:[%s13797_s1 + $0x1c68] ss:$16 sps:$4 sm:$0xff]  }
 0x358   :  { %6942 = vmatprep.subr.bf16.mxu0 %v10245_v63  ;;  %7598 = vmatprep.subr.bf16.mxu1 %v10248_v55  ;;  %v10329_v63 = vld [vmem:[%s13797_s1 + $0x1c84] ss:$16 sps:$4 sm:$0xff]   ;;  %v10332_v55 = vld [vmem:[%s13797_s1 + $0x1c8c] ss:$16 sps:$4 sm:$0xff]  }
 0x35b   :  { %6943 = vmatpush1.bf16.msra.mxu0 %v10243_v0  ;;  %7599 = vmatpush1.bf16.msra.mxu1 %v10246_v1  ;;  %v10327_v0 = vld [vmem:[%s13797_s1 + $0x1c80] ss:$16 sps:$4 sm:$0xff]   ;;  %v10330_v1 = vld [vmem:[%s13797_s1 + $0x1c88] ss:$16 sps:$4 sm:$0xff]  }
 0x35c   :  { %6944 = vmatprep.subr.bf16.mxu0 %v10251_v2  ;;  %7600 = vmatprep.subr.bf16.mxu1 %v10254_v3  ;;  %v10335_v2 = vld [vmem:[%s13797_s1 + $0x1ca4] ss:$16 sps:$4 sm:$0xff]   ;;  %v10338_v3 = vld [vmem:[%s13797_s1 + $0x1cac] ss:$16 sps:$4 sm:$0xff]  }
 0x35f   :  { %6945 = vmatpush1.bf16.msra.mxu0 %v10249_v57  ;;  %7601 = vmatpush1.bf16.msra.mxu1 %v10252_v5  ;;  %v10333_v57 = vld [vmem:[%s13797_s1 + $0x1ca0] ss:$16 sps:$4 sm:$0xff]   ;;  %v10336_v5 = vld [vmem:[%s13797_s1 + $0x1ca8] ss:$16 sps:$4 sm:$0xff]  }
 0x360   :  { %6946 = vmatprep.subr.bf16.mxu0 %v10257_v6  ;;  %7602 = vmatprep.subr.bf16.mxu1 %v10260_v8  ;;  %v10341_v6 = vld [vmem:[%s13797_s1 + $0x1cc4] ss:$16 sps:$4 sm:$0xff]   ;;  %v10344_v8 = vld [vmem:[%s13797_s1 + $0x1ccc] ss:$16 sps:$4 sm:$0xff]  }
 0x363   :  { %6947 = vmatpush1.bf16.msra.mxu0 %v10255_v9  ;;  %7603 = vmatpush1.bf16.msra.mxu1 %v10258_v54  ;;  %v10339_v9 = vld [vmem:[%s13797_s1 + $0x1cc0] ss:$16 sps:$4 sm:$0xff]   ;;  %v10342_v54 = vld [vmem:[%s13797_s1 + $0x1cc8] ss:$16 sps:$4 sm:$0xff]  }
 0x364   :  { %6948 = vmatprep.subr.bf16.mxu0 %v10263_v60  ;;  %7604 = vmatprep.subr.bf16.mxu1 %v10266_v11  ;;  %v10347_v60 = vld [vmem:[%s13797_s1 + $0x1ce4] ss:$16 sps:$4 sm:$0xff]   ;;  %v10350_v11 = vld [vmem:[%s13797_s1 + $0x1cec] ss:$16 sps:$4 sm:$0xff]  }
 0x367   :  { %6949 = vmatpush1.bf16.msra.mxu0 %v10261_v12  ;;  %7605 = vmatpush1.bf16.msra.mxu1 %v10264_v14  ;;  %v10345_v12 = vld [vmem:[%s13797_s1 + $0x1ce0] ss:$16 sps:$4 sm:$0xff]   ;;  %v10348_v14 = vld [vmem:[%s13797_s1 + $0x1ce8] ss:$16 sps:$4 sm:$0xff]  }
 0x368   :  { %6950 = vmatprep.subr.bf16.mxu0 %v10269_v4  ;;  %7606 = vmatprep.subr.bf16.mxu1 %v10272_v52  ;;  %v10353_v4 = vld [vmem:[%s13797_s1 + $0x1d04] ss:$16 sps:$4 sm:$0xff]   ;;  %v10356_v52 = vld [vmem:[%s13797_s1 + $0x1d0c] ss:$16 sps:$4 sm:$0xff]  }
 0x36b   :  { %6951 = vmatpush1.bf16.msra.mxu0 %v10267_v16  ;;  %7607 = vmatpush1.bf16.msra.mxu1 %v10270_v17  ;;  %v10351_v16 = vld [vmem:[%s13797_s1 + $0x1d00] ss:$16 sps:$4 sm:$0xff]   ;;  %v10354_v17 = vld [vmem:[%s13797_s1 + $0x1d08] ss:$16 sps:$4 sm:$0xff]  }
 0x36c   :  { %6952 = vmatprep.subr.bf16.mxu0 %v10275_v7  ;;  %7608 = vmatprep.subr.bf16.mxu1 %v10278_v20  ;;  %v10359_v7 = vld [vmem:[%s13797_s1 + $0x1d24] ss:$16 sps:$4 sm:$0xff]   ;;  %v10362_v20 = vld [vmem:[%s13797_s1 + $0x1d2c] ss:$16 sps:$4 sm:$0xff]  }
 0x36f   :  { %6953 = vmatpush1.bf16.msra.mxu0 %v10273_v22  ;;  %7609 = vmatpush1.bf16.msra.mxu1 %v10276_v23  ;;  %v10357_v22 = vld [vmem:[%s13797_s1 + $0x1d20] ss:$16 sps:$4 sm:$0xff]   ;;  %v10360_v23 = vld [vmem:[%s13797_s1 + $0x1d28] ss:$16 sps:$4 sm:$0xff]  }
 0x370   :  { %6954 = vmatprep.subr.bf16.mxu0 %v10281_v10  ;;  %7610 = vmatprep.subr.bf16.mxu1 %v10284_v13  ;;  %v10365_v10 = vld [vmem:[%s13797_s1 + $0x1d44] ss:$16 sps:$4 sm:$0xff]   ;;  %v10368_v13 = vld [vmem:[%s13797_s1 + $0x1d4c] ss:$16 sps:$4 sm:$0xff]  }
 0x373   :  { %6955 = vmatpush1.bf16.msra.mxu0 %v10279_v27  ;;  %7611 = vmatpush1.bf16.msra.mxu1 %v10282_v29  ;;  %v10363_v27 = vld [vmem:[%s13797_s1 + $0x1d40] ss:$16 sps:$4 sm:$0xff]   ;;  %v10366_v29 = vld [vmem:[%s13797_s1 + $0x1d48] ss:$16 sps:$4 sm:$0xff]  }
 0x374   :  { %6956 = vmatprep.subr.bf16.mxu0 %v10287_v19  ;;  %7612 = vmatprep.subr.bf16.mxu1 %v10290_v30  ;;  %v10371_v19 = vld [vmem:[%s13797_s1 + $0x1d64] ss:$16 sps:$4 sm:$0xff]   ;;  %v10374_v30 = vld [vmem:[%s13797_s1 + $0x1d6c] ss:$16 sps:$4 sm:$0xff]  }
 0x377   :  { %6957 = vmatpush1.bf16.msra.mxu0 %v10285_v31  ;;  %7613 = vmatpush1.bf16.msra.mxu1 %v10288_v15  ;;  %v10369_v31 = vld [vmem:[%s13797_s1 + $0x1d60] ss:$16 sps:$4 sm:$0xff]   ;;  %v10372_v15 = vld [vmem:[%s13797_s1 + $0x1d68] ss:$16 sps:$4 sm:$0xff]  }
 0x378   :  { %6958 = vmatprep.subr.bf16.mxu0 %v10293_v32  ;;  %7614 = vmatprep.subr.bf16.mxu1 %v10296_v21  ;;  %v10377_v32 = vld [vmem:[%s13797_s1 + $0x1d84] ss:$16 sps:$4 sm:$0xff]   ;;  %v10380_v21 = vld [vmem:[%s13797_s1 + $0x1d8c] ss:$16 sps:$4 sm:$0xff]  }
 0x37b   :  { %6959 = vmatpush1.bf16.msra.mxu0 %v10291_v34  ;;  %7615 = vmatpush1.bf16.msra.mxu1 %v10294_v36  ;;  %v10378_v34 = vld [vmem:[%s13797_s1 + $0x1d88] ss:$16 sps:$4 sm:$0xff]   ;;  %v10383_v36 = vld [vmem:[%s13797_s1 + $0x1da4] ss:$16 sps:$4 sm:$0xff]  }
 0x37c   :  { %6960 = vmatprep.subr.bf16.mxu0 %v10299_v28  ;;  %7616 = vmatprep.subr.bf16.mxu1 %v10302_v18  ;;  %v10386_v28 = vld [vmem:[%s13797_s1 + $0x1dac] ss:$16 sps:$4 sm:$0xff]   ;;  %v10381_v18 = vld [vmem:[%s13797_s1 + $0x1da0] ss:$16 sps:$4 sm:$0xff]  }
 0x37f   :  { %6961 = vmatpush1.bf16.msra.mxu0 %v10297_v25  ;;  %7617 = vmatpush1.bf16.msra.mxu1 %v10300_v41  ;;  %v10384_v25 = vld [vmem:[%s13797_s1 + $0x1da8] ss:$16 sps:$4 sm:$0xff]   ;;  %v10389_v41 = vld [vmem:[%s13797_s1 + $0x1dc4] ss:$16 sps:$4 sm:$0xff]  }
 0x380   :  { %6971 = vmatprep.subr.bf16.mxu0 %v10305_v42  ;;  %7627 = vmatprep.subr.bf16.mxu1 %v10308_v44  ;;  %v10392_v42 = vld [vmem:[%s13797_s1 + $0x1dcc] ss:$16 sps:$4 sm:$0xff]   ;;  %v10387_v44 = vld [vmem:[%s13797_s1 + $0x1dc0] ss:$16 sps:$4 sm:$0xff]  }
 0x382   :  { %6963 = vmatmul.mubr.bf16.vlgmr.msra.gmra.mrb[0].mxu0 %v1241_v45  ;;  %7619 = vmatmul.mubr.bf16.vlgmr.msra.gmra.mrb[0].mxu1 %v1241_v45  ;;  %v10395_v45 = vld [vmem:[%s13797_s1 + $0x1de4] ss:$16 sps:$4 sm:$0xff]  }
 0x383   :  { %6972 = vmatpush1.bf16.msra.mxu0 %v10303_v46  ;;  %7628 = vmatpush1.bf16.msra.mxu1 %v10306_v47  ;;  %v10398_v46 = vld [vmem:[%s13797_s1 + $0x1dec] ss:$16 sps:$4 sm:$0xff]   ;;  %v10393_v47 = vld [vmem:[%s13797_s1 + $0x1de0] ss:$16 sps:$4 sm:$0xff]  }
 0x384   :  { %6973 = vmatprep.subr.bf16.mxu0 %v10311_v37  ;;  %7629 = vmatprep.subr.bf16.mxu1 %v10314_v35  ;;  %v10396_v37 = vld [vmem:[%s13797_s1 + $0x1de8] ss:$16 sps:$4 sm:$0xff]   ;;  %v10402_v35 = vld [vmem:[%s13797_s1 + $0x1e04] ss:$16 sps:$4 sm:$0xff]  }
 0x385   :  { %7003 = vmatprep.mubr.bf16.mxu0 %v13400_v48  ;;  %7659 = vmatprep.mubr.bf16.mxu1 %v13400_v48 }
 0x387   :  { %6974 = vmatpush1.bf16.msra.mxu0 %v10309_v50  ;;  %7630 = vmatpush1.bf16.msra.mxu1 %v10312_v51  ;;  %v10405_v50 = vld [vmem:[%s13797_s1 + $0x1e0c] ss:$16 sps:$4 sm:$0xff]   ;;  %v13586_v51 = vrot.slane %v13369_v39, %v10660_v49 }
 0x388   :  { %6975 = vmatprep.subr.bf16.mxu0 %v10317_v53  ;;  %7631 = vmatprep.subr.bf16.mxu1 %v10320_v40  ;;  %v10400_v53 = vld [vmem:[%s13797_s1 + $0x1e00] ss:$16 sps:$4 sm:$0xff]   ;;  %v10403_v40 = vld [vmem:[%s13797_s1 + $0x1e08] ss:$16 sps:$4 sm:$0xff]   ;;  %v10411_v39 = vld [vmem:[%s13797_s1 + $0x1e2c] ss:$16 sps:$4 sm:$0xff]  }
 0x38b   :  { %6976 = vmatpush1.bf16.msra.mxu0 %v10315_v56  ;;  %7632 = vmatpush1.bf16.msra.mxu1 %v10318_v58  ;;  %v10408_v56 = vld [vmem:[%s13797_s1 + $0x1e24] ss:$16 sps:$4 sm:$0xff]   ;;  %v1244_v58 = vcombine.high %v13400_v48, %v13400_v48 }
 0x38c   :  { %6977 = vmatprep.subr.bf16.mxu0 %v10323_v59  ;;  %7633 = vmatprep.subr.bf16.mxu1 %v10326_v24  ;;  %v10406_v59 = vld [vmem:[%s13797_s1 + $0x1e20] ss:$16 sps:$4 sm:$0xff]   ;;  %v10409_v24 = vld [vmem:[%s13797_s1 + $0x1e28] ss:$16 sps:$4 sm:$0xff]   ;;  %v10414_v48 = vld [vmem:[%s13797_s1 + $0x1e44] ss:$16 sps:$4 sm:$0xff]  }
 0x38f   :  { %6978 = vmatpush1.bf16.msra.mxu0 %v10321_v61  ;;  %7634 = vmatpush1.bf16.msra.mxu1 %v10324_v62  ;;  %v10417_v61 = vld [vmem:[%s13797_s1 + $0x1e4c] ss:$16 sps:$4 sm:$0xff]   ;;  %v10412_v62 = vld [vmem:[%s13797_s1 + $0x1e40] ss:$16 sps:$4 sm:$0xff]  }
 0x390   :  { %6979 = vmatprep.subr.bf16.mxu0 %v10329_v63  ;;  %7635 = vmatprep.subr.bf16.mxu1 %v10332_v55  ;;  %v10415_v63 = vld [vmem:[%s13797_s1 + $0x1e48] ss:$16 sps:$4 sm:$0xff]   ;;  %v10420_v55 = vld [vmem:[%s13797_s1 + $0x1e64] ss:$16 sps:$4 sm:$0xff]  }
 0x393   :  { %6980 = vmatpush1.bf16.msra.mxu0 %v10327_v0  ;;  %7636 = vmatpush1.bf16.msra.mxu1 %v10330_v1  ;;  %v10423_v0 = vld [vmem:[%s13797_s1 + $0x1e6c] ss:$16 sps:$4 sm:$0xff]   ;;  %v10418_v1 = vld [vmem:[%s13797_s1 + $0x1e60] ss:$16 sps:$4 sm:$0xff]  }
 0x394   :  { %6981 = vmatprep.subr.bf16.mxu0 %v10335_v2  ;;  %7637 = vmatprep.subr.bf16.mxu1 %v10338_v3  ;;  %v10421_v2 = vld [vmem:[%s13797_s1 + $0x1e68] ss:$16 sps:$4 sm:$0xff]   ;;  %v10426_v3 = vld [vmem:[%s13797_s1 + $0x1e84] ss:$16 sps:$4 sm:$0xff]  }
 0x397   :  { %6982 = vmatpush1.bf16.msra.mxu0 %v10333_v57  ;;  %7638 = vmatpush1.bf16.msra.mxu1 %v10336_v5  ;;  %v10429_v57 = vld [vmem:[%s13797_s1 + $0x1e8c] ss:$16 sps:$4 sm:$0xff]   ;;  %v10424_v5 = vld [vmem:[%s13797_s1 + $0x1e80] ss:$16 sps:$4 sm:$0xff]  }
 0x398   :  { %6983 = vmatprep.subr.bf16.mxu0 %v10341_v6  ;;  %7639 = vmatprep.subr.bf16.mxu1 %v10344_v8  ;;  %v10427_v6 = vld [vmem:[%s13797_s1 + $0x1e88] ss:$16 sps:$4 sm:$0xff]   ;;  %v10432_v8 = vld [vmem:[%s13797_s1 + $0x1ea4] ss:$16 sps:$4 sm:$0xff]  }
 0x39b   :  { %6984 = vmatpush1.bf16.msra.mxu0 %v10339_v9  ;;  %7640 = vmatpush1.bf16.msra.mxu1 %v10342_v54  ;;  %v10435_v9 = vld [vmem:[%s13797_s1 + $0x1eac] ss:$16 sps:$4 sm:$0xff]   ;;  %v10430_v54 = vld [vmem:[%s13797_s1 + $0x1ea0] ss:$16 sps:$4 sm:$0xff]  }
 0x39c   :  { %6985 = vmatprep.subr.bf16.mxu0 %v10347_v60  ;;  %7641 = vmatprep.subr.bf16.mxu1 %v10350_v11  ;;  %v10433_v60 = vld [vmem:[%s13797_s1 + $0x1ea8] ss:$16 sps:$4 sm:$0xff]   ;;  %v10438_v11 = vld [vmem:[%s13797_s1 + $0x1ec4] ss:$16 sps:$4 sm:$0xff]  }
 0x39f   :  { %6986 = vmatpush1.bf16.msra.mxu0 %v10345_v12  ;;  %7642 = vmatpush1.bf16.msra.mxu1 %v10348_v14  ;;  %v10441_v12 = vld [vmem:[%s13797_s1 + $0x1ecc] ss:$16 sps:$4 sm:$0xff]   ;;  %v10436_v14 = vld [vmem:[%s13797_s1 + $0x1ec0] ss:$16 sps:$4 sm:$0xff]  }
 0x3a0   :  { %6987 = vmatprep.subr.bf16.mxu0 %v10353_v4  ;;  %7643 = vmatprep.subr.bf16.mxu1 %v10356_v52  ;;  %v10439_v4 = vld [vmem:[%s13797_s1 + $0x1ec8] ss:$16 sps:$4 sm:$0xff]   ;;  %v10444_v52 = vld [vmem:[%s13797_s1 + $0x1ee4] ss:$16 sps:$4 sm:$0xff]  }
 0x3a3   :  { %6988 = vmatpush1.bf16.msra.mxu0 %v10351_v16  ;;  %7644 = vmatpush1.bf16.msra.mxu1 %v10354_v17  ;;  %v10447_v16 = vld [vmem:[%s13797_s1 + $0x1eec] ss:$16 sps:$4 sm:$0xff]   ;;  %v10442_v17 = vld [vmem:[%s13797_s1 + $0x1ee0] ss:$16 sps:$4 sm:$0xff]  }
 0x3a4   :  { %6989 = vmatprep.subr.bf16.mxu0 %v10359_v7  ;;  %7645 = vmatprep.subr.bf16.mxu1 %v10362_v20  ;;  %v10445_v7 = vld [vmem:[%s13797_s1 + $0x1ee8] ss:$16 sps:$4 sm:$0xff]   ;;  %v10450_v20 = vld [vmem:[%s13797_s1 + $0x1f04] ss:$16 sps:$4 sm:$0xff]  }
 0x3a7   :  { %6990 = vmatpush1.bf16.msra.mxu0 %v10357_v22  ;;  %7646 = vmatpush1.bf16.msra.mxu1 %v10360_v23  ;;  %v10453_v22 = vld [vmem:[%s13797_s1 + $0x1f0c] ss:$16 sps:$4 sm:$0xff]   ;;  %v10448_v23 = vld [vmem:[%s13797_s1 + $0x1f00] ss:$16 sps:$4 sm:$0xff]  }
 0x3a8   :  { %6991 = vmatprep.subr.bf16.mxu0 %v10365_v10  ;;  %7647 = vmatprep.subr.bf16.mxu1 %v10368_v13  ;;  %v10451_v10 = vld [vmem:[%s13797_s1 + $0x1f08] ss:$16 sps:$4 sm:$0xff]   ;;  %v10456_v13 = vld [vmem:[%s13797_s1 + $0x1f24] ss:$16 sps:$4 sm:$0xff]  }
 0x3ab   :  { %6992 = vmatpush1.bf16.msra.mxu0 %v10363_v27  ;;  %7648 = vmatpush1.bf16.msra.mxu1 %v10366_v29  ;;  %v10459_v27 = vld [vmem:[%s13797_s1 + $0x1f2c] ss:$16 sps:$4 sm:$0xff]   ;;  %v10454_v29 = vld [vmem:[%s13797_s1 + $0x1f20] ss:$16 sps:$4 sm:$0xff]  }
 0x3ac   :  { %6993 = vmatprep.subr.bf16.mxu0 %v10371_v19  ;;  %7649 = vmatprep.subr.bf16.mxu1 %v10374_v30  ;;  %v10457_v19 = vld [vmem:[%s13797_s1 + $0x1f28] ss:$16 sps:$4 sm:$0xff]   ;;  %v10462_v30 = vld [vmem:[%s13797_s1 + $0x1f44] ss:$16 sps:$4 sm:$0xff]  }
 0x3af   :  { %6994 = vmatpush1.bf16.msra.mxu0 %v10369_v31  ;;  %7650 = vmatpush1.bf16.msra.mxu1 %v10372_v15  ;;  %v10465_v31 = vld [vmem:[%s13797_s1 + $0x1f4c] ss:$16 sps:$4 sm:$0xff]   ;;  %v10460_v15 = vld [vmem:[%s13797_s1 + $0x1f40] ss:$16 sps:$4 sm:$0xff]  }
 0x3b0   :  { %6995 = vmatprep.subr.bf16.mxu0 %v10377_v32  ;;  %7651 = vmatprep.subr.bf16.mxu1 %v10380_v21  ;;  %v10463_v32 = vld [vmem:[%s13797_s1 + $0x1f48] ss:$16 sps:$4 sm:$0xff]   ;;  %v10468_v21 = vld [vmem:[%s13797_s1 + $0x1f64] ss:$16 sps:$4 sm:$0xff]  }
 0x3b3   :  { %6996 = vmatpush1.bf16.msra.mxu0 %v10375_v26  ;;  %7652 = vmatpush1.bf16.msra.mxu1 %v10378_v34  ;;  %v10471_v26 = vld [vmem:[%s13797_s1 + $0x1f6c] ss:$16 sps:$4 sm:$0xff]   ;;  %v10466_v34 = vld [vmem:[%s13797_s1 + $0x1f60] ss:$16 sps:$4 sm:$0xff]  }
 0x3b4   :  { %6997 = vmatprep.subr.bf16.mxu0 %v10383_v36  ;;  %7653 = vmatprep.subr.bf16.mxu1 %v10386_v28  ;;  %v10469_v36 = vld [vmem:[%s13797_s1 + $0x1f68] ss:$16 sps:$4 sm:$0xff]   ;;  %v10474_v28 = vld [vmem:[%s13797_s1 + $0x1f84] ss:$16 sps:$4 sm:$0xff]  }
 0x3b7   :  { %6998 = vmatpush1.bf16.msra.mxu0 %v10381_v18  ;;  %7654 = vmatpush1.bf16.msra.mxu1 %v10384_v25  ;;  %v10477_v18 = vld [vmem:[%s13797_s1 + $0x1f8c] ss:$16 sps:$4 sm:$0xff]   ;;  %v10472_v25 = vld [vmem:[%s13797_s1 + $0x1f80] ss:$16 sps:$4 sm:$0xff]  }
 0x3b8   :  { %6999 = vmatprep.subr.bf16.mxu0 %v10389_v41  ;;  %7655 = vmatprep.subr.bf16.mxu1 %v10392_v42  ;;  %v10475_v41 = vld [vmem:[%s13797_s1 + $0x1f88] ss:$16 sps:$4 sm:$0xff]   ;;  %v10480_v42 = vld [vmem:[%s13797_s1 + $0x1fa4] ss:$16 sps:$4 sm:$0xff]  }
 0x3bb   :  { %7000 = vmatpush1.bf16.msra.mxu0 %v10387_v44  ;;  %7656 = vmatpush1.bf16.msra.mxu1 %v10390_v33  ;;  %v10483_v44 = vld [vmem:[%s13797_s1 + $0x1fac] ss:$16 sps:$4 sm:$0xff]   ;;  %v10478_v33 = vld [vmem:[%s13797_s1 + $0x1fa0] ss:$16 sps:$4 sm:$0xff]  }
 0x3bc   :  { %7001 = vmatprep.subr.bf16.mxu0 %v10395_v45  ;;  %7657 = vmatprep.subr.bf16.mxu1 %v10398_v46  ;;  %v10481_v45 = vld [vmem:[%s13797_s1 + $0x1fa8] ss:$16 sps:$4 sm:$0xff]   ;;  %v10486_v46 = vld [vmem:[%s13797_s1 + $0x1fc4] ss:$16 sps:$4 sm:$0xff]  }
 0x3bf   :  { %7002 = vmatpush1.bf16.msra.mxu0 %v10393_v47  ;;  %7658 = vmatpush1.bf16.msra.mxu1 %v10396_v37  ;;  %v10489_v47 = vld [vmem:[%s13797_s1 + $0x1fcc] ss:$16 sps:$4 sm:$0xff]   ;;  %v10484_v37 = vld [vmem:[%s13797_s1 + $0x1fc0] ss:$16 sps:$4 sm:$0xff]  }
 0x3c0   :  { %7012 = vmatprep.subr.bf16.mxu0 %v10402_v35  ;;  %7668 = vmatprep.subr.bf16.mxu1 %v10405_v50  ;;  %v10487_v35 = vld [vmem:[%s13797_s1 + $0x1fc8] ss:$16 sps:$4 sm:$0xff]   ;;  %v10492_v50 = vld [vmem:[%s13797_s1 + $0x1fe4] ss:$16 sps:$4 sm:$0xff]  }
 0x3c2   :  { %7004 = vmatmul.mubr.bf16.vlgmr.msra.gmra.mrb[0].mxu0 %v13586_v51  ;;  %7660 = vmatmul.mubr.bf16.vlgmr.msra.gmra.mrb[0].mxu1 %v13586_v51 }
 0x3c3   :  { %7013 = vmatpush1.bf16.msra.mxu0 %v10400_v53  ;;  %7669 = vmatpush1.bf16.msra.mxu1 %v10403_v40  ;;  %v10495_v53 = vld [vmem:[%s13797_s1 + $0x1fec] ss:$16 sps:$4 sm:$0xff]   ;;  %v10490_v40 = vld [vmem:[%s13797_s1 + $0x1fe0] ss:$16 sps:$4 sm:$0xff]  }
 0x3c4   :  { %7014 = vmatprep.subr.bf16.mxu0 %v10408_v56  ;;  %7670 = vmatprep.subr.bf16.mxu1 %v10411_v39  ;;  %v10493_v56 = vld [vmem:[%s13797_s1 + $0x1fe8] ss:$16 sps:$4 sm:$0xff]   ;;  %v1242_v39 = vcombine.high %v13586_v51, %v13586_v51  ;;  %v7735_v51 = vld [vmem:[%s13800_s3] sm:$0xf] }
 0x3c5   :  { %7044 = vmatprep.mubr.bf16.mxu0 %v1244_v58  ;;  %7700 = vmatprep.mubr.bf16.mxu1 %v1244_v58  ;;  %v7713_v58 = vsub.s32 0, %v10642_v43 }
 0x3c7   :  { %7015 = vmatpush1.bf16.msra.mxu0 %v10406_v59  ;;  %7671 = vmatpush1.bf16.msra.mxu1 %v10409_v24  ;;  %v7721_v59 = vsub.s32 2, %v10642_v43  ;;  %v7709_v24 = vld [vmem:[%s13799_s2] sm:$0xf] }
 0x3c8   :  { %7016 = vmatprep.subr.bf16.mxu0 %v10414_v48  ;;  %7672 = vmatprep.subr.bf16.mxu1 %v10417_v61  ;;  %v7717_v48 = vsub.s32 1, %v10642_v43  ;;  %v7725_v61 = vsub.s32 3, %v10642_v43 }
 0x3cb   :  { %7017 = vmatpush1.bf16.msra.mxu0 %v10412_v62  ;;  %7673 = vmatpush1.bf16.msra.mxu1 %v10415_v63  ;;  %v7714_v62 = vrot.slane %v7709_v24, %v7713_v58  ;;  %v7722_v63 = vrot.slane %v7709_v24, %v7721_v59 }
 0x3cc   :  { %7018 = vmatprep.subr.bf16.mxu0 %v10420_v55  ;;  %7674 = vmatprep.subr.bf16.mxu1 %v10423_v0  ;;  %v7718_v55 = vrot.slane %v7709_v24, %v7717_v48  ;;  %v7726_v0 = vrot.slane %v7709_v24, %v7725_v61 }
 0x3cf   :  { %7019 = vmatpush1.bf16.msra.mxu0 %v10418_v1  ;;  %7675 = vmatpush1.bf16.msra.mxu1 %v10421_v2  ;;  %v7740_v1 = vrot.slane %v7735_v51, %v7713_v58  ;;  %v7748_v2 = vrot.slane %v7735_v51, %v7721_v59 }
 0x3d0   :  { %7020 = vmatprep.subr.bf16.mxu0 %v10426_v3  ;;  %7676 = vmatprep.subr.bf16.mxu1 %v10429_v57 }
 0x3d3   :  { %7021 = vmatpush1.bf16.msra.mxu0 %v10424_v5  ;;  %7677 = vmatpush1.bf16.msra.mxu1 %v10427_v6  ;;  %v7744_v5 = vrot.slane %v7735_v51, %v7717_v48  ;;  %v7752_v6 = vrot.slane %v7735_v51, %v7725_v61 }
 0x3d4   :  { %7022 = vmatprep.subr.bf16.mxu0 %v10432_v8  ;;  %7678 = vmatprep.subr.bf16.mxu1 %v10435_v9 }
 0x3d7   :  { %7023 = vmatpush1.bf16.msra.mxu0 %v10430_v54  ;;  %7679 = vmatpush1.bf16.msra.mxu1 %v10433_v60 }
 0x3d8   :  { %7024 = vmatprep.subr.bf16.mxu0 %v10438_v11  ;;  %7680 = vmatprep.subr.bf16.mxu1 %v10441_v12 }
 0x3db   :  { %7025 = vmatpush1.bf16.msra.mxu0 %v10436_v14  ;;  %7681 = vmatpush1.bf16.msra.mxu1 %v10439_v4 }
 0x3dc   :  { %7026 = vmatprep.subr.bf16.mxu0 %v10444_v52  ;;  %7682 = vmatprep.subr.bf16.mxu1 %v10447_v16 }
 0x3df   :  { %7027 = vmatpush1.bf16.msra.mxu0 %v10442_v17  ;;  %7683 = vmatpush1.bf16.msra.mxu1 %v10445_v7 }
 0x3e0   :  { %7028 = vmatprep.subr.bf16.mxu0 %v10450_v20  ;;  %7684 = vmatprep.subr.bf16.mxu1 %v10453_v22 }
 0x3e3   :  { %7029 = vmatpush1.bf16.msra.mxu0 %v10448_v23  ;;  %7685 = vmatpush1.bf16.msra.mxu1 %v10451_v10 }
 0x3e4   :  { %7030 = vmatprep.subr.bf16.mxu0 %v10456_v13  ;;  %7686 = vmatprep.subr.bf16.mxu1 %v10459_v27 }
 0x3e7   :  { %7031 = vmatpush1.bf16.msra.mxu0 %v10454_v29  ;;  %7687 = vmatpush1.bf16.msra.mxu1 %v10457_v19 }
 0x3e8   :  { %7032 = vmatprep.subr.bf16.mxu0 %v10462_v30  ;;  %7688 = vmatprep.subr.bf16.mxu1 %v10465_v31 }
 0x3eb   :  { %7033 = vmatpush1.bf16.msra.mxu0 %v10460_v15  ;;  %7689 = vmatpush1.bf16.msra.mxu1 %v10463_v32 }
 0x3ec   :  { %7034 = vmatprep.subr.bf16.mxu0 %v10468_v21  ;;  %7690 = vmatprep.subr.bf16.mxu1 %v10471_v26 }
 0x3ef   :  { %7035 = vmatpush1.bf16.msra.mxu0 %v10466_v34  ;;  %7691 = vmatpush1.bf16.msra.mxu1 %v10469_v36 }
 0x3f0   :  { %7036 = vmatprep.subr.bf16.mxu0 %v10474_v28  ;;  %7692 = vmatprep.subr.bf16.mxu1 %v10477_v18 }
 0x3f3   :  { %7037 = vmatpush1.bf16.msra.mxu0 %v10472_v25  ;;  %7693 = vmatpush1.bf16.msra.mxu1 %v10475_v41 }
 0x3f4   :  { %7038 = vmatprep.subr.bf16.mxu0 %v10480_v42  ;;  %7694 = vmatprep.subr.bf16.mxu1 %v10483_v44 }
 0x3f7   :  { %7039 = vmatpush1.bf16.msra.mxu0 %v10478_v33  ;;  %7695 = vmatpush1.bf16.msra.mxu1 %v10481_v45 }
 0x3f8   :  { %7040 = vmatprep.subr.bf16.mxu0 %v10486_v46  ;;  %7696 = vmatprep.subr.bf16.mxu1 %v10489_v47 }
 0x3fb   :  { %7041 = vmatpush1.bf16.msra.mxu0 %v10484_v37  ;;  %7697 = vmatpush1.bf16.msra.mxu1 %v10487_v35 }
 0x3fc   :  { %7042 = vmatprep.subr.bf16.mxu0 %v10492_v50  ;;  %7698 = vmatprep.subr.bf16.mxu1 %v10495_v53 }
 0x3ff   :  { %7043 = vmatpush1.bf16.msra.mxu0 %v10490_v40  ;;  %7699 = vmatpush1.bf16.msra.mxu1 %v10493_v56 }
 0x402   :  { %7045 = vmatmul.mubr.bf16.vlgmr.msra.gmra.mrb[0].mxu0 %v1242_v39  ;;  %7701 = vmatmul.mubr.bf16.vlgmr.msra.gmra.mrb[0].mxu1 %v1242_v39 }
 0x4d5   :  { %v7046_v3 = vpop.f32.mrb[0].mxu0  ;;  %v7702_v57 = vpop.f32.mrb[0].mxu1 }
 0x4d6   :  { %v7731_v8 = vmul.f32 %v7714_v62, %v7046_v3  ;;  %v7733_v9 = vmul.f32 %v7722_v63, %v7702_v57  ;;  %v7048_v54 = vpop.f32.mrb[1].mxu0  ;;  %v7704_v60 = vpop.f32.mrb[1].mxu1 }
 0x4d7   :  { %v7732_v11 = vmul.f32 %v7718_v55, %v7048_v54  ;;  %v7734_v43 = vmul.f32 %v7726_v0, %v7704_v60  ;;  %v7050_v12 = vpop.f32.mrb[2].mxu0  ;;  %v7706_v14 = vpop.f32.mrb[2].mxu1 }
 0x4d8   :  { %v7757_v4 = vadd.f32 %v7740_v1, %v7731_v8  ;;  %v7759_v52 = vadd.f32 %v7748_v2, %v7733_v9  ;;  %v7051_v16 = vpop.f32.mrb[3].mxu0  ;;  %v7707_v17 = vpop.f32.mrb[3].mxu1 }
 0x4d9   :  { %v7758_v7 = vadd.f32 %v7744_v5, %v7732_v11  ;;  %v7760_v20 = vadd.f32 %v7752_v6, %v7734_v43 }
 0x4da   :  { %vm7761_vm0 = vcmp.ge.f32.partialorder %v7757_v4, 0.0  ;;  %v7765_v22 = vmul.f32 0.01, %v7757_v4  ;;  %vm7763_vm1 = vcmp.ge.f32.partialorder %v7759_v52, 0.0  ;;  %v7767_v23 = vmul.f32 0.01, %v7759_v52 }
 0x4db   :  { %vm7762_vm2 = vcmp.ge.f32.partialorder %v7758_v7, 0.0  ;;  %v7766_v10 = vmul.f32 0.01, %v7758_v7  ;;  %vm7764_vm3 = vcmp.ge.f32.partialorder %v7760_v20, 0.0  ;;  %v7768_v13 = vmul.f32 0.01, %v7760_v20 }
 0x4dc   :  { %v7769_v27 = vsel %vm7761_vm0, %v7757_v4, %v7765_v22  ;;  %v7771_v29 = vsel %vm7763_vm1, %v7759_v52, %v7767_v23 }
 0x4dd   :  { %v7770_v19 = vsel %vm7762_vm2, %v7758_v7, %v7766_v10  ;;  %v7772_v30 = vsel %vm7764_vm3, %v7760_v20, %v7768_v13 }
 0x4de   :  { %v7777_v31 = vcombine.low %v7769_v27, %v7770_v19  ;;  %v7778_v15 = vcombine.low %v7771_v29, %v7772_v30 }
 0x4e0   :  { %v7785_v32 = vrot.slane %v7777_v31, %v10660_v49  ;;  %v7792_v21 = vrot.slane %v7778_v15, %v10660_v49 }
 0x4e2   :  { %v7793_v26 = vcombine.low %v7785_v32, %v7792_v21 }
 0x4e4   :  { %v7800_v34 = vrot.slane %v7793_v26, %v10660_v49 }
 0x4e6   :  { %7806 = vst.msk [vmem:[%s13801_s4] sm:$0xf] %vm7804_vm4, %v7800_v34 }

// kernel: _lambda_.19
= control target key start
LH: loop header
LB: loop body
LE: loop exit
PB: predicated region body
PF: predicated region fallthrough
CT: control target
= control target key end

     0   :  { %s2326_s15 = smov 0   ;;  %s2328_s16 = smov 0   ;;  %s2519_s0 = inlined_call_operand.vmem [shape: bf16[4,4,2048], index: 0, kind: input, shape index: {}]   ;;  %s2520_s1 = inlined_call_operand.vmem [shape: bf16[4,2048,128], index: 1, kind: input, shape index: {}]   ;;  %s2521_s2 = inlined_call_operand.vmem [shape: f32[1,128], index: 2, kind: input, shape index: {}]   ;;  %s2522_s3 = inlined_call_operand.vmem [shape: f32[1,128], index: 3, kind: input, shape index: {}]   ;;  %s2523_s4 = inlined_call_operand.vmem [shape: f32[4,4,128], index: 4, kind: output, shape index: {}]  }
   0x1   :  { %s2330_s17 = smov 0  }
   0x2 LB: > { %s26_s18 = sadd.s32 1, %s2294_s16  ;;  %p1803_p0 = scmp.ge.s32.totalorder %s2298_s17, 1  ;;  %s2298_s17 = sphi %s2330_s17, %s14_s17   ;;  %s2294_s16 = sphi %s2328_s16, %s2525_s16   ;;  %s2290_s15 = sphi %s2326_s15, %s2524_s15  }
   0x3   : > { %p28_p1 = scmp.ge.s32.totalorder %s26_s18, 4  ;;  %p192_p2 = scmp.lt.s32.totalorder %s2298_s17, 5 }
   0x5   : > { %s2527_s18 = smov (%p28_p1, %s26_s18), 0  ;;  %p193_p3 = pnand %p1803_p0, %p192_p2 }
   0x6   : > { %p229_p4 = scmp.lt.s32.totalorder (!%p193_p3), %s2290_s15, 3  ;;  %v2300_v22 = vmov (!%p193_p3), 1983009808   ;;  %v519_v24 = vlaneseq (!%p193_p3) }
   0x7   : > { %196 = sbr.rel (%p193_p3) target bundleno = 374 (0x176), region = 36  ;;  %v517_v23 = vunpack.c.l.s4 (!%p193_p3), %v2300_v22 }
   0x8   : > { %v520_v30 = vshrl.u32 (!%p193_p3), %v519_v24, 7 }
   0x9   : > { %v518_v29 = vunpack.c.0.s8 (!%p193_p3), %v517_v23 }
   0xb   : > { %v2388_v35 = vsub.s32 (!%p193_p3), %v518_v29, %v520_v30 }
   0xe   : > { %s2529_s15 = smov (!%p229_p4, %s2290_s15), 3 }
   0xf   : > { %s1942_s19 = sshll.u32 %s2529_s15, 10  ;;  %s1941_s23 = sshll.u32 %s2529_s15, 5 }
  0x10   : > { %s2350_s22 = scalar_lea.vmem %s2520_s1, %s1942_s19  ;;  %s2386_s26 = scalar_lea.vmem %s2519_s0, %s1941_s23 }
  0x11   : > { %v2144_v0 = vld [vmem:[%s2350_s22 + $0x40] sm:$0xff]   ;;  %v2148_v4 = vld [vmem:[%s2350_s22 + $0x48] sm:$0xff]   ;;  %v2152_v8 = vld [vmem:[%s2350_s22 + $0x50] sm:$0xff]   ;;  %s1808_s5 = sshll.u32 %s2529_s15, 2 }
  0x12   : > { %v2145_v1 = vld [vmem:[%s2350_s22 + $0xc0] sm:$0xff]   ;;  %1943 = vmatprep.subr.bf16.mxu0 %v2144_v0  ;;  %v2149_v5 = vld [vmem:[%s2350_s22 + $0xc8] sm:$0xff]   ;;  %v2153_v9 = vld [vmem:[%s2350_s22 + $0xd0] sm:$0xff]   ;;  %s249_s8 = scalar_lea.vmem %s2523_s4, %s1808_s5 }
  0x13   : > { %v2146_v2 = vld [vmem:[%s2350_s22] sm:$0xff]   ;;  %1965 = vmatprep.subr.bf16.mxu1 %v2145_v1  ;;  %v2150_v6 = vld [vmem:[%s2350_s22 + $0x8] sm:$0xff]   ;;  %v2154_v10 = vld [vmem:[%s2350_s22 + $0x10] sm:$0xff]  }
  0x14   : > { %v2147_v3 = vld [vmem:[%s2350_s22 + $0x80] sm:$0xff]   ;;  %1944 = vmatpush3.bf16.msra.mxu0 %v2146_v2  ;;  %v2151_v7 = vld [vmem:[%s2350_s22 + $0x88] sm:$0xff]   ;;  %v2155_v11 = vld [vmem:[%s2350_s22 + $0x90] sm:$0xff]  }
  0x15   : > { %1966 = vmatpush3.bf16.msra.mxu1 %v2147_v3  ;;  %1945 = vmatprep.subr.bf16.mxu0 %v2148_v4  ;;  %v2156_v12 = vld [vmem:[%s2350_s22 + $0x58] sm:$0xff]   ;;  %v2160_v16 = vld [vmem:[%s2350_s22 + $0x60] sm:$0xff]   ;;  %v2164_v20 = vld [vmem:[%s2350_s22 + $0x68] sm:$0xff]  }
  0x16   : > { %1967 = vmatprep.subr.bf16.mxu1 %v2149_v5  ;;  %v2157_v13 = vld [vmem:[%s2350_s22 + $0xd8] sm:$0xff]   ;;  %v2161_v17 = vld [vmem:[%s2350_s22 + $0xe0] sm:$0xff]   ;;  %v2165_v21 = vld [vmem:[%s2350_s22 + $0xe8] sm:$0xff]  }
  0x17   : > { %v2158_v14 = vld [vmem:[%s2350_s22 + $0x18] sm:$0xff]   ;;  %v2162_v18 = vld [vmem:[%s2350_s22 + $0x20] sm:$0xff]   ;;  %v2166_v25 = vld [vmem:[%s2350_s22 + $0x28] sm:$0xff]  }
  0x18   : > { %1946 = vmatpush3.bf16.msra.mxu0 %v2150_v6  ;;  %v2159_v15 = vld [vmem:[%s2350_s22 + $0x98] sm:$0xff]   ;;  %v2163_v19 = vld [vmem:[%s2350_s22 + $0xa0] sm:$0xff]   ;;  %v2167_v26 = vld [vmem:[%s2350_s22 + $0xa8] sm:$0xff]  }
  0x19   : > { %1968 = vmatpush3.bf16.msra.mxu1 %v2151_v7  ;;  %1947 = vmatprep.subr.bf16.mxu0 %v2152_v8  ;;  %v2168_v27 = vld [vmem:[%s2350_s22 + $0x70] sm:$0xff]   ;;  %v2172_v33 = vld [vmem:[%s2350_s22 + $0x78] sm:$0xff]   ;;  %v251_v38 = vld [vmem:[%s2386_s26] sm:$0xff] }
  0x1a   : > { %1969 = vmatprep.subr.bf16.mxu1 %v2153_v9  ;;  %v2169_v28 = vld [vmem:[%s2350_s22 + $0xf0] sm:$0xff]   ;;  %v2173_v34 = vld [vmem:[%s2350_s22 + $0xf8] sm:$0xff]   ;;  %v522_v39 = vrot.slane %v251_v38, %v2388_v35  ;;  %v515_v40 = vcombine.high %v251_v38, %v251_v38  ;;  %v2177_v41 = vld [vmem:[%s2350_s22 + $0x140] sm:$0xff]  }
  0x1b   : > { %v2170_v31 = vld [vmem:[%s2350_s22 + $0x30] sm:$0xff]   ;;  %v2174_v36 = vld [vmem:[%s2350_s22 + $0x38] sm:$0xff]   ;;  %v2178_v42 = vld [vmem:[%s2350_s22 + $0x1c0] sm:$0xff]  }
  0x1c   : > { %1948 = vmatpush3.bf16.msra.mxu0 %v2154_v10  ;;  %v2171_v32 = vld [vmem:[%s2350_s22 + $0xb0] sm:$0xff]   ;;  %v2175_v37 = vld [vmem:[%s2350_s22 + $0xb8] sm:$0xff]   ;;  %v530_v43 = vcombine.high %v522_v39, %v522_v39  ;;  %v529_v44 = vrot.slane %v515_v40, %v2388_v35  ;;  %v2179_v45 = vld [vmem:[%s2350_s22 + $0x100] sm:$0xff]  }
  0x1d   : > { %1970 = vmatpush3.bf16.msra.mxu1 %v2155_v11  ;;  %1949 = vmatprep.subr.bf16.mxu0 %v2156_v12  ;;  %v2180_v46 = vld [vmem:[%s2350_s22 + $0x180] sm:$0xff]   ;;  %v2181_v48 = vld [vmem:[%s2350_s22 + $0x148] sm:$0xff]   ;;  %v2185_v52 = vld [vmem:[%s2350_s22 + $0x150] sm:$0xff]  }
  0x1e   : > { %1971 = vmatprep.subr.bf16.mxu1 %v2157_v13  ;;  %1399 = vmatprep.mubr.bf16.mxu0 %v530_v43  ;;  %v531_v47 = vcombine.high %v529_v44, %v529_v44  ;;  %v2182_v49 = vld [vmem:[%s2350_s22 + $0x1c8] sm:$0xff]   ;;  %v2186_v53 = vld [vmem:[%s2350_s22 + $0x1d0] sm:$0xff]   ;;  %v2189_v56 = vld [vmem:[%s2350_s22 + $0x158] sm:$0xff]  }
  0x1f   : > { %v2183_v50 = vld [vmem:[%s2350_s22 + $0x108] sm:$0xff]   ;;  %v2187_v54 = vld [vmem:[%s2350_s22 + $0x110] sm:$0xff]   ;;  %v2190_v57 = vld [vmem:[%s2350_s22 + $0x1d8] sm:$0xff]  }
  0x20   : > { %1950 = vmatpush3.bf16.msra.mxu0 %v2158_v14  ;;  %1439 = vmatprep.mubr.bf16.mxu1 %v531_v47  ;;  %v2184_v51 = vld [vmem:[%s2350_s22 + $0x188] sm:$0xff]   ;;  %v2188_v55 = vld [vmem:[%s2350_s22 + $0x190] sm:$0xff]   ;;  %v2191_v58 = vld [vmem:[%s2350_s22 + $0x118] sm:$0xff]  }
  0x21   : > { %1972 = vmatpush3.bf16.msra.mxu1 %v2159_v15  ;;  %1951 = vmatprep.subr.bf16.mxu0 %v2160_v16  ;;  %v2192_v59 = vld [vmem:[%s2350_s22 + $0x198] sm:$0xff]   ;;  %v2193_v60 = vld [vmem:[%s2350_s22 + $0x160] sm:$0xff]   ;;  %v2197_v0 = vld [vmem:[%s2350_s22 + $0x168] sm:$0xff]  }
  0x22   : > { %1973 = vmatprep.subr.bf16.mxu1 %v2161_v17  ;;  %v2194_v61 = vld [vmem:[%s2350_s22 + $0x1e0] sm:$0xff]   ;;  %v2198_v1 = vld [vmem:[%s2350_s22 + $0x1e8] sm:$0xff]   ;;  %v2201_v4 = vld [vmem:[%s2350_s22 + $0x170] sm:$0xff]  }
  0x23   : > { %v2195_v62 = vld [vmem:[%s2350_s22 + $0x120] sm:$0xff]   ;;  %v2199_v2 = vld [vmem:[%s2350_s22 + $0x128] sm:$0xff]   ;;  %v2202_v5 = vld [vmem:[%s2350_s22 + $0x1f0] sm:$0xff]  }
  0x24   : > { %1952 = vmatpush3.bf16.msra.mxu0 %v2162_v18  ;;  %v2196_v63 = vld [vmem:[%s2350_s22 + $0x1a0] sm:$0xff]   ;;  %v2200_v3 = vld [vmem:[%s2350_s22 + $0x1a8] sm:$0xff]   ;;  %v2203_v6 = vld [vmem:[%s2350_s22 + $0x130] sm:$0xff]  }
  0x25   : > { %1974 = vmatpush3.bf16.msra.mxu1 %v2163_v19  ;;  %1953 = vmatprep.subr.bf16.mxu0 %v2164_v20  ;;  %v2204_v7 = vld [vmem:[%s2350_s22 + $0x1b0] sm:$0xff]   ;;  %v2205_v8 = vld [vmem:[%s2350_s22 + $0x178] sm:$0xff]   ;;  %v252_v12 = vld [vmem:[%s2386_s26 + $0x8] sm:$0xff] }
  0x26   : > { %1975 = vmatprep.subr.bf16.mxu1 %v2165_v21  ;;  %v2206_v9 = vld [vmem:[%s2350_s22 + $0x1f8] sm:$0xff]   ;;  %v539_v13 = vrot.slane %v252_v12, %v2388_v35  ;;  %v532_v14 = vcombine.high %v252_v12, %v252_v12  ;;  %v2210_v15 = vld [vmem:[%s2350_s22 + $0x240] sm:$0xff]   ;;  %v2214_v22 = vld [vmem:[%s2350_s22 + $0x248] sm:$0xff]  }
  0x27   : > { %v2207_v10 = vld [vmem:[%s2350_s22 + $0x138] sm:$0xff]   ;;  %v2211_v16 = vld [vmem:[%s2350_s22 + $0x2c0] sm:$0xff]   ;;  %v2215_v23 = vld [vmem:[%s2350_s22 + $0x2c8] sm:$0xff]  }
  0x28   : > { %1954 = vmatpush3.bf16.msra.mxu0 %v2166_v25  ;;  %v2208_v11 = vld [vmem:[%s2350_s22 + $0x1b8] sm:$0xff]   ;;  %v547_v17 = vcombine.high %v539_v13, %v539_v13  ;;  %v546_v18 = vrot.slane %v532_v14, %v2388_v35  ;;  %v2212_v19 = vld [vmem:[%s2350_s22 + $0x200] sm:$0xff]   ;;  %v2216_v24 = vld [vmem:[%s2350_s22 + $0x208] sm:$0xff]  }
  0x29   : > { %1976 = vmatpush3.bf16.msra.mxu1 %v2167_v26  ;;  %1955 = vmatprep.subr.bf16.mxu0 %v2168_v27  ;;  %v2213_v20 = vld [vmem:[%s2350_s22 + $0x280] sm:$0xff]   ;;  %v2217_v25 = vld [vmem:[%s2350_s22 + $0x288] sm:$0xff]   ;;  %v2218_v26 = vld [vmem:[%s2350_s22 + $0x250] sm:$0xff]  }
  0x2a   : > { %1977 = vmatprep.subr.bf16.mxu1 %v2169_v28  ;;  %v548_v21 = vcombine.high %v546_v18, %v546_v18  ;;  %v2219_v27 = vld [vmem:[%s2350_s22 + $0x2d0] sm:$0xff]   ;;  %v2222_v30 = vld [vmem:[%s2350_s22 + $0x258] sm:$0xff]   ;;  %v2229_v38 = vld [vmem:[%s2350_s22 + $0x2a0] sm:$0xff]  }
  0x2b   : > { %v2220_v28 = vld [vmem:[%s2350_s22 + $0x210] sm:$0xff]   ;;  %v2231_v40 = vld [vmem:[%s2350_s22 + $0x2e8] sm:$0xff]   ;;  %v2238_v47 = vld [vmem:[%s2350_s22 + $0x278] sm:$0xff]  }
  0x2c   : > { %1956 = vmatpush3.bf16.msra.mxu0 %v2170_v31  ;;  %v2221_v29 = vld [vmem:[%s2350_s22 + $0x290] sm:$0xff]   ;;  %v2223_v31 = vld [vmem:[%s2350_s22 + $0x2d8] sm:$0xff]   ;;  %v2262_v12 = vld [vmem:[%s2350_s22 + $0x3a0] sm:$0xff]  }
  0x2d   : > { %1978 = vmatpush3.bf16.msra.mxu1 %v2171_v32  ;;  %1957 = vmatprep.subr.bf16.mxu0 %v2172_v33  ;;  %v2224_v32 = vld [vmem:[%s2350_s22 + $0x218] sm:$0xff]   ;;  %v2234_v43 = vld [vmem:[%s2350_s22 + $0x270] sm:$0xff]   ;;  %v2264_v14 = vld [vmem:[%s2350_s22 + $0x3e8] sm:$0xff]  }
  0x2e   : > { %1979 = vmatprep.subr.bf16.mxu1 %v2173_v34  ;;  %v2225_v33 = vld [vmem:[%s2350_s22 + $0x298] sm:$0xff]   ;;  %v2226_v34 = vld [vmem:[%s2350_s22 + $0x260] sm:$0xff]  }
  0x30   : > { %1958 = vmatpush3.bf16.msra.mxu0 %v2174_v36  ;;  %v2227_v36 = vld [vmem:[%s2350_s22 + $0x2e0] sm:$0xff]  }
  0x31   : > { %1980 = vmatpush3.bf16.msra.mxu1 %v2175_v37  ;;  %1987 = vmatprep.subr.bf16.mxu0 %v2177_v41  ;;  %v2228_v37 = vld [vmem:[%s2350_s22 + $0x220] sm:$0xff]   ;;  %v2232_v41 = vld [vmem:[%s2350_s22 + $0x228] sm:$0xff]  }
  0x32   : > { %2009 = vmatprep.subr.bf16.mxu1 %v2178_v42  ;;  %v2233_v42 = vld [vmem:[%s2350_s22 + $0x2a8] sm:$0xff]  }
  0x33   : > { %1400 = vmatmul.mubr.bf16.vlgmr.msra.gmra.mrb[0].mxu0 %v522_v39  ;;  %v2230_v39 = vld [vmem:[%s2350_s22 + $0x268] sm:$0xff]  }
  0x34   : > { %1988 = vmatpush3.bf16.msra.mxu0 %v2179_v45  ;;  %1440 = vmatmul.mubr.bf16.vlgmr.msra.gmra.mrb[0].mxu1 %v529_v44  ;;  %v2235_v44 = vld [vmem:[%s2350_s22 + $0x2f0] sm:$0xff]  }
  0x35   : > { %1989 = vmatprep.subr.bf16.mxu0 %v2181_v48  ;;  %2010 = vmatpush3.bf16.msra.mxu1 %v2180_v46  ;;  %v2236_v45 = vld [vmem:[%s2350_s22 + $0x230] sm:$0xff]   ;;  %v2239_v48 = vld [vmem:[%s2350_s22 + $0x2f8] sm:$0xff]  }
  0x36   : > { %2011 = vmatprep.subr.bf16.mxu1 %v2182_v49  ;;  %1479 = vmatprep.mubr.bf16.mxu0 %v547_v17  ;;  %v2237_v46 = vld [vmem:[%s2350_s22 + $0x2b0] sm:$0xff]   ;;  %v2240_v49 = vld [vmem:[%s2350_s22 + $0x238] sm:$0xff]  }
  0x37   : > { %1519 = vmatprep.mubr.bf16.mxu1 %v548_v21  ;;  %v2267_v17 = vld [vmem:[%s2350_s22 + $0x370] sm:$0xff]   ;;  %v2271_v21 = vld [vmem:[%s2350_s22 + $0x378] sm:$0xff]  }
  0x38   : > { %1990 = vmatpush3.bf16.msra.mxu0 %v2183_v50  ;;  %v2241_v50 = vld [vmem:[%s2350_s22 + $0x2b8] sm:$0xff]  }
  0x39   : > { %1991 = vmatprep.subr.bf16.mxu0 %v2185_v52  ;;  %2012 = vmatpush3.bf16.msra.mxu1 %v2184_v51  ;;  %v253_v51 = vld [vmem:[%s2386_s26 + $0x10] sm:$0xff] }
  0x3a   : > { %2013 = vmatprep.subr.bf16.mxu1 %v2186_v53  ;;  %v556_v52 = vrot.slane %v253_v51, %v2388_v35  ;;  %v549_v53 = vcombine.high %v253_v51, %v253_v51 }
  0x3c   : > { %1992 = vmatpush3.bf16.msra.mxu0 %v2187_v54  ;;  %v2243_v54 = vld [vmem:[%s2350_s22 + $0x340] sm:$0xff]  }
  0x3d   : > { %1993 = vmatprep.subr.bf16.mxu0 %v2189_v56  ;;  %2014 = vmatpush3.bf16.msra.mxu1 %v2188_v55  ;;  %v2244_v55 = vld [vmem:[%s2350_s22 + $0x3c0] sm:$0xff]   ;;  %v564_v56 = vcombine.high %v556_v52, %v556_v52 }
  0x3e   : > { %2015 = vmatprep.subr.bf16.mxu1 %v2190_v57  ;;  %v563_v57 = vrot.slane %v549_v53, %v2388_v35 }
  0x40   : > { %1994 = vmatpush3.bf16.msra.mxu0 %v2191_v58  ;;  %v2245_v58 = vld [vmem:[%s2350_s22 + $0x300] sm:$0xff]  }
  0x41   : > { %1995 = vmatprep.subr.bf16.mxu0 %v2193_v60  ;;  %2016 = vmatpush3.bf16.msra.mxu1 %v2192_v59  ;;  %v2246_v59 = vld [vmem:[%s2350_s22 + $0x380] sm:$0xff]   ;;  %v565_v60 = vcombine.high %v563_v57, %v563_v57 }
  0x42   : > { %2017 = vmatprep.subr.bf16.mxu1 %v2194_v61  ;;  %v2247_v61 = vld [vmem:[%s2350_s22 + $0x348] sm:$0xff]  }
  0x44   : > { %1996 = vmatpush3.bf16.msra.mxu0 %v2195_v62  ;;  %v2248_v62 = vld [vmem:[%s2350_s22 + $0x3c8] sm:$0xff]  }
  0x45   : > { %1997 = vmatprep.subr.bf16.mxu0 %v2197_v0  ;;  %2018 = vmatpush3.bf16.msra.mxu1 %v2196_v63  ;;  %v2249_v63 = vld [vmem:[%s2350_s22 + $0x308] sm:$0xff]  }
  0x46   : > { %2019 = vmatprep.subr.bf16.mxu1 %v2198_v1  ;;  %v2250_v0 = vld [vmem:[%s2350_s22 + $0x388] sm:$0xff]   ;;  %v2251_v1 = vld [vmem:[%s2350_s22 + $0x350] sm:$0xff]  }
  0x48   : > { %1998 = vmatpush3.bf16.msra.mxu0 %v2199_v2  ;;  %v2252_v2 = vld [vmem:[%s2350_s22 + $0x3d0] sm:$0xff]  }
  0x49   : > { %1999 = vmatprep.subr.bf16.mxu0 %v2201_v4  ;;  %2020 = vmatpush3.bf16.msra.mxu1 %v2200_v3  ;;  %v2253_v3 = vld [vmem:[%s2350_s22 + $0x310] sm:$0xff]  }
  0x4a   : > { %2021 = vmatprep.subr.bf16.mxu1 %v2202_v5  ;;  %v2254_v4 = vld [vmem:[%s2350_s22 + $0x390] sm:$0xff]   ;;  %v2255_v5 = vld [vmem:[%s2350_s22 + $0x358] sm:$0xff]  }
  0x4c   : > { %2000 = vmatpush3.bf16.msra.mxu0 %v2203_v6  ;;  %v2256_v6 = vld [vmem:[%s2350_s22 + $0x3d8] sm:$0xff]  }
  0x4d   : > { %2001 = vmatprep.subr.bf16.mxu0 %v2205_v8  ;;  %2022 = vmatpush3.bf16.msra.mxu1 %v2204_v7  ;;  %v2257_v7 = vld [vmem:[%s2350_s22 + $0x318] sm:$0xff]  }
  0x4e   : > { %2023 = vmatprep.subr.bf16.mxu1 %v2206_v9  ;;  %v2258_v8 = vld [vmem:[%s2350_s22 + $0x398] sm:$0xff]   ;;  %v2259_v9 = vld [vmem:[%s2350_s22 + $0x360] sm:$0xff]  }
  0x50   : > { %2002 = vmatpush3.bf16.msra.mxu0 %v2207_v10  ;;  %v2260_v10 = vld [vmem:[%s2350_s22 + $0x3e0] sm:$0xff]  }
  0x51   : > { %2031 = vmatprep.subr.bf16.mxu0 %v2210_v15  ;;  %2024 = vmatpush3.bf16.msra.mxu1 %v2208_v11  ;;  %v2261_v11 = vld [vmem:[%s2350_s22 + $0x320] sm:$0xff]   ;;  %v2265_v15 = vld [vmem:[%s2350_s22 + $0x328] sm:$0xff]  }
  0x52   : > { %2053 = vmatprep.subr.bf16.mxu1 %v2211_v16  ;;  %v2266_v16 = vld [vmem:[%s2350_s22 + $0x3a8] sm:$0xff]  }
  0x53   : > { %1480 = vmatmul.mubr.bf16.vlgmr.msra.gmra.mrb[4].mxu0 %v539_v13  ;;  %v2263_v13 = vld [vmem:[%s2350_s22 + $0x368] sm:$0xff]  }
  0x54   : > { %2032 = vmatpush3.bf16.msra.mxu0 %v2212_v19  ;;  %1520 = vmatmul.mubr.bf16.vlgmr.msra.gmra.mrb[4].mxu1 %v546_v18  ;;  %v2268_v18 = vld [vmem:[%s2350_s22 + $0x3f0] sm:$0xff]  }
  0x55   : > { %2033 = vmatprep.subr.bf16.mxu0 %v2214_v22  ;;  %2054 = vmatpush3.bf16.msra.mxu1 %v2213_v20  ;;  %v2269_v19 = vld [vmem:[%s2350_s22 + $0x330] sm:$0xff]   ;;  %v2272_v22 = vld [vmem:[%s2350_s22 + $0x3f8] sm:$0xff]  }
  0x56   : > { %2055 = vmatprep.subr.bf16.mxu1 %v2215_v23  ;;  %1559 = vmatprep.mubr.bf16.mxu0 %v564_v56  ;;  %v2270_v20 = vld [vmem:[%s2350_s22 + $0x3b0] sm:$0xff]   ;;  %v2273_v23 = vld [vmem:[%s2350_s22 + $0x338] sm:$0xff]  }
  0x57   : > { %1599 = vmatprep.mubr.bf16.mxu1 %v565_v60 }
  0x58   : > { %2034 = vmatpush3.bf16.msra.mxu0 %v2216_v24  ;;  %v2274_v24 = vld [vmem:[%s2350_s22 + $0x3b8] sm:$0xff]  }
  0x59   : > { %2035 = vmatprep.subr.bf16.mxu0 %v2218_v26  ;;  %2056 = vmatpush3.bf16.msra.mxu1 %v2217_v25  ;;  %v254_v25 = vld [vmem:[%s2386_s26 + $0x18] sm:$0xff] }
  0x5a   : > { %2057 = vmatprep.subr.bf16.mxu1 %v2219_v27  ;;  %v573_v26 = vrot.slane %v254_v25, %v2388_v35  ;;  %v566_v27 = vcombine.high %v254_v25, %v254_v25 }
  0x5c   : > { %2036 = vmatpush3.bf16.msra.mxu0 %v2220_v28  ;;  %v581_v28 = vcombine.high %v573_v26, %v573_v26 }
  0x5d   : > { %2037 = vmatprep.subr.bf16.mxu0 %v2222_v30  ;;  %2058 = vmatpush3.bf16.msra.mxu1 %v2221_v29  ;;  %v580_v29 = vrot.slane %v566_v27, %v2388_v35 }
  0x5e   : > { %2059 = vmatprep.subr.bf16.mxu1 %v2223_v31 }
  0x5f   : > { %v582_v30 = vcombine.high %v580_v29, %v580_v29 }
  0x60   : > { %2038 = vmatpush3.bf16.msra.mxu0 %v2224_v32 }
  0x61   : > { %2039 = vmatprep.subr.bf16.mxu0 %v2226_v34  ;;  %2060 = vmatpush3.bf16.msra.mxu1 %v2225_v33 }
  0x62   : > { %2061 = vmatprep.subr.bf16.mxu1 %v2227_v36 }
  0x64   : > { %2040 = vmatpush3.bf16.msra.mxu0 %v2228_v37 }
  0x65   : > { %2041 = vmatprep.subr.bf16.mxu0 %v2230_v39  ;;  %2062 = vmatpush3.bf16.msra.mxu1 %v2229_v38 }
  0x66   : > { %2063 = vmatprep.subr.bf16.mxu1 %v2231_v40 }
  0x68   : > { %2042 = vmatpush3.bf16.msra.mxu0 %v2232_v41 }
  0x69   : > { %2043 = vmatprep.subr.bf16.mxu0 %v2234_v43  ;;  %2064 = vmatpush3.bf16.msra.mxu1 %v2233_v42 }
  0x6a   : > { %2065 = vmatprep.subr.bf16.mxu1 %v2235_v44 }
  0x6c   : > { %2044 = vmatpush3.bf16.msra.mxu0 %v2236_v45 }
  0x6d   : > { %2045 = vmatprep.subr.bf16.mxu0 %v2238_v47  ;;  %2066 = vmatpush3.bf16.msra.mxu1 %v2237_v46 }
  0x6e   : > { %2067 = vmatprep.subr.bf16.mxu1 %v2239_v48 }
  0x70   : > { %2046 = vmatpush3.bf16.msra.mxu0 %v2240_v49 }
  0x71   : > { %2075 = vmatprep.subr.bf16.mxu0 %v2243_v54  ;;  %2068 = vmatpush3.bf16.msra.mxu1 %v2241_v50 }
  0x72   : > { %2097 = vmatprep.subr.bf16.mxu1 %v2244_v55 }
  0x73   : > { %1560 = vmatmul.mubr.bf16.vlgmr.msra.gmra.mrb[8].mxu0 %v556_v52 }
  0x74   : > { %2076 = vmatpush3.bf16.msra.mxu0 %v2245_v58  ;;  %1600 = vmatmul.mubr.bf16.vlgmr.msra.gmra.mrb[8].mxu1 %v563_v57 }
  0x75   : > { %2077 = vmatprep.subr.bf16.mxu0 %v2247_v61  ;;  %2098 = vmatpush3.bf16.msra.mxu1 %v2246_v59 }
  0x76   : > { %2099 = vmatprep.subr.bf16.mxu1 %v2248_v62  ;;  %1639 = vmatprep.mubr.bf16.mxu0 %v581_v28 }
  0x77   : > { %1679 = vmatprep.mubr.bf16.mxu1 %v582_v30 }
  0x78   : > { %2078 = vmatpush3.bf16.msra.mxu0 %v2249_v63 }
  0x79   : > { %2079 = vmatprep.subr.bf16.mxu0 %v2251_v1  ;;  %2100 = vmatpush3.bf16.msra.mxu1 %v2250_v0 }
  0x7a   : > { %2101 = vmatprep.subr.bf16.mxu1 %v2252_v2 }
  0x7c   : > { %2080 = vmatpush3.bf16.msra.mxu0 %v2253_v3 }
  0x7d   : > { %2081 = vmatprep.subr.bf16.mxu0 %v2255_v5  ;;  %2102 = vmatpush3.bf16.msra.mxu1 %v2254_v4 }
  0x7e   : > { %2103 = vmatprep.subr.bf16.mxu1 %v2256_v6 }
  0x80   : > { %2082 = vmatpush3.bf16.msra.mxu0 %v2257_v7 }
  0x81   : > { %2083 = vmatprep.subr.bf16.mxu0 %v2259_v9  ;;  %2104 = vmatpush3.bf16.msra.mxu1 %v2258_v8 }
  0x82   : > { %2105 = vmatprep.subr.bf16.mxu1 %v2260_v10 }
  0x84   : > { %2084 = vmatpush3.bf16.msra.mxu0 %v2261_v11 }
  0x85   : > { %2085 = vmatprep.subr.bf16.mxu0 %v2263_v13  ;;  %2106 = vmatpush3.bf16.msra.mxu1 %v2262_v12  ;;  %v1937_v12 = vld [vmem:[%s2521_s2] ss:$0 sm:$0xff] }
  0x86   : > { %2107 = vmatprep.subr.bf16.mxu1 %v2264_v14 }
  0x88   : > { %2086 = vmatpush3.bf16.msra.mxu0 %v2265_v15  ;;  %v1938_v15 = vld [vmem:[%s2522_s3] ss:$0 sm:$0xff] }
  0x89   : > { %2087 = vmatprep.subr.bf16.mxu0 %v2267_v17  ;;  %2108 = vmatpush3.bf16.msra.mxu1 %v2266_v16 }
  0x8a   : > { %2109 = vmatprep.subr.bf16.mxu1 %v2268_v18 }
  0x8c   : > { %2088 = vmatpush3.bf16.msra.mxu0 %v2269_v19 }
  0x8d   : > { %2089 = vmatprep.subr.bf16.mxu0 %v2271_v21  ;;  %2110 = vmatpush3.bf16.msra.mxu1 %v2270_v20 }
  0x8e   : > { %2111 = vmatprep.subr.bf16.mxu1 %v2272_v22 }
  0x90   : > { %2090 = vmatpush3.bf16.msra.mxu0 %v2273_v23 }
  0x91   : > { %2112 = vmatpush3.bf16.msra.mxu1 %v2274_v24 }
  0x93   : > { %1640 = vmatmul.mubr.bf16.vlgmr.msra.gmra.mrb[12].mxu0 %v573_v26 }
  0x94   : > { %1680 = vmatmul.mubr.bf16.vlgmr.msra.gmra.mrb[12].mxu1 %v580_v29 }
 0x106   : > { %v1959_v31 = vpop.f32.mrb[0].mxu0 }
 0x107   : > { %v1960_v32 = vpop.f32.mrb[1].mxu0  ;;  %v1981_v33 = vpop.f32.mrb[0].mxu1 }
 0x108   : > { %v1961_v34 = vadd.f32 %v1960_v32, %v1959_v31  ;;  %v1962_v36 = vpop.f32.mrb[2].mxu0  ;;  %v1982_v37 = vpop.f32.mrb[1].mxu1 }
 0x109   : > { %v1963_v38 = vpop.f32.mrb[3].mxu0  ;;  %v1983_v39 = vadd.f32 %v1982_v37, %v1981_v33  ;;  %v1984_v40 = vpop.f32.mrb[2].mxu1 }
 0x10a   : > { %v1985_v41 = vpop.f32.mrb[3].mxu1 }
 0x10b   : > { %v1442_v42 = vadd.f32 %v1983_v39, %v1961_v34 }
 0x126   : > { %v2003_v43 = vpop.f32.mrb[4].mxu0 }
 0x127   : > { %v2004_v44 = vpop.f32.mrb[5].mxu0  ;;  %v2025_v35 = vpop.f32.mrb[4].mxu1 }
 0x128   : > { %v2005_v45 = vadd.f32 %v2004_v44, %v2003_v43  ;;  %v2006_v46 = vpop.f32.mrb[6].mxu0  ;;  %v2026_v47 = vpop.f32.mrb[5].mxu1 }
 0x129   : > { %v2007_v48 = vpop.f32.mrb[7].mxu0  ;;  %v2027_v50 = vadd.f32 %v2026_v47, %v2025_v35  ;;  %v2028_v51 = vpop.f32.mrb[6].mxu1 }
 0x12a   : > { %v1482_v49 = vadd.f32 %v2005_v45, %v1442_v42  ;;  %v2029_v52 = vpop.f32.mrb[7].mxu1 }
 0x12c   : > { %v1522_v53 = vadd.f32 %v2027_v50, %v1482_v49 }
 0x146   : > { %v2047_v54 = vpop.f32.mrb[8].mxu0 }
 0x147   : > { %v2048_v55 = vpop.f32.mrb[9].mxu0  ;;  %v2069_v56 = vpop.f32.mrb[8].mxu1 }
 0x148   : > { %v2049_v57 = vadd.f32 %v2048_v55, %v2047_v54  ;;  %v2050_v58 = vpop.f32.mrb[10].mxu0  ;;  %v2070_v59 = vpop.f32.mrb[9].mxu1 }
 0x149   : > { %v2051_v60 = vpop.f32.mrb[11].mxu0  ;;  %v2071_v62 = vadd.f32 %v2070_v59, %v2069_v56  ;;  %v2072_v63 = vpop.f32.mrb[10].mxu1 }
 0x14a   : > { %v1562_v61 = vadd.f32 %v2049_v57, %v1522_v53  ;;  %v2073_v0 = vpop.f32.mrb[11].mxu1 }
 0x14c   : > { %v1602_v1 = vadd.f32 %v2071_v62, %v1562_v61 }
 0x166   : > { %v2091_v2 = vpop.f32.mrb[12].mxu0 }
 0x167   : > { %v2092_v3 = vpop.f32.mrb[13].mxu0  ;;  %v2113_v4 = vpop.f32.mrb[12].mxu1 }
 0x168   : > { %v2093_v5 = vadd.f32 %v2092_v3, %v2091_v2  ;;  %v2094_v6 = vpop.f32.mrb[14].mxu0  ;;  %v2114_v7 = vpop.f32.mrb[13].mxu1 }
 0x169   : > { %v2095_v8 = vpop.f32.mrb[15].mxu0  ;;  %v2115_v10 = vadd.f32 %v2114_v7, %v2113_v4  ;;  %v2116_v11 = vpop.f32.mrb[14].mxu1 }
 0x16a   : > { %v1642_v9 = vadd.f32 %v2093_v5, %v1602_v1  ;;  %v2117_v13 = vpop.f32.mrb[15].mxu1 }
 0x16c   : > { %v1682_v14 = vadd.f32 %v2115_v10, %v1642_v9 }
 0x16e   : > { %v1694_v16 = vmul.f32 %v1937_v12, %v1682_v14 }
 0x170   : > { %v1702_v17 = vadd.f32 %v1938_v15, %v1694_v16 }
 0x172   : > { %vm1703_vm0 = vcmp.ge.f32.partialorder %v1702_v17, 0.0  ;;  %v1704_v18 = vmul.f32 0.01, %v1702_v17 }
 0x174   : > { %v1705_v19 = vsel %vm1703_vm0, %v1702_v17, %v1704_v18 }
 0x175   : > { %1706 = vst [vmem:[%s249_s8] sm:$0xf] %v1705_v19 }
 0x176 PF: > { %s14_s17 = sadd.s32 1, %s2298_s17   ;;  %s2524_s15 = smov %s2294_s16 }
 0x177   : > { %p11_p5 = scmp.ge.s32.totalorder %s14_s17, 6   ;;  %s2525_s16 = smov %s2527_s18 }
 0x179   :  { %13 = sbr.rel (!%p11_p5) target bundleno = 2 (0x2), region = 69 }

// kernel: _lambda_.20
= control target key start
LH: loop header
LB: loop body
LE: loop exit
PB: predicated region body
PF: predicated region fallthrough
CT: control target
= control target key end

     0   :  { %s1429_s15 = smov 0   ;;  %s1431_s16 = smov 0   ;;  %s1552_s0 = inlined_call_operand.vmem [shape: bf16[4,16,1024], index: 0, kind: input, shape index: {}]   ;;  %s1553_s1 = inlined_call_operand.vmem [shape: bf16[4,1024,64], index: 1, kind: input, shape index: {}]   ;;  %s1554_s2 = inlined_call_operand.vmem [shape: f32[1,64], index: 2, kind: input, shape index: {}]   ;;  %s1555_s3 = inlined_call_operand.vmem [shape: f32[1,64], index: 3, kind: input, shape index: {}]   ;;  %s1556_s4 = inlined_call_operand.vmem [shape: f32[4,16,64], index: 4, kind: output, shape index: {}]  }
   0x1   :  { %s1433_s17 = smov 0  }
   0x2 LB: > { %s26_s18 = sadd.s32 1, %s1398_s16  ;;  %p1118_p0 = scmp.ge.s32.totalorder %s1402_s17, 1  ;;  %s1402_s17 = sphi %s1433_s17, %s14_s17   ;;  %s1398_s16 = sphi %s1431_s16, %s1558_s16   ;;  %s1394_s15 = sphi %s1429_s15, %s1557_s15  }
   0x3   : > { %p28_p1 = scmp.ge.s32.totalorder %s26_s18, 4  ;;  %p194_p2 = scmp.lt.s32.totalorder %s1402_s17, 5 }
   0x5   : > { %s1560_s18 = smov (%p28_p1, %s26_s18), 0  ;;  %p195_p3 = pnand %p1118_p0, %p194_p2 }
   0x6   : > { %p235_p4 = scmp.lt.s32.totalorder (!%p195_p3), %s1394_s15, 3  ;;  %vm1009_vm1 = vcmask (!%p195_p3), 523264  }
   0x7   : > { %198 = sbr.rel (%p195_p3) target bundleno = 312 (0x138), region = 36 }
   0xe   : > { %s1562_s15 = smov (!%p235_p4, %s1394_s15), 3 }
   0xf   : > { %s1202_s19 = sshll.u32 %s1562_s15, 9  ;;  %s1201_s23 = sshll.u32 %s1562_s15, 6 }
  0x10   : > { %s1453_s22 = scalar_lea.vmem %s1553_s1, %s1202_s19  ;;  %s1489_s26 = scalar_lea.vmem %s1552_s0, %s1201_s23 }
  0x11   : > { %v1316_v0 = vld [vmem:[%s1453_s22 + $0x40] sm:$0xff]   ;;  %v1320_v4 = vld [vmem:[%s1453_s22 + $0x48] sm:$0xff]   ;;  %v1324_v8 = vld [vmem:[%s1453_s22 + $0x50] sm:$0xff]   ;;  %s1203_s5 = sshll.u32 %s1562_s15, 4 }
  0x12   : > { %v1317_v1 = vld [vmem:[%s1453_s22 + $0xc0] sm:$0xff]   ;;  %1204 = vmatprep.subr.bf16.mxu0 %v1316_v0  ;;  %v1321_v5 = vld [vmem:[%s1453_s22 + $0xc8] sm:$0xff]   ;;  %v1325_v9 = vld [vmem:[%s1453_s22 + $0xd0] sm:$0xff]   ;;  %s258_s8 = scalar_lea.vmem %s1556_s4, %s1203_s5 }
  0x13   : > { %v1318_v2 = vld [vmem:[%s1453_s22] sm:$0xff]   ;;  %1226 = vmatprep.subr.bf16.mxu1 %v1317_v1  ;;  %v1322_v6 = vld [vmem:[%s1453_s22 + $0x8] sm:$0xff]   ;;  %v1326_v10 = vld [vmem:[%s1453_s22 + $0x10] sm:$0xff]  }
  0x14   : > { %v1319_v3 = vld [vmem:[%s1453_s22 + $0x80] sm:$0xff]   ;;  %1205 = vmatpush3.bf16.msra.mxu0 %v1318_v2  ;;  %v1323_v7 = vld [vmem:[%s1453_s22 + $0x88] sm:$0xff]   ;;  %v1327_v11 = vld [vmem:[%s1453_s22 + $0x90] sm:$0xff]  }
  0x15   : > { %1227 = vmatpush3.bf16.msra.mxu1 %v1319_v3  ;;  %1206 = vmatprep.subr.bf16.mxu0 %v1320_v4  ;;  %v1328_v12 = vld [vmem:[%s1453_s22 + $0x58] sm:$0xff]   ;;  %v1332_v16 = vld [vmem:[%s1453_s22 + $0x60] sm:$0xff]   ;;  %v1336_v20 = vld [vmem:[%s1453_s22 + $0x68] sm:$0xff]  }
  0x16   : > { %1228 = vmatprep.subr.bf16.mxu1 %v1321_v5  ;;  %v1329_v13 = vld [vmem:[%s1453_s22 + $0xd8] sm:$0xff]   ;;  %v1333_v17 = vld [vmem:[%s1453_s22 + $0xe0] sm:$0xff]   ;;  %v1337_v21 = vld [vmem:[%s1453_s22 + $0xe8] sm:$0xff]  }
  0x17   : > { %v1330_v14 = vld [vmem:[%s1453_s22 + $0x18] sm:$0xff]   ;;  %v1334_v18 = vld [vmem:[%s1453_s22 + $0x20] sm:$0xff]   ;;  %v1338_v22 = vld [vmem:[%s1453_s22 + $0x28] sm:$0xff]  }
  0x18   : > { %1207 = vmatpush3.bf16.msra.mxu0 %v1322_v6  ;;  %v1331_v15 = vld [vmem:[%s1453_s22 + $0x98] sm:$0xff]   ;;  %v1335_v19 = vld [vmem:[%s1453_s22 + $0xa0] sm:$0xff]   ;;  %v1339_v23 = vld [vmem:[%s1453_s22 + $0xa8] sm:$0xff]  }
  0x19   : > { %1229 = vmatpush3.bf16.msra.mxu1 %v1323_v7  ;;  %1208 = vmatprep.subr.bf16.mxu0 %v1324_v8  ;;  %v1340_v24 = vld [vmem:[%s1453_s22 + $0x70] sm:$0xff]   ;;  %v1344_v28 = vld [vmem:[%s1453_s22 + $0x78] sm:$0xff]   ;;  %v261_v32 = vld [vmem:[%s1489_s26] sm:$0xff] }
  0x1a   : > { %1230 = vmatprep.subr.bf16.mxu1 %v1325_v9  ;;  %v1341_v25 = vld [vmem:[%s1453_s22 + $0xf0] sm:$0xff]   ;;  %v1345_v29 = vld [vmem:[%s1453_s22 + $0xf8] sm:$0xff]   ;;  %v265_v33 = vld [vmem:[%s1489_s26 + $0x20] sm:$0xff] }
  0x1b   : > { %v1342_v26 = vld [vmem:[%s1453_s22 + $0x30] sm:$0xff]   ;;  %v1346_v30 = vld [vmem:[%s1453_s22 + $0x38] sm:$0xff]   ;;  %v262_v34 = vld [vmem:[%s1489_s26 + $0x8] sm:$0xff]  ;;  %v1125_v35 = vcombine.low %v261_v32, %v265_v33  ;;  %v1126_v36 = vcombine.high %v261_v32, %v265_v33 }
  0x1c   : > { %1209 = vmatpush3.bf16.msra.mxu0 %v1326_v10  ;;  %v1343_v27 = vld [vmem:[%s1453_s22 + $0xb0] sm:$0xff]   ;;  %v1347_v31 = vld [vmem:[%s1453_s22 + $0xb8] sm:$0xff]   ;;  %v266_v37 = vld [vmem:[%s1489_s26 + $0x28] sm:$0xff] }
  0x1d   : > { %1231 = vmatpush3.bf16.msra.mxu1 %v1327_v11  ;;  %1210 = vmatprep.subr.bf16.mxu0 %v1328_v12  ;;  %v1127_v38 = vcombine.low %v262_v34, %v266_v37  ;;  %v1128_v39 = vcombine.high %v262_v34, %v266_v37  ;;  %v1348_v40 = vld [vmem:[%s1453_s22 + $0x140] sm:$0xff]   ;;  %v1352_v44 = vld [vmem:[%s1453_s22 + $0x148] sm:$0xff]   ;;  %v1356_v48 = vld [vmem:[%s1453_s22 + $0x150] sm:$0xff]  }
  0x1e   : > { %1232 = vmatprep.subr.bf16.mxu1 %v1329_v13  ;;  %853 = vmatprep.mubr.bf16.mxu0 %v1126_v36  ;;  %v1349_v41 = vld [vmem:[%s1453_s22 + $0x1c0] sm:$0xff]   ;;  %v1353_v45 = vld [vmem:[%s1453_s22 + $0x1c8] sm:$0xff]   ;;  %v1357_v49 = vld [vmem:[%s1453_s22 + $0x1d0] sm:$0xff]  }
  0x1f   : > { %894 = vmatprep.mubr.bf16.mxu1 %v1128_v39  ;;  %v1350_v42 = vld [vmem:[%s1453_s22 + $0x100] sm:$0xff]   ;;  %v1354_v46 = vld [vmem:[%s1453_s22 + $0x108] sm:$0xff]   ;;  %v1358_v50 = vld [vmem:[%s1453_s22 + $0x110] sm:$0xff]  }
  0x20   : > { %1211 = vmatpush3.bf16.msra.mxu0 %v1330_v14  ;;  %v1351_v43 = vld [vmem:[%s1453_s22 + $0x180] sm:$0xff]   ;;  %v1355_v47 = vld [vmem:[%s1453_s22 + $0x188] sm:$0xff]   ;;  %v1359_v51 = vld [vmem:[%s1453_s22 + $0x190] sm:$0xff]  }
  0x21   : > { %1233 = vmatpush3.bf16.msra.mxu1 %v1331_v15  ;;  %1212 = vmatprep.subr.bf16.mxu0 %v1332_v16  ;;  %v1360_v52 = vld [vmem:[%s1453_s22 + $0x158] sm:$0xff]   ;;  %v1364_v56 = vld [vmem:[%s1453_s22 + $0x160] sm:$0xff]   ;;  %v1368_v60 = vld [vmem:[%s1453_s22 + $0x168] sm:$0xff]  }
  0x22   : > { %1234 = vmatprep.subr.bf16.mxu1 %v1333_v17  ;;  %v1361_v53 = vld [vmem:[%s1453_s22 + $0x1d8] sm:$0xff]   ;;  %v1365_v57 = vld [vmem:[%s1453_s22 + $0x1e0] sm:$0xff]   ;;  %v1369_v61 = vld [vmem:[%s1453_s22 + $0x1e8] sm:$0xff]  }
  0x23   : > { %v1362_v54 = vld [vmem:[%s1453_s22 + $0x118] sm:$0xff]   ;;  %v1366_v58 = vld [vmem:[%s1453_s22 + $0x120] sm:$0xff]   ;;  %v1370_v62 = vld [vmem:[%s1453_s22 + $0x128] sm:$0xff]  }
  0x24   : > { %1213 = vmatpush3.bf16.msra.mxu0 %v1334_v18  ;;  %v1363_v55 = vld [vmem:[%s1453_s22 + $0x198] sm:$0xff]   ;;  %v1367_v59 = vld [vmem:[%s1453_s22 + $0x1a0] sm:$0xff]   ;;  %v1371_v63 = vld [vmem:[%s1453_s22 + $0x1a8] sm:$0xff]  }
  0x25   : > { %1235 = vmatpush3.bf16.msra.mxu1 %v1335_v19  ;;  %1214 = vmatprep.subr.bf16.mxu0 %v1336_v20  ;;  %v1372_v0 = vld [vmem:[%s1453_s22 + $0x170] sm:$0xff]   ;;  %v1376_v4 = vld [vmem:[%s1453_s22 + $0x178] sm:$0xff]  }
  0x26   : > { %1236 = vmatprep.subr.bf16.mxu1 %v1337_v21  ;;  %v1373_v1 = vld [vmem:[%s1453_s22 + $0x1f0] sm:$0xff]   ;;  %v1377_v5 = vld [vmem:[%s1453_s22 + $0x1f8] sm:$0xff]  }
  0x27   : > { %v1374_v2 = vld [vmem:[%s1453_s22 + $0x130] sm:$0xff]   ;;  %v1378_v6 = vld [vmem:[%s1453_s22 + $0x138] sm:$0xff]  }
  0x28   : > { %1215 = vmatpush3.bf16.msra.mxu0 %v1338_v22  ;;  %v1375_v3 = vld [vmem:[%s1453_s22 + $0x1b0] sm:$0xff]   ;;  %v1379_v7 = vld [vmem:[%s1453_s22 + $0x1b8] sm:$0xff]  }
  0x29   : > { %1237 = vmatpush3.bf16.msra.mxu1 %v1339_v23  ;;  %1216 = vmatprep.subr.bf16.mxu0 %v1340_v24  ;;  %v263_v8 = vld [vmem:[%s1489_s26 + $0x10] sm:$0xff]  ;;  %v264_v12 = vld [vmem:[%s1489_s26 + $0x18] sm:$0xff] }
  0x2a   : > { %1238 = vmatprep.subr.bf16.mxu1 %v1341_v25  ;;  %v267_v9 = vld [vmem:[%s1489_s26 + $0x30] sm:$0xff]  ;;  %v268_v13 = vld [vmem:[%s1489_s26 + $0x38] sm:$0xff] }
  0x2b   : > { %v1129_v10 = vcombine.low %v263_v8, %v267_v9  ;;  %v1130_v11 = vcombine.high %v263_v8, %v267_v9  ;;  %v1131_v14 = vcombine.low %v264_v12, %v268_v13  ;;  %v1132_v15 = vcombine.high %v264_v12, %v268_v13 }
  0x2c   : > { %1217 = vmatpush3.bf16.msra.mxu0 %v1342_v26 }
  0x2d   : > { %1239 = vmatpush3.bf16.msra.mxu1 %v1343_v27  ;;  %1218 = vmatprep.subr.bf16.mxu0 %v1344_v28 }
  0x2e   : > { %1240 = vmatprep.subr.bf16.mxu1 %v1345_v29 }
  0x30   : > { %1219 = vmatpush3.bf16.msra.mxu0 %v1346_v30 }
  0x31   : > { %1241 = vmatpush3.bf16.msra.mxu1 %v1347_v31  ;;  %1248 = vmatprep.subr.bf16.mxu0 %v1348_v40 }
  0x32   : > { %1270 = vmatprep.subr.bf16.mxu1 %v1349_v41 }
  0x33   : > { %854 = vmatmul.mubr.bf16.vlgmr.msra.gmra.mrb[0].mxu0 %v1125_v35 }
  0x34   : > { %895 = vmatmul.mubr.bf16.vlgmr.msra.gmra.mrb[0].mxu1 %v1127_v38  ;;  %1249 = vmatpush3.bf16.msra.mxu0 %v1350_v42  ;;  %v1197_v42 = vld [vmem:[%s1554_s2] ss:$0 sm:$0xff] }
  0x35   : > { %1271 = vmatpush3.bf16.msra.mxu1 %v1351_v43  ;;  %1250 = vmatprep.subr.bf16.mxu0 %v1352_v44 }
  0x36   : > { %1272 = vmatprep.subr.bf16.mxu1 %v1353_v45  ;;  %935 = vmatprep.mubr.bf16.mxu0 %v1130_v11 }
  0x37   : > { %976 = vmatprep.mubr.bf16.mxu1 %v1132_v15 }
  0x38   : > { %1251 = vmatpush3.bf16.msra.mxu0 %v1354_v46  ;;  %v1198_v46 = vld [vmem:[%s1555_s3] ss:$0 sm:$0xff] }
  0x39   : > { %1273 = vmatpush3.bf16.msra.mxu1 %v1355_v47  ;;  %1252 = vmatprep.subr.bf16.mxu0 %v1356_v48 }
  0x3a   : > { %1274 = vmatprep.subr.bf16.mxu1 %v1357_v49 }
  0x3c   : > { %1253 = vmatpush3.bf16.msra.mxu0 %v1358_v50 }
  0x3d   : > { %1275 = vmatpush3.bf16.msra.mxu1 %v1359_v51  ;;  %1254 = vmatprep.subr.bf16.mxu0 %v1360_v52 }
  0x3e   : > { %1276 = vmatprep.subr.bf16.mxu1 %v1361_v53 }
  0x40   : > { %1255 = vmatpush3.bf16.msra.mxu0 %v1362_v54 }
  0x41   : > { %1277 = vmatpush3.bf16.msra.mxu1 %v1363_v55  ;;  %1256 = vmatprep.subr.bf16.mxu0 %v1364_v56 }
  0x42   : > { %1278 = vmatprep.subr.bf16.mxu1 %v1365_v57 }
  0x44   : > { %1257 = vmatpush3.bf16.msra.mxu0 %v1366_v58 }
  0x45   : > { %1279 = vmatpush3.bf16.msra.mxu1 %v1367_v59  ;;  %1258 = vmatprep.subr.bf16.mxu0 %v1368_v60 }
  0x46   : > { %1280 = vmatprep.subr.bf16.mxu1 %v1369_v61 }
  0x48   : > { %1259 = vmatpush3.bf16.msra.mxu0 %v1370_v62 }
  0x49   : > { %1281 = vmatpush3.bf16.msra.mxu1 %v1371_v63  ;;  %1260 = vmatprep.subr.bf16.mxu0 %v1372_v0 }
  0x4a   : > { %1282 = vmatprep.subr.bf16.mxu1 %v1373_v1 }
  0x4c   : > { %1261 = vmatpush3.bf16.msra.mxu0 %v1374_v2 }
  0x4d   : > { %1283 = vmatpush3.bf16.msra.mxu1 %v1375_v3  ;;  %1262 = vmatprep.subr.bf16.mxu0 %v1376_v4 }
  0x4e   : > { %1284 = vmatprep.subr.bf16.mxu1 %v1377_v5 }
  0x50   : > { %1263 = vmatpush3.bf16.msra.mxu0 %v1378_v6 }
  0x51   : > { %1285 = vmatpush3.bf16.msra.mxu1 %v1379_v7 }
  0x53   : > { %936 = vmatmul.mubr.bf16.vlgmr.msra.gmra.mrb[4].mxu0 %v1129_v10 }
  0x54   : > { %977 = vmatmul.mubr.bf16.vlgmr.msra.gmra.mrb[4].mxu1 %v1131_v14 }
 0x106   : > { %v1220_v16 = vpop.f32.mrb[0].mxu0 }
 0x107   : > { %v1242_v17 = vpop.f32.mrb[0].mxu1  ;;  %v1221_v18 = vpop.f32.mrb[1].mxu0 }
 0x108   : > { %v1222_v19 = vadd.f32 %v1221_v18, %v1220_v16  ;;  %v1243_v20 = vpop.f32.mrb[1].mxu1  ;;  %v1223_v21 = vpop.f32.mrb[2].mxu0 }
 0x109   : > { %v1244_v22 = vadd.f32 %v1243_v20, %v1242_v17  ;;  %v1245_v23 = vpop.f32.mrb[2].mxu1  ;;  %v1224_v24 = vpop.f32.mrb[3].mxu0 }
 0x10a   : > { %v1225_v25 = vadd.f32 %v1224_v24, %v1223_v21  ;;  %v1246_v26 = vpop.f32.mrb[3].mxu1 }
 0x10b   : > { %v897_v27 = vadd.f32 %v1244_v22, %v1222_v19  ;;  %v1247_v28 = vadd.f32 %v1246_v26, %v1245_v23 }
 0x10d   : > { %v900_v29 = vadd.f32 %v1247_v28, %v1225_v25 }
 0x126   : > { %v1264_v30 = vpop.f32.mrb[4].mxu0 }
 0x127   : > { %v1286_v31 = vpop.f32.mrb[4].mxu1  ;;  %v1265_v32 = vpop.f32.mrb[5].mxu0 }
 0x128   : > { %v1266_v33 = vadd.f32 %v1265_v32, %v1264_v30  ;;  %v1287_v34 = vpop.f32.mrb[5].mxu1  ;;  %v1267_v35 = vpop.f32.mrb[6].mxu0 }
 0x129   : > { %v1288_v36 = vadd.f32 %v1287_v34, %v1286_v31  ;;  %v1289_v37 = vpop.f32.mrb[6].mxu1  ;;  %v1268_v38 = vpop.f32.mrb[7].mxu0 }
 0x12a   : > { %v938_v39 = vadd.f32 %v1266_v33, %v897_v27  ;;  %v1269_v40 = vadd.f32 %v1268_v38, %v1267_v35  ;;  %v1290_v41 = vpop.f32.mrb[7].mxu1 }
 0x12b   : > { %v1291_v43 = vadd.f32 %v1290_v41, %v1289_v37 }
 0x12c   : > { %v979_v44 = vadd.f32 %v1288_v36, %v938_v39  ;;  %v941_v45 = vadd.f32 %v1269_v40, %v900_v29 }
 0x12e   : > { %v992_v47 = vmul.f32 %v1197_v42, %v979_v44  ;;  %v982_v48 = vadd.f32 %v1291_v43, %v941_v45 }
 0x130   : > { %v1001_v49 = vadd.f32 %v1198_v46, %v992_v47  ;;  %v993_v50 = vmul.f32 %v1197_v42, %v982_v48 }
 0x132   : > { %vm1003_vm0 = vcmp.ge.f32.partialorder %v1001_v49, 0.0  ;;  %v1005_v51 = vmul.f32 0.01, %v1001_v49  ;;  %v1002_v52 = vadd.f32 %v1198_v46, %v993_v50 }
 0x134   : > { %v1007_v53 = vsel %vm1003_vm0, %v1001_v49, %v1005_v51  ;;  %vm1004_vm2 = vcmp.ge.f32.partialorder %v1002_v52, 0.0  ;;  %v1006_v54 = vmul.f32 0.01, %v1002_v52 }
 0x135   : > { %1010 = vst.msk [vmem:[%s258_s8] sm:$0xff] %vm1009_vm1, %v1007_v53 }
 0x136   : > { %v1008_v55 = vsel %vm1004_vm2, %v1002_v52, %v1006_v54 }
 0x137   : > { %1011 = vst.msk [vmem:[%s258_s8 + $0x8] sm:$0xff] %vm1009_vm1, %v1008_v55 }
 0x138 PF: > { %s14_s17 = sadd.s32 1, %s1402_s17   ;;  %s1557_s15 = smov %s1398_s16 }
 0x139   : > { %p11_p5 = scmp.ge.s32.totalorder %s14_s17, 6   ;;  %s1558_s16 = smov %s1560_s18 }
 0x13b   :  { %13 = sbr.rel (!%p11_p5) target bundleno = 2 (0x2), region = 69 }

// kernel: _lambda_.21
= control target key start
LH: loop header
LB: loop body
LE: loop exit
PB: predicated region body
PF: predicated region fallthrough
CT: control target
= control target key end

     0   :  { %s1183_s15 = smov 0   ;;  %s1185_s16 = smov 0   ;;  %s1320_s0 = inlined_call_operand.vmem [shape: bf16[4,64,512], index: 0, kind: input, shape index: {}]   ;;  %s1321_s1 = inlined_call_operand.vmem [shape: bf16[4,512,32], index: 1, kind: input, shape index: {}]   ;;  %s1322_s2 = inlined_call_operand.vmem [shape: f32[1,32], index: 2, kind: input, shape index: {}]   ;;  %s1323_s3 = inlined_call_operand.vmem [shape: f32[1,32], index: 3, kind: input, shape index: {}]   ;;  %s1324_s4 = inlined_call_operand.vmem [shape: f32[4,64,32], index: 4, kind: output, shape index: {}]  }
   0x1   :  { %s1187_s17 = smov 0  }
   0x2 LB: > { %s26_s18 = sadd.s32 1, %s1152_s16  ;;  %p912_p0 = scmp.ge.s32.totalorder %s1156_s17, 1  ;;  %s1156_s17 = sphi %s1187_s17, %s14_s17   ;;  %s1152_s16 = sphi %s1185_s16, %s1326_s16   ;;  %s1148_s15 = sphi %s1183_s15, %s1325_s15  }
   0x3   : > { %p28_p1 = scmp.ge.s32.totalorder %s26_s18, 4  ;;  %p194_p2 = scmp.lt.s32.totalorder %s1156_s17, 5 }
   0x5   : > { %s1328_s18 = smov (%p28_p1, %s26_s18), 0  ;;  %p195_p3 = pnand %p912_p0, %p194_p2 }
   0x6   : > { %p235_p4 = scmp.lt.s32.totalorder (!%p195_p3), %s1148_s15, 3  ;;  %v1266_v57 = vld [vmem:[%s1322_s2] ss:$0 sm:$0xff] (!%p195_p3)  ;;  %vm797_vm0 = vcmask (!%p195_p3), 261120  }
   0x7   : > { %198 = sbr.rel (%p195_p3) target bundleno = 304 (0x130), region = 36  ;;  %v1271_v62 = vld [vmem:[%s1323_s3] ss:$0 sm:$0xff] (!%p195_p3) }
   0xe   : > { %s1330_s15 = smov (!%p235_p4, %s1148_s15), 3 }
   0xf   : > { %s972_s19 = sshll.u32 %s1330_s15, 8  ;;  %s971_s23 = sshll.u32 %s1330_s15, 7 }
  0x10   : > { %s1207_s22 = scalar_lea.vmem %s1321_s1, %s972_s19  ;;  %s1243_s26 = scalar_lea.vmem %s1320_s0, %s971_s23 }
  0x11   : > { %v1078_v0 = vld [vmem:[%s1207_s22 + $0x40] sm:$0xff]   ;;  %v1082_v4 = vld [vmem:[%s1207_s22 + $0x48] sm:$0xff]   ;;  %v1086_v8 = vld [vmem:[%s1207_s22 + $0x50] sm:$0xff]   ;;  %s973_s5 = sshll.u32 %s1330_s15, 6 }
  0x12   : > { %v1079_v1 = vld [vmem:[%s1207_s22 + $0xc0] sm:$0xff]   ;;  %974 = vmatprep.subr.bf16.mxu0 %v1078_v0  ;;  %v1083_v5 = vld [vmem:[%s1207_s22 + $0xc8] sm:$0xff]   ;;  %v1087_v9 = vld [vmem:[%s1207_s22 + $0xd0] sm:$0xff]   ;;  %s1280_s8 = scalar_lea.vmem %s1324_s4, %s973_s5 }
  0x13   : > { %v1080_v2 = vld [vmem:[%s1207_s22] sm:$0xff]   ;;  %1014 = vmatprep.subr.bf16.mxu1 %v1079_v1  ;;  %v1084_v6 = vld [vmem:[%s1207_s22 + $0x8] sm:$0xff]   ;;  %v1088_v10 = vld [vmem:[%s1207_s22 + $0x10] sm:$0xff]  }
  0x14   : > { %v1081_v3 = vld [vmem:[%s1207_s22 + $0x80] sm:$0xff]   ;;  %975 = vmatpush3.bf16.msra.mxu0 %v1080_v2  ;;  %v1085_v7 = vld [vmem:[%s1207_s22 + $0x88] sm:$0xff]   ;;  %v1089_v11 = vld [vmem:[%s1207_s22 + $0x90] sm:$0xff]  }
  0x15   : > { %1015 = vmatpush3.bf16.msra.mxu1 %v1081_v3  ;;  %976 = vmatprep.subr.bf16.mxu0 %v1082_v4  ;;  %v1090_v12 = vld [vmem:[%s1207_s22 + $0x58] sm:$0xff]   ;;  %v1094_v16 = vld [vmem:[%s1207_s22 + $0x60] sm:$0xff]   ;;  %v1098_v20 = vld [vmem:[%s1207_s22 + $0x68] sm:$0xff]  }
  0x16   : > { %1016 = vmatprep.subr.bf16.mxu1 %v1083_v5  ;;  %v1091_v13 = vld [vmem:[%s1207_s22 + $0xd8] sm:$0xff]   ;;  %v1095_v17 = vld [vmem:[%s1207_s22 + $0xe0] sm:$0xff]   ;;  %v1099_v21 = vld [vmem:[%s1207_s22 + $0xe8] sm:$0xff]  }
  0x17   : > { %v1092_v14 = vld [vmem:[%s1207_s22 + $0x18] sm:$0xff]   ;;  %v1096_v18 = vld [vmem:[%s1207_s22 + $0x20] sm:$0xff]   ;;  %v1100_v22 = vld [vmem:[%s1207_s22 + $0x28] sm:$0xff]  }
  0x18   : > { %977 = vmatpush3.bf16.msra.mxu0 %v1084_v6  ;;  %v1093_v15 = vld [vmem:[%s1207_s22 + $0x98] sm:$0xff]   ;;  %v1097_v19 = vld [vmem:[%s1207_s22 + $0xa0] sm:$0xff]   ;;  %v1101_v23 = vld [vmem:[%s1207_s22 + $0xa8] sm:$0xff]  }
  0x19   : > { %1017 = vmatpush3.bf16.msra.mxu1 %v1085_v7  ;;  %978 = vmatprep.subr.bf16.mxu0 %v1086_v8  ;;  %v1102_v24 = vld [vmem:[%s1207_s22 + $0x70] sm:$0xff]   ;;  %v1106_v28 = vld [vmem:[%s1207_s22 + $0x78] sm:$0xff]  }
  0x1a   : > { %1018 = vmatprep.subr.bf16.mxu1 %v1087_v9  ;;  %v1103_v25 = vld [vmem:[%s1207_s22 + $0xf0] sm:$0xff]   ;;  %v1107_v29 = vld [vmem:[%s1207_s22 + $0xf8] sm:$0xff]  }
  0x1b   : > { %v1104_v26 = vld [vmem:[%s1207_s22 + $0x30] sm:$0xff]   ;;  %v1108_v30 = vld [vmem:[%s1207_s22 + $0x38] sm:$0xff]  }
  0x1c   : > { %979 = vmatpush3.bf16.msra.mxu0 %v1088_v10  ;;  %v1105_v27 = vld [vmem:[%s1207_s22 + $0xb0] sm:$0xff]   ;;  %v1109_v31 = vld [vmem:[%s1207_s22 + $0xb8] sm:$0xff]  }
  0x1d   : > { %1019 = vmatpush3.bf16.msra.mxu1 %v1089_v11  ;;  %980 = vmatprep.subr.bf16.mxu0 %v1090_v12  ;;  %v1110_v32 = vld [vmem:[%s1243_s26] ss:$16 sps:$4 sm:$0xff]   ;;  %v1112_v33 = vld [vmem:[%s1243_s26 + $0x4] ss:$16 sps:$4 sm:$0xff]   ;;  %v1113_v34 = vld [vmem:[%s1243_s26 + $0x8] ss:$16 sps:$4 sm:$0xff]  }
  0x1e   : > { %1020 = vmatprep.subr.bf16.mxu1 %v1091_v13  ;;  %v1115_v35 = vld [vmem:[%s1243_s26 + $0xc] ss:$16 sps:$4 sm:$0xff]   ;;  %645 = vmatprep.mubr.bf16.mxu0 %v1112_v33  ;;  %v1116_v36 = vld [vmem:[%s1243_s26 + $0x24] ss:$16 sps:$4 sm:$0xff]   ;;  %v1120_v38 = vld [vmem:[%s1243_s26 + $0x20] ss:$16 sps:$4 sm:$0xff]  }
  0x1f   : > { %710 = vmatprep.mubr.bf16.mxu1 %v1115_v35  ;;  %v1118_v37 = vld [vmem:[%s1243_s26 + $0x2c] ss:$16 sps:$4 sm:$0xff]   ;;  %v1121_v39 = vld [vmem:[%s1243_s26 + $0x28] ss:$16 sps:$4 sm:$0xff]   ;;  %v1122_v40 = vld [vmem:[%s1243_s26 + $0x44] ss:$16 sps:$4 sm:$0xff]  }
  0x20   : > { %981 = vmatpush3.bf16.msra.mxu0 %v1092_v14  ;;  %v1124_v41 = vld [vmem:[%s1243_s26 + $0x4c] ss:$16 sps:$4 sm:$0xff]   ;;  %v1126_v42 = vld [vmem:[%s1243_s26 + $0x40] ss:$16 sps:$4 sm:$0xff]   ;;  %v1127_v43 = vld [vmem:[%s1243_s26 + $0x48] ss:$16 sps:$4 sm:$0xff]  }
  0x21   : > { %1021 = vmatpush3.bf16.msra.mxu1 %v1093_v15  ;;  %982 = vmatprep.subr.bf16.mxu0 %v1094_v16  ;;  %v1128_v44 = vld [vmem:[%s1243_s26 + $0x64] ss:$16 sps:$4 sm:$0xff]   ;;  %v1130_v45 = vld [vmem:[%s1243_s26 + $0x6c] ss:$16 sps:$4 sm:$0xff]   ;;  %v1132_v46 = vld [vmem:[%s1243_s26 + $0x60] ss:$16 sps:$4 sm:$0xff]  }
  0x22   : > { %1022 = vmatprep.subr.bf16.mxu1 %v1095_v17  ;;  %v1133_v47 = vld [vmem:[%s1243_s26 + $0x68] ss:$16 sps:$4 sm:$0xff]  }
  0x24   : > { %983 = vmatpush3.bf16.msra.mxu0 %v1096_v18 }
  0x25   : > { %1023 = vmatpush3.bf16.msra.mxu1 %v1097_v19  ;;  %984 = vmatprep.subr.bf16.mxu0 %v1098_v20 }
  0x26   : > { %1024 = vmatprep.subr.bf16.mxu1 %v1099_v21 }
  0x28   : > { %985 = vmatpush3.bf16.msra.mxu0 %v1100_v22 }
  0x29   : > { %1025 = vmatpush3.bf16.msra.mxu1 %v1101_v23  ;;  %986 = vmatprep.subr.bf16.mxu0 %v1102_v24 }
  0x2a   : > { %1026 = vmatprep.subr.bf16.mxu1 %v1103_v25 }
  0x2c   : > { %987 = vmatpush3.bf16.msra.mxu0 %v1104_v26 }
  0x2d   : > { %1027 = vmatpush3.bf16.msra.mxu1 %v1105_v27  ;;  %988 = vmatprep.subr.bf16.mxu0 %v1106_v28 }
  0x2e   : > { %1028 = vmatprep.subr.bf16.mxu1 %v1107_v29 }
  0x30   : > { %989 = vmatpush3.bf16.msra.mxu0 %v1108_v30 }
  0x31   : > { %1029 = vmatpush3.bf16.msra.mxu1 %v1109_v31 }
  0x33   : > { %646 = vmatmul.mubr.bf16.vlgmr.msra.gmra.mrb[0].mxu0 %v1110_v32 }
  0x34   : > { %711 = vmatmul.mubr.bf16.vlgmr.msra.gmra.mrb[0].mxu1 %v1113_v34  ;;  %653 = vmatprep.mubr.bf16.mxu0 %v1116_v36 }
  0x35   : > { %718 = vmatprep.mubr.bf16.mxu1 %v1118_v37 }
  0x3b   : > { %654 = vmatmul.mubr.bf16.gmra.mrb[4].mxu0 %v1120_v38 }
  0x3c   : > { %719 = vmatmul.mubr.bf16.gmra.mrb[4].mxu1 %v1121_v39  ;;  %661 = vmatprep.mubr.bf16.mxu0 %v1122_v40 }
  0x3d   : > { %726 = vmatprep.mubr.bf16.mxu1 %v1124_v41 }
  0x43   : > { %662 = vmatmul.mubr.bf16.gmra.mrb[8].mxu0 %v1126_v42 }
  0x44   : > { %727 = vmatmul.mubr.bf16.gmra.mrb[8].mxu1 %v1127_v43  ;;  %669 = vmatprep.mubr.bf16.mxu0 %v1128_v44 }
  0x45   : > { %734 = vmatprep.mubr.bf16.mxu1 %v1130_v45 }
  0x4b   : > { %670 = vmatmul.mubr.bf16.gmra.mrb[12].mxu0 %v1132_v46 }
  0x4c   : > { %735 = vmatmul.mubr.bf16.gmra.mrb[12].mxu1 %v1133_v47 }
 0x106   : > { %v990_v48 = vpop.f32.mrb[0].mxu0 }
 0x107   : > { %v1030_v49 = vpop.f32.mrb[0].mxu1  ;;  %v991_v50 = vpop.f32.mrb[1].mxu0 }
 0x108   : > { %v992_v51 = vadd.f32 %v991_v50, %v990_v48  ;;  %v1031_v52 = vpop.f32.mrb[1].mxu1  ;;  %v993_v53 = vpop.f32.mrb[2].mxu0 }
 0x109   : > { %v1032_v54 = vadd.f32 %v1031_v52, %v1030_v49  ;;  %v1033_v55 = vpop.f32.mrb[2].mxu1  ;;  %v994_v56 = vpop.f32.mrb[3].mxu0 }
 0x10a   : > { %v995_v58 = vadd.f32 %v994_v56, %v993_v53  ;;  %v1034_v59 = vpop.f32.mrb[3].mxu1 }
 0x10b   : > { %v713_v60 = vadd.f32 %v1032_v54, %v992_v51  ;;  %v1035_v61 = vadd.f32 %v1034_v59, %v1033_v55 }
 0x10d   : > { %v750_v63 = vmul.f32 %v1266_v57, %v713_v60  ;;  %v716_v0 = vadd.f32 %v1035_v61, %v995_v58 }
 0x10e   : > { %v996_v1 = vpop.f32.mrb[4].mxu0 }
 0x10f   : > { %v765_v2 = vadd.f32 %v1271_v62, %v750_v63  ;;  %v751_v3 = vmul.f32 %v1266_v57, %v716_v0  ;;  %v1036_v4 = vpop.f32.mrb[4].mxu1  ;;  %v997_v5 = vpop.f32.mrb[5].mxu0 }
 0x110   : > { %v998_v6 = vadd.f32 %v997_v5, %v996_v1  ;;  %v1037_v7 = vpop.f32.mrb[5].mxu1  ;;  %v999_v8 = vpop.f32.mrb[6].mxu0 }
 0x111   : > { %vm773_vm1 = vcmp.ge.f32.partialorder %v765_v2, 0.0  ;;  %v781_v9 = vmul.f32 0.01, %v765_v2  ;;  %v766_v10 = vadd.f32 %v1271_v62, %v751_v3  ;;  %v1038_v11 = vadd.f32 %v1037_v7, %v1036_v4  ;;  %v1039_v12 = vpop.f32.mrb[6].mxu1  ;;  %v1000_v13 = vpop.f32.mrb[7].mxu0 }
 0x112   : > { %v1001_v14 = vadd.f32 %v1000_v13, %v999_v8  ;;  %v1040_v15 = vpop.f32.mrb[7].mxu1 }
 0x113   : > { %v789_v16 = vsel %vm773_vm1, %v765_v2, %v781_v9  ;;  %vm774_vm2 = vcmp.ge.f32.partialorder %v766_v10, 0.0  ;;  %v782_v17 = vmul.f32 0.01, %v766_v10  ;;  %v721_v18 = vadd.f32 %v1038_v11, %v998_v6 }
 0x114   : > { %798 = vst.msk [vmem:[%s1280_s8] sm:$0xff] %vm797_vm0, %v789_v16  ;;  %v1041_v19 = vadd.f32 %v1040_v15, %v1039_v12 }
 0x115   : > { %v790_v20 = vsel %vm774_vm2, %v766_v10, %v782_v17  ;;  %v752_v21 = vmul.f32 %v1266_v57, %v721_v18 }
 0x116   : > { %799 = vst.msk [vmem:[%s1280_s8 + $0x8] sm:$0xff] %vm797_vm0, %v790_v20  ;;  %v724_v22 = vadd.f32 %v1041_v19, %v1001_v14  ;;  %v1002_v23 = vpop.f32.mrb[8].mxu0 }
 0x117   : > { %v767_v24 = vadd.f32 %v1271_v62, %v752_v21  ;;  %v1042_v25 = vpop.f32.mrb[8].mxu1  ;;  %v1003_v26 = vpop.f32.mrb[9].mxu0 }
 0x118   : > { %v753_v27 = vmul.f32 %v1266_v57, %v724_v22  ;;  %v1004_v28 = vadd.f32 %v1003_v26, %v1002_v23  ;;  %v1043_v29 = vpop.f32.mrb[9].mxu1  ;;  %v1005_v30 = vpop.f32.mrb[10].mxu0 }
 0x119   : > { %vm775_vm3 = vcmp.ge.f32.partialorder %v767_v24, 0.0  ;;  %v783_v31 = vmul.f32 0.01, %v767_v24  ;;  %v1044_v32 = vadd.f32 %v1043_v29, %v1042_v25  ;;  %v1045_v33 = vpop.f32.mrb[10].mxu1  ;;  %v1006_v34 = vpop.f32.mrb[11].mxu0 }
 0x11a   : > { %v768_v35 = vadd.f32 %v1271_v62, %v753_v27  ;;  %v1007_v36 = vadd.f32 %v1006_v34, %v1005_v30  ;;  %v1046_v37 = vpop.f32.mrb[11].mxu1 }
 0x11b   : > { %v791_v38 = vsel %vm775_vm3, %v767_v24, %v783_v31  ;;  %v729_v39 = vadd.f32 %v1044_v32, %v1004_v28  ;;  %v1047_v40 = vadd.f32 %v1046_v37, %v1045_v33 }
 0x11c   : > { %800 = vst.msk [vmem:[%s1280_s8 + $0x10] sm:$0xff] %vm797_vm0, %v791_v38  ;;  %vm776_vm4 = vcmp.ge.f32.partialorder %v768_v35, 0.0  ;;  %v784_v41 = vmul.f32 0.01, %v768_v35 }
 0x11d   : > { %v754_v42 = vmul.f32 %v1266_v57, %v729_v39  ;;  %v732_v43 = vadd.f32 %v1047_v40, %v1007_v36 }
 0x11e   : > { %v792_v44 = vsel %vm776_vm4, %v768_v35, %v784_v41  ;;  %v1008_v45 = vpop.f32.mrb[12].mxu0 }
 0x11f   : > { %801 = vst.msk [vmem:[%s1280_s8 + $0x18] sm:$0xff] %vm797_vm0, %v792_v44  ;;  %v769_v46 = vadd.f32 %v1271_v62, %v754_v42  ;;  %v755_v47 = vmul.f32 %v1266_v57, %v732_v43  ;;  %v1048_v48 = vpop.f32.mrb[12].mxu1  ;;  %v1009_v49 = vpop.f32.mrb[13].mxu0 }
 0x120   : > { %v1010_v50 = vadd.f32 %v1009_v49, %v1008_v45  ;;  %v1049_v51 = vpop.f32.mrb[13].mxu1  ;;  %v1011_v52 = vpop.f32.mrb[14].mxu0 }
 0x121   : > { %vm777_vm5 = vcmp.ge.f32.partialorder %v769_v46, 0.0  ;;  %v785_v53 = vmul.f32 0.01, %v769_v46  ;;  %v770_v54 = vadd.f32 %v1271_v62, %v755_v47  ;;  %v1050_v55 = vadd.f32 %v1049_v51, %v1048_v48  ;;  %v1051_v56 = vpop.f32.mrb[14].mxu1  ;;  %v1012_v58 = vpop.f32.mrb[15].mxu0 }
 0x122   : > { %v1013_v59 = vadd.f32 %v1012_v58, %v1011_v52  ;;  %v1052_v60 = vpop.f32.mrb[15].mxu1 }
 0x123   : > { %v793_v61 = vsel %vm777_vm5, %v769_v46, %v785_v53  ;;  %vm778_vm6 = vcmp.ge.f32.partialorder %v770_v54, 0.0  ;;  %v786_v63 = vmul.f32 0.01, %v770_v54  ;;  %v737_v0 = vadd.f32 %v1050_v55, %v1010_v50 }
 0x124   : > { %802 = vst.msk [vmem:[%s1280_s8 + $0x20] sm:$0xff] %vm797_vm0, %v793_v61  ;;  %v1053_v1 = vadd.f32 %v1052_v60, %v1051_v56 }
 0x125   : > { %v794_v2 = vsel %vm778_vm6, %v770_v54, %v786_v63  ;;  %v756_v3 = vmul.f32 %v1266_v57, %v737_v0 }
 0x126   : > { %803 = vst.msk [vmem:[%s1280_s8 + $0x28] sm:$0xff] %vm797_vm0, %v794_v2  ;;  %v740_v4 = vadd.f32 %v1053_v1, %v1013_v59 }
 0x127   : > { %v771_v5 = vadd.f32 %v1271_v62, %v756_v3 }
 0x128   : > { %v757_v6 = vmul.f32 %v1266_v57, %v740_v4 }
 0x129   : > { %vm779_vm7 = vcmp.ge.f32.partialorder %v771_v5, 0.0  ;;  %v787_v7 = vmul.f32 0.01, %v771_v5 }
 0x12a   : > { %v772_v8 = vadd.f32 %v1271_v62, %v757_v6 }
 0x12b   : > { %v795_v9 = vsel %vm779_vm7, %v771_v5, %v787_v7 }
 0x12c   : > { %804 = vst.msk [vmem:[%s1280_s8 + $0x30] sm:$0xff] %vm797_vm0, %v795_v9  ;;  %vm780_vm8 = vcmp.ge.f32.partialorder %v772_v8, 0.0  ;;  %v788_v10 = vmul.f32 0.01, %v772_v8 }
 0x12e   : > { %v796_v11 = vsel %vm780_vm8, %v772_v8, %v788_v10 }
 0x12f   : > { %805 = vst.msk [vmem:[%s1280_s8 + $0x38] sm:$0xff] %vm797_vm0, %v796_v11 }
 0x130 PF: > { %s14_s17 = sadd.s32 1, %s1156_s17   ;;  %s1325_s15 = smov %s1152_s16 }
 0x131   : > { %p11_p5 = scmp.ge.s32.totalorder %s14_s17, 6   ;;  %s1326_s16 = smov %s1328_s18 }
 0x133   :  { %13 = sbr.rel (!%p11_p5) target bundleno = 2 (0x2), region = 69 }

// kernel: _lambda_.22
= control target key start
LH: loop header
LB: loop body
LE: loop exit
PB: predicated region body
PF: predicated region fallthrough
CT: control target
= control target key end

     0   :  { %s1382_s15 = smov 0   ;;  %s1384_s16 = smov 0   ;;  %s1618_s0 = inlined_call_operand.vmem [shape: bf16[4,256,256], index: 0, kind: input, shape index: {}]   ;;  %s1619_s1 = inlined_call_operand.vmem [shape: bf16[4,256,16], index: 1, kind: input, shape index: {}]   ;;  %s1620_s2 = inlined_call_operand.vmem [shape: f32[1,16], index: 2, kind: input, shape index: {}]   ;;  %s1621_s3 = inlined_call_operand.vmem [shape: f32[1,16], index: 3, kind: input, shape index: {}]   ;;  %s1622_s4 = inlined_call_operand.vmem [shape: f32[4,256,16], index: 4, kind: output, shape index: {}]  }
   0x1   :  { %s1386_s17 = smov 0  }
   0x2 LB: > { %s26_s18 = sadd.s32 1, %s1351_s16  ;;  %p1055_p0 = scmp.ge.s32.totalorder %s1355_s17, 1  ;;  %s1355_s17 = sphi %s1386_s17, %s14_s17   ;;  %s1351_s16 = sphi %s1384_s16, %s1624_s16   ;;  %s1347_s15 = sphi %s1382_s15, %s1623_s15  }
   0x3   : > { %p28_p1 = scmp.ge.s32.totalorder %s26_s18, 4  ;;  %p194_p2 = scmp.lt.s32.totalorder %s1355_s17, 5 }
   0x5   : > { %s1626_s18 = smov (%p28_p1, %s26_s18), 0  ;;  %p195_p3 = pnand %p1055_p0, %p194_p2 }
   0x6   : > { %p235_p4 = scmp.lt.s32.totalorder (!%p195_p3), %s1347_s15, 3  ;;  %v1467_v51 = vld [vmem:[%s1620_s2] ss:$0 sm:$0xff] (!%p195_p3)  ;;  %vm916_vm0 = vcmask (!%p195_p3), 130048  }
   0x7   : > { %198 = sbr.rel (%p195_p3) target bundleno = 333 (0x14d), region = 36  ;;  %v1472_v57 = vld [vmem:[%s1621_s3] ss:$0 sm:$0xff] (!%p195_p3) }
   0xe   : > { %s1628_s15 = smov (!%p235_p4, %s1347_s15), 3 }
   0xf   : > { %s1115_s19 = sshll.u32 %s1628_s15, 7  ;;  %s1114_s23 = sshll.u32 %s1628_s15, 8 }
  0x10   : > { %s1406_s22 = scalar_lea.vmem %s1619_s1, %s1115_s19  ;;  %s1423_s26 = scalar_lea.vmem %s1618_s0, %s1114_s23 }
  0x11   : > { %v1269_v0 = vld [vmem:[%s1406_s22 + $0x40] sm:$0xff]   ;;  %v1271_v2 = vld [vmem:[%s1406_s22 + $0x48] sm:$0xff]   ;;  %v1273_v4 = vld [vmem:[%s1406_s22 + $0x50] sm:$0xff]   ;;  %s1485_s7 = scalar_lea.vmem %s1622_s4, %s1114_s23 }
  0x12   : > { %v1270_v1 = vld [vmem:[%s1406_s22] sm:$0xff]   ;;  %1117 = vmatprep.subr.bf16.mxu0 %v1269_v0  ;;  %1229 = vmatprep.subr.bf16.mxu1 %v1269_v0  ;;  %v1272_v3 = vld [vmem:[%s1406_s22 + $0x8] sm:$0xff]   ;;  %v1274_v5 = vld [vmem:[%s1406_s22 + $0x10] sm:$0xff]  }
  0x13   : > { %1118 = vmatpush3.bf16.msra.mxu0 %v1270_v1  ;;  %1237 = vmatpush3.bf16.msra.mxu1 %v1270_v1  ;;  %v1275_v6 = vld [vmem:[%s1406_s22 + $0x58] sm:$0xff]   ;;  %v1277_v8 = vld [vmem:[%s1406_s22 + $0x60] sm:$0xff]   ;;  %v1279_v10 = vld [vmem:[%s1406_s22 + $0x68] sm:$0xff]  }
  0x14   : > { %1119 = vmatprep.subr.bf16.mxu0 %v1271_v2  ;;  %1230 = vmatprep.subr.bf16.mxu1 %v1271_v2  ;;  %v1276_v7 = vld [vmem:[%s1406_s22 + $0x18] sm:$0xff]   ;;  %v1278_v9 = vld [vmem:[%s1406_s22 + $0x20] sm:$0xff]   ;;  %v1280_v13 = vld [vmem:[%s1406_s22 + $0x28] sm:$0xff]  }
  0x15   : > { %v1287_v11 = vld [vmem:[%s1423_s26 + $0x4] ss:$8 sps:$4 sm:$0xff]   ;;  %v1281_v14 = vld [vmem:[%s1406_s22 + $0x70] sm:$0xff]   ;;  %v1283_v16 = vld [vmem:[%s1406_s22 + $0x78] sm:$0xff]  }
  0x16   : > { %v1290_v12 = vld [vmem:[%s1423_s26 + $0x84] ss:$8 sps:$4 sm:$0xff]   ;;  %613 = vmatprep.mubr.bf16.mxu0 %v1287_v11  ;;  %v1282_v15 = vld [vmem:[%s1406_s22 + $0x30] sm:$0xff]   ;;  %v1284_v17 = vld [vmem:[%s1406_s22 + $0x38] sm:$0xff]  }
  0x17   : > { %1120 = vmatpush3.bf16.msra.mxu0 %v1272_v3  ;;  %1238 = vmatpush3.bf16.msra.mxu1 %v1272_v3  ;;  %v1285_v18 = vld [vmem:[%s1423_s26] ss:$8 sps:$4 sm:$0xff]   ;;  %v1291_v20 = vld [vmem:[%s1423_s26 + $0x14] ss:$8 sps:$4 sm:$0xff]   ;;  %v1295_v22 = vld [vmem:[%s1423_s26 + $0x10] ss:$8 sps:$4 sm:$0xff]  }
  0x18   : > { %1121 = vmatprep.subr.bf16.mxu0 %v1273_v4  ;;  %1231 = vmatprep.subr.bf16.mxu1 %v1273_v4  ;;  %v1288_v19 = vld [vmem:[%s1423_s26 + $0x80] ss:$8 sps:$4 sm:$0xff]   ;;  %v1293_v21 = vld [vmem:[%s1423_s26 + $0x94] ss:$8 sps:$4 sm:$0xff]   ;;  %v1296_v23 = vld [vmem:[%s1423_s26 + $0x90] ss:$8 sps:$4 sm:$0xff]  }
  0x19   : > { %677 = vmatprep.mubr.bf16.mxu1 %v1290_v12  ;;  %v1297_v24 = vld [vmem:[%s1423_s26 + $0x24] ss:$8 sps:$4 sm:$0xff]   ;;  %v1301_v26 = vld [vmem:[%s1423_s26 + $0x20] ss:$8 sps:$4 sm:$0xff]   ;;  %v1303_v28 = vld [vmem:[%s1423_s26 + $0x34] ss:$8 sps:$4 sm:$0xff]  }
  0x1a   : > { %v1299_v25 = vld [vmem:[%s1423_s26 + $0xa4] ss:$8 sps:$4 sm:$0xff]   ;;  %v1302_v27 = vld [vmem:[%s1423_s26 + $0xa0] ss:$8 sps:$4 sm:$0xff]   ;;  %v1305_v29 = vld [vmem:[%s1423_s26 + $0xb4] ss:$8 sps:$4 sm:$0xff]  }
  0x1b   : > { %1122 = vmatpush3.bf16.msra.mxu0 %v1274_v5  ;;  %1239 = vmatpush3.bf16.msra.mxu1 %v1274_v5  ;;  %v1307_v30 = vld [vmem:[%s1423_s26 + $0x30] ss:$8 sps:$4 sm:$0xff]   ;;  %v1309_v32 = vld [vmem:[%s1423_s26 + $0x44] ss:$8 sps:$4 sm:$0xff]   ;;  %v1313_v34 = vld [vmem:[%s1423_s26 + $0x40] ss:$8 sps:$4 sm:$0xff]  }
  0x1c   : > { %1123 = vmatprep.subr.bf16.mxu0 %v1275_v6  ;;  %1232 = vmatprep.subr.bf16.mxu1 %v1275_v6  ;;  %v1308_v31 = vld [vmem:[%s1423_s26 + $0xb0] ss:$8 sps:$4 sm:$0xff]   ;;  %v1311_v33 = vld [vmem:[%s1423_s26 + $0xc4] ss:$8 sps:$4 sm:$0xff]   ;;  %v1314_v35 = vld [vmem:[%s1423_s26 + $0xc0] ss:$8 sps:$4 sm:$0xff]  }
  0x1d   : > { %v1315_v36 = vld [vmem:[%s1423_s26 + $0x54] ss:$8 sps:$4 sm:$0xff]   ;;  %v1319_v38 = vld [vmem:[%s1423_s26 + $0x50] ss:$8 sps:$4 sm:$0xff]   ;;  %v1321_v40 = vld [vmem:[%s1423_s26 + $0x64] ss:$8 sps:$4 sm:$0xff]  }
  0x1e   : > { %v1317_v37 = vld [vmem:[%s1423_s26 + $0xd4] ss:$8 sps:$4 sm:$0xff]   ;;  %v1320_v39 = vld [vmem:[%s1423_s26 + $0xd0] ss:$8 sps:$4 sm:$0xff]   ;;  %v1323_v41 = vld [vmem:[%s1423_s26 + $0xe4] ss:$8 sps:$4 sm:$0xff]  }
  0x1f   : > { %1124 = vmatpush3.bf16.msra.mxu0 %v1276_v7  ;;  %1240 = vmatpush3.bf16.msra.mxu1 %v1276_v7  ;;  %v1325_v42 = vld [vmem:[%s1423_s26 + $0x60] ss:$8 sps:$4 sm:$0xff]   ;;  %v1327_v44 = vld [vmem:[%s1423_s26 + $0x74] ss:$8 sps:$4 sm:$0xff]   ;;  %v1331_v46 = vld [vmem:[%s1423_s26 + $0x70] ss:$8 sps:$4 sm:$0xff]  }
  0x20   : > { %1125 = vmatprep.subr.bf16.mxu0 %v1277_v8  ;;  %1233 = vmatprep.subr.bf16.mxu1 %v1277_v8  ;;  %v1326_v43 = vld [vmem:[%s1423_s26 + $0xe0] ss:$8 sps:$4 sm:$0xff]   ;;  %v1329_v45 = vld [vmem:[%s1423_s26 + $0xf4] ss:$8 sps:$4 sm:$0xff]   ;;  %v1332_v47 = vld [vmem:[%s1423_s26 + $0xf0] ss:$8 sps:$4 sm:$0xff]  }
  0x23   : > { %1126 = vmatpush3.bf16.msra.mxu0 %v1278_v9  ;;  %1241 = vmatpush3.bf16.msra.mxu1 %v1278_v9 }
  0x24   : > { %1127 = vmatprep.subr.bf16.mxu0 %v1279_v10  ;;  %1234 = vmatprep.subr.bf16.mxu1 %v1279_v10 }
  0x27   : > { %1128 = vmatpush3.bf16.msra.mxu0 %v1280_v13  ;;  %1242 = vmatpush3.bf16.msra.mxu1 %v1280_v13 }
  0x28   : > { %1129 = vmatprep.subr.bf16.mxu0 %v1281_v14  ;;  %1235 = vmatprep.subr.bf16.mxu1 %v1281_v14 }
  0x2b   : > { %1130 = vmatpush3.bf16.msra.mxu0 %v1282_v15  ;;  %1243 = vmatpush3.bf16.msra.mxu1 %v1282_v15 }
  0x2c   : > { %1131 = vmatprep.subr.bf16.mxu0 %v1283_v16  ;;  %1236 = vmatprep.subr.bf16.mxu1 %v1283_v16 }
  0x2f   : > { %1132 = vmatpush3.bf16.msra.mxu0 %v1284_v17  ;;  %1244 = vmatpush3.bf16.msra.mxu1 %v1284_v17 }
  0x32   : > { %614 = vmatmul.mubr.bf16.vlgmr.msra.gmra.mrb[0].mxu0 %v1285_v18  ;;  %678 = vmatmul.mubr.bf16.vlgmr.msra.gmra.mrb[0].mxu1 %v1288_v19 }
  0x33   : > { %621 = vmatprep.mubr.bf16.mxu0 %v1291_v20  ;;  %685 = vmatprep.mubr.bf16.mxu1 %v1293_v21 }
  0x3a   : > { %622 = vmatmul.mubr.bf16.gmra.mrb[4].mxu0 %v1295_v22  ;;  %686 = vmatmul.mubr.bf16.gmra.mrb[4].mxu1 %v1296_v23 }
  0x3b   : > { %629 = vmatprep.mubr.bf16.mxu0 %v1297_v24  ;;  %693 = vmatprep.mubr.bf16.mxu1 %v1299_v25 }
  0x42   : > { %630 = vmatmul.mubr.bf16.gmra.mrb[8].mxu0 %v1301_v26  ;;  %694 = vmatmul.mubr.bf16.gmra.mrb[8].mxu1 %v1302_v27 }
  0x43   : > { %637 = vmatprep.mubr.bf16.mxu0 %v1303_v28  ;;  %701 = vmatprep.mubr.bf16.mxu1 %v1305_v29 }
  0x4a   : > { %638 = vmatmul.mubr.bf16.gmra.mrb[12].mxu0 %v1307_v30  ;;  %702 = vmatmul.mubr.bf16.gmra.mrb[12].mxu1 %v1308_v31 }
  0x4b   : > { %645 = vmatprep.mubr.bf16.mxu0 %v1309_v32  ;;  %709 = vmatprep.mubr.bf16.mxu1 %v1311_v33 }
  0x52   : > { %646 = vmatmul.mubr.bf16.gmra.mrb[16].mxu0 %v1313_v34  ;;  %710 = vmatmul.mubr.bf16.gmra.mrb[16].mxu1 %v1314_v35 }
  0x53   : > { %653 = vmatprep.mubr.bf16.mxu0 %v1315_v36  ;;  %717 = vmatprep.mubr.bf16.mxu1 %v1317_v37 }
  0x5a   : > { %654 = vmatmul.mubr.bf16.gmra.mrb[20].mxu0 %v1319_v38  ;;  %718 = vmatmul.mubr.bf16.gmra.mrb[20].mxu1 %v1320_v39 }
  0x5b   : > { %661 = vmatprep.mubr.bf16.mxu0 %v1321_v40  ;;  %725 = vmatprep.mubr.bf16.mxu1 %v1323_v41 }
  0x62   : > { %662 = vmatmul.mubr.bf16.gmra.mrb[24].mxu0 %v1325_v42  ;;  %726 = vmatmul.mubr.bf16.gmra.mrb[24].mxu1 %v1326_v43 }
  0x63   : > { %669 = vmatprep.mubr.bf16.mxu0 %v1327_v44  ;;  %733 = vmatprep.mubr.bf16.mxu1 %v1329_v45 }
  0x6a   : > { %670 = vmatmul.mubr.bf16.gmra.mrb[28].mxu0 %v1331_v46  ;;  %734 = vmatmul.mubr.bf16.gmra.mrb[28].mxu1 %v1332_v47 }
 0x105   : > { %v1133_v48 = vpop.f32.mrb[0].mxu0  ;;  %v1181_v49 = vpop.f32.mrb[0].mxu1 }
 0x106   : > { %v1134_v50 = vpop.f32.mrb[1].mxu0  ;;  %v1182_v52 = vpop.f32.mrb[1].mxu1 }
 0x107   : > { %v1135_v53 = vadd.f32 %v1134_v50, %v1133_v48  ;;  %v1183_v54 = vadd.f32 %v1182_v52, %v1181_v49  ;;  %v1136_v55 = vpop.f32.mrb[2].mxu0  ;;  %v1184_v56 = vpop.f32.mrb[2].mxu1 }
 0x108   : > { %v1137_v58 = vpop.f32.mrb[3].mxu0  ;;  %v1185_v59 = vpop.f32.mrb[3].mxu1 }
 0x109   : > { %v749_v60 = vmul.f32 %v1135_v53, %v1467_v51  ;;  %v765_v61 = vmul.f32 %v1183_v54, %v1467_v51  ;;  %v1138_v62 = vadd.f32 %v1137_v58, %v1136_v55  ;;  %v1186_v63 = vadd.f32 %v1185_v59, %v1184_v56 }
 0x10b   : > { %v788_v0 = vadd.f32 %v1472_v57, %v749_v60  ;;  %v804_v1 = vadd.f32 %v1472_v57, %v765_v61  ;;  %v750_v2 = vmul.f32 %v1138_v62, %v1467_v51  ;;  %v766_v3 = vmul.f32 %v1186_v63, %v1467_v51 }
 0x10d   : > { %vm820_vm1 = vcmp.ge.f32.partialorder %v788_v0, 0.0  ;;  %v852_v4 = vmul.f32 0.01, %v788_v0  ;;  %vm836_vm2 = vcmp.ge.f32.partialorder %v804_v1, 0.0  ;;  %v868_v5 = vmul.f32 0.01, %v804_v1 }
 0x10e   : > { %v789_v6 = vadd.f32 %v1472_v57, %v750_v2  ;;  %v805_v7 = vadd.f32 %v1472_v57, %v766_v3  ;;  %v1139_v8 = vpop.f32.mrb[4].mxu0  ;;  %v1187_v9 = vpop.f32.mrb[4].mxu1 }
 0x10f   : > { %v884_v10 = vsel %vm820_vm1, %v788_v0, %v852_v4  ;;  %v900_v11 = vsel %vm836_vm2, %v804_v1, %v868_v5  ;;  %v1140_v12 = vpop.f32.mrb[5].mxu0  ;;  %v1188_v13 = vpop.f32.mrb[5].mxu1 }
 0x110   : > { %917 = vst.msk [vmem:[%s1485_s7] sm:$0xff] %vm916_vm0, %v884_v10  ;;  %933 = vst.msk [vmem:[%s1485_s7 + $0x80] sm:$0xff] %vm916_vm0, %v900_v11  ;;  %vm821_vm3 = vcmp.ge.f32.partialorder %v789_v6, 0.0  ;;  %v853_v14 = vmul.f32 0.01, %v789_v6  ;;  %vm837_vm4 = vcmp.ge.f32.partialorder %v805_v7, 0.0  ;;  %v1141_v16 = vadd.f32 %v1140_v12, %v1139_v8 }
 0x111   : > { %v869_v15 = vmul.f32 0.01, %v805_v7  ;;  %v1189_v17 = vadd.f32 %v1188_v13, %v1187_v9  ;;  %v1142_v18 = vpop.f32.mrb[6].mxu0  ;;  %v1190_v19 = vpop.f32.mrb[6].mxu1 }
 0x112   : > { %v885_v20 = vsel %vm821_vm3, %v789_v6, %v853_v14  ;;  %v1143_v22 = vpop.f32.mrb[7].mxu0  ;;  %v1191_v23 = vpop.f32.mrb[7].mxu1  ;;  %v751_v24 = vmul.f32 %v1141_v16, %v1467_v51 }
 0x113   : > { %v901_v21 = vsel %vm837_vm4, %v805_v7, %v869_v15  ;;  %918 = vst.msk [vmem:[%s1485_s7 + $0x8] sm:$0xff] %vm916_vm0, %v885_v20  ;;  %v767_v25 = vmul.f32 %v1189_v17, %v1467_v51  ;;  %v1144_v26 = vadd.f32 %v1143_v22, %v1142_v18  ;;  %v1192_v27 = vadd.f32 %v1191_v23, %v1190_v19 }
 0x114   : > { %934 = vst.msk [vmem:[%s1485_s7 + $0x88] sm:$0xff] %vm916_vm0, %v901_v21  ;;  %v790_v28 = vadd.f32 %v1472_v57, %v751_v24 }
 0x115   : > { %v806_v29 = vadd.f32 %v1472_v57, %v767_v25  ;;  %v752_v30 = vmul.f32 %v1144_v26, %v1467_v51  ;;  %v768_v31 = vmul.f32 %v1192_v27, %v1467_v51  ;;  %v1145_v32 = vpop.f32.mrb[8].mxu0  ;;  %v1193_v33 = vpop.f32.mrb[8].mxu1 }
 0x116   : > { %v1146_v34 = vpop.f32.mrb[9].mxu0  ;;  %v1194_v35 = vpop.f32.mrb[9].mxu1  ;;  %vm822_vm5 = vcmp.ge.f32.partialorder %v790_v28, 0.0  ;;  %v854_v36 = vmul.f32 0.01, %v790_v28 }
 0x117   : > { %vm838_vm6 = vcmp.ge.f32.partialorder %v806_v29, 0.0  ;;  %v870_v37 = vmul.f32 0.01, %v806_v29  ;;  %v791_v38 = vadd.f32 %v1472_v57, %v752_v30  ;;  %v807_v39 = vadd.f32 %v1472_v57, %v768_v31  ;;  %v1148_v42 = vpop.f32.mrb[10].mxu0  ;;  %v1196_v43 = vpop.f32.mrb[10].mxu1 }
 0x118   : > { %v1147_v40 = vadd.f32 %v1146_v34, %v1145_v32  ;;  %v1195_v41 = vadd.f32 %v1194_v35, %v1193_v33  ;;  %v886_v44 = vsel %vm822_vm5, %v790_v28, %v854_v36  ;;  %v1149_v46 = vpop.f32.mrb[11].mxu0  ;;  %v1197_v47 = vpop.f32.mrb[11].mxu1 }
 0x119   : > { %v902_v45 = vsel %vm838_vm6, %v806_v29, %v870_v37  ;;  %919 = vst.msk [vmem:[%s1485_s7 + $0x10] sm:$0xff] %vm916_vm0, %v886_v44  ;;  %vm823_vm7 = vcmp.ge.f32.partialorder %v791_v38, 0.0  ;;  %v855_v48 = vmul.f32 0.01, %v791_v38  ;;  %vm839_vm8 = vcmp.ge.f32.partialorder %v807_v39, 0.0 }
 0x11a   : > { %935 = vst.msk [vmem:[%s1485_s7 + $0x90] sm:$0xff] %vm916_vm0, %v902_v45  ;;  %v871_v49 = vmul.f32 0.01, %v807_v39  ;;  %v753_v50 = vmul.f32 %v1147_v40, %v1467_v51  ;;  %v769_v52 = vmul.f32 %v1195_v41, %v1467_v51  ;;  %v1150_v53 = vadd.f32 %v1149_v46, %v1148_v42 }
 0x11b   : > { %v1198_v54 = vadd.f32 %v1197_v47, %v1196_v43  ;;  %v887_v55 = vsel %vm823_vm7, %v791_v38, %v855_v48 }
 0x11c   : > { %v903_v56 = vsel %vm839_vm8, %v807_v39, %v871_v49  ;;  %920 = vst.msk [vmem:[%s1485_s7 + $0x18] sm:$0xff] %vm916_vm0, %v887_v55  ;;  %v792_v58 = vadd.f32 %v1472_v57, %v753_v50  ;;  %v808_v59 = vadd.f32 %v1472_v57, %v769_v52  ;;  %v754_v60 = vmul.f32 %v1150_v53, %v1467_v51 }
 0x11d   : > { %936 = vst.msk [vmem:[%s1485_s7 + $0x98] sm:$0xff] %vm916_vm0, %v903_v56  ;;  %v770_v61 = vmul.f32 %v1198_v54, %v1467_v51  ;;  %v1151_v62 = vpop.f32.mrb[12].mxu0  ;;  %v1199_v63 = vpop.f32.mrb[12].mxu1 }
 0x11e   : > { %v1152_v0 = vpop.f32.mrb[13].mxu0  ;;  %v1200_v1 = vpop.f32.mrb[13].mxu1  ;;  %vm824_vm9 = vcmp.ge.f32.partialorder %v792_v58, 0.0  ;;  %v856_v2 = vmul.f32 0.01, %v792_v58  ;;  %vm840_vm10 = vcmp.ge.f32.partialorder %v808_v59, 0.0  ;;  %v793_v4 = vadd.f32 %v1472_v57, %v754_v60 }
 0x11f   : > { %v872_v3 = vmul.f32 0.01, %v808_v59  ;;  %v809_v5 = vadd.f32 %v1472_v57, %v770_v61  ;;  %v1153_v6 = vadd.f32 %v1152_v0, %v1151_v62  ;;  %v1201_v7 = vadd.f32 %v1200_v1, %v1199_v63  ;;  %v1154_v8 = vpop.f32.mrb[14].mxu0  ;;  %v1202_v9 = vpop.f32.mrb[14].mxu1 }
 0x120   : > { %v888_v10 = vsel %vm824_vm9, %v792_v58, %v856_v2  ;;  %v1155_v12 = vpop.f32.mrb[15].mxu0  ;;  %v1203_v13 = vpop.f32.mrb[15].mxu1  ;;  %vm825_vm11 = vcmp.ge.f32.partialorder %v793_v4, 0.0  ;;  %v857_v14 = vmul.f32 0.01, %v793_v4 }
 0x121   : > { %v904_v11 = vsel %vm840_vm10, %v808_v59, %v872_v3  ;;  %921 = vst.msk [vmem:[%s1485_s7 + $0x20] sm:$0xff] %vm916_vm0, %v888_v10  ;;  %vm841_vm12 = vcmp.ge.f32.partialorder %v809_v5, 0.0  ;;  %v873_v15 = vmul.f32 0.01, %v809_v5  ;;  %v755_v16 = vmul.f32 %v1153_v6, %v1467_v51 }
 0x122   : > { %937 = vst.msk [vmem:[%s1485_s7 + $0xa0] sm:$0xff] %vm916_vm0, %v904_v11  ;;  %v771_v17 = vmul.f32 %v1201_v7, %v1467_v51  ;;  %v1156_v18 = vadd.f32 %v1155_v12, %v1154_v8  ;;  %v1204_v19 = vadd.f32 %v1203_v13, %v1202_v9  ;;  %v889_v20 = vsel %vm825_vm11, %v793_v4, %v857_v14 }
 0x123   : > { %v905_v21 = vsel %vm841_vm12, %v809_v5, %v873_v15  ;;  %922 = vst.msk [vmem:[%s1485_s7 + $0x28] sm:$0xff] %vm916_vm0, %v889_v20  ;;  %v794_v22 = vadd.f32 %v1472_v57, %v755_v16 }
 0x124   : > { %938 = vst.msk [vmem:[%s1485_s7 + $0xa8] sm:$0xff] %vm916_vm0, %v905_v21  ;;  %v810_v23 = vadd.f32 %v1472_v57, %v771_v17  ;;  %v756_v24 = vmul.f32 %v1156_v18, %v1467_v51  ;;  %v772_v25 = vmul.f32 %v1204_v19, %v1467_v51 }
 0x125   : > { %v1157_v26 = vpop.f32.mrb[16].mxu0  ;;  %v1205_v27 = vpop.f32.mrb[16].mxu1  ;;  %vm826_vm13 = vcmp.ge.f32.partialorder %v794_v22, 0.0  ;;  %v858_v30 = vmul.f32 0.01, %v794_v22 }
 0x126   : > { %v1158_v28 = vpop.f32.mrb[17].mxu0  ;;  %v1206_v29 = vpop.f32.mrb[17].mxu1  ;;  %vm842_vm14 = vcmp.ge.f32.partialorder %v810_v23, 0.0  ;;  %v874_v31 = vmul.f32 0.01, %v810_v23  ;;  %v795_v32 = vadd.f32 %v1472_v57, %v756_v24  ;;  %v811_v33 = vadd.f32 %v1472_v57, %v772_v25 }
 0x127   : > { %v1159_v34 = vadd.f32 %v1158_v28, %v1157_v26  ;;  %v1207_v35 = vadd.f32 %v1206_v29, %v1205_v27  ;;  %v1160_v36 = vpop.f32.mrb[18].mxu0  ;;  %v1208_v37 = vpop.f32.mrb[18].mxu1  ;;  %v890_v38 = vsel %vm826_vm13, %v794_v22, %v858_v30 }
 0x128   : > { %v906_v39 = vsel %vm842_vm14, %v810_v23, %v874_v31  ;;  %v1161_v40 = vpop.f32.mrb[19].mxu0  ;;  %v1209_v41 = vpop.f32.mrb[19].mxu1  ;;  %923 = vst.msk [vmem:[%s1485_s7 + $0x30] sm:$0xff] %vm916_vm0, %v890_v38  ;;  %vm827_vm15 = vcmp.ge.f32.partialorder %v795_v32, 0.0  ;;  %v859_v42 = vmul.f32 0.01, %v795_v32 }
 0x129   : > { %939 = vst.msk [vmem:[%s1485_s7 + $0xb0] sm:$0xff] %vm916_vm0, %v906_v39  ;;  %vm843_vm1 = vcmp.ge.f32.partialorder %v811_v33, 0.0  ;;  %v875_v43 = vmul.f32 0.01, %v811_v33  ;;  %v757_v44 = vmul.f32 %v1159_v34, %v1467_v51  ;;  %v773_v45 = vmul.f32 %v1207_v35, %v1467_v51 }
 0x12a   : > { %v1162_v46 = vadd.f32 %v1161_v40, %v1160_v36  ;;  %v1210_v47 = vadd.f32 %v1209_v41, %v1208_v37  ;;  %v891_v48 = vsel %vm827_vm15, %v795_v32, %v859_v42 }
 0x12b   : > { %v907_v49 = vsel %vm843_vm1, %v811_v33, %v875_v43  ;;  %924 = vst.msk [vmem:[%s1485_s7 + $0x38] sm:$0xff] %vm916_vm0, %v891_v48  ;;  %v796_v50 = vadd.f32 %v1472_v57, %v757_v44  ;;  %v812_v52 = vadd.f32 %v1472_v57, %v773_v45 }
 0x12c   : > { %940 = vst.msk [vmem:[%s1485_s7 + $0xb8] sm:$0xff] %vm916_vm0, %v907_v49  ;;  %v758_v53 = vmul.f32 %v1162_v46, %v1467_v51  ;;  %v774_v54 = vmul.f32 %v1210_v47, %v1467_v51 }
 0x12d   : > { %v1163_v55 = vpop.f32.mrb[20].mxu0  ;;  %v1211_v56 = vpop.f32.mrb[20].mxu1  ;;  %vm828_vm2 = vcmp.ge.f32.partialorder %v796_v50, 0.0  ;;  %v860_v60 = vmul.f32 0.01, %v796_v50  ;;  %vm844_vm3 = vcmp.ge.f32.partialorder %v812_v52, 0.0 }
 0x12e   : > { %v1164_v58 = vpop.f32.mrb[21].mxu0  ;;  %v1212_v59 = vpop.f32.mrb[21].mxu1  ;;  %v876_v61 = vmul.f32 0.01, %v812_v52  ;;  %v797_v62 = vadd.f32 %v1472_v57, %v758_v53  ;;  %v813_v63 = vadd.f32 %v1472_v57, %v774_v54 }
 0x12f   : > { %v1165_v0 = vadd.f32 %v1164_v58, %v1163_v55  ;;  %v1213_v1 = vadd.f32 %v1212_v59, %v1211_v56  ;;  %v1166_v2 = vpop.f32.mrb[22].mxu0  ;;  %v1214_v3 = vpop.f32.mrb[22].mxu1  ;;  %v892_v4 = vsel %vm828_vm2, %v796_v50, %v860_v60 }
 0x130   : > { %v908_v5 = vsel %vm844_vm3, %v812_v52, %v876_v61  ;;  %v1167_v6 = vpop.f32.mrb[23].mxu0  ;;  %v1215_v7 = vpop.f32.mrb[23].mxu1  ;;  %925 = vst.msk [vmem:[%s1485_s7 + $0x40] sm:$0xff] %vm916_vm0, %v892_v4  ;;  %vm829_vm4 = vcmp.ge.f32.partialorder %v797_v62, 0.0  ;;  %v861_v8 = vmul.f32 0.01, %v797_v62 }
 0x131   : > { %941 = vst.msk [vmem:[%s1485_s7 + $0xc0] sm:$0xff] %vm916_vm0, %v908_v5  ;;  %vm845_vm5 = vcmp.ge.f32.partialorder %v813_v63, 0.0  ;;  %v877_v9 = vmul.f32 0.01, %v813_v63  ;;  %v759_v10 = vmul.f32 %v1165_v0, %v1467_v51  ;;  %v775_v11 = vmul.f32 %v1213_v1, %v1467_v51 }
 0x132   : > { %v1168_v12 = vadd.f32 %v1167_v6, %v1166_v2  ;;  %v1216_v13 = vadd.f32 %v1215_v7, %v1214_v3  ;;  %v893_v14 = vsel %vm829_vm4, %v797_v62, %v861_v8 }
 0x133   : > { %v909_v15 = vsel %vm845_vm5, %v813_v63, %v877_v9  ;;  %926 = vst.msk [vmem:[%s1485_s7 + $0x48] sm:$0xff] %vm916_vm0, %v893_v14  ;;  %v798_v16 = vadd.f32 %v1472_v57, %v759_v10  ;;  %v814_v17 = vadd.f32 %v1472_v57, %v775_v11 }
 0x134   : > { %942 = vst.msk [vmem:[%s1485_s7 + $0xc8] sm:$0xff] %vm916_vm0, %v909_v15  ;;  %v760_v18 = vmul.f32 %v1168_v12, %v1467_v51  ;;  %v776_v19 = vmul.f32 %v1216_v13, %v1467_v51 }
 0x135   : > { %v1169_v20 = vpop.f32.mrb[24].mxu0  ;;  %v1217_v21 = vpop.f32.mrb[24].mxu1  ;;  %vm830_vm6 = vcmp.ge.f32.partialorder %v798_v16, 0.0  ;;  %v862_v24 = vmul.f32 0.01, %v798_v16  ;;  %vm846_vm7 = vcmp.ge.f32.partialorder %v814_v17, 0.0 }
 0x136   : > { %v1170_v22 = vpop.f32.mrb[25].mxu0  ;;  %v1218_v23 = vpop.f32.mrb[25].mxu1  ;;  %v878_v25 = vmul.f32 0.01, %v814_v17  ;;  %v799_v26 = vadd.f32 %v1472_v57, %v760_v18  ;;  %v815_v27 = vadd.f32 %v1472_v57, %v776_v19 }
 0x137   : > { %v1171_v28 = vadd.f32 %v1170_v22, %v1169_v20  ;;  %v1219_v29 = vadd.f32 %v1218_v23, %v1217_v21  ;;  %v1172_v30 = vpop.f32.mrb[26].mxu0  ;;  %v1220_v31 = vpop.f32.mrb[26].mxu1  ;;  %v894_v32 = vsel %vm830_vm6, %v798_v16, %v862_v24 }
 0x138   : > { %v910_v33 = vsel %vm846_vm7, %v814_v17, %v878_v25  ;;  %v1173_v34 = vpop.f32.mrb[27].mxu0  ;;  %v1221_v35 = vpop.f32.mrb[27].mxu1  ;;  %927 = vst.msk [vmem:[%s1485_s7 + $0x50] sm:$0xff] %vm916_vm0, %v894_v32  ;;  %vm831_vm8 = vcmp.ge.f32.partialorder %v799_v26, 0.0  ;;  %v863_v36 = vmul.f32 0.01, %v799_v26 }
 0x139   : > { %943 = vst.msk [vmem:[%s1485_s7 + $0xd0] sm:$0xff] %vm916_vm0, %v910_v33  ;;  %vm847_vm9 = vcmp.ge.f32.partialorder %v815_v27, 0.0  ;;  %v879_v37 = vmul.f32 0.01, %v815_v27  ;;  %v761_v38 = vmul.f32 %v1171_v28, %v1467_v51  ;;  %v777_v39 = vmul.f32 %v1219_v29, %v1467_v51 }
 0x13a   : > { %v1174_v40 = vadd.f32 %v1173_v34, %v1172_v30  ;;  %v1222_v41 = vadd.f32 %v1221_v35, %v1220_v31  ;;  %v895_v42 = vsel %vm831_vm8, %v799_v26, %v863_v36 }
 0x13b   : > { %v911_v43 = vsel %vm847_vm9, %v815_v27, %v879_v37  ;;  %928 = vst.msk [vmem:[%s1485_s7 + $0x58] sm:$0xff] %vm916_vm0, %v895_v42  ;;  %v800_v44 = vadd.f32 %v1472_v57, %v761_v38  ;;  %v816_v45 = vadd.f32 %v1472_v57, %v777_v39 }
 0x13c   : > { %944 = vst.msk [vmem:[%s1485_s7 + $0xd8] sm:$0xff] %vm916_vm0, %v911_v43  ;;  %v762_v46 = vmul.f32 %v1174_v40, %v1467_v51  ;;  %v778_v47 = vmul.f32 %v1222_v41, %v1467_v51 }
 0x13d   : > { %v1175_v48 = vpop.f32.mrb[28].mxu0  ;;  %v1223_v49 = vpop.f32.mrb[28].mxu1  ;;  %vm832_vm10 = vcmp.ge.f32.partialorder %v800_v44, 0.0  ;;  %v864_v53 = vmul.f32 0.01, %v800_v44  ;;  %vm848_vm11 = vcmp.ge.f32.partialorder %v816_v45, 0.0 }
 0x13e   : > { %v1176_v50 = vpop.f32.mrb[29].mxu0  ;;  %v1224_v52 = vpop.f32.mrb[29].mxu1  ;;  %v880_v54 = vmul.f32 0.01, %v816_v45  ;;  %v801_v55 = vadd.f32 %v1472_v57, %v762_v46  ;;  %v817_v56 = vadd.f32 %v1472_v57, %v778_v47 }
 0x13f   : > { %v1177_v58 = vadd.f32 %v1176_v50, %v1175_v48  ;;  %v1225_v59 = vadd.f32 %v1224_v52, %v1223_v49  ;;  %v1178_v60 = vpop.f32.mrb[30].mxu0  ;;  %v1226_v61 = vpop.f32.mrb[30].mxu1  ;;  %v896_v62 = vsel %vm832_vm10, %v800_v44, %v864_v53 }
 0x140   : > { %v912_v63 = vsel %vm848_vm11, %v816_v45, %v880_v54  ;;  %v1179_v0 = vpop.f32.mrb[31].mxu0  ;;  %v1227_v1 = vpop.f32.mrb[31].mxu1  ;;  %929 = vst.msk [vmem:[%s1485_s7 + $0x60] sm:$0xff] %vm916_vm0, %v896_v62  ;;  %vm833_vm12 = vcmp.ge.f32.partialorder %v801_v55, 0.0  ;;  %v865_v2 = vmul.f32 0.01, %v801_v55 }
 0x141   : > { %945 = vst.msk [vmem:[%s1485_s7 + $0xe0] sm:$0xff] %vm916_vm0, %v912_v63  ;;  %vm849_vm13 = vcmp.ge.f32.partialorder %v817_v56, 0.0  ;;  %v881_v3 = vmul.f32 0.01, %v817_v56  ;;  %v763_v4 = vmul.f32 %v1177_v58, %v1467_v51  ;;  %v779_v5 = vmul.f32 %v1225_v59, %v1467_v51 }
 0x142   : > { %v1180_v6 = vadd.f32 %v1179_v0, %v1178_v60  ;;  %v1228_v7 = vadd.f32 %v1227_v1, %v1226_v61  ;;  %v897_v8 = vsel %vm833_vm12, %v801_v55, %v865_v2 }
 0x143   : > { %v913_v9 = vsel %vm849_vm13, %v817_v56, %v881_v3  ;;  %930 = vst.msk [vmem:[%s1485_s7 + $0x68] sm:$0xff] %vm916_vm0, %v897_v8  ;;  %v802_v10 = vadd.f32 %v1472_v57, %v763_v4  ;;  %v818_v11 = vadd.f32 %v1472_v57, %v779_v5 }
 0x144   : > { %946 = vst.msk [vmem:[%s1485_s7 + $0xe8] sm:$0xff] %vm916_vm0, %v913_v9  ;;  %v764_v12 = vmul.f32 %v1180_v6, %v1467_v51  ;;  %v780_v13 = vmul.f32 %v1228_v7, %v1467_v51 }
 0x145   : > { %vm834_vm14 = vcmp.ge.f32.partialorder %v802_v10, 0.0  ;;  %v866_v14 = vmul.f32 0.01, %v802_v10  ;;  %vm850_vm15 = vcmp.ge.f32.partialorder %v818_v11, 0.0  ;;  %v882_v15 = vmul.f32 0.01, %v818_v11 }
 0x146   : > { %v803_v16 = vadd.f32 %v1472_v57, %v764_v12  ;;  %v819_v17 = vadd.f32 %v1472_v57, %v780_v13 }
 0x147   : > { %v898_v18 = vsel %vm834_vm14, %v802_v10, %v866_v14  ;;  %v914_v19 = vsel %vm850_vm15, %v818_v11, %v882_v15 }
 0x148   : > { %931 = vst.msk [vmem:[%s1485_s7 + $0x70] sm:$0xff] %vm916_vm0, %v898_v18  ;;  %947 = vst.msk [vmem:[%s1485_s7 + $0xf0] sm:$0xff] %vm916_vm0, %v914_v19  ;;  %vm835_vm1 = vcmp.ge.f32.partialorder %v803_v16, 0.0  ;;  %v867_v20 = vmul.f32 0.01, %v803_v16  ;;  %vm851_vm2 = vcmp.ge.f32.partialorder %v819_v17, 0.0 }
 0x149   : > { %v883_v51 = vmul.f32 0.01, %v819_v17 }
 0x14a   : > { %v899_v21 = vsel %vm835_vm1, %v803_v16, %v867_v20 }
 0x14b   : > { %v915_v22 = vsel %vm851_vm2, %v819_v17, %v883_v51  ;;  %932 = vst.msk [vmem:[%s1485_s7 + $0x78] sm:$0xff] %vm916_vm0, %v899_v21 }
 0x14c   : > { %948 = vst.msk [vmem:[%s1485_s7 + $0xf8] sm:$0xff] %vm916_vm0, %v915_v22 }
 0x14d PF: > { %s14_s17 = sadd.s32 1, %s1355_s17   ;;  %s1623_s15 = smov %s1351_s16 }
 0x14e   : > { %p11_p5 = scmp.ge.s32.totalorder %s14_s17, 6   ;;  %s1624_s16 = smov %s1626_s18 }
 0x150   :  { %13 = sbr.rel (!%p11_p5) target bundleno = 2 (0x2), region = 69 }

// kernel: _lambda_.23
= control target key start
LH: loop header
LB: loop body
LE: loop exit
PB: predicated region body
PF: predicated region fallthrough
CT: control target
= control target key end

     0   :  { %s1072_s15 = smov 0   ;;  %s1074_s16 = smov 0   ;;  %s1304_s0 = inlined_call_operand.vmem [shape: bf16[8,1024,64], index: 0, kind: input, shape index: {}]   ;;  %s1305_s1 = inlined_call_operand.vmem [shape: bf16[8,64,20], index: 1, kind: input, shape index: {}]   ;;  %s1306_s2 = inlined_call_operand.vmem [shape: f32[1,20], index: 2, kind: input, shape index: {}]   ;;  %s1307_s3 = inlined_call_operand.vmem [shape: f32[1,20], index: 3, kind: input, shape index: {}]   ;;  %s1308_s4 = inlined_call_operand.vmem [shape: f32[8,1024,20], index: 4, kind: output, shape index: {}]  }
   0x1   :  { %s1076_s17 = smov 0   ;;  %s1078_s18 = smov 0  }
   0x2   :  { %s1080_s19 = smov 0  }
   0x3 LB: > { %s23_s20 = sadd.s32 1, %s1037_s17  ;;  %s26_s21 = sadd.s32 1, %s1041_s18  ;;  %s1045_s19 = sphi %s1080_s19, %s14_s19   ;;  %s1041_s18 = sphi %s1078_s18, %s1312_s18   ;;  %s1037_s17 = sphi %s1076_s17, %s1311_s17   ;;  %s1033_s16 = sphi %s1074_s16, %s1310_s16   ;;  %s1029_s15 = sphi %s1072_s15, %s1309_s15  }
   0x4   : > { %p24_p0 = scmp.ge.s32.totalorder %s23_s20, 4  ;;  %p829_p1 = scmp.ge.s32.totalorder %s1045_s19, 1 }
   0x5   : > { %p193_p2 = scmp.lt.s32.totalorder %s1045_s19, 33 }
   0x6   : > { %s1314_s20 = smov (%p24_p0, %s23_s20), 0  ;;  %s1316_s21 = smov (!%p24_p0, %s26_s21), %s1041_s18 }
   0x7   : > { %p194_p3 = pnand %p829_p1, %p193_p2  ;;  %p28_p4 = scmp.ge.s32.totalorder %s1316_s21, 8 }
   0x8   : > { %s830_s22 = sshll.u32 (!%p194_p3), %s1029_s15, 5  ;;  %p233_p5 = scmp.lt.s32.totalorder (!%p194_p3), %s1033_s16, 7  ;;  %vm402_vm0 = vcmask (!%p194_p3), 523264   ;;  %v1148_v20 = vld [vmem:[%s1306_s2] ss:$0 sm:$0xff] (!%p194_p3)  ;;  %vm690_vm1 = vcmask (!%p194_p3), 162816  }
   0x9   : > { %s1318_s21 = smov (%p28_p4, %s1316_s21), 0  ;;  %197 = sbr.rel (%p194_p3) target bundleno = 280 (0x118), region = 36 }
   0xa   : > { %p235_p6 = scmp.lt.s32.totalorder (!%p194_p3), %s830_s22, 127  ;;  %v1154_v22 = vld [vmem:[%s1307_s3] ss:$0 sm:$0xff] (!%p194_p3) }
  0x10   : > { %s1320_s16 = smov (!%p233_p5, %s1033_s16), 7  ;;  %s1322_s22 = smov (!%p235_p6, %s830_s22), 127 }
  0x11   : > { %s831_s23 = sshll.u32 %s1320_s16, 7  ;;  %s878_s24 = sshll.u32 %s1320_s16, 5 }
  0x12   : > { %s1102_s25 = sadd.s32 %s831_s23, %s1322_s22  ;;  %s246_s28 = scalar_lea.vmem %s1305_s1, %s878_s24 }
  0x13   : > { %s832_s29 = sshll.u32 %s1102_s25, 2  ;;  %v987_v0 = vld [vmem:[%s246_s28] sm:$0xff]   ;;  %v988_v1 = vld [vmem:[%s246_s28 + $0x8] sm:$0xff]   ;;  %v989_v2 = vld [vmem:[%s246_s28 + $0x10] sm:$0xff]   ;;  %s837_s9 = sshll.u32 %s1102_s25, 3 }
  0x14   : > { %s1111_s6 = scalar_lea.vmem %s1304_s0, %s832_s29  ;;  %899 = vmatprep.subr.bf16.mxu0 %v987_v0  ;;  %939 = vmatprep.subr.bf16.mxu1 %v987_v0  ;;  %v990_v5 = vld [vmem:[%s246_s28 + $0x18] sm:$0xff]   ;;  %s1161_s14 = scalar_lea.vmem %s1308_s4, %s837_s9 }
  0x15   : > { %900 = vmatpush3.bf16.msra.mxu0 %v987_v0  ;;  %943 = vmatpush3.bf16.msra.mxu1 %v987_v0  ;;  %v991_v3 = vld [vmem:[%s1111_s6] sm:$0xff]   ;;  %v993_v6 = vld [vmem:[%s1111_s6 + $0x8] sm:$0xff]   ;;  %v995_v8 = vld [vmem:[%s1111_s6 + $0x10] sm:$0xff]  }
  0x16   : > { %901 = vmatprep.subr.bf16.mxu0 %v988_v1  ;;  %940 = vmatprep.subr.bf16.mxu1 %v988_v1  ;;  %v992_v4 = vld [vmem:[%s1111_s6 + $0x40] sm:$0xff]   ;;  %v994_v7 = vld [vmem:[%s1111_s6 + $0x48] sm:$0xff]   ;;  %v996_v9 = vld [vmem:[%s1111_s6 + $0x50] sm:$0xff]  }
  0x17   : > { %907 = vmatprep.mubr.msk.bf16.mxu0 %vm402_vm0, %v991_v3  ;;  %923 = vmatprep.mubr.msk.bf16.mxu1 %vm402_vm0, %v992_v4  ;;  %v997_v10 = vld [vmem:[%s1111_s6 + $0x18] sm:$0xff]   ;;  %v999_v12 = vld [vmem:[%s1111_s6 + $0x20] sm:$0xff]   ;;  %v1001_v14 = vld [vmem:[%s1111_s6 + $0x28] sm:$0xff]  }
  0x18   : > { %v998_v11 = vld [vmem:[%s1111_s6 + $0x58] sm:$0xff]   ;;  %v1000_v13 = vld [vmem:[%s1111_s6 + $0x60] sm:$0xff]   ;;  %v1002_v15 = vld [vmem:[%s1111_s6 + $0x68] sm:$0xff]  }
  0x19   : > { %902 = vmatpush3.bf16.msra.mxu0 %v988_v1  ;;  %944 = vmatpush3.bf16.msra.mxu1 %v988_v1  ;;  %v1003_v16 = vld [vmem:[%s1111_s6 + $0x30] sm:$0xff]   ;;  %v1005_v18 = vld [vmem:[%s1111_s6 + $0x38] sm:$0xff]  }
  0x1a   : > { %903 = vmatprep.subr.bf16.mxu0 %v989_v2  ;;  %941 = vmatprep.subr.bf16.mxu1 %v989_v2  ;;  %v1004_v17 = vld [vmem:[%s1111_s6 + $0x70] sm:$0xff]   ;;  %v1006_v19 = vld [vmem:[%s1111_s6 + $0x78] sm:$0xff]  }
  0x1d   : > { %904 = vmatpush3.bf16.msra.mxu0 %v989_v2  ;;  %945 = vmatpush3.bf16.msra.mxu1 %v989_v2 }
  0x1e   : > { %905 = vmatprep.subr.bf16.mxu0 %v990_v5  ;;  %942 = vmatprep.subr.bf16.mxu1 %v990_v5 }
  0x21   : > { %906 = vmatpush3.bf16.msra.mxu0 %v990_v5  ;;  %946 = vmatpush3.bf16.msra.mxu1 %v990_v5 }
  0x24   : > { %908 = vmatmul.mubr.msk.bf16.vlgmr.msra.gmra.mrb[0].mxu0 %vm402_vm0, %v993_v6  ;;  %924 = vmatmul.mubr.msk.bf16.vlgmr.msra.gmra.mrb[0].mxu1 %vm402_vm0, %v994_v7 }
  0x25   : > { %911 = vmatprep.mubr.msk.bf16.mxu0 %vm402_vm0, %v995_v8  ;;  %927 = vmatprep.mubr.msk.bf16.mxu1 %vm402_vm0, %v996_v9 }
  0x2c   : > { %912 = vmatmul.mubr.msk.bf16.gmra.mrb[4].mxu0 %vm402_vm0, %v997_v10  ;;  %928 = vmatmul.mubr.msk.bf16.gmra.mrb[4].mxu1 %vm402_vm0, %v998_v11 }
  0x2d   : > { %915 = vmatprep.mubr.msk.bf16.mxu0 %vm402_vm0, %v999_v12  ;;  %931 = vmatprep.mubr.msk.bf16.mxu1 %vm402_vm0, %v1000_v13 }
  0x34   : > { %916 = vmatmul.mubr.msk.bf16.gmra.mrb[8].mxu0 %vm402_vm0, %v1001_v14  ;;  %932 = vmatmul.mubr.msk.bf16.gmra.mrb[8].mxu1 %vm402_vm0, %v1002_v15 }
  0x35   : > { %919 = vmatprep.mubr.msk.bf16.mxu0 %vm402_vm0, %v1003_v16  ;;  %935 = vmatprep.mubr.msk.bf16.mxu1 %vm402_vm0, %v1004_v17 }
  0x3c   : > { %920 = vmatmul.mubr.msk.bf16.gmra.mrb[12].mxu0 %vm402_vm0, %v1005_v18  ;;  %936 = vmatmul.mubr.msk.bf16.gmra.mrb[12].mxu1 %vm402_vm0, %v1006_v19 }
  0xf7   : > { %v909_v21 = vpop.f32.mrb[0].mxu0  ;;  %v925_v23 = vpop.f32.mrb[0].mxu1 }
  0xf8   : > { %v621_v24 = vmul.f32 %v909_v21, %v1148_v20  ;;  %v637_v25 = vmul.f32 %v925_v23, %v1148_v20  ;;  %v485_v26 = vpop.f32.mrb[1].mxu0  ;;  %v549_v27 = vpop.f32.mrb[1].mxu1 }
  0xf9   : > { %v619_v28 = vmul.f32 %v1148_v20, %v485_v26  ;;  %v635_v29 = vmul.f32 %v1148_v20, %v549_v27  ;;  %v910_v30 = vpop.f32.mrb[2].mxu0  ;;  %v926_v31 = vpop.f32.mrb[2].mxu1 }
  0xfa   : > { %v660_v32 = vadd.f32 %v1154_v22, %v621_v24  ;;  %v676_v33 = vadd.f32 %v1154_v22, %v637_v25  ;;  %v622_v34 = vmul.f32 %v910_v30, %v1148_v20  ;;  %v638_v35 = vmul.f32 %v926_v31, %v1148_v20  ;;  %v488_v36 = vpop.f32.mrb[3].mxu0  ;;  %v552_v37 = vpop.f32.mrb[3].mxu1 }
  0xfb   : > { %v658_v38 = vadd.f32 %v1154_v22, %v619_v28  ;;  %v674_v39 = vadd.f32 %v1154_v22, %v635_v29  ;;  %v620_v40 = vmul.f32 %v1148_v20, %v488_v36  ;;  %v636_v41 = vmul.f32 %v1148_v20, %v552_v37 }
  0xfc   : > { %693 = vst.msk [vmem:[%s1161_s14 + $0x10] sm:$0xff] %vm690_vm1, %v660_v32  ;;  %709 = vst.msk [vmem:[%s1161_s14 + $0x90] sm:$0xff] %vm690_vm1, %v676_v33  ;;  %v661_v42 = vadd.f32 %v1154_v22, %v622_v34  ;;  %v677_v43 = vadd.f32 %v1154_v22, %v638_v35 }
  0xfd   : > { %691 = vst.msk [vmem:[%s1161_s14] sm:$0xff] %vm690_vm1, %v658_v38  ;;  %707 = vst.msk [vmem:[%s1161_s14 + $0x80] sm:$0xff] %vm690_vm1, %v674_v39  ;;  %v659_v44 = vadd.f32 %v1154_v22, %v620_v40  ;;  %v675_v45 = vadd.f32 %v1154_v22, %v636_v41 }
  0xfe   : > { %694 = vst.msk [vmem:[%s1161_s14 + $0x18] sm:$0xff] %vm690_vm1, %v661_v42  ;;  %710 = vst.msk [vmem:[%s1161_s14 + $0x98] sm:$0xff] %vm690_vm1, %v677_v43 }
  0xff   : > { %692 = vst.msk [vmem:[%s1161_s14 + $0x8] sm:$0xff] %vm690_vm1, %v659_v44  ;;  %708 = vst.msk [vmem:[%s1161_s14 + $0x88] sm:$0xff] %vm690_vm1, %v675_v45  ;;  %v913_v46 = vpop.f32.mrb[4].mxu0  ;;  %v929_v47 = vpop.f32.mrb[4].mxu1 }
 0x100   : > { %v625_v48 = vmul.f32 %v913_v46, %v1148_v20  ;;  %v641_v49 = vmul.f32 %v929_v47, %v1148_v20  ;;  %v501_v50 = vpop.f32.mrb[5].mxu0  ;;  %v565_v51 = vpop.f32.mrb[5].mxu1 }
 0x101   : > { %v623_v52 = vmul.f32 %v1148_v20, %v501_v50  ;;  %v639_v53 = vmul.f32 %v1148_v20, %v565_v51  ;;  %v914_v54 = vpop.f32.mrb[6].mxu0  ;;  %v930_v55 = vpop.f32.mrb[6].mxu1 }
 0x102   : > { %v664_v56 = vadd.f32 %v1154_v22, %v625_v48  ;;  %v680_v57 = vadd.f32 %v1154_v22, %v641_v49  ;;  %v626_v58 = vmul.f32 %v914_v54, %v1148_v20  ;;  %v642_v59 = vmul.f32 %v930_v55, %v1148_v20  ;;  %v504_v60 = vpop.f32.mrb[7].mxu0  ;;  %v568_v61 = vpop.f32.mrb[7].mxu1 }
 0x103   : > { %v662_v62 = vadd.f32 %v1154_v22, %v623_v52  ;;  %v678_v63 = vadd.f32 %v1154_v22, %v639_v53  ;;  %v624_v0 = vmul.f32 %v1148_v20, %v504_v60  ;;  %v640_v1 = vmul.f32 %v1148_v20, %v568_v61 }
 0x104   : > { %697 = vst.msk [vmem:[%s1161_s14 + $0x30] sm:$0xff] %vm690_vm1, %v664_v56  ;;  %713 = vst.msk [vmem:[%s1161_s14 + $0xb0] sm:$0xff] %vm690_vm1, %v680_v57  ;;  %v665_v2 = vadd.f32 %v1154_v22, %v626_v58  ;;  %v681_v3 = vadd.f32 %v1154_v22, %v642_v59 }
 0x105   : > { %695 = vst.msk [vmem:[%s1161_s14 + $0x20] sm:$0xff] %vm690_vm1, %v662_v62  ;;  %711 = vst.msk [vmem:[%s1161_s14 + $0xa0] sm:$0xff] %vm690_vm1, %v678_v63  ;;  %v663_v4 = vadd.f32 %v1154_v22, %v624_v0  ;;  %v679_v5 = vadd.f32 %v1154_v22, %v640_v1 }
 0x106   : > { %698 = vst.msk [vmem:[%s1161_s14 + $0x38] sm:$0xff] %vm690_vm1, %v665_v2  ;;  %714 = vst.msk [vmem:[%s1161_s14 + $0xb8] sm:$0xff] %vm690_vm1, %v681_v3 }
 0x107   : > { %696 = vst.msk [vmem:[%s1161_s14 + $0x28] sm:$0xff] %vm690_vm1, %v663_v4  ;;  %712 = vst.msk [vmem:[%s1161_s14 + $0xa8] sm:$0xff] %vm690_vm1, %v679_v5  ;;  %v917_v6 = vpop.f32.mrb[8].mxu0  ;;  %v933_v7 = vpop.f32.mrb[8].mxu1 }
 0x108   : > { %v629_v8 = vmul.f32 %v917_v6, %v1148_v20  ;;  %v645_v9 = vmul.f32 %v933_v7, %v1148_v20  ;;  %v517_v10 = vpop.f32.mrb[9].mxu0  ;;  %v581_v11 = vpop.f32.mrb[9].mxu1 }
 0x109   : > { %v627_v12 = vmul.f32 %v1148_v20, %v517_v10  ;;  %v643_v13 = vmul.f32 %v1148_v20, %v581_v11  ;;  %v918_v14 = vpop.f32.mrb[10].mxu0  ;;  %v934_v15 = vpop.f32.mrb[10].mxu1 }
 0x10a   : > { %v668_v16 = vadd.f32 %v1154_v22, %v629_v8  ;;  %v684_v17 = vadd.f32 %v1154_v22, %v645_v9  ;;  %v630_v18 = vmul.f32 %v918_v14, %v1148_v20  ;;  %v646_v19 = vmul.f32 %v934_v15, %v1148_v20  ;;  %v520_v21 = vpop.f32.mrb[11].mxu0  ;;  %v584_v23 = vpop.f32.mrb[11].mxu1 }
 0x10b   : > { %v666_v24 = vadd.f32 %v1154_v22, %v627_v12  ;;  %v682_v25 = vadd.f32 %v1154_v22, %v643_v13  ;;  %v628_v26 = vmul.f32 %v1148_v20, %v520_v21  ;;  %v644_v27 = vmul.f32 %v1148_v20, %v584_v23 }
 0x10c   : > { %701 = vst.msk [vmem:[%s1161_s14 + $0x50] sm:$0xff] %vm690_vm1, %v668_v16  ;;  %717 = vst.msk [vmem:[%s1161_s14 + $0xd0] sm:$0xff] %vm690_vm1, %v684_v17  ;;  %v669_v28 = vadd.f32 %v1154_v22, %v630_v18  ;;  %v685_v29 = vadd.f32 %v1154_v22, %v646_v19 }
 0x10d   : > { %699 = vst.msk [vmem:[%s1161_s14 + $0x40] sm:$0xff] %vm690_vm1, %v666_v24  ;;  %715 = vst.msk [vmem:[%s1161_s14 + $0xc0] sm:$0xff] %vm690_vm1, %v682_v25  ;;  %v667_v30 = vadd.f32 %v1154_v22, %v628_v26  ;;  %v683_v31 = vadd.f32 %v1154_v22, %v644_v27 }
 0x10e   : > { %702 = vst.msk [vmem:[%s1161_s14 + $0x58] sm:$0xff] %vm690_vm1, %v669_v28  ;;  %718 = vst.msk [vmem:[%s1161_s14 + $0xd8] sm:$0xff] %vm690_vm1, %v685_v29 }
 0x10f   : > { %700 = vst.msk [vmem:[%s1161_s14 + $0x48] sm:$0xff] %vm690_vm1, %v667_v30  ;;  %716 = vst.msk [vmem:[%s1161_s14 + $0xc8] sm:$0xff] %vm690_vm1, %v683_v31  ;;  %v921_v32 = vpop.f32.mrb[12].mxu0  ;;  %v937_v33 = vpop.f32.mrb[12].mxu1 }
 0x110   : > { %v633_v34 = vmul.f32 %v921_v32, %v1148_v20  ;;  %v649_v35 = vmul.f32 %v937_v33, %v1148_v20  ;;  %v533_v36 = vpop.f32.mrb[13].mxu0  ;;  %v597_v37 = vpop.f32.mrb[13].mxu1 }
 0x111   : > { %v631_v38 = vmul.f32 %v1148_v20, %v533_v36  ;;  %v647_v39 = vmul.f32 %v1148_v20, %v597_v37  ;;  %v922_v40 = vpop.f32.mrb[14].mxu0  ;;  %v938_v41 = vpop.f32.mrb[14].mxu1 }
 0x112   : > { %v672_v42 = vadd.f32 %v1154_v22, %v633_v34  ;;  %v688_v43 = vadd.f32 %v1154_v22, %v649_v35  ;;  %v634_v44 = vmul.f32 %v922_v40, %v1148_v20  ;;  %v650_v45 = vmul.f32 %v938_v41, %v1148_v20  ;;  %v536_v46 = vpop.f32.mrb[15].mxu0  ;;  %v600_v47 = vpop.f32.mrb[15].mxu1 }
 0x113   : > { %v670_v48 = vadd.f32 %v1154_v22, %v631_v38  ;;  %v686_v49 = vadd.f32 %v1154_v22, %v647_v39  ;;  %v632_v50 = vmul.f32 %v1148_v20, %v536_v46  ;;  %v648_v51 = vmul.f32 %v1148_v20, %v600_v47 }
 0x114   : > { %705 = vst.msk [vmem:[%s1161_s14 + $0x70] sm:$0xff] %vm690_vm1, %v672_v42  ;;  %721 = vst.msk [vmem:[%s1161_s14 + $0xf0] sm:$0xff] %vm690_vm1, %v688_v43  ;;  %v673_v52 = vadd.f32 %v1154_v22, %v634_v44  ;;  %v689_v53 = vadd.f32 %v1154_v22, %v650_v45 }
 0x115   : > { %703 = vst.msk [vmem:[%s1161_s14 + $0x60] sm:$0xff] %vm690_vm1, %v670_v48  ;;  %719 = vst.msk [vmem:[%s1161_s14 + $0xe0] sm:$0xff] %vm690_vm1, %v686_v49  ;;  %v671_v54 = vadd.f32 %v1154_v22, %v632_v50  ;;  %v687_v55 = vadd.f32 %v1154_v22, %v648_v51 }
 0x116   : > { %706 = vst.msk [vmem:[%s1161_s14 + $0x78] sm:$0xff] %vm690_vm1, %v673_v52  ;;  %722 = vst.msk [vmem:[%s1161_s14 + $0xf8] sm:$0xff] %vm690_vm1, %v689_v53 }
 0x117   : > { %704 = vst.msk [vmem:[%s1161_s14 + $0x68] sm:$0xff] %vm690_vm1, %v671_v54  ;;  %720 = vst.msk [vmem:[%s1161_s14 + $0xe8] sm:$0xff] %vm690_vm1, %v687_v55 }
 0x118 PF: > { %s14_s19 = sadd.s32 1, %s1045_s19   ;;  %s1309_s15 = smov %s1037_s17 }
 0x119   : > { %p11_p7 = scmp.ge.s32.totalorder %s14_s19, 34   ;;  %s1310_s16 = smov %s1041_s18 }
 0x11a   : > { %s1311_s17 = smov %s1314_s20  ;;  %s1312_s18 = smov %s1318_s21 }
 0x11b   :  { %13 = sbr.rel (!%p11_p7) target bundleno = 3 (0x3), region = 69 }

</bundles_post_ra>
